<compile_context>
chip_gen: v6e
topology: v6e:2x2x1
jax: 0.10.0
libtpu: 0.0.40
codegen_flags: <defaults>
</compile_context>

<pallas_src>
import functools

import jax
import jax.numpy as jnp
from jax.experimental import pallas as pl
from jax.experimental.pallas import tpu as pltpu

# ----------------------------- configuration -------------------------------
ADAPTIVE = True
ADAPTIVE_ITER = 3          # self.adaptive_iter
HID = 32                   # INR MLP hidden width
CF = 32                    # classifier feature width
NUM_CLASSES = 10

CIFAR_MEAN = (0.4914, 0.4822, 0.4465)
CIFAR_STD = (0.2471, 0.2435, 0.2616)

LANE_CAP = 8192            # max pixels (lanes) per grid step; ~6 live [32,TN] f32
                           # intermediates stay well under every gen's scoped VMEM.

# --------------------------- weight slab layout -----------------------------
# One f32 slab of shape [SLAB_ROWS, 32]; every sub-array starts at an 8-aligned row.
R_W2 = 0                   # rows  0:32  -> w2^T  [HID, HID]
R_W3 = 32                  # rows 32:35  -> w3^T  [3, HID]
R_FC = 40                  # rows 40:50  -> wfc^T [NUM_CLASSES, CF]
R_V = 56                   # rows 56:88  -> column-vector block [32, N_VEC]
N_VEC = 13
SLAB_ROWS = R_V + 32       # 88
SLAB_COLS = 32

# columns inside the vector block (each column is a length-32 sublane vector):
VC_W1R = 0                 # 0,1,2 : w1_rgb per input channel        [HID]
VC_W1Y = 3                 # y-coordinate projection                 [HID]
VC_W1X = 4                 # x-coordinate projection                 [HID]
VC_B1 = 5                  # layer-1 bias                            [HID]
VC_B2 = 6                  # layer-2 bias                            [HID]
VC_WC = 7                  # 7,8,9 : classifier conv per channel (1/std folded) [CF]
VC_BC = 10                 # classifier conv bias (mean/std folded)  [CF]
VC_B3 = 11                 # layer-3 bias (rows 0:3 used)            [3]
VC_BFC = 12                # final fc bias (rows 0:NUM_CLASSES used) [NC]


# ------------------------------ fused kernel --------------------------------
def fused_kernel(x_ref, slab_ref, o_ref, *, H, W, HW, NB, adaptive, adaptive_iter):
    """Defense (INR MLP x adaptive_iter) + classifier on one group of NB images.

    x_ref:    [1, 3, NB*HW]  channels on sublanes, pixels of NB images on lanes
    slab_ref: [SLAB_ROWS, 32]  packed weights (single DMA)
    o_ref:    [1, NUM_CLASSES, NB]  per-image logits of this group
    """
    TN = NB * HW

    def v(c):                                             # [32, 1] vector column
        return slab_ref[R_V:R_V + 32, c:c + 1]

    rgb = x_ref[0]                                        # [3, TN]
    r0, r1, r2 = rgb[0:1, :], rgb[1:2, :], rgb[2:3, :]

    if adaptive:
        # normalized (y, x) coordinates in [-1, 1], generated in-kernel.
        lane = jax.lax.broadcasted_iota(jnp.int32, (1, TN), 1)     # [1, TN]
        local = lane & (HW - 1) if HW & (HW - 1) == 0 else lane % HW
        if W & (W - 1) == 0:
            row = local >> (W.bit_length() - 1)
            col = local & (W - 1)
        else:
            row = local // W
            col = local - row * W
        yc = row.astype(jnp.float32) * (2.0 / (H - 1)) - 1.0       # [1, TN]
        xc = col.astype(jnp.float32) * (2.0 / (W - 1)) - 1.0       # [1, TN]

        # loop-invariant coordinate projection + layer-1 bias: [HID, TN]
        coord_proj = v(VC_W1Y) * yc + v(VC_W1X) * xc + v(VC_B1)

        w1r0, w1r1, w1r2 = v(VC_W1R), v(VC_W1R + 1), v(VC_W1R + 2)
        b2c = v(VC_B2)                                    # [HID, 1]
        b3c = slab_ref[R_V:R_V + 3, VC_B3:VC_B3 + 1]      # [3, 1]
        # bf16 operands -> single-pass MXU; accumulate in f32.
        w2t_bf = slab_ref[R_W2:R_W2 + HID, :].astype(jnp.bfloat16)   # [HID, HID]
        w3t_bf = slab_ref[R_W3:R_W3 + 3, :].astype(jnp.bfloat16)     # [3, HID]

        for _ in range(adaptive_iter):                    # small static unroll
            # K=3 contraction on the VPU (3 broadcast-FMA terms), not the MXU.
            h1 = jnp.maximum(w1r0 * r0 + w1r1 * r1 + w1r2 * r2 + coord_proj, 0.0)
            h2 = jnp.maximum(
                jnp.dot(w2t_bf, h1.astype(jnp.bfloat16),
                        preferred_element_type=jnp.float32) + b2c, 0.0)
            z = jnp.dot(w3t_bf, h2.astype(jnp.bfloat16),
                        preferred_element_type=jnp.float32) + b3c
            rgb = 1.0 / (1.0 + jnp.exp(-z))               # exact sigmoid (parity)
            r0, r1, r2 = rgb[0:1, :], rgb[1:2, :], rgb[2:3, :]

    # classifier head; CIFAR mean/std normalization is folded into the weights.
    wc0, wc1, wc2 = v(VC_WC), v(VC_WC + 1), v(VC_WC + 2)
    h = jnp.maximum(wc0 * r0 + wc1 * r1 + wc2 * r2 + v(VC_BC), 0.0)   # [CF, TN]

    # per-image global-average-pool with static, 128-aligned lane slices.
    cols = [jnp.sum(h[:, i * HW:(i + 1) * HW], axis=1, keepdims=True)
            for i in range(NB)]                                       # NB x [CF, 1]
    pooled = cols[0] if NB == 1 else jnp.concatenate(cols, axis=1)    # [CF, NB]
    pooled = pooled * (1.0 / HW)

    wfct = slab_ref[R_FC:R_FC + NUM_CLASSES, :]                       # [NC, CF]
    bfc = slab_ref[R_V:R_V + NUM_CLASSES, VC_BFC:VC_BFC + 1]          # [NC, 1]
    g = jnp.dot(wfct, pooled, preferred_element_type=jnp.float32) + bfc   # [NC, NB]
    o_ref[0] = g


# ------------------------------- wrappers -----------------------------------
def init_params(seed=42):
    ks = jax.random.split(jax.random.PRNGKey(seed), 9)
    n = lambda k, shape, s=0.2: (s * jax.random.normal(k, shape)).astype(jnp.float32)
    return dict(
        # INR defense MLP (shared across all adaptive iterations)
        w1_rgb=n(ks[0], (3, HID)),
        w1_xy=n(ks[1], (2, HID)),
        b1=n(ks[2], (1, HID), 0.05),
        w2=n(ks[3], (HID, HID)),
        b2=n(ks[4], (1, HID), 0.05),
        w3=n(ks[5], (HID, 3)),
        b3=n(ks[6], (1, 3), 0.05),
        # classifier head
        wc=n(ks[7], (3, CF)),
        bc=jnp.zeros((1, CF), jnp.float32),
        wfc=n(ks[8], (CF, NUM_CLASSES)),
        bfc=jnp.zeros((1, NUM_CLASSES), jnp.float32),
    )


def pack_weight_slab(params):
    """Pack every weight/bias into one pre-padded f32 slab (single DMA)."""
    mean = jnp.asarray(CIFAR_MEAN, jnp.float32)
    inv_std = 1.0 / jnp.asarray(CIFAR_STD, jnp.float32)

    slab = jnp.zeros((SLAB_ROWS, SLAB_COLS), jnp.float32)
    slab = slab.at[R_W2:R_W2 + HID, :].set(params["w2"].T)
    slab = slab.at[R_W3:R_W3 + 3, :].set(params["w3"].T)
    slab = slab.at[R_FC:R_FC + NUM_CLASSES, :].set(params["wfc"].T)

    vec = jnp.zeros((32, N_VEC), jnp.float32)
    vec = vec.at[:, VC_W1R + 0].set(params["w1_rgb"][0])
    vec = vec.at[:, VC_W1R + 1].set(params["w1_rgb"][1])
    vec = vec.at[:, VC_W1R + 2].set(params["w1_rgb"][2])
    vec = vec.at[:, VC_W1Y].set(params["w1_xy"][0])
    vec = vec.at[:, VC_W1X].set(params["w1_xy"][1])
    vec = vec.at[:, VC_B1].set(params["b1"][0])
    vec = vec.at[:, VC_B2].set(params["b2"][0])
    wc_folded = params["wc"] * inv_std[:, None]                       # [3, CF]
    vec = vec.at[:, VC_WC + 0].set(wc_folded[0])
    vec = vec.at[:, VC_WC + 1].set(wc_folded[1])
    vec = vec.at[:, VC_WC + 2].set(wc_folded[2])
    bc_folded = params["bc"][0] - (mean * inv_std) @ params["wc"]     # [CF]
    vec = vec.at[:, VC_BC].set(bc_folded)
    vec = vec.at[0:3, VC_B3].set(params["b3"][0])
    vec = vec.at[0:NUM_CLASSES, VC_BFC].set(params["bfc"][0])

    return slab.at[R_V:R_V + 32, 0:N_VEC].set(vec)


def _pick_images_per_step(B, HW):
    """Pack NB whole images per grid step, keeping >=2 steps when B >= 2 (v7x)."""
    max_nb = max(1, LANE_CAP // HW)
    min_steps = 2 if B >= 2 else 1
    nb = 1
    for cand in range(1, B + 1):
        if B % cand == 0 and cand <= max_nb and B // cand >= min_steps:
            nb = cand
    return nb


@functools.partial(jax.jit, static_argnames=("adaptive", "adaptive_iter"))
def adaptive_attack_model_forward(x_nchw, params,
                                  adaptive=ADAPTIVE, adaptive_iter=ADAPTIVE_ITER):
    """AdaptiveAttackModel.forward: defense loop then cifar10_model (fused)."""
    B, C, H, W = x_nchw.shape
    assert C == 3 and H > 1 and W > 1
    HW = H * W
    assert HW % 128 == 0, "pixels per image must be a multiple of 128"
    # TODO(synk): very large images (HW*4B*~6 live buffers > scoped VMEM) would need an
    # inner pixel-tile grid axis with an accumulator; not needed for CIFAR (32x32).
    NB = _pick_images_per_step(B, HW)
    G = B // NB
    TN = NB * HW

    # [B,C,H,W] -> [G, C, NB*HW]: channels on sublanes, NB images packed along lanes.
    x = x_nchw.reshape(G, NB, C, HW).transpose(0, 2, 1, 3).reshape(G, C, TN)
    slab = pack_weight_slab(params)

    kern = functools.partial(fused_kernel, H=H, W=W, HW=HW, NB=NB,
                             adaptive=adaptive, adaptive_iter=adaptive_iter)

    out = pl.pallas_call(
        kern,
        out_shape=jax.ShapeDtypeStruct((G, NUM_CLASSES, NB), jnp.float32),
        grid_spec=pltpu.PrefetchScalarGridSpec(
            num_scalar_prefetch=0,
            grid=(G,),
            in_specs=[
                pl.BlockSpec((1, C, TN), lambda g: (g, 0, 0)),
                pl.BlockSpec((SLAB_ROWS, SLAB_COLS), lambda g: (0, 0)),
            ],
            out_specs=pl.BlockSpec((1, NUM_CLASSES, NB), lambda g: (g, 0, 0)),
        ),
        compiler_params=pltpu.CompilerParams(dimension_semantics=("parallel",)),
    )(x, slab)

    # tiny once-per-call relayout of the [NC, NB] per-group logits back to [B, NC]
    return jnp.transpose(out, (0, 2, 1)).reshape(B, NUM_CLASSES)


# ------------------------- pure-JAX reference (check) ------------------------
def reference_forward(x_nchw, p, adaptive=ADAPTIVE, adaptive_iter=ADAPTIVE_ITER):
    B, C, H, W = x_nchw.shape
    rgb = jnp.transpose(x_nchw, (0, 2, 3, 1)).reshape(B * H * W, C)
    ys = (jnp.arange(H, dtype=jnp.float32) / (H - 1)) * 2.0 - 1.0
    xs = (jnp.arange(W, dtype=jnp.float32) / (W - 1)) * 2.0 - 1.0
    yy, xx = jnp.meshgrid(ys, xs, indexing="ij")
    coords = jnp.tile(jnp.stack([yy, xx], -1).reshape(H * W, 2), (B, 1))
    if adaptive:
        cp = coords @ p["w1_xy"] + p["b1"]
        for _ in range(adaptive_iter):
            h1 = jax.nn.relu(rgb @ p["w1_rgb"] + cp)
            h2 = jax.nn.relu(h1 @ p["w2"] + p["b2"])
            rgb = jax.nn.sigmoid(h2 @ p["w3"] + p["b3"])
    mean = jnp.asarray(CIFAR_MEAN, jnp.float32)
    std = jnp.asarray(CIFAR_STD, jnp.float32)
    xn = (rgb - mean) / std
    h = jax.nn.relu(xn @ p["wc"] + p["bc"])
    pooled = h.reshape(B, H * W, CF).mean(axis=1)
    return pooled @ p["wfc"] + p["bfc"]


# --------------------------------- main --------------------------------------
if __name__ == "__main__":
    B, C, H, W = 4, 3, 32, 32                      # CIFAR-10 geometry, small batch
    key = jax.random.PRNGKey(0)
    x = jax.random.uniform(key, (B, C, H, W), dtype=jnp.float32)   # image in [0, 1]

    params = init_params(seed=42)
    logits = adaptive_attack_model_forward(x, params)
    jax.block_until_ready(logits)

    assert logits.shape == (B, NUM_CLASSES)
    assert bool(jnp.all(jnp.isfinite(logits)))

    # loose tolerance: bf16 MXU operands in the defense loop introduce small drift
    ref = reference_forward(x, params)
    assert bool(jnp.allclose(logits, ref, atol=2e-2, rtol=2e-2)), \
        f"max abs err {float(jnp.max(jnp.abs(logits - ref)))}"

    print("KERNEL_OK")
</pallas_src>

<mosaic_0001>
module attributes {stable_mosaic.version = 11 : i64} {
  func.func @fused_kernel(%arg0: i32, %arg1: memref<1x3x2048xf32, #tpu.memory_space<vmem>>, %arg2: memref<88x32xf32, #tpu.memory_space<vmem>>, %arg3: memref<1x10x2xf32, #tpu.memory_space<vmem>>) attributes {dimension_semantics = [#tpu.dimension_semantics<parallel>], iteration_bounds = array<i64: 2>, scalar_prefetch = 0 : i64, scratch_operands = 0 : i64, tpu.core_type = #tpu.core_type<tc>, window_params = [{transform_indices = @transform_0, window_bounds = array<i64: 1, 3, 2048>}, {pipeline_mode = #tpu.pipeline_mode<synchronous>, transform_indices = @transform_1, window_bounds = array<i64: 88, 32>}, {transform_indices = @transform_2, window_bounds = array<i64: 1, 10, 2>}]} {
    %c0 = arith.constant 0 : index
    %c0_0 = arith.constant 0 : index
    %c0_1 = arith.constant 0 : index
    %0 = vector.load %arg1[%c0, %c0_0, %c0_1] : memref<1x3x2048xf32, #tpu.memory_space<vmem>>, vector<1x3x2048xf32>
    %1 = vector.shape_cast %0 : vector<1x3x2048xf32> to vector<3x2048xf32>
    %2 = vector.extract_strided_slice %1 {offsets = [0, 0], sizes = [1, 2048], strides = [1, 1]} : vector<3x2048xf32> to vector<1x2048xf32>
    %3 = vector.extract_strided_slice %1 {offsets = [1, 0], sizes = [1, 2048], strides = [1, 1]} : vector<3x2048xf32> to vector<1x2048xf32>
    %4 = vector.extract_strided_slice %1 {offsets = [2, 0], sizes = [1, 2048], strides = [1, 1]} : vector<3x2048xf32> to vector<1x2048xf32>
    %5 = tpu.iota {dimensions = array<i32: 1>} : vector<1x2048xi32>
    %c1023_i32 = arith.constant 1023 : i32
    %6 = vector.broadcast %c1023_i32 : i32 to vector<1x2048xi32>
    %7 = arith.andi %5, %6 : vector<1x2048xi32>
    %c5_i32 = arith.constant 5 : i32
    %8 = vector.broadcast %c5_i32 : i32 to vector<1x2048xi32>
    %9 = arith.shrsi %7, %8 : vector<1x2048xi32>
    %c31_i32 = arith.constant 31 : i32
    %10 = vector.broadcast %c31_i32 : i32 to vector<1x2048xi32>
    %11 = arith.andi %7, %10 : vector<1x2048xi32>
    %12 = arith.sitofp %9 : vector<1x2048xi32> to vector<1x2048xf32>
    %cst = arith.constant 0.0645161271 : f32
    %13 = vector.broadcast %cst : f32 to vector<1x2048xf32>
    %14 = arith.mulf %12, %13 : vector<1x2048xf32>
    %cst_2 = arith.constant 1.000000e+00 : f32
    %15 = vector.broadcast %cst_2 : f32 to vector<1x2048xf32>
    %16 = arith.subf %14, %15 : vector<1x2048xf32>
    %17 = arith.sitofp %11 : vector<1x2048xi32> to vector<1x2048xf32>
    %cst_3 = arith.constant 0.0645161271 : f32
    %18 = vector.broadcast %cst_3 : f32 to vector<1x2048xf32>
    %19 = arith.mulf %17, %18 : vector<1x2048xf32>
    %cst_4 = arith.constant 1.000000e+00 : f32
    %20 = vector.broadcast %cst_4 : f32 to vector<1x2048xf32>
    %21 = arith.subf %19, %20 : vector<1x2048xf32>
    %c56 = arith.constant 56 : index
    %c3 = arith.constant 3 : index
    %22 = vector.load %arg2[%c56, %c3] : memref<88x32xf32, #tpu.memory_space<vmem>>, vector<32x1xf32>
    %23 = vector.broadcast %22 : vector<32x1xf32> to vector<32x2048xf32>
    %24 = vector.broadcast %16 : vector<1x2048xf32> to vector<32x2048xf32>
    %25 = arith.mulf %23, %24 : vector<32x2048xf32>
    %c56_5 = arith.constant 56 : index
    %c4 = arith.constant 4 : index
    %26 = vector.load %arg2[%c56_5, %c4] : memref<88x32xf32, #tpu.memory_space<vmem>>, vector<32x1xf32>
    %27 = vector.broadcast %26 : vector<32x1xf32> to vector<32x2048xf32>
    %28 = vector.broadcast %21 : vector<1x2048xf32> to vector<32x2048xf32>
    %29 = arith.mulf %27, %28 : vector<32x2048xf32>
    %30 = arith.addf %25, %29 : vector<32x2048xf32>
    %c56_6 = arith.constant 56 : index
    %c5 = arith.constant 5 : index
    %31 = vector.load %arg2[%c56_6, %c5] : memref<88x32xf32, #tpu.memory_space<vmem>>, vector<32x1xf32>
    %32 = vector.broadcast %31 : vector<32x1xf32> to vector<32x2048xf32>
    %33 = arith.addf %30, %32 : vector<32x2048xf32>
    %c56_7 = arith.constant 56 : index
    %c0_8 = arith.constant 0 : index
    %34 = vector.load %arg2[%c56_7, %c0_8] : memref<88x32xf32, #tpu.memory_space<vmem>>, vector<32x1xf32>
    %c56_9 = arith.constant 56 : index
    %c1 = arith.constant 1 : index
    %35 = vector.load %arg2[%c56_9, %c1] : memref<88x32xf32, #tpu.memory_space<vmem>>, vector<32x1xf32>
    %c56_10 = arith.constant 56 : index
    %c2 = arith.constant 2 : index
    %36 = vector.load %arg2[%c56_10, %c2] : memref<88x32xf32, #tpu.memory_space<vmem>>, vector<32x1xf32>
    %c56_11 = arith.constant 56 : index
    %c6 = arith.constant 6 : index
    %37 = vector.load %arg2[%c56_11, %c6] : memref<88x32xf32, #tpu.memory_space<vmem>>, vector<32x1xf32>
    %c56_12 = arith.constant 56 : index
    %c11 = arith.constant 11 : index
    %38 = vector.load %arg2[%c56_12, %c11] : memref<88x32xf32, #tpu.memory_space<vmem>>, vector<3x1xf32>
    %c0_13 = arith.constant 0 : index
    %c0_14 = arith.constant 0 : index
    %39 = vector.load %arg2[%c0_13, %c0_14] : memref<88x32xf32, #tpu.memory_space<vmem>>, vector<32x32xf32>
    %40 = arith.truncf %39 : vector<32x32xf32> to vector<32x32xbf16>
    %c32 = arith.constant 32 : index
    %c0_15 = arith.constant 0 : index
    %41 = vector.load %arg2[%c32, %c0_15] : memref<88x32xf32, #tpu.memory_space<vmem>>, vector<3x32xf32>
    %42 = arith.truncf %41 : vector<3x32xf32> to vector<3x32xbf16>
    %43 = vector.broadcast %34 : vector<32x1xf32> to vector<32x2048xf32>
    %44 = vector.broadcast %2 : vector<1x2048xf32> to vector<32x2048xf32>
    %45 = arith.mulf %43, %44 : vector<32x2048xf32>
    %46 = vector.broadcast %35 : vector<32x1xf32> to vector<32x2048xf32>
    %47 = vector.broadcast %3 : vector<1x2048xf32> to vector<32x2048xf32>
    %48 = arith.mulf %46, %47 : vector<32x2048xf32>
    %49 = arith.addf %45, %48 : vector<32x2048xf32>
    %50 = vector.broadcast %36 : vector<32x1xf32> to vector<32x2048xf32>
    %51 = vector.broadcast %4 : vector<1x2048xf32> to vector<32x2048xf32>
    %52 = arith.mulf %50, %51 : vector<32x2048xf32>
    %53 = arith.addf %49, %52 : vector<32x2048xf32>
    %54 = arith.addf %53, %33 : vector<32x2048xf32>
    %cst_16 = arith.constant 0.000000e+00 : f32
    %55 = vector.broadcast %cst_16 : f32 to vector<32x2048xf32>
    %56 = arith.maximumf %54, %55 : vector<32x2048xf32>
    %57 = arith.truncf %56 : vector<32x2048xf32> to vector<32x2048xbf16>
    %cst_17 = arith.constant dense<0.000000e+00> : vector<32x2048xf32>
    %58 = tpu.matmul %40, %57, %cst_17 {dimension_numbers = #tpu.dot_dimension_numbers<[1], [0], [0], [1], [0, 0, 1, 1], [], []>} : vector<32x32xbf16>, vector<32x2048xbf16>, vector<32x2048xf32> -> vector<32x2048xf32>
    %59 = vector.broadcast %37 : vector<32x1xf32> to vector<32x2048xf32>
    %60 = arith.addf %58, %59 : vector<32x2048xf32>
    %cst_18 = arith.constant 0.000000e+00 : f32
    %61 = vector.broadcast %cst_18 : f32 to vector<32x2048xf32>
    %62 = arith.maximumf %60, %61 : vector<32x2048xf32>
    %63 = arith.truncf %62 : vector<32x2048xf32> to vector<32x2048xbf16>
    %cst_19 = arith.constant dense<0.000000e+00> : vector<3x2048xf32>
    %64 = tpu.matmul %42, %63, %cst_19 {dimension_numbers = #tpu.dot_dimension_numbers<[1], [0], [0], [1], [0, 0, 1, 1], [], []>} : vector<3x32xbf16>, vector<32x2048xbf16>, vector<3x2048xf32> -> vector<3x2048xf32>
    %65 = vector.broadcast %38 : vector<3x1xf32> to vector<3x2048xf32>
    %66 = arith.addf %64, %65 : vector<3x2048xf32>
    %cst_20 = arith.constant 0.000000e+00 : f32
    %67 = vector.broadcast %cst_20 : f32 to vector<3x2048xf32>
    %68 = arith.subf %67, %66 : vector<3x2048xf32>
    %69 = math.exp %68 : vector<3x2048xf32>
    %cst_21 = arith.constant 1.000000e+00 : f32
    %70 = vector.broadcast %cst_21 : f32 to vector<3x2048xf32>
    %71 = arith.addf %70, %69 : vector<3x2048xf32>
    %cst_22 = arith.constant 1.000000e+00 : f32
    %72 = vector.broadcast %cst_22 : f32 to vector<3x2048xf32>
    %73 = arith.divf %72, %71 : vector<3x2048xf32>
    %74 = vector.extract_strided_slice %73 {offsets = [0, 0], sizes = [1, 2048], strides = [1, 1]} : vector<3x2048xf32> to vector<1x2048xf32>
    %75 = vector.extract_strided_slice %73 {offsets = [1, 0], sizes = [1, 2048], strides = [1, 1]} : vector<3x2048xf32> to vector<1x2048xf32>
    %76 = vector.extract_strided_slice %73 {offsets = [2, 0], sizes = [1, 2048], strides = [1, 1]} : vector<3x2048xf32> to vector<1x2048xf32>
    %77 = vector.broadcast %34 : vector<32x1xf32> to vector<32x2048xf32>
    %78 = vector.broadcast %74 : vector<1x2048xf32> to vector<32x2048xf32>
    %79 = arith.mulf %77, %78 : vector<32x2048xf32>
    %80 = vector.broadcast %35 : vector<32x1xf32> to vector<32x2048xf32>
    %81 = vector.broadcast %75 : vector<1x2048xf32> to vector<32x2048xf32>
    %82 = arith.mulf %80, %81 : vector<32x2048xf32>
    %83 = arith.addf %79, %82 : vector<32x2048xf32>
    %84 = vector.broadcast %36 : vector<32x1xf32> to vector<32x2048xf32>
    %85 = vector.broadcast %76 : vector<1x2048xf32> to vector<32x2048xf32>
    %86 = arith.mulf %84, %85 : vector<32x2048xf32>
    %87 = arith.addf %83, %86 : vector<32x2048xf32>
    %88 = arith.addf %87, %33 : vector<32x2048xf32>
    %cst_23 = arith.constant 0.000000e+00 : f32
    %89 = vector.broadcast %cst_23 : f32 to vector<32x2048xf32>
    %90 = arith.maximumf %88, %89 : vector<32x2048xf32>
    %91 = arith.truncf %90 : vector<32x2048xf32> to vector<32x2048xbf16>
    %cst_24 = arith.constant dense<0.000000e+00> : vector<32x2048xf32>
    %92 = tpu.matmul %40, %91, %cst_24 {dimension_numbers = #tpu.dot_dimension_numbers<[1], [0], [0], [1], [0, 0, 1, 1], [], []>} : vector<32x32xbf16>, vector<32x2048xbf16>, vector<32x2048xf32> -> vector<32x2048xf32>
    %93 = vector.broadcast %37 : vector<32x1xf32> to vector<32x2048xf32>
    %94 = arith.addf %92, %93 : vector<32x2048xf32>
    %cst_25 = arith.constant 0.000000e+00 : f32
    %95 = vector.broadcast %cst_25 : f32 to vector<32x2048xf32>
    %96 = arith.maximumf %94, %95 : vector<32x2048xf32>
    %97 = arith.truncf %96 : vector<32x2048xf32> to vector<32x2048xbf16>
    %cst_26 = arith.constant dense<0.000000e+00> : vector<3x2048xf32>
    %98 = tpu.matmul %42, %97, %cst_26 {dimension_numbers = #tpu.dot_dimension_numbers<[1], [0], [0], [1], [0, 0, 1, 1], [], []>} : vector<3x32xbf16>, vector<32x2048xbf16>, vector<3x2048xf32> -> vector<3x2048xf32>
    %99 = vector.broadcast %38 : vector<3x1xf32> to vector<3x2048xf32>
    %100 = arith.addf %98, %99 : vector<3x2048xf32>
    %cst_27 = arith.constant 0.000000e+00 : f32
    %101 = vector.broadcast %cst_27 : f32 to vector<3x2048xf32>
    %102 = arith.subf %101, %100 : vector<3x2048xf32>
    %103 = math.exp %102 : vector<3x2048xf32>
    %cst_28 = arith.constant 1.000000e+00 : f32
    %104 = vector.broadcast %cst_28 : f32 to vector<3x2048xf32>
    %105 = arith.addf %104, %103 : vector<3x2048xf32>
    %cst_29 = arith.constant 1.000000e+00 : f32
    %106 = vector.broadcast %cst_29 : f32 to vector<3x2048xf32>
    %107 = arith.divf %106, %105 : vector<3x2048xf32>
    %108 = vector.extract_strided_slice %107 {offsets = [0, 0], sizes = [1, 2048], strides = [1, 1]} : vector<3x2048xf32> to vector<1x2048xf32>
    %109 = vector.extract_strided_slice %107 {offsets = [1, 0], sizes = [1, 2048], strides = [1, 1]} : vector<3x2048xf32> to vector<1x2048xf32>
    %110 = vector.extract_strided_slice %107 {offsets = [2, 0], sizes = [1, 2048], strides = [1, 1]} : vector<3x2048xf32> to vector<1x2048xf32>
    %111 = vector.broadcast %34 : vector<32x1xf32> to vector<32x2048xf32>
    %112 = vector.broadcast %108 : vector<1x2048xf32> to vector<32x2048xf32>
    %113 = arith.mulf %111, %112 : vector<32x2048xf32>
    %114 = vector.broadcast %35 : vector<32x1xf32> to vector<32x2048xf32>
    %115 = vector.broadcast %109 : vector<1x2048xf32> to vector<32x2048xf32>
    %116 = arith.mulf %114, %115 : vector<32x2048xf32>
    %117 = arith.addf %113, %116 : vector<32x2048xf32>
    %118 = vector.broadcast %36 : vector<32x1xf32> to vector<32x2048xf32>
    %119 = vector.broadcast %110 : vector<1x2048xf32> to vector<32x2048xf32>
    %120 = arith.mulf %118, %119 : vector<32x2048xf32>
    %121 = arith.addf %117, %120 : vector<32x2048xf32>
    %122 = arith.addf %121, %33 : vector<32x2048xf32>
    %cst_30 = arith.constant 0.000000e+00 : f32
    %123 = vector.broadcast %cst_30 : f32 to vector<32x2048xf32>
    %124 = arith.maximumf %122, %123 : vector<32x2048xf32>
    %125 = arith.truncf %124 : vector<32x2048xf32> to vector<32x2048xbf16>
    %cst_31 = arith.constant dense<0.000000e+00> : vector<32x2048xf32>
    %126 = tpu.matmul %40, %125, %cst_31 {dimension_numbers = #tpu.dot_dimension_numbers<[1], [0], [0], [1], [0, 0, 1, 1], [], []>} : vector<32x32xbf16>, vector<32x2048xbf16>, vector<32x2048xf32> -> vector<32x2048xf32>
    %127 = vector.broadcast %37 : vector<32x1xf32> to vector<32x2048xf32>
    %128 = arith.addf %126, %127 : vector<32x2048xf32>
    %cst_32 = arith.constant 0.000000e+00 : f32
    %129 = vector.broadcast %cst_32 : f32 to vector<32x2048xf32>
    %130 = arith.maximumf %128, %129 : vector<32x2048xf32>
    %131 = arith.truncf %130 : vector<32x2048xf32> to vector<32x2048xbf16>
    %cst_33 = arith.constant dense<0.000000e+00> : vector<3x2048xf32>
    %132 = tpu.matmul %42, %131, %cst_33 {dimension_numbers = #tpu.dot_dimension_numbers<[1], [0], [0], [1], [0, 0, 1, 1], [], []>} : vector<3x32xbf16>, vector<32x2048xbf16>, vector<3x2048xf32> -> vector<3x2048xf32>
    %133 = vector.broadcast %38 : vector<3x1xf32> to vector<3x2048xf32>
    %134 = arith.addf %132, %133 : vector<3x2048xf32>
    %cst_34 = arith.constant 0.000000e+00 : f32
    %135 = vector.broadcast %cst_34 : f32 to vector<3x2048xf32>
    %136 = arith.subf %135, %134 : vector<3x2048xf32>
    %137 = math.exp %136 : vector<3x2048xf32>
    %cst_35 = arith.constant 1.000000e+00 : f32
    %138 = vector.broadcast %cst_35 : f32 to vector<3x2048xf32>
    %139 = arith.addf %138, %137 : vector<3x2048xf32>
    %cst_36 = arith.constant 1.000000e+00 : f32
    %140 = vector.broadcast %cst_36 : f32 to vector<3x2048xf32>
    %141 = arith.divf %140, %139 : vector<3x2048xf32>
    %142 = vector.extract_strided_slice %141 {offsets = [0, 0], sizes = [1, 2048], strides = [1, 1]} : vector<3x2048xf32> to vector<1x2048xf32>
    %143 = vector.extract_strided_slice %141 {offsets = [1, 0], sizes = [1, 2048], strides = [1, 1]} : vector<3x2048xf32> to vector<1x2048xf32>
    %144 = vector.extract_strided_slice %141 {offsets = [2, 0], sizes = [1, 2048], strides = [1, 1]} : vector<3x2048xf32> to vector<1x2048xf32>
    %c56_37 = arith.constant 56 : index
    %c7 = arith.constant 7 : index
    %145 = vector.load %arg2[%c56_37, %c7] : memref<88x32xf32, #tpu.memory_space<vmem>>, vector<32x1xf32>
    %c56_38 = arith.constant 56 : index
    %c8 = arith.constant 8 : index
    %146 = vector.load %arg2[%c56_38, %c8] : memref<88x32xf32, #tpu.memory_space<vmem>>, vector<32x1xf32>
    %c56_39 = arith.constant 56 : index
    %c9 = arith.constant 9 : index
    %147 = vector.load %arg2[%c56_39, %c9] : memref<88x32xf32, #tpu.memory_space<vmem>>, vector<32x1xf32>
    %148 = vector.broadcast %145 : vector<32x1xf32> to vector<32x2048xf32>
    %149 = vector.broadcast %142 : vector<1x2048xf32> to vector<32x2048xf32>
    %150 = arith.mulf %148, %149 : vector<32x2048xf32>
    %151 = vector.broadcast %146 : vector<32x1xf32> to vector<32x2048xf32>
    %152 = vector.broadcast %143 : vector<1x2048xf32> to vector<32x2048xf32>
    %153 = arith.mulf %151, %152 : vector<32x2048xf32>
    %154 = arith.addf %150, %153 : vector<32x2048xf32>
    %155 = vector.broadcast %147 : vector<32x1xf32> to vector<32x2048xf32>
    %156 = vector.broadcast %144 : vector<1x2048xf32> to vector<32x2048xf32>
    %157 = arith.mulf %155, %156 : vector<32x2048xf32>
    %158 = arith.addf %154, %157 : vector<32x2048xf32>
    %c56_40 = arith.constant 56 : index
    %c10 = arith.constant 10 : index
    %159 = vector.load %arg2[%c56_40, %c10] : memref<88x32xf32, #tpu.memory_space<vmem>>, vector<32x1xf32>
    %160 = vector.broadcast %159 : vector<32x1xf32> to vector<32x2048xf32>
    %161 = arith.addf %158, %160 : vector<32x2048xf32>
    %cst_41 = arith.constant 0.000000e+00 : f32
    %162 = vector.broadcast %cst_41 : f32 to vector<32x2048xf32>
    %163 = arith.maximumf %161, %162 : vector<32x2048xf32>
    %164 = vector.extract_strided_slice %163 {offsets = [0, 0], sizes = [32, 1024], strides = [1, 1]} : vector<32x2048xf32> to vector<32x1024xf32>
    %cst_42 = arith.constant dense<0.000000e+00> : vector<32xf32>
    %165 = vector.multi_reduction <add>, %164, %cst_42 [1] : vector<32x1024xf32> to vector<32xf32>
    %166 = vector.shape_cast %165 : vector<32xf32> to vector<32x1xf32>
    %167 = vector.extract_strided_slice %163 {offsets = [0, 1024], sizes = [32, 1024], strides = [1, 1]} : vector<32x2048xf32> to vector<32x1024xf32>
    %cst_43 = arith.constant dense<0.000000e+00> : vector<32xf32>
    %168 = vector.multi_reduction <add>, %167, %cst_43 [1] : vector<32x1024xf32> to vector<32xf32>
    %169 = vector.shape_cast %168 : vector<32xf32> to vector<32x1xf32>
    %170 = tpu.concatenate %166, %169 in 1 : vector<32x1xf32>, vector<32x1xf32> -> vector<32x2xf32>
    %cst_44 = arith.constant 9.765625E-4 : f32
    %171 = vector.broadcast %cst_44 : f32 to vector<32x2xf32>
    %172 = arith.mulf %170, %171 : vector<32x2xf32>
    %c40 = arith.constant 40 : index
    %c0_45 = arith.constant 0 : index
    %173 = vector.load %arg2[%c40, %c0_45] : memref<88x32xf32, #tpu.memory_space<vmem>>, vector<10x32xf32>
    %c56_46 = arith.constant 56 : index
    %c12 = arith.constant 12 : index
    %174 = vector.load %arg2[%c56_46, %c12] : memref<88x32xf32, #tpu.memory_space<vmem>>, vector<10x1xf32>
    %cst_47 = arith.constant dense<0.000000e+00> : vector<10x2xf32>
    %175 = tpu.matmul %173, %172, %cst_47 {dimension_numbers = #tpu.dot_dimension_numbers<[1], [0], [0], [1], [0, 0, 1, 1], [], []>} : vector<10x32xf32>, vector<32x2xf32>, vector<10x2xf32> -> vector<10x2xf32>
    %176 = vector.broadcast %174 : vector<10x1xf32> to vector<10x2xf32>
    %177 = arith.addf %175, %176 : vector<10x2xf32>
    %c0_48 = arith.constant 0 : index
    %c0_49 = arith.constant 0 : index
    %c0_50 = arith.constant 0 : index
    %178 = vector.load %arg3[%c0_48, %c0_49, %c0_50] : memref<1x10x2xf32, #tpu.memory_space<vmem>>, vector<1x10x2xf32>
    %179 = vector.shape_cast %178 : vector<1x10x2xf32> to vector<10x2xf32>
    %180 = vector.shape_cast %177 : vector<10x2xf32> to vector<1x10x2xf32>
    tpu.vector_store %arg3[%c0_48, %c0_49, %c0_50], %180 {strides = array<i32>} : memref<1x10x2xf32, #tpu.memory_space<vmem>>, vector<1x10x2xf32>,
    return
  }
  func.func @transform_0(%arg0: i32) -> (i32, i32, i32) {
    %c0_i32 = arith.constant 0 : i32
    %c0_i32_0 = arith.constant 0 : i32
    %c0_i32_1 = arith.constant 0 : i32
    return %arg0, %c0_i32, %c0_i32_0 : i32, i32, i32
  }
  func.func @transform_1(%arg0: i32) -> (i32, i32) {
    %c0_i32 = arith.constant 0 : i32
    %c0_i32_0 = arith.constant 0 : i32
    %c0_i32_1 = arith.constant 0 : i32
    return %c0_i32, %c0_i32_0 : i32, i32
  }
  func.func @transform_2(%arg0: i32) -> (i32, i32, i32) {
    %c0_i32 = arith.constant 0 : i32
    %c0_i32_0 = arith.constant 0 : i32
    %c0_i32_1 = arith.constant 0 : i32
    return %arg0, %c0_i32, %c0_i32_0 : i32, i32, i32
  }
}

</mosaic_0001>

<bundles_post_ra>
// kernel: adaptive_attack_model_forward.1
= control target key start
LH: loop header
LB: loop body
LE: loop exit
PB: predicated region body
PF: predicated region fallthrough
CT: control target
= control target key end

     0   :  { %s7173_s9 = smov 0   ;;  %s11280_s0 = inlined_call_operand.vmem [shape: f32[2,3,2048], index: 0, kind: input, shape index: {}]   ;;  %s11281_s1 = inlined_call_operand.vmem [shape: f32[88,32], index: 1, kind: input, shape index: {}]   ;;  %s11282_s2 = inlined_call_operand.vmem [shape: f32[2,10,2], index: 2, kind: output, shape index: {}]  }
   0x1 LB: > { %s6749_s10 = sadd.s32 4294967295, %s7143_s9   ;;  %p6753_p0 = scmp.ge.s32.totalorder %s7143_s9, 1  ;;  %s7143_s9 = sphi %s7173_s9, %s12_s9  }
   0x2   : > { %p112_p1 = scmp.lt.s32.totalorder %s7143_s9, 3 }
   0x4   : > { %p113_p2 = pnand %p6753_p0, %p112_p1 }
   0x6   : > { %116 = sbr.rel (%p113_p2) target bundleno = 2214 (0x8a6), region = 28 }
   0xb   : > { %v316_v0 = vld [vmem:[%s11281_s1 + $0x48] sm:$0xff]  ;;  %v7145_v1 = vmov 4   ;;  %v7146_v2 = vmov 3   ;;  %v317_v3 = vld [vmem:[%s11281_s1 + $0x50] sm:$0xff]  ;;  %v11283_v4 = vmov 0   ;;  %v314_v5 = vld [vmem:[%s11281_s1 + $0x38] sm:$0xff]  ;;  %v153_v10 = vlaneseq }
   0xc   : > { %6907 = vset.pattern.permute.xlu1 %v7145_v1  ;;  %6906 = vset.pattern.permute.xlu0 %v7146_v2  ;;  %v315_v6 = vld [vmem:[%s11281_s1 + $0x40] sm:$0xff]  ;;  %v7148_v7 = vmov 1   ;;  %v7149_v8 = vmov 2   ;;  %v7150_v9 = vmov 5   ;;  %p134_p3 = scmp.lt.s32.totalorder %s6749_s10, 1  ;;  %vm1619_vm0 = vcmask 261120  }
   0xd   : > { %411 = vperm.xlu1 %6907, %v316_v0   ;;  %330 = vperm.xlu0 %6906, %v316_v0   ;;  %v7198_v11 = vand.u32 127, %v153_v10  ;;  %v660_v16 = vshrl.u32 %v153_v10, 7  ;;  %vm6586_vm1 = vcmask 7168   ;;  %vm6692_vm2 = vcmask 9216  }
   0xe   : > { %1658 = vmatprep.mubr.bf16.mxu0 %v11283_v4  ;;  %1711 = vmatprep.mubr.bf16.mxu1 %v11283_v4  ;;  %s12001_s10 = smov (!%p134_p3, %s6749_s10), 1  ;;  %vm6690_vm3 = vcmask 15360  }
   0xf   : > { %11552 = vst [vmem:[#allocation2_spill] sm:$0xff] %v7198_v11  ;;  %v155_v12 = vadd.s32 128, %v7198_v11  ;;  %v157_v13 = vadd.s32 384, %v7198_v11  ;;  %s6866_s19 = sshll.u32 %s12001_s10, 6  ;;  %v170_v17 = vand.u32 1023, %v7198_v11  ;;  %v7215_v21 = vsub.s32 4, %v660_v16 }
  0x10   : > { %s7213_s22 = scalar_lea.vmem %s11280_s0, %s6866_s19  ;;  %v7220_v24 = vsub.s32 5, %v660_v16  ;;  %v7222_v28 = vsub.s32 6, %v660_v16  ;;  %v156_v32 = vadd.s32 256, %v7198_v11  ;;  %v7228_v33 = vsub.s32 0, %v660_v16  ;;  %s6867_s5 = sshll.u32 %s12001_s10, 4 }
  0x11   : > { %415 = vperm.xlu1 %6907, %v317_v3   ;;  %335 = vperm.xlu0 %6906, %v317_v3   ;;  %v171_v14 = vand.u32 1023, %v155_v12  ;;  %v173_v15 = vand.u32 1023, %v157_v13  ;;  %11553 = vst [vmem:[#allocation3_spill] sm:$0xff] %v7215_v21  ;;  %v7218_v23 = vld [vmem:[%s7213_s22] sm:$0x77]  ;;  %v186_v25 = vshra.s32 %v170_v17, 5  ;;  %s143_s8 = scalar_lea.vmem %s11282_s2, %s6867_s5 }
  0x12   : > { %11554 = vst [vmem:[#allocation4_spill] sm:$0xff] %v7220_v24  ;;  %11555 = vst [vmem:[#allocation5_spill] sm:$0xff] %v7222_v28  ;;  %v7225_v29 = vld [vmem:[%s7213_s22 + $0x8] sm:$0x77]  ;;  %v202_v30 = vand.u32 31, %v170_v17  ;;  %v666_v34 = vrot.slane %v7218_v23, %v7215_v21  ;;  %v159_v36 = vadd.s32 640, %v7198_v11  ;;  %v890_v37 = vrot.slane %v7218_v23, %v7220_v24 }
  0x13   : > { %v187_v18 = vshra.s32 %v171_v14, 5  ;;  %v203_v19 = vand.u32 31, %v171_v14  ;;  %v189_v20 = vshra.s32 %v173_v15, 5  ;;  %v205_v22 = vand.u32 31, %v173_v15  ;;  %11556 = vst [vmem:[#allocation6_spill] sm:$0xff] %v7228_v33 }
  0x14   : > { %v674_v38 = vrot.slane %v7225_v29, %v7215_v21  ;;  %v898_v39 = vrot.slane %v7225_v29, %v7220_v24  ;;  %v218_v40 = vcvt.s32.f32 %v186_v25  ;;  %v1178_v43 = vrot.slane %v7218_v23, %v7222_v28 }
  0x15   : > { %6908 = vset.pattern.permute.xlu1 %v11283_v4  ;;  %320 = vperm.xlu0 %6906, %v314_v5   ;;  %v219_v26 = vcvt.s32.f32 %v187_v18  ;;  %v267_v27 = vcvt.s32.f32 %v203_v19  ;;  %v221_v31 = vcvt.s32.f32 %v189_v20  ;;  %v269_v35 = vcvt.s32.f32 %v205_v22 }
  0x16   : > { %648 = vperm.xlu1 %6908, %v317_v3   ;;  %v266_v44 = vcvt.s32.f32 %v202_v30  ;;  %v7241_v45 = vsub.s32 1, %v660_v16  ;;  %v172_v47 = vand.u32 1023, %v156_v32  ;;  %v161_v48 = vadd.s32 896, %v7198_v11  ;;  %v7315_v30 = vld [vmem:[%s7213_s22 + $0x18] sm:$0x77] }
  0x17   : > { %v235_v41 = vmul.f32 0.06451613, %v219_v26  ;;  %v283_v42 = vmul.f32 0.06451613, %v267_v27  ;;  %v237_v46 = vmul.f32 0.06451613, %v221_v31  ;;  %v7245_v49 = vrot.slane %v666_v34, %v7228_v33 }
  0x18   : > { %11557 = vst [vmem:[#allocation7_spill] sm:$0xff] %v7241_v45  ;;  %v7247_v50 = vsub.s32 2, %v660_v16  ;;  %v285_v51 = vmul.f32 0.06451613, %v269_v35  ;;  %v1186_v52 = vrot.slane %v7225_v29, %v7222_v28  ;;  %v7252_v53 = vrot.slane %v890_v37, %v7241_v45 }
  0x19   : > { %6913 = vset.pattern.permute.xlu0 %v7145_v1  ;;  %v7255_v54 = vrot.slane %v674_v38, %v7228_v33  ;;  %v7258_v55 = vrot.slane %v898_v39, %v7241_v45  ;;  %v234_v56 = vmul.f32 0.06451613, %v218_v40  ;;  %v7260_v57 = vadd.f32 -1.0, %v235_v41 }
  0x1a   : > { %6909 = vset.pattern.permute.xlu1 %v7148_v7  ;;  %407 = vperm.xlu0 %6913, %v315_v6   ;;  %11558 = vst [vmem:[#allocation8_spill] sm:$0xff] %v7247_v50  ;;  %v7262_v58 = vadd.f32 -1.0, %v283_v42  ;;  %v7265_v59 = vrot.slane %v1178_v43, %v7247_v50  ;;  %v282_v60 = vmul.f32 0.06451613, %v266_v44  ;;  %v7267_v61 = vadd.f32 -1.0, %v237_v46 }
  0x1b   : > { %876 = vperm.xlu1 %6909, %v316_v0   ;;  %v188_v62 = vshra.s32 %v172_v47, 5  ;;  %v204_v63 = vand.u32 31, %v172_v47  ;;  %v894_v10 = vrot.slane %v7225_v29, %v7241_v45  ;;  %v1182_v13 = vrot.slane %v7225_v29, %v7247_v50 }
  0x1c   : > { %11559 = vst [vmem:[#allocation9_spill] sm:$0xff] %v7265_v59  ;;  %v7289_v12 = vadd.f32 -1.0, %v282_v60  ;;  %v158_v15 = vadd.s32 512, %v7198_v11  ;;  %v160_v25 = vadd.s32 768, %v7198_v11  ;;  %v177_v31 = vand.u32 1023, %v161_v48 }
  0x1d   : > { %v220_v16 = vcvt.s32.f32 %v188_v62  ;;  %v268_v17 = vcvt.s32.f32 %v204_v63  ;;  %v7318_v32 = vrot.slane %v1182_v13, %v7247_v50  ;;  %v690_v42 = vrot.slane %v7315_v30, %v7215_v21 }
  0x1e   : > { %6914 = vset.pattern.permute.xlu0 %v11283_v4  ;;  %v176_v43 = vand.u32 1023, %v160_v25  ;;  %v163_v44 = vadd.s32 1152, %v7198_v11  ;;  %v193_v46 = vshra.s32 %v177_v31, 5  ;;  %v209_v47 = vand.u32 31, %v177_v31 }
  0x1f   : > { %6910 = vset.pattern.permute.xlu1 %v7149_v8  ;;  %644 = vperm.xlu0 %6914, %v316_v0   ;;  %11562 = vst [vmem:[#allocation12_spill] sm:$0xff] %v7318_v32  ;;  %v236_v37 = vmul.f32 0.06451613, %v220_v16  ;;  %v284_v38 = vmul.f32 0.06451613, %v268_v17  ;;  %v914_v48 = vrot.slane %v7315_v30, %v7220_v24  ;;  %v165_v62 = vadd.s32 1408, %v7198_v11 }
  0x20   : > { %1164 = vperm.xlu1 %6910, %v316_v0   ;;  %v179_v13 = vand.u32 1023, %v163_v44 }
  0x21   : > { %v7339_v63 = vadd.f32 -1.0, %v236_v37  ;;  %v7348_v16 = vrot.slane %v914_v48, %v7241_v45  ;;  %v181_v25 = vand.u32 1023, %v165_v62  ;;  %v164_v37 = vadd.s32 1280, %v7198_v11 }
  0x23   : > { %636 = vperm.xlu0 %6914, %v314_v5   ;;  %11567 = vst [vmem:[#allocation17_spill] sm:$0xff] %v7348_v16  ;;  %v213_v62 = vand.u32 31, %v181_v25 }
  0x24   : > { %1168 = vperm.xlu1 %6910, %v317_v3  }
  0x27   : > { %6916 = vset.pattern.permute.xlu0 %v7148_v7 }
  0x28   : > { %6911 = vset.pattern.permute.xlu1 %v7146_v2  ;;  %880 = vperm.xlu0 %6916, %v317_v3   ;;  %v7272_v2 = vadd.f32 -1.0, %v285_v51  ;;  %v1202_v51 = vrot.slane %v7315_v30, %v7222_v28 }
  0x29   : > { %325 = vperm.xlu1 %6911, %v315_v6  }
  0x2a   : > { %v7351_v17 = vrot.slane %v1202_v51, %v7247_v50 }
  0x2c   : > { %872 = vperm.xlu0 %6916, %v315_v6   ;;  %11568 = vst [vmem:[#allocation18_spill] sm:$0xff] %v7351_v17 }
  0x2d   : > { %6912 = vset.pattern.permute.xlu1 %v7145_v1  ;;  %v175_v1 = vand.u32 1023, %v159_v36  ;;  %v174_v36 = vand.u32 1023, %v158_v15  ;;  %v273_v15 = vcvt.s32.f32 %v209_v47  ;;  %v211_v47 = vand.u32 31, %v179_v13 }
  0x2e   : > { %403 = vperm.xlu1 %6912, %v314_v5  }
  0x2f   : > { %v191_v18 = vshra.s32 %v175_v1, 5  ;;  %v207_v19 = vand.u32 31, %v175_v1  ;;  %v206_v60 = vand.u32 31, %v174_v36 }
  0x30   : > { %6920 = vset.pattern.permute.xlu0 %v7150_v9 }
  0x31   : > { %547 = vperm.xlu0 %6920, %v314_v5   ;;  %v223_v39 = vcvt.s32.f32 %v191_v18  ;;  %v271_v40 = vcvt.s32.f32 %v207_v19  ;;  %v270_v19 = vcvt.s32.f32 %v206_v60  ;;  %v197_v60 = vshra.s32 %v181_v25, 5 }
  0x32   : > { %6915 = vset.pattern.permute.xlu1 %v7150_v9 }
  0x33   : > { %555 = vperm.xlu1 %6915, %v316_v0   ;;  %v7270_v0 = vld [vmem:[%s7213_s22 + $0x10] sm:$0x77]  ;;  %v239_v1 = vmul.f32 0.06451613, %v223_v39  ;;  %v286_v51 = vmul.f32 0.06451613, %v270_v19 }
  0x34   : > { %v682_v14 = vrot.slane %v7270_v0, %v7215_v21  ;;  %v1194_v35 = vrot.slane %v7270_v0, %v7222_v28  ;;  %v902_v39 = vrot.slane %v7270_v0, %v7241_v45 }
  0x35   : > { %v7353_v31 = vadd.f32 -1.0, %v239_v1  ;;  %v7374_v25 = vadd.f32 -1.0, %v286_v51  ;;  %v627_v51 = vld [vmem:[%s11281_s1] sm:$0xff] }
  0x36   : > { %v7321_v34 = vrot.slane %v682_v14, %v7228_v33  ;;  %v225_v14 = vcvt.s32.f32 %v193_v46  ;;  %v289_v46 = vmul.f32 0.06451613, %v273_v15 }
  0x37   : > { %559 = vperm.xlu1 %6915, %v317_v3   ;;  %v7275_v3 = vrot.slane %v1186_v52, %v7247_v50  ;;  %v7336_v52 = vrot.slane %v1194_v35, %v7247_v50  ;;  %11569 = vst [vmem:[#allocation19_spill] sm:$0xff] %v7353_v31  ;;  %11575 = vst [vmem:[#allocation25_spill] sm:$0xff] %v7374_v25 }
  0x38   : > { %11563 = vst [vmem:[#allocation13_spill] sm:$0xff] %v7321_v34  ;;  %v241_v44 = vmul.f32 0.06451613, %v225_v14 }
  0x39   : > { %11560 = vst [vmem:[#allocation10_spill] sm:$0xff] %v7275_v3  ;;  %11565 = vst [vmem:[#allocation15_spill] sm:$0xff] %v7336_v52  ;;  %v277_v52 = vcvt.s32.f32 %v213_v62  ;;  %v1198_v62 = vrot.slane %v7315_v30, %v7247_v50 }
  0x3a   : > { %v7368_v15 = vadd.f32 -1.0, %v241_v44 }
  0x3b   : > { %6917 = vset.pattern.permute.xlu1 %v11283_v4 }
  0x3c   : > { %640 = vperm.xlu1 %6917, %v315_v6   ;;  %11572 = vst [vmem:[#allocation22_spill] sm:$0xff] %v7368_v15 }
  0x40   : > { %6918 = vset.pattern.permute.xlu1 %v7148_v7  ;;  %v7281_v7 = vadd.f32 -1.0, %v234_v56  ;;  %v190_v56 = vshra.s32 %v174_v36, 5 }
  0x41   : > { %868 = vperm.xlu1 %6918, %v314_v5  }
  0x42   : > { %v222_v18 = vcvt.s32.f32 %v190_v56 }
  0x44   : > { %v238_v48 = vmul.f32 0.06451613, %v222_v18  ;;  %v275_v18 = vcvt.s32.f32 %v211_v47 }
  0x45   : > { %6919 = vset.pattern.permute.xlu1 %v7149_v8  ;;  %v1174_v8 = vrot.slane %v7218_v23, %v7247_v50 }
  0x46   : > { %1156 = vperm.xlu1 %6919, %v314_v5   ;;  %v662_v5 = vrot.slane %v7218_v23, %v7228_v33  ;;  %v291_v47 = vmul.f32 0.06451613, %v275_v18 }
  0x47   : > { %v7306_v26 = vrot.slane %v1174_v8, %v7247_v50  ;;  %v7342_v8 = vadd.f32 -1.0, %v284_v38  ;;  %v678_v38 = vrot.slane %v7270_v0, %v7228_v33 }
  0x48   : > { %v7297_v20 = vrot.slane %v662_v5, %v7228_v33  ;;  %v287_v5 = vmul.f32 0.06451613, %v271_v40 }
  0x49   : > { %11561 = vst [vmem:[#allocation11_spill] sm:$0xff] %v7306_v26  ;;  %v7364_v4 = vrot.slane %v678_v38, %v7228_v33 }
  0x4a   : > { %1160 = vperm.xlu1 %6919, %v315_v6   ;;  %v7355_v35 = vadd.f32 -1.0, %v287_v5 }
  0x4b   : > { %11571 = vst [vmem:[#allocation21_spill] sm:$0xff] %v7364_v4 }
  0x4c   : > { %11570 = vst [vmem:[#allocation20_spill] sm:$0xff] %v7355_v35 }
  0x4e   : > { %6921 = vset.pattern.permute.xlu1 %v7150_v9  ;;  %v670_v9 = vrot.slane %v7225_v29, %v7228_v33  ;;  %v7312_v29 = vrot.slane %v894_v10, %v7241_v45  ;;  %v192_v10 = vshra.s32 %v176_v43, 5 }
  0x4f   : > { %551 = vperm.xlu1 %6921, %v315_v6   ;;  %v886_v6 = vrot.slane %v7218_v23, %v7241_v45  ;;  %v906_v23 = vrot.slane %v7270_v0, %v7220_v24 }
  0x50   : > { %v7309_v27 = vrot.slane %v670_v9, %v7228_v33  ;;  %v7345_v9 = vrot.slane %v690_v42, %v7228_v33  ;;  %v224_v40 = vcvt.s32.f32 %v192_v10  ;;  %v195_v42 = vshra.s32 %v179_v13, 5 }
  0x51   : > { %v7300_v22 = vrot.slane %v886_v6, %v7241_v45  ;;  %v7326_v41 = vrot.slane %v906_v23, %v7241_v45  ;;  %v162_v6 = vadd.s32 1024, %v7198_v11  ;;  %v208_v23 = vand.u32 31, %v176_v43 }
  0x52   : > { %11566 = vst [vmem:[#allocation16_spill] sm:$0xff] %v7345_v9  ;;  %v167_v43 = vadd.s32 1664, %v7198_v11  ;;  %v1190_v10 = vrot.slane %v7270_v0, %v7247_v50  ;;  %v240_v17 = vmul.f32 0.06451613, %v224_v40  ;;  %v227_v14 = vcvt.s32.f32 %v195_v42 }
  0x53   : > { %11564 = vst [vmem:[#allocation14_spill] sm:$0xff] %v7326_v41  ;;  %v178_v36 = vand.u32 1023, %v162_v6  ;;  %v272_v56 = vcvt.s32.f32 %v208_v23  ;;  %v180_v6 = vand.u32 1023, %v164_v37  ;;  %v7370_v13 = vadd.f32 -1.0, %v289_v46 }
  0x54   : > { %v183_v19 = vand.u32 1023, %v167_v43  ;;  %v7372_v23 = vadd.f32 -1.0, %v238_v48  ;;  %v229_v37 = vcvt.s32.f32 %v197_v60  ;;  %v7376_v0 = vadd.f32 -1.0, %v240_v17  ;;  %v628_v17 = vld [vmem:[%s11281_s1 + $0x8] sm:$0xff] }
  0x55   : > { %v194_v1 = vshra.s32 %v178_v36, 5  ;;  %v210_v5 = vand.u32 31, %v178_v36  ;;  %11573 = vst [vmem:[#allocation23_spill] sm:$0xff] %v7370_v13  ;;  %v288_v36 = vmul.f32 0.06451613, %v272_v56  ;;  %v196_v26 = vshra.s32 %v180_v6, 5 }
  0x56   : > { %11574 = vst [vmem:[#allocation24_spill] sm:$0xff] %v7372_v23  ;;  %11576 = vst [vmem:[#allocation26_spill] sm:$0xff] %v7376_v0  ;;  %v686_v40 = vrot.slane %v7315_v30, %v7228_v33  ;;  %v243_v42 = vmul.f32 0.06451613, %v227_v14  ;;  %v212_v44 = vand.u32 31, %v180_v6  ;;  %v910_v46 = vrot.slane %v7315_v30, %v7241_v45 }
  0x57   : > { %v226_v38 = vcvt.s32.f32 %v194_v1  ;;  %v274_v32 = vcvt.s32.f32 %v210_v5  ;;  %v199_v43 = vshra.s32 %v183_v19, 5  ;;  %v215_v48 = vand.u32 31, %v183_v19  ;;  %v149_v1 = vld [vmem:[%s7213_s22 + $0x20] sm:$0x77]  ;;  %v150_v30 = vld [vmem:[%s7213_s22 + $0x28] sm:$0x77] }
  0x58   : > { %v7389_v56 = vrot.slane %v902_v39, %v7241_v45  ;;  %v7392_v60 = vrot.slane %v1190_v10, %v7247_v50  ;;  %v245_v5 = vmul.f32 0.06451613, %v229_v37  ;;  %v293_v6 = vmul.f32 0.06451613, %v277_v52 }
  0x59   : > { %v242_v14 = vmul.f32 0.06451613, %v226_v38  ;;  %v290_v18 = vmul.f32 0.06451613, %v274_v32  ;;  %v228_v19 = vcvt.s32.f32 %v196_v26  ;;  %v7397_v3 = vadd.f32 -1.0, %v288_v36 }
  0x5a   : > { %11577 = vst [vmem:[#allocation27_spill] sm:$0xff] %v7389_v56  ;;  %11578 = vst [vmem:[#allocation28_spill] sm:$0xff] %v7392_v60  ;;  %v7400_v59 = vrot.slane %v686_v40, %v7228_v33  ;;  %v7402_v16 = vadd.f32 -1.0, %v243_v42  ;;  %v276_v39 = vcvt.s32.f32 %v212_v44  ;;  %v7405_v10 = vrot.slane %v910_v46, %v7241_v45 }
  0x5b   : > { %11579 = vst [vmem:[#allocation29_spill] sm:$0xff] %v7397_v3  ;;  %v7407_v60 = vadd.f32 -1.0, %v291_v47  ;;  %v231_v56 = vcvt.s32.f32 %v199_v43  ;;  %v279_v37 = vcvt.s32.f32 %v215_v48  ;;  %v7410_v52 = vpack.c.bf16 %v628_v17, %v627_v51 }
  0x5c   : > { %11580 = vst [vmem:[#allocation30_spill] sm:$0xff] %v7400_v59  ;;  %11581 = vst [vmem:[#allocation31_spill] sm:$0xff] %v7402_v16  ;;  %v7413_v26 = vrot.slane %v1198_v62, %v7247_v50  ;;  %v698_v32 = vrot.slane %v149_v1, %v7215_v21  ;;  %v7416_v36 = vadd.f32 -1.0, %v245_v5  ;;  %v7418_v38 = vadd.f32 -1.0, %v293_v6 }
  0x5d   : > { %11582 = vst [vmem:[#allocation32_spill] sm:$0xff] %v7405_v10  ;;  %11583 = vst [vmem:[#allocation33_spill] sm:$0xff] %v7407_v60  ;;  %v7420_v40 = vadd.f32 -1.0, %v242_v14  ;;  %v7422_v42 = vadd.f32 -1.0, %v290_v18  ;;  %v244_v44 = vmul.f32 0.06451613, %v228_v19  ;;  %v922_v46 = vrot.slane %v149_v1, %v7220_v24 }
  0x5e   : > { %11584 = vst [vmem:[#allocation34_spill] sm:$0xff] %v7410_v52  ;;  %11585 = vst [vmem:[#allocation35_spill] sm:$0xff] %v7413_v26  ;;  %v1210_v47 = vrot.slane %v149_v1, %v7222_v28  ;;  %v706_v43 = vrot.slane %v150_v30, %v7215_v21  ;;  %v292_v48 = vmul.f32 0.06451613, %v276_v39  ;;  %v930_v51 = vrot.slane %v150_v30, %v7220_v24  ;;  %v629_v21 = vld [vmem:[%s11281_s1 + $0x10] sm:$0xff]  ;;  %v630_v39 = vld [vmem:[%s11281_s1 + $0x18] sm:$0xff] }
  0x5f   : > { %11586 = vst [vmem:[#allocation36_spill] sm:$0xff] %v7416_v36  ;;  %11587 = vst [vmem:[#allocation37_spill] sm:$0xff] %v7418_v38  ;;  %v1218_v17 = vrot.slane %v150_v30, %v7222_v28  ;;  %v247_v62 = vmul.f32 0.06451613, %v231_v56  ;;  %v295_v5 = vmul.f32 0.06451613, %v279_v37  ;;  %v7430_v6 = vrot.slane %v698_v32, %v7228_v33 }
  0x60   : > { %11588 = vst [vmem:[#allocation38_spill] sm:$0xff] %v7420_v40  ;;  %11589 = vst [vmem:[#allocation39_spill] sm:$0xff] %v7422_v42  ;;  %v694_v14 = vrot.slane %v149_v1, %v7228_v33  ;;  %v918_v18 = vrot.slane %v149_v1, %v7241_v45  ;;  %v1206_v19 = vrot.slane %v149_v1, %v7247_v50  ;;  %v7441_v28 = vadd.f32 -1.0, %v244_v44 }
  0x61   : > { %11590 = vst [vmem:[#allocation40_spill] sm:$0xff] %v7430_v6  ;;  %v702_v56 = vrot.slane %v150_v30, %v7228_v33  ;;  %v926_v37 = vrot.slane %v150_v30, %v7241_v45  ;;  %v1214_v32 = vrot.slane %v150_v30, %v7247_v50  ;;  %v7447_v24 = vrot.slane %v922_v46, %v7241_v45 }
  0x62   : > { %11591 = vst [vmem:[#allocation41_spill] sm:$0xff] %v7441_v28  ;;  %v7450_v1 = vrot.slane %v1210_v47, %v7247_v50  ;;  %v7453_v42 = vrot.slane %v706_v43, %v7228_v33  ;;  %v7455_v40 = vadd.f32 -1.0, %v292_v48  ;;  %v7458_v44 = vrot.slane %v930_v51, %v7241_v45 }
  0x63   : > { %11592 = vst [vmem:[#allocation42_spill] sm:$0xff] %v7447_v24  ;;  %v7461_v28 = vrot.slane %v1218_v17, %v7247_v50  ;;  %v7463_v38 = vadd.f32 -1.0, %v247_v62  ;;  %v7465_v30 = vadd.f32 -1.0, %v295_v5  ;;  %v7467_v46 = vpack.c.bf16 %v630_v39, %v629_v21 }
  0x64   : > { %11593 = vst [vmem:[#allocation43_spill] sm:$0xff] %v7450_v1  ;;  %11594 = vst [vmem:[#allocation44_spill] sm:$0xff] %v7453_v42  ;;  %v7470_v47 = vrot.slane %v694_v14, %v7228_v33  ;;  %v7473_v43 = vrot.slane %v918_v18, %v7241_v45  ;;  %v7476_v48 = vrot.slane %v1206_v19, %v7247_v50  ;;  %v7492_v5 = vadd.s32 1920, %v7198_v11 }
  0x65   : > { %11595 = vst [vmem:[#allocation45_spill] sm:$0xff] %v7455_v40  ;;  %11596 = vst [vmem:[#allocation46_spill] sm:$0xff] %v7458_v44  ;;  %v7483_v17 = vrot.slane %v702_v56, %v7228_v33  ;;  %v7486_v62 = vrot.slane %v926_v37, %v7241_v45  ;;  %v7489_v21 = vrot.slane %v1214_v32, %v7247_v50 }
  0x66   : > { %11597 = vst [vmem:[#allocation47_spill] sm:$0xff] %v7461_v28  ;;  %11598 = vst [vmem:[#allocation48_spill] sm:$0xff] %v7463_v38 }
  0x67   : > { %11599 = vst [vmem:[#allocation49_spill] sm:$0xff] %v7465_v30  ;;  %11600 = vst [vmem:[#allocation50_spill] sm:$0xff] %v7467_v46 }
  0x68   : > { %11601 = vst [vmem:[#allocation51_spill] sm:$0xff] %v7470_v47  ;;  %11602 = vst [vmem:[#allocation52_spill] sm:$0xff] %v7473_v43 }
  0x69   : > { %11603 = vst [vmem:[#allocation53_spill] sm:$0xff] %v7476_v48  ;;  %11606 = vst [vmem:[#allocation56_spill] sm:$0xff] %v7483_v17 }
  0x6a   : > { %11607 = vst [vmem:[#allocation57_spill] sm:$0xff] %v7486_v62  ;;  %11608 = vst [vmem:[#allocation58_spill] sm:$0xff] %v7489_v21 }
  0x6b   : > { %11609 = vst [vmem:[#allocation59_spill] sm:$0xff] %v7492_v5 }
  0x88   : > { %v7478_v51 = vpop.permute.xlu1 %411  ;;  %v7480_v40 = vpop.permute.xlu0 %330 }
  0x89   : > { %11604 = vst [vmem:[#allocation54_spill] sm:$0xff] %v7478_v51  ;;  %11605 = vst [vmem:[#allocation55_spill] sm:$0xff] %v7480_v40  ;;  %v371_v14 = vmul.f32 %v7260_v57, %v7480_v40  ;;  %v451_v18 = vmul.f32 %v7262_v58, %v7478_v51  ;;  %v373_v19 = vmul.f32 %v7267_v61, %v7480_v40 }
  0x8a   : > { %v453_v39 = vmul.f32 %v7272_v2, %v7478_v51  ;;  %v370_v56 = vmul.f32 %v7281_v7, %v7480_v40  ;;  %v450_v37 = vmul.f32 %v7289_v12, %v7478_v51  ;;  %v372_v32 = vmul.f32 %v7339_v63, %v7480_v40 }
  0x8b   : > { %v452_v11 = vmul.f32 %v7342_v8, %v7478_v51  ;;  %v7510_v50 = vadd.f32 %v451_v18, %v371_v14  ;;  %v375_v33 = vmul.f32 %v7353_v31, %v7480_v40  ;;  %v455_v30 = vmul.f32 %v7355_v35, %v7478_v51 }
  0x8c   : > { %v7512_v45 = vadd.f32 %v453_v39, %v373_v19  ;;  %v7518_v38 = vpop.permute.xlu1 %415  ;;  %v7520_v21 = vpop.permute.xlu0 %335  ;;  %v7522_v62 = vadd.f32 %v450_v37, %v370_v56  ;;  %v377_v14 = vmul.f32 %v7368_v15, %v7480_v40  ;;  %v457_v18 = vmul.f32 %v7370_v13, %v7478_v51 }
  0x8d   : > { %11610 = vst [vmem:[#allocation60_spill] sm:$0xff] %v7510_v50  ;;  %11612 = vst [vmem:[#allocation62_spill] sm:$0xff] %v7518_v38  ;;  %v7524_v17 = vadd.f32 %v452_v11, %v372_v32  ;;  %v387_v19 = vmul.f32 %v7260_v57, %v7520_v21  ;;  %v467_v39 = vmul.f32 %v7262_v58, %v7518_v38 }
  0x8e   : > { %11611 = vst [vmem:[#allocation61_spill] sm:$0xff] %v7512_v45  ;;  %11613 = vst [vmem:[#allocation63_spill] sm:$0xff] %v7520_v21  ;;  %v389_v48 = vmul.f32 %v7267_v61, %v7520_v21  ;;  %v469_v56 = vmul.f32 %v7272_v2, %v7518_v38  ;;  %v386_v11 = vmul.f32 %v7281_v7, %v7520_v21 }
  0x8f   : > { %11614 = vst [vmem:[#allocation64_spill] sm:$0xff] %v7522_v62  ;;  %11615 = vst [vmem:[#allocation65_spill] sm:$0xff] %v7524_v17  ;;  %v466_v37 = vmul.f32 %v7289_v12, %v7518_v38  ;;  %v388_v32 = vmul.f32 %v7339_v63, %v7520_v21  ;;  %v468_v43 = vmul.f32 %v7342_v8, %v7518_v38  ;;  %v11637_v62 = vld [vmem:[#allocation27_spill] sm:$0xff] }
  0x90   : > { %v7546_v47 = vadd.f32 %v467_v39, %v387_v19  ;;  %v7548_v28 = vadd.f32 %v469_v56, %v389_v48  ;;  %v391_v44 = vmul.f32 %v7353_v31, %v7520_v21  ;;  %v471_v42 = vmul.f32 %v7355_v35, %v7518_v38  ;;  %v7554_v36 = vpop.permute.xlu0 %320 }
  0x91   : > { %11618 = vst [vmem:[#allocation68_spill] sm:$0xff] %v7554_v36  ;;  %v7556_v1 = vadd.f32 %v466_v37, %v386_v11  ;;  %v7558_v24 = vadd.f32 %v468_v43, %v388_v32  ;;  %v7560_v6 = vadd.f32 %v455_v30, %v375_v33  ;;  %v393_v19 = vmul.f32 %v7368_v15, %v7520_v21  ;;  %v7564_v39 = vpop.permute.xlu1 %648 }
  0x92   : > { %11616 = vst [vmem:[#allocation66_spill] sm:$0xff] %v7546_v47  ;;  %11617 = vst [vmem:[#allocation67_spill] sm:$0xff] %v7548_v28  ;;  %v7568_v48 = vmul.f32 %v7260_v57, %v7554_v36  ;;  %v7572_v56 = vmul.f32 %v7267_v61, %v7554_v36  ;;  %v7576_v11 = vmul.f32 %v7281_v7, %v7554_v36 }
  0x93   : > { %11619 = vst [vmem:[#allocation69_spill] sm:$0xff] %v7556_v1  ;;  %11620 = vst [vmem:[#allocation70_spill] sm:$0xff] %v7558_v24  ;;  %v7580_v33 = vmul.f32 %v7339_v63, %v7554_v36  ;;  %v7584_v30 = vmul.f32 %v7245_v49, %v7564_v39  ;;  %v7588_v43 = vmul.f32 %v7255_v54, %v7564_v39 }
  0x94   : > { %11621 = vst [vmem:[#allocation71_spill] sm:$0xff] %v7560_v6  ;;  %11622 = vst [vmem:[#allocation72_spill] sm:$0xff] %v7564_v39  ;;  %v7592_v37 = vmul.f32 %v7297_v20, %v7564_v39  ;;  %v7596_v32 = vmul.f32 %v7309_v27, %v7564_v39  ;;  %v7598_v60 = vadd.f32 %v471_v42, %v391_v44 }
  0x95   : > { %11623 = vst [vmem:[#allocation73_spill] sm:$0xff] %v7572_v56  ;;  %11624 = vst [vmem:[#allocation74_spill] sm:$0xff] %v7576_v11  ;;  %v7602_v16 = vmul.f32 %v7321_v34, %v7564_v39  ;;  %v473_v46 = vmul.f32 %v7370_v13, %v7518_v38  ;;  %v7606_v52 = vadd.f32 %v457_v18, %v377_v14  ;;  %v7618_v5 = vpop.permute.xlu0 %407 }
  0x96   : > { %11625 = vst [vmem:[#allocation75_spill] sm:$0xff] %v7580_v33  ;;  %11626 = vst [vmem:[#allocation76_spill] sm:$0xff] %v7598_v60  ;;  %v7610_v15 = vmul.f32 %v7345_v9, %v7564_v39  ;;  %v374_v26 = vmul.f32 %v7372_v23, %v7480_v40  ;;  %v390_v42 = vmul.f32 %v7372_v23, %v7520_v21  ;;  %v7630_v24 = vpop.permute.xlu1 %876 }
  0x97   : > { %11627 = vst [vmem:[#allocation77_spill] sm:$0xff] %v7602_v16  ;;  %11628 = vst [vmem:[#allocation78_spill] sm:$0xff] %v7606_v52  ;;  %v454_v44 = vmul.f32 %v7374_v25, %v7478_v51  ;;  %v7620_v60 = vadd.f32 %v473_v46, %v393_v19  ;;  %v470_v14 = vmul.f32 %v7374_v25, %v7518_v38 }
  0x98   : > { %11629 = vst [vmem:[#allocation79_spill] sm:$0xff] %v7610_v15  ;;  %11630 = vst [vmem:[#allocation80_spill] sm:$0xff] %v7618_v5  ;;  %v7626_v18 = vmul.f32 %v7364_v4, %v7564_v39  ;;  %v376_v13 = vmul.f32 %v7376_v0, %v7480_v40  ;;  %v7634_v23 = vmul.f32 %v7262_v58, %v7618_v5 }
  0x99   : > { %11631 = vst [vmem:[#allocation81_spill] sm:$0xff] %v7620_v60  ;;  %11633 = vst [vmem:[#allocation83_spill] sm:$0xff] %v7630_v24  ;;  %v7638_v46 = vmul.f32 %v7272_v2, %v7618_v5  ;;  %v7642_v19 = vmul.f32 %v7289_v12, %v7618_v5  ;;  %v7646_v25 = vmul.f32 %v7342_v8, %v7618_v5 }
  0x9a   : > { %11632 = vst [vmem:[#allocation82_spill] sm:$0xff] %v7626_v18  ;;  %v1060_v40 = vmul.f32 %v7252_v53, %v7630_v24  ;;  %v1062_v60 = vmul.f32 %v7258_v55, %v7630_v24  ;;  %v1059_v1 = vmul.f32 %v7300_v22, %v7630_v24  ;;  %v1061_v28 = vmul.f32 %v7312_v29, %v7630_v24  ;;  %v11634_v18 = vld [vmem:[#allocation17_spill] sm:$0xff]  ;;  %v7678_v33 = vpop.permute.xlu0 %644 }
  0x9b   : > { %v1064_v47 = vmul.f32 %v7326_v41, %v7630_v24  ;;  %v1066_v52 = vmul.f32 %v11634_v18, %v7630_v24  ;;  %v7660_v6 = vadd.f32 %v454_v44, %v374_v26  ;;  %v7662_v17 = vadd.f32 %v470_v14, %v390_v42  ;;  %11641 = vst [vmem:[#allocation89_spill] sm:$0xff] %v7678_v33 }
  0x9c   : > { %v7666_v45 = vmul.f32 %v11637_v62, %v7630_v24  ;;  %v7670_v50 = vmul.f32 %v7376_v0, %v7520_v21  ;;  %v456_v15 = vmul.f32 %v7397_v3, %v7478_v51  ;;  %v7676_v16 = vmul.f32 %v7397_v3, %v7518_v38  ;;  %v7696_v38 = vpop.permute.xlu1 %1164  ;;  %v11647_v3 = vld [vmem:[#allocation9_spill] sm:$0xff]  ;;  %v11653_v62 = vld [vmem:[#allocation18_spill] sm:$0xff] }
  0x9d   : > { %11635 = vst [vmem:[#allocation84_spill] sm:$0xff] %v7660_v6  ;;  %11636 = vst [vmem:[#allocation85_spill] sm:$0xff] %v7662_v17  ;;  %v7682_v26 = vmul.f32 %v7400_v59, %v7564_v39  ;;  %v7686_v42 = vmul.f32 %v7405_v10, %v7630_v24  ;;  %v7690_v44 = vmul.f32 %v7353_v31, %v7554_v36  ;;  %v11652_v17 = vld [vmem:[#allocation15_spill] sm:$0xff] }
  0x9e   : > { %11638 = vst [vmem:[#allocation86_spill] sm:$0xff] %v7666_v45  ;;  %11639 = vst [vmem:[#allocation87_spill] sm:$0xff] %v7670_v50  ;;  %v7694_v14 = vmul.f32 %v7355_v35, %v7618_v5  ;;  %v836_v51 = vmul.f32 %v7245_v49, %v7678_v33  ;;  %v838_v39 = vmul.f32 %v7255_v54, %v7678_v33  ;;  %v11648_v5 = vld [vmem:[#allocation10_spill] sm:$0xff]  ;;  %v11650_v35 = vld [vmem:[#allocation12_spill] sm:$0xff] }
  0x9f   : > { %11640 = vst [vmem:[#allocation88_spill] sm:$0xff] %v7676_v16  ;;  %11642 = vst [vmem:[#allocation90_spill] sm:$0xff] %v7682_v26  ;;  %v835_v24 = vmul.f32 %v7297_v20, %v7678_v33  ;;  %v837_v21 = vmul.f32 %v7309_v27, %v7678_v33  ;;  %v1348_v0 = vmul.f32 %v11647_v3, %v7696_v38  ;;  %v7714_v16 = vpop.permute.xlu0 %636 }
  0xa0   : > { %11643 = vst [vmem:[#allocation91_spill] sm:$0xff] %v7686_v42  ;;  %11644 = vst [vmem:[#allocation92_spill] sm:$0xff] %v7690_v44  ;;  %v1350_v36 = vmul.f32 %v11648_v5, %v7696_v38  ;;  %v1349_v31 = vmul.f32 %v11650_v35, %v7696_v38  ;;  %v1124_v26 = vadd.f32 %v1060_v40, %v836_v51  ;;  %v7724_v56 = vpop.permute.xlu1 %1168 }
  0xa1   : > { %11645 = vst [vmem:[#allocation93_spill] sm:$0xff] %v7694_v14  ;;  %11646 = vst [vmem:[#allocation94_spill] sm:$0xff] %v7696_v38  ;;  %v11649_v14 = vld [vmem:[#allocation11_spill] sm:$0xff]  ;;  %v1126_v42 = vadd.f32 %v1062_v60, %v838_v39  ;;  %v1123_v10 = vadd.f32 %v1059_v1, %v835_v24  ;;  %v1125_v59 = vadd.f32 %v1061_v28, %v837_v21 }
  0xa2   : > { %v1347_v44 = vmul.f32 %v11649_v14, %v7696_v38  ;;  %11651 = vst [vmem:[#allocation95_spill] sm:$0xff] %v7714_v16  ;;  %v840_v50 = vmul.f32 %v7321_v34, %v7678_v33  ;;  %v1352_v6 = vmul.f32 %v11652_v17, %v7696_v38  ;;  %v842_v45 = vmul.f32 %v7345_v9, %v7678_v33 }
  0xa3   : > { %v1354_v11 = vmul.f32 %v11653_v62, %v7696_v38  ;;  %11654 = vst [vmem:[#allocation96_spill] sm:$0xff] %v7724_v56  ;;  %v7726_v40 = vadd.f32 %v1348_v0, %v1124_v26  ;;  %v7728_v24 = vadd.f32 %v1350_v36, %v1126_v42  ;;  %v7732_v60 = vadd.f32 %v1349_v31, %v1125_v59  ;;  %v7762_v9 = vpop.permute.xlu0 %880 }
  0xa4   : > { %v7730_v28 = vadd.f32 %v1347_v44, %v1123_v10  ;;  %v1364_v1 = vmul.f32 %v11647_v3, %v7724_v56  ;;  %v1366_v51 = vmul.f32 %v11648_v5, %v7724_v56  ;;  %v1363_v21 = vmul.f32 %v11649_v14, %v7724_v56 }
  0xa5   : > { %v1365_v39 = vmul.f32 %v11650_v35, %v7724_v56  ;;  %v7744_v0 = vmul.f32 %v7245_v49, %v7714_v16  ;;  %v7748_v59 = vmul.f32 %v7255_v54, %v7714_v16  ;;  %v7752_v31 = vmul.f32 %v7297_v20, %v7714_v16  ;;  %v11655_v35 = vld [vmem:[#allocation28_spill] sm:$0xff] }
  0xa6   : > { %v7756_v10 = vmul.f32 %v7309_v27, %v7714_v16  ;;  %v1128_v36 = vadd.f32 %v1064_v47, %v840_v50  ;;  %v1368_v26 = vmul.f32 %v11652_v17, %v7724_v56  ;;  %v1130_v42 = vadd.f32 %v1066_v52, %v842_v45  ;;  %v7776_v47 = vpop.permute.xlu1 %325 }
  0xa7   : > { %v1370_v44 = vmul.f32 %v11653_v62, %v7724_v56  ;;  %v839_v34 = vmul.f32 %v7364_v4, %v7678_v33  ;;  %v7768_v14 = vmul.f32 %v11655_v35, %v7696_v38  ;;  %v7772_v16 = vmul.f32 %v11655_v35, %v7724_v56  ;;  %v7798_v33 = vpop.permute.xlu0 %872 }
  0xa8   : > { %v7774_v50 = vadd.f32 %v456_v15, %v376_v13  ;;  %v1076_v45 = vmul.f32 %v7252_v53, %v7762_v9  ;;  %v1078_v52 = vmul.f32 %v7258_v55, %v7762_v9  ;;  %v1075_v4 = vmul.f32 %v7300_v22, %v7762_v9  ;;  %11656 = vst [vmem:[#allocation97_spill] sm:$0xff] %v7798_v33 }
  0xa9   : > { %v1077_v62 = vmul.f32 %v7312_v29, %v7762_v9  ;;  %v355_v35 = vmul.f32 %v7260_v57, %v7776_v47  ;;  %v357_v15 = vmul.f32 %v7267_v61, %v7776_v47  ;;  %v354_v13 = vmul.f32 %v7281_v7, %v7776_v47 }
  0xaa   : > { %v356_v17 = vmul.f32 %v7339_v63, %v7776_v47  ;;  %v1140_v56 = vadd.f32 %v1076_v45, %v7584_v30  ;;  %v1142_v5 = vadd.f32 %v1078_v52, %v7588_v43  ;;  %v1139_v3 = vadd.f32 %v1075_v4, %v7592_v37  ;;  %v7812_v37 = vpop.permute.xlu1 %403 }
  0xab   : > { %v1141_v38 = vadd.f32 %v1077_v62, %v7596_v32  ;;  %v7801_v57 = vadd.f32 %v7634_v23, %v355_v35  ;;  %v7804_v61 = vadd.f32 %v7638_v46, %v357_v15  ;;  %v7807_v7 = vadd.f32 %v7642_v19, %v354_v13  ;;  %v11660_v15 = vld [vmem:[#allocation77_spill] sm:$0xff]  ;;  %v11661_v13 = vld [vmem:[#allocation79_spill] sm:$0xff] }
  0xac   : > { %v7810_v63 = vadd.f32 %v7646_v25, %v356_v17  ;;  %v1428_v30 = vadd.f32 %v1364_v1, %v1140_v56  ;;  %v1430_v43 = vadd.f32 %v1366_v51, %v1142_v5  ;;  %v1427_v45 = vadd.f32 %v1363_v21, %v1139_v3  ;;  %v7842_v1 = vpop.permute.xlu0 %547  ;;  %v11657_v51 = vld [vmem:[#allocation73_spill] sm:$0xff]  ;;  %v11658_v21 = vld [vmem:[#allocation74_spill] sm:$0xff] }
  0xad   : > { %v1429_v4 = vadd.f32 %v1365_v39, %v1141_v38  ;;  %v7816_v62 = vmul.f32 %v7252_v53, %v7798_v33  ;;  %v7820_v35 = vmul.f32 %v7258_v55, %v7798_v33  ;;  %v7824_v23 = vmul.f32 %v7300_v22, %v7798_v33 }
  0xae   : > { %v7828_v25 = vmul.f32 %v7312_v29, %v7798_v33  ;;  %v419_v3 = vmul.f32 %v7262_v58, %v7812_v37  ;;  %v421_v38 = vmul.f32 %v7272_v2, %v7812_v37  ;;  %v418_v17 = vmul.f32 %v7289_v12, %v7812_v37  ;;  %v11659_v12 = vld [vmem:[#allocation75_spill] sm:$0xff] }
  0xaf   : > { %v420_v5 = vmul.f32 %v7342_v8, %v7812_v37  ;;  %v1080_v56 = vmul.f32 %v7326_v41, %v7762_v9  ;;  %v1416_v32 = vadd.f32 %v1352_v6, %v1128_v36  ;;  %v1082_v46 = vmul.f32 %v11634_v18, %v7762_v9  ;;  %v11662_v6 = vld [vmem:[#allocation27_spill] sm:$0xff]  ;;  %v11663_v41 = vld [vmem:[#allocation86_spill] sm:$0xff] }
  0xb0   : > { %v1418_v19 = vadd.f32 %v1354_v11, %v1130_v42  ;;  %v483_v58 = vadd.f32 %v419_v3, %v7568_v48  ;;  %v485_v2 = vadd.f32 %v421_v38, %v11657_v51  ;;  %v482_v39 = vadd.f32 %v418_v17, %v11658_v21  ;;  %v7855_v11 = vpop.permute.xlu1 %555  ;;  %v11668_v17 = vld [vmem:[#allocation60_spill] sm:$0xff] }
  0xb1   : > { %v484_v52 = vadd.f32 %v420_v5, %v11659_v12  ;;  %v1144_v8 = vadd.f32 %v1080_v56, %v11660_v15  ;;  %v1146_v33 = vadd.f32 %v1082_v46, %v11661_v13  ;;  %v1079_v36 = vmul.f32 %v11662_v6, %v7762_v9  ;;  %v11672_v56 = vld [vmem:[#allocation64_spill] sm:$0xff]  ;;  %v11678_v12 = vld [vmem:[#allocation78_spill] sm:$0xff] }
  0xb2   : > { %v7853_v18 = vadd.f32 %v11663_v41, %v839_v34  ;;  %v7858_v48 = vadd.f32 %v7842_v1, %v483_v58  ;;  %v7861_v42 = vadd.f32 %v7842_v1, %v485_v2  ;;  %v7864_v3 = vadd.f32 %v7842_v1, %v482_v39  ;;  %v11670_v34 = vld [vmem:[#allocation61_spill] sm:$0xff]  ;;  %v11676_v2 = vld [vmem:[#allocation71_spill] sm:$0xff] }
  0xb3   : > { %v7867_v38 = vadd.f32 %v7842_v1, %v484_v52  ;;  %v7871_v5 = vadd.f32 %v7855_v11, %v11668_v17  ;;  %v7875_v41 = vadd.f32 %v7855_v11, %v11670_v34  ;;  %v7879_v46 = vadd.f32 %v7855_v11, %v11672_v56  ;;  %v11674_v58 = vld [vmem:[#allocation65_spill] sm:$0xff] }
  0xb4   : > { %11664 = vst [vmem:[#allocation73_spill] sm:$0xff] %v7858_v48  ;;  %11665 = vst [vmem:[#allocation74_spill] sm:$0xff] %v7861_v42  ;;  %v7883_v51 = vadd.f32 %v7855_v11, %v11674_v58  ;;  %v7887_v21 = vadd.f32 %v7855_v11, %v11676_v2  ;;  %v1432_v39 = vadd.f32 %v1368_v26, %v1144_v8  ;;  %v7901_v58 = vpop.permute.xlu1 %559  ;;  %v11680_v2 = vld [vmem:[#allocation84_spill] sm:$0xff] }
  0xb5   : > { %11666 = vst [vmem:[#allocation75_spill] sm:$0xff] %v7864_v3  ;;  %11667 = vst [vmem:[#allocation77_spill] sm:$0xff] %v7867_v38  ;;  %v7891_v52 = vadd.f32 %v7855_v11, %v11678_v12  ;;  %v1434_v15 = vadd.f32 %v1370_v44, %v1146_v33  ;;  %v1476_v13 = vadd.f32 %v7726_v40, %v7871_v5  ;;  %v11682_v40 = vld [vmem:[#allocation82_spill] sm:$0xff] }
  0xb6   : > { %11669 = vst [vmem:[#allocation79_spill] sm:$0xff] %v7871_v5  ;;  %11671 = vst [vmem:[#allocation86_spill] sm:$0xff] %v7875_v41  ;;  %v1478_v17 = vadd.f32 %v7728_v24, %v7875_v41  ;;  %v1475_v34 = vadd.f32 %v7730_v28, %v7879_v46  ;;  %v1477_v56 = vadd.f32 %v7732_v60, %v7883_v51  ;;  %v11683_v12 = vld [vmem:[#allocation66_spill] sm:$0xff]  ;;  %v11687_v41 = vld [vmem:[#allocation69_spill] sm:$0xff] }
  0xb7   : > { %11673 = vst [vmem:[#allocation60_spill] sm:$0xff] %v7879_v46  ;;  %11675 = vst [vmem:[#allocation61_spill] sm:$0xff] %v7883_v51  ;;  %v1480_v26 = vadd.f32 %v1416_v32, %v7887_v21  ;;  %v1482_v8 = vadd.f32 %v1418_v19, %v7891_v52  ;;  %v7907_v33 = vadd.f32 %v7855_v11, %v11680_v2  ;;  %v1540_v28 = vmax.f32 %v1476_v13, 0.0  ;;  %v11685_v46 = vld [vmem:[#allocation67_spill] sm:$0xff]  ;;  %v11691_v13 = vld [vmem:[#allocation76_spill] sm:$0xff] }
  0xb8   : > { %11677 = vst [vmem:[#allocation64_spill] sm:$0xff] %v7887_v21  ;;  %11679 = vst [vmem:[#allocation65_spill] sm:$0xff] %v7891_v52  ;;  %v1143_v44 = vadd.f32 %v1079_v36, %v11682_v40  ;;  %v7912_v24 = vadd.f32 %v7901_v58, %v11683_v12  ;;  %v7916_v60 = vadd.f32 %v7901_v58, %v11685_v46  ;;  %v1542_v51 = vmax.f32 %v1478_v17, 0.0  ;;  %v11689_v52 = vld [vmem:[#allocation70_spill] sm:$0xff]  ;;  %v11693_v5 = vld [vmem:[#allocation81_spill] sm:$0xff]  ;;  %v7938_v6 = vpop.permute.xlu1 %640 }
  0xb9   : > { %11681 = vst [vmem:[#allocation71_spill] sm:$0xff] %v7907_v33  ;;  %v7920_v32 = vadd.f32 %v7901_v58, %v11687_v41  ;;  %v1539_v19 = vmax.f32 %v1475_v34, 0.0  ;;  %v7924_v2 = vadd.f32 %v7901_v58, %v11689_v52  ;;  %v1541_v36 = vmax.f32 %v1477_v56, 0.0 }
  0xba   : > { %11684 = vst [vmem:[#allocation78_spill] sm:$0xff] %v7912_v24  ;;  %11686 = vst [vmem:[#allocation84_spill] sm:$0xff] %v7916_v60  ;;  %v1492_v40 = vadd.f32 %v1428_v30, %v7912_v24  ;;  %v1494_v12 = vadd.f32 %v1430_v43, %v7916_v60  ;;  %v7930_v21 = vadd.f32 %v7901_v58, %v11691_v13  ;;  %v1544_v46 = vmax.f32 %v1480_v26, 0.0  ;;  %v11695_v60 = vld [vmem:[#allocation85_spill] sm:$0xff] }
  0xbb   : > { %11688 = vst [vmem:[#allocation82_spill] sm:$0xff] %v7920_v32  ;;  %11690 = vst [vmem:[#allocation66_spill] sm:$0xff] %v7924_v2  ;;  %v1491_v17 = vadd.f32 %v1427_v45, %v7920_v32  ;;  %v1493_v41 = vadd.f32 %v1429_v4, %v7924_v2  ;;  %v7936_v34 = vadd.f32 %v7901_v58, %v11693_v5  ;;  %v1546_v52 = vmax.f32 %v1482_v8, 0.0  ;;  %v11716_v2 = vld [vmem:[#allocation19_spill] sm:$0xff] }
  0xbc   : > { %11692 = vst [vmem:[#allocation67_spill] sm:$0xff] %v7930_v21  ;;  %v1556_v56 = vmax.f32 %v1492_v40, 0.0  ;;  %v1558_v30 = vmax.f32 %v1494_v12, 0.0  ;;  %v1496_v43 = vadd.f32 %v1432_v39, %v7930_v21  ;;  %v7943_v13 = vadd.f32 %v7901_v58, %v11695_v60 }
  0xbd   : > { %11694 = vst [vmem:[#allocation69_spill] sm:$0xff] %v7936_v34  ;;  %v1555_v26 = vmax.f32 %v1491_v17, 0.0  ;;  %v1557_v24 = vmax.f32 %v1493_v41, 0.0  ;;  %v820_v45 = vmul.f32 %v7245_v49, %v7938_v6  ;;  %v822_v4 = vmul.f32 %v7255_v54, %v7938_v6  ;;  %v7958_v41 = vpop.permute.xlu1 %868 }
  0xbe   : > { %11696 = vst [vmem:[#allocation70_spill] sm:$0xff] %v7943_v13  ;;  %v1588_v5 = vpack.c.bf16 %v1556_v56, %v1540_v28  ;;  %v1590_v8 = vpack.c.bf16 %v1558_v30, %v1542_v51  ;;  %v819_v40 = vmul.f32 %v7297_v20, %v7938_v6  ;;  %v821_v39 = vmul.f32 %v7309_v27, %v7938_v6 }
  0xbf   : > { %v1587_v12 = vpack.c.bf16 %v1555_v26, %v1539_v19  ;;  %v1589_v21 = vpack.c.bf16 %v1557_v24, %v1541_v36  ;;  %v1108_v60 = vadd.f32 %v7816_v62, %v820_v45  ;;  %v1110_v17 = vadd.f32 %v7820_v35, %v822_v4  ;;  %v11697_v62 = vld [vmem:[#allocation87_spill] sm:$0xff]  ;;  %v11698_v35 = vld [vmem:[#allocation88_spill] sm:$0xff]  ;;  %v11704_v4 = vld [vmem:[#allocation30_spill] sm:$0xff] }
  0xc0   : > { %1638 = vmatprep.subr.bf16.mxu0 %v1588_v5  ;;  %1691 = vmatprep.subr.bf16.mxu1 %v1590_v8  ;;  %v1107_v49 = vadd.f32 %v7824_v23, %v819_v40  ;;  %v1109_v54 = vadd.f32 %v7828_v25, %v821_v39  ;;  %v1560_v28 = vmax.f32 %v1496_v43, 0.0  ;;  %v1498_v51 = vadd.f32 %v1434_v15, %v7936_v34  ;;  %v11699_v19 = vld [vmem:[#allocation59_spill] sm:$0xff]  ;;  %v11708_v40 = vld [vmem:[#allocation9_spill] sm:$0xff] }
  0xc1   : > { %1639 = vmatpush1.bf16.msra.mxu0 %v1587_v12  ;;  %1692 = vmatpush1.bf16.msra.mxu1 %v1589_v21  ;;  %v1415_v20 = vadd.f32 %v7768_v14, %v7853_v18  ;;  %v1431_v27 = vadd.f32 %v7772_v16, %v1143_v44  ;;  %v536_v24 = vadd.f32 %v11698_v35, %v11697_v62  ;;  %v11712_v35 = vld [vmem:[#allocation91_spill] sm:$0xff] }
  0xc2   : > { %v1028_v23 = vmul.f32 %v7252_v53, %v7958_v41  ;;  %v1030_v25 = vmul.f32 %v7258_v55, %v7958_v41  ;;  %v1027_v15 = vmul.f32 %v7300_v22, %v7958_v41  ;;  %v1029_v21 = vmul.f32 %v7312_v29, %v7958_v41 }
  0xc3   : > { %v7974_v18 = vpack.c.bf16 %v1560_v28, %v1544_v46  ;;  %v1562_v16 = vmax.f32 %v1498_v51, 0.0  ;;  %v1479_v14 = vadd.f32 %v1415_v20, %v7907_v33  ;;  %v1495_v44 = vadd.f32 %v1431_v27, %v7943_v13  ;;  %v7988_v46 = vpop.permute.xlu1 %1156  ;;  %v11710_v28 = vld [vmem:[#allocation11_spill] sm:$0xff]  ;;  %v11711_v20 = vld [vmem:[#allocation12_spill] sm:$0xff] }
  0xc4   : > { %v1092_v56 = vadd.f32 %v1028_v23, %v7744_v0  ;;  %v1094_v53 = vadd.f32 %v1030_v25, %v7748_v59  ;;  %v1091_v30 = vadd.f32 %v1027_v15, %v7752_v31  ;;  %v1093_v55 = vadd.f32 %v1029_v21, %v7756_v10  ;;  %11701 = vst [vmem:[#allocation81_spill] sm:$0xff] %v7988_v46  ;;  %v11703_v0 = vld [vmem:[#allocation89_spill] sm:$0xff]  ;;  %v11705_v31 = vld [vmem:[#allocation32_spill] sm:$0xff]  ;;  %v11706_v10 = vld [vmem:[#allocation94_spill] sm:$0xff] }
  0xc5   : > { %v7982_v43 = vpack.c.bf16 %v1562_v16, %v1546_v52  ;;  %v1543_v22 = vmax.f32 %v1479_v14, 0.0  ;;  %v1559_v26 = vmax.f32 %v1495_v44, 0.0  ;;  %v7986_v29 = vadd.f32 %v7855_v11, %v7774_v50  ;;  %v11707_v52 = vld [vmem:[#allocation35_spill] sm:$0xff]  ;;  %v11709_v50 = vld [vmem:[#allocation10_spill] sm:$0xff]  ;;  %v11714_v15 = vld [vmem:[#allocation96_spill] sm:$0xff] }
  0xc6   : > { %v7991_v45 = vadd.f32 %v7901_v58, %v536_v24  ;;  %v841_v59 = vmul.f32 %v11704_v4, %v11703_v0  ;;  %v1081_v5 = vmul.f32 %v11705_v31, %v7762_v9  ;;  %v1353_v8 = vmul.f32 %v11707_v52, %v11706_v10  ;;  %v11713_v23 = vld [vmem:[#allocation90_spill] sm:$0xff] }
  0xc7   : > { %11700 = vst [vmem:[#allocation76_spill] sm:$0xff] %v7986_v29  ;;  %v1316_v39 = vmul.f32 %v11708_v40, %v7988_v46  ;;  %v1318_v12 = vmul.f32 %v11709_v50, %v7988_v46  ;;  %v1315_v51 = vmul.f32 %v11710_v28, %v7988_v46  ;;  %v1317_v27 = vmul.f32 %v11711_v20, %v7988_v46  ;;  %v8013_v13 = vpop.permute.xlu1 %1160 }
  0xc8   : > { %11702 = vst [vmem:[#allocation85_spill] sm:$0xff] %v7991_v45  ;;  %v8007_v62 = vpack.c.bf16 %v1559_v26, %v1543_v22  ;;  %v1129_v24 = vadd.f32 %v11712_v35, %v841_v59  ;;  %v1145_v25 = vadd.f32 %v1081_v5, %v11713_v23  ;;  %v1369_v21 = vmul.f32 %v11707_v52, %v11714_v15  ;;  %v11717_v22 = vld [vmem:[#allocation20_spill] sm:$0xff] }
  0xc9   : > { %v1380_v16 = vadd.f32 %v1316_v39, %v1092_v56  ;;  %v1382_v14 = vadd.f32 %v1318_v12, %v1094_v53  ;;  %v1379_v44 = vadd.f32 %v1315_v51, %v1091_v30  ;;  %v1381_v36 = vadd.f32 %v1317_v27, %v1093_v55  ;;  %11715 = vst [vmem:[#allocation87_spill] sm:$0xff] %v8013_v13 }
  0xca   : > { %v1417_v33 = vadd.f32 %v1353_v8, %v1129_v24  ;;  %v1433_v34 = vadd.f32 %v1369_v21, %v1145_v25  ;;  %v359_v32 = vmul.f32 %v11716_v2, %v7776_v47  ;;  %v423_v26 = vmul.f32 %v11717_v22, %v7812_v37  ;;  %v11718_v21 = vld [vmem:[#allocation92_spill] sm:$0xff] }
  0xcb   : > { %v1332_v59 = vmul.f32 %v11708_v40, %v8013_v13  ;;  %v1444_v5 = vadd.f32 %v1380_v16, %v7858_v48  ;;  %v1334_v56 = vmul.f32 %v11709_v50, %v8013_v13  ;;  %v1446_v53 = vadd.f32 %v1382_v14, %v7861_v42  ;;  %v8031_v23 = vpop.permute.xlu1 %551  ;;  %v11719_v14 = vld [vmem:[#allocation93_spill] sm:$0xff] }
  0xcc   : > { %v1331_v30 = vmul.f32 %v11710_v28, %v8013_v13  ;;  %v1443_v55 = vadd.f32 %v1379_v44, %v7864_v3  ;;  %v1333_v2 = vmul.f32 %v11711_v20, %v8013_v13  ;;  %v1445_v8 = vadd.f32 %v1381_v36, %v7867_v38 }
  0xcd   : > { %v1396_v39 = vadd.f32 %v1332_v59, %v1108_v60  ;;  %v1508_v12 = vmax.f32 %v1444_v5, 0.0  ;;  %v1398_v40 = vadd.f32 %v1334_v56, %v1110_v17  ;;  %v1510_v51 = vmax.f32 %v1446_v53, 0.0  ;;  %v11728_v56 = vld [vmem:[#allocation14_spill] sm:$0xff] }
  0xce   : > { %v1395_v27 = vadd.f32 %v1331_v30, %v1107_v49  ;;  %v1507_v35 = vmax.f32 %v1443_v55, 0.0  ;;  %v1397_v24 = vadd.f32 %v1333_v2, %v1109_v54  ;;  %v1509_v50 = vmax.f32 %v1445_v8, 0.0 }
  0xcf   : > { %v1481_v25 = vadd.f32 %v1417_v33, %v7986_v29  ;;  %v1497_v28 = vadd.f32 %v1433_v34, %v7991_v45  ;;  %v487_v16 = vadd.f32 %v423_v26, %v11718_v21  ;;  %v503_v20 = vadd.f32 %v11719_v14, %v359_v32  ;;  %v11727_v26 = vld [vmem:[#allocation13_spill] sm:$0xff] }
  0xd0   : > { %v8039_v60 = vadd.f32 %v8031_v23, %v7801_v57  ;;  %v8043_v17 = vadd.f32 %v8031_v23, %v7804_v61  ;;  %v8047_v49 = vadd.f32 %v8031_v23, %v7807_v7  ;;  %v8051_v33 = vadd.f32 %v8031_v23, %v7810_v63  ;;  %v11726_v63 = vld [vmem:[#allocation95_spill] sm:$0xff] }
  0xd1   : > { %v1545_v34 = vmax.f32 %v1481_v25, 0.0  ;;  %v1561_v54 = vmax.f32 %v1497_v28, 0.0  ;;  %v8054_v32 = vadd.f32 %v7842_v1, %v487_v16  ;;  %v8057_v57 = vadd.f32 %v8031_v23, %v503_v20 }
  0xd2   : > { %11720 = vst [vmem:[#allocation88_spill] sm:$0xff] %v8039_v60  ;;  %11721 = vst [vmem:[#allocation59_spill] sm:$0xff] %v8043_v17  ;;  %v1460_v61 = vadd.f32 %v1396_v39, %v8039_v60  ;;  %v1462_v36 = vadd.f32 %v1398_v40, %v8043_v17  ;;  %v1459_v7 = vadd.f32 %v1395_v27, %v8047_v49  ;;  %v11729_v39 = vld [vmem:[#allocation97_spill] sm:$0xff]  ;;  %v11781_v17 = vld [vmem:[#allocation52_spill] sm:$0xff] }
  0xd3   : > { %11722 = vst [vmem:[#allocation89_spill] sm:$0xff] %v8047_v49  ;;  %11723 = vst [vmem:[#allocation30_spill] sm:$0xff] %v8051_v33  ;;  %v1461_v44 = vadd.f32 %v1397_v24, %v8051_v33  ;;  %v1593_v22 = vpack.c.bf16 %v1561_v54, %v1545_v34  ;;  %v808_v59 = vmul.f32 %v11727_v26, %v11726_v63  ;;  %v11730_v24 = vld [vmem:[#allocation15_spill] sm:$0xff] }
  0xd4   : > { %11724 = vst [vmem:[#allocation32_spill] sm:$0xff] %v8054_v32  ;;  %11725 = vst [vmem:[#allocation94_spill] sm:$0xff] %v8057_v57  ;;  %v824_v5 = vmul.f32 %v11727_v26, %v7938_v6  ;;  %v1032_v53 = vmul.f32 %v11728_v56, %v7958_v41  ;;  %v1524_v30 = vmax.f32 %v1460_v61, 0.0  ;;  %v1526_v55 = vmax.f32 %v1462_v36, 0.0  ;;  %v11731_v61 = vld [vmem:[#allocation68_spill] sm:$0xff]  ;;  %v11732_v36 = vld [vmem:[#allocation22_spill] sm:$0xff] }
  0xd5   : > { %v1523_v2 = vmax.f32 %v1459_v7, 0.0  ;;  %v1525_v8 = vmax.f32 %v1461_v44, 0.0  ;;  %v1048_v40 = vmul.f32 %v11728_v56, %v11729_v39  ;;  %v1320_v25 = vmul.f32 %v11730_v24, %v7988_v46  ;;  %v11733_v26 = vld [vmem:[#allocation23_spill] sm:$0xff]  ;;  %v11734_v56 = vld [vmem:[#allocation80_spill] sm:$0xff] }
  0xd6   : > { %v1096_v27 = vadd.f32 %v1032_v53, %v808_v59  ;;  %v1336_v28 = vmul.f32 %v11730_v24, %v8013_v13  ;;  %v1572_v21 = vpack.c.bf16 %v1524_v30, %v1508_v12  ;;  %v1574_v16 = vpack.c.bf16 %v1526_v55, %v1510_v51  ;;  %v11735_v12 = vld [vmem:[#allocation16_spill] sm:$0xff]  ;;  %v11739_v24 = vld [vmem:[#allocation17_spill] sm:$0xff] }
  0xd7   : > { %v1571_v14 = vpack.c.bf16 %v1523_v2, %v1507_v35  ;;  %v1573_v20 = vpack.c.bf16 %v1525_v8, %v1509_v50  ;;  %v1112_v34 = vadd.f32 %v1048_v40, %v824_v5  ;;  %v345_v7 = vmul.f32 %v11732_v36, %v11731_v61 }
  0xd8   : > { %v1384_v54 = vadd.f32 %v1320_v25, %v1096_v27  ;;  %v361_v44 = vmul.f32 %v11732_v36, %v7776_v47  ;;  %1640 = vmatprep.subr.bf16.mxu0 %v1572_v21  ;;  %1693 = vmatprep.subr.bf16.mxu1 %v1574_v16  ;;  %v425_v59 = vmul.f32 %v11733_v26, %v7812_v37  ;;  %v11736_v35 = vand.u32 1023, %v11699_v19  ;;  %v11740_v19 = vld [vmem:[#allocation18_spill] sm:$0xff] }
  0xd9   : > { %v441_v53 = vmul.f32 %v11733_v26, %v11734_v56  ;;  %v810_v51 = vmul.f32 %v11735_v12, %v11726_v63  ;;  %1641 = vmatpush1.bf16.msra.mxu0 %v1571_v14  ;;  %1694 = vmatpush1.bf16.msra.mxu1 %v1573_v20  ;;  %v1400_v5 = vadd.f32 %v1336_v28, %v1112_v34  ;;  %v11741_v34 = vld [vmem:[#allocation34_spill] sm:$0xff] }
  0xda   : > { %v201_v50 = vshra.s32 %v11736_v35, 5  ;;  %v1448_v30 = vadd.f32 %v1384_v54, %v8054_v32  ;;  %v826_v55 = vmul.f32 %v11735_v12, %v7938_v6  ;;  %v11737_v2 = vmov %v11736_v35  ;;  %1744 = vmatprep.subr.bf16.mxu0 %v7974_v18  ;;  %1797 = vmatprep.subr.bf16.mxu1 %v7982_v43 }
  0xdb   : > { %v8092_v8 = vand.u32 31, %v11737_v2  ;;  %v489_v40 = vadd.f32 %v425_v59, %v345_v7  ;;  %v505_v27 = vadd.f32 %v441_v53, %v361_v44  ;;  %v1034_v25 = vmul.f32 %v11739_v24, %v7958_v41  ;;  %v11745_v59 = vld [vmem:[#allocation24_spill] sm:$0xff] }
  0xdc   : > { %v233_v21 = vcvt.s32.f32 %v201_v50  ;;  %v1464_v28 = vadd.f32 %v1400_v5, %v8057_v57  ;;  %v1512_v16 = vmax.f32 %v1448_v30, 0.0  ;;  %v1050_v14 = vmul.f32 %v11739_v24, %v11729_v39  ;;  %6790 = vmatmul.mubr.msk.bf16.vlgmr.msra.gmra.mxu0 %vm1619_vm0, %v11741_v34  ;;  %6792 = vmatmul.mubr.msk.bf16.vlgmr.msra.gmra.mxu1 %vm1619_vm0, %v11741_v34  ;;  %v11746_v50 = vld [vmem:[#allocation25_spill] sm:$0xff] }
  0xdd   : > { %11738 = vst [vmem:[#allocation35_spill] sm:$0xff] %v8092_v8  ;;  %v1322_v20 = vmul.f32 %v11740_v19, %v7988_v46  ;;  %v8108_v18 = vadd.f32 %v7842_v1, %v489_v40  ;;  %v8111_v43 = vadd.f32 %v8031_v23, %v505_v27  ;;  %v1098_v54 = vadd.f32 %v1034_v25, %v810_v51 }
  0xde   : > { %v8113_v36 = vmul.f32 0.06451613, %v233_v21  ;;  %1745 = vmatpush1.bf16.msra.mxu0 %v8007_v62  ;;  %1798 = vmatpush1.bf16.msra.mxu1 %v1593_v22  ;;  %v1528_v7 = vmax.f32 %v1464_v28, 0.0  ;;  %v1114_v44 = vadd.f32 %v1050_v14, %v826_v55  ;;  %v1338_v26 = vmul.f32 %v11740_v19, %v8013_v13  ;;  %v11748_v55 = vld [vmem:[#allocation21_spill] sm:$0xff]  ;;  %v11749_v21 = vld [vmem:[#allocation27_spill] sm:$0xff]  ;;  %v11750_v19 = vld [vmem:[#allocation28_spill] sm:$0xff] }
  0xdf   : > { %11742 = vst [vmem:[#allocation9_spill] sm:$0xff] %v8108_v18  ;;  %11743 = vst [vmem:[#allocation10_spill] sm:$0xff] %v8111_v43  ;;  %v342_v53 = vmul.f32 %v11745_v59, %v11731_v61  ;;  %v1386_v12 = vadd.f32 %v1322_v20, %v1098_v54  ;;  %v358_v35 = vmul.f32 %v11745_v59, %v7776_v47  ;;  %v11747_v62 = vmov 0  }
  0xe0   : > { %11744 = vst [vmem:[#allocation11_spill] sm:$0xff] %v8113_v36  ;;  %v422_v51 = vmul.f32 %v11746_v50, %v7812_v37  ;;  %v438_v5 = vmul.f32 %v11746_v50, %v11734_v56  ;;  %1668 = vmatprep.mubr.bf16.mxu0 %v11747_v62  ;;  %v1576_v22 = vpack.c.bf16 %v1528_v7, %v1512_v16 }
  0xe1   : > { %v1402_v30 = vadd.f32 %v1338_v26, %v1114_v44  ;;  %v807_v2 = vmul.f32 %v11748_v55, %v11726_v63  ;;  %v823_v40 = vmul.f32 %v11748_v55, %v7938_v6  ;;  %1721 = vmatprep.mubr.bf16.mxu1 %v11747_v62  ;;  %v1450_v27 = vadd.f32 %v1386_v12, %v8108_v18 }
  0xe2   : > { %v486_v24 = vadd.f32 %v422_v51, %v342_v53  ;;  %v502_v25 = vadd.f32 %v438_v5, %v358_v35  ;;  %v1031_v28 = vmul.f32 %v11749_v21, %v7958_v41  ;;  %1746 = vmatprep.subr.bf16.mxu0 %v1576_v22  ;;  %v1047_v16 = vmul.f32 %v11749_v21, %v11729_v39  ;;  %v11753_v35 = vld [vmem:[#allocation26_spill] sm:$0xff]  ;;  %v11754_v22 = vld [vmem:[#allocation29_spill] sm:$0xff] }
  0xe3   : > { %v1466_v14 = vadd.f32 %v1402_v30, %v8111_v43  ;;  %v1319_v20 = vmul.f32 %v11750_v19, %v7988_v46  ;;  %v1335_v54 = vmul.f32 %v11750_v19, %v8013_v13  ;;  %v1514_v7 = vmax.f32 %v1450_v27, 0.0 }
  0xe4   : > { %v8143_v44 = vadd.f32 %v7842_v1, %v486_v24  ;;  %v8146_v26 = vadd.f32 %v8031_v23, %v502_v25  ;;  %v1095_v59 = vadd.f32 %v1031_v28, %v807_v2  ;;  %v1111_v12 = vadd.f32 %v1047_v16, %v823_v40  ;;  %v11755_v24 = vld [vmem:[#allocation50_spill] sm:$0xff] }
  0xe5   : > { %v1530_v53 = vmax.f32 %v1466_v14, 0.0  ;;  %v344_v50 = vmul.f32 %v11753_v35, %v11731_v61  ;;  %v360_v51 = vmul.f32 %v11753_v35, %v7776_v47  ;;  %v424_v30 = vmul.f32 %v11754_v22, %v7812_v37  ;;  %6791 = vmatmul.mubr.msk.bf16.gmra.mxu0 %vm1619_vm0, %v11755_v24  ;;  %6793 = vmatmul.mubr.msk.bf16.gmra.mxu1 %vm1619_vm0, %v11755_v24 }
  0xe6   : > { %11751 = vst [vmem:[#allocation12_spill] sm:$0xff] %v8143_v44  ;;  %11752 = vst [vmem:[#allocation91_spill] sm:$0xff] %v8146_v26  ;;  %v1383_v5 = vadd.f32 %v1319_v20, %v1095_v59  ;;  %v440_v55 = vmul.f32 %v11754_v22, %v11734_v56  ;;  %v809_v27 = vmul.f32 %v11704_v4, %v11726_v63  ;;  %1764 = vmatprep.mubr.bf16.mxu0 %v11747_v62 }
  0xe7   : > { %v1578_v2 = vpack.c.bf16 %v1530_v53, %v1514_v7  ;;  %v1399_v40 = vadd.f32 %v1335_v54, %v1111_v12  ;;  %v825_v25 = vmul.f32 %v11704_v4, %v7938_v6  ;;  %v1033_v21 = vmul.f32 %v11705_v31, %v7958_v41  ;;  %1817 = vmatprep.mubr.bf16.mxu1 %v11747_v62 }
  0xe8   : > { %v1447_v28 = vadd.f32 %v1383_v5, %v8143_v44  ;;  %v488_v14 = vadd.f32 %v424_v30, %v344_v50  ;;  %v504_v16 = vadd.f32 %v440_v55, %v360_v51  ;;  %v1049_v19 = vmul.f32 %v11705_v31, %v11729_v39  ;;  %v11758_v51 = vld [vmem:[#allocation55_spill] sm:$0xff] }
  0xe9   : > { %1799 = vmatprep.subr.bf16.mxu1 %v1578_v2  ;;  %v1463_v20 = vadd.f32 %v1399_v40, %v8146_v26  ;;  %v1097_v54 = vadd.f32 %v1033_v21, %v809_v27  ;;  %v1321_v4 = vmul.f32 %v11707_v52, %v7988_v46  ;;  %v1337_v7 = vmul.f32 %v11707_v52, %v8013_v13  ;;  %v11759_v5 = vld [vmem:[#allocation31_spill] sm:$0xff]  ;;  %v11761_v52 = vld [vmem:[#allocation54_spill] sm:$0xff]  ;;  %v11762_v2 = vld [vmem:[#allocation33_spill] sm:$0xff] }
  0xea   : > { %v1511_v59 = vmax.f32 %v1447_v28, 0.0  ;;  %v8176_v53 = vadd.f32 %v7842_v1, %v488_v14  ;;  %v8179_v12 = vadd.f32 %v8031_v23, %v504_v16  ;;  %v1113_v31 = vadd.f32 %v1049_v19, %v825_v25  ;;  %v11760_v30 = vld [vmem:[#allocation63_spill] sm:$0xff]  ;;  %v11763_v21 = vld [vmem:[#allocation62_spill] sm:$0xff]  ;;  %v11764_v14 = vld [vmem:[#allocation40_spill] sm:$0xff] }
  0xeb   : > { %v1527_v35 = vmax.f32 %v1463_v20, 0.0  ;;  %v1385_v50 = vadd.f32 %v1321_v4, %v1097_v54  ;;  %v379_v22 = vmul.f32 %v11759_v5, %v11758_v51  ;;  %v395_v55 = vmul.f32 %v11759_v5, %v11760_v30  ;;  %v11765_v20 = vld [vmem:[#allocation72_spill] sm:$0xff]  ;;  %v11766_v4 = vld [vmem:[#allocation83_spill] sm:$0xff]  ;;  %v11767_v26 = vld [vmem:[#allocation42_spill] sm:$0xff] }
  0xec   : > { %11756 = vst [vmem:[#allocation90_spill] sm:$0xff] %v8176_v53  ;;  %11757 = vst [vmem:[#allocation96_spill] sm:$0xff] %v8179_v12  ;;  %v1401_v27 = vadd.f32 %v1337_v7, %v1113_v31  ;;  %v459_v40 = vmul.f32 %v11762_v2, %v11761_v52  ;;  %v475_v28 = vmul.f32 %v11762_v2, %v11763_v21 }
  0xed   : > { %v844_v25 = vmul.f32 %v11764_v14, %v11703_v0  ;;  %v1575_v16 = vpack.c.bf16 %v1527_v35, %v1511_v59  ;;  %v1449_v19 = vadd.f32 %v1385_v50, %v8176_v53  ;;  %v860_v54 = vmul.f32 %v11764_v14, %v11765_v20  ;;  %v11768_v59 = vld [vmem:[#allocation43_spill] sm:$0xff] }
  0xee   : > { %v1068_v44 = vmul.f32 %v11767_v26, %v11766_v4  ;;  %v1465_v7 = vadd.f32 %v1401_v27, %v8179_v12  ;;  %v523_v31 = vadd.f32 %v459_v40, %v379_v22  ;;  %v539_v43 = vadd.f32 %v475_v28, %v395_v55  ;;  %v11771_v40 = vld [vmem:[#allocation36_spill] sm:$0xff] }
  0xef   : > { %v1084_v18 = vmul.f32 %v11767_v26, %v7762_v9  ;;  %1747 = vmatpush1.bf16.msra.mxu0 %v1575_v16  ;;  %v1513_v57 = vmax.f32 %v1449_v19, 0.0  ;;  %v1356_v35 = vmul.f32 %v11768_v59, %v11706_v10  ;;  %v1372_v50 = vmul.f32 %v11768_v59, %v11714_v15 }
  0xf0   : > { %v1132_v32 = vadd.f32 %v1068_v44, %v844_v25  ;;  %v1529_v53 = vmax.f32 %v1465_v7, 0.0  ;;  %v8205_v45 = vadd.f32 %v7855_v11, %v523_v31  ;;  %v8208_v27 = vadd.f32 %v7901_v58, %v539_v43  ;;  %v11772_v25 = vld [vmem:[#allocation37_spill] sm:$0xff]  ;;  %v11773_v31 = vld [vmem:[#allocation44_spill] sm:$0xff] }
  0xf1   : > { %v1148_v22 = vadd.f32 %v1084_v18, %v860_v54  ;;  %v381_v28 = vmul.f32 %v11771_v40, %v11758_v51  ;;  %v397_v44 = vmul.f32 %v11771_v40, %v11760_v30  ;;  %v461_v16 = vmul.f32 %v11772_v25, %v11761_v52 }
  0xf2   : > { %11769 = vst [vmem:[#allocation19_spill] sm:$0xff] %v8205_v45  ;;  %11770 = vst [vmem:[#allocation20_spill] sm:$0xff] %v8208_v27  ;;  %v1420_v55 = vadd.f32 %v1356_v35, %v1132_v32  ;;  %v1577_v19 = vpack.c.bf16 %v1529_v53, %v1513_v57  ;;  %v477_v7 = vmul.f32 %v11772_v25, %v11763_v21  ;;  %6794 = vmatmul.mubr.msk.bf16.vlgmr.msra.gmra.mxu0 %vm1619_vm0, %v11741_v34  ;;  %v11774_v35 = vld [vmem:[#allocation46_spill] sm:$0xff] }
  0xf3   : > { %v1436_v12 = vadd.f32 %v1372_v50, %v1148_v22  ;;  %v846_v43 = vmul.f32 %v11773_v31, %v11703_v0  ;;  %v525_v18 = vadd.f32 %v461_v16, %v381_v28  ;;  %v862_v54 = vmul.f32 %v11773_v31, %v11765_v20  ;;  %1774 = vmatprep.mubr.bf16.mxu0 %v11747_v62  ;;  %v11775_v22 = vld [vmem:[#allocation47_spill] sm:$0xff] }
  0xf4   : > { %v1484_v32 = vadd.f32 %v1420_v55, %v8205_v45  ;;  %v1070_v29 = vmul.f32 %v11774_v35, %v11766_v4  ;;  %1800 = vmatpush1.bf16.msra.mxu1 %v1577_v19  ;;  %v541_v53 = vadd.f32 %v477_v7, %v397_v44  ;;  %v1086_v50 = vmul.f32 %v11774_v35, %v7762_v9  ;;  %v11778_v44 = vld [vmem:[#allocation38_spill] sm:$0xff] }
  0xf5   : > { %v1500_v57 = vadd.f32 %v1436_v12, %v8208_v27  ;;  %v1358_v33 = vmul.f32 %v11775_v22, %v11706_v10  ;;  %v8234_v28 = vadd.f32 %v7855_v11, %v525_v18  ;;  %v1374_v45 = vmul.f32 %v11775_v22, %v11714_v15 }
  0xf6   : > { %v1548_v55 = vmax.f32 %v1484_v32, 0.0  ;;  %v1134_v16 = vadd.f32 %v1070_v29, %v846_v43  ;;  %v8239_v19 = vadd.f32 %v7901_v58, %v541_v53  ;;  %v1150_v12 = vadd.f32 %v1086_v50, %v862_v54  ;;  %v11779_v29 = vld [vmem:[#allocation39_spill] sm:$0xff] }
  0xf7   : > { %11776 = vst [vmem:[#allocation92_spill] sm:$0xff] %v8234_v28  ;;  %v1564_v38 = vmax.f32 %v1500_v57, 0.0  ;;  %v378_v7 = vmul.f32 %v11778_v44, %v11758_v51  ;;  %6796 = vmatmul.mubr.msk.bf16.vlgmr.msra.gmra.mxu1 %vm1619_vm0, %v11741_v34  ;;  %v394_v32 = vmul.f32 %v11778_v44, %v11760_v30  ;;  %v458_v43 = vmul.f32 %v11779_v29, %v11761_v52  ;;  %v11780_v54 = vld [vmem:[#allocation51_spill] sm:$0xff]  ;;  %v11788_v34 = vld [vmem:[#allocation57_spill] sm:$0xff] }
  0xf8   : > { %11777 = vst [vmem:[#allocation93_spill] sm:$0xff] %v8239_v19  ;;  %v1422_v27 = vadd.f32 %v1358_v33, %v1134_v16  ;;  %v474_v18 = vmul.f32 %v11779_v29, %v11763_v21  ;;  %v1438_v53 = vadd.f32 %v1374_v45, %v1150_v12  ;;  %v843_v50 = vmul.f32 %v11780_v54, %v11703_v0  ;;  %v11782_v45 = vld [vmem:[#allocation53_spill] sm:$0xff] }
  0xf9   : > { %v1596_v57 = vpack.c.bf16 %v1564_v38, %v1548_v55  ;;  %v859_v33 = vmul.f32 %v11780_v54, %v11765_v20  ;;  %1827 = vmatprep.mubr.bf16.mxu1 %v11747_v62  ;;  %v522_v49 = vadd.f32 %v458_v43, %v378_v7  ;;  %v1067_v42 = vmul.f32 %v11781_v17, %v11766_v4 }
  0xfa   : > { %v1486_v16 = vadd.f32 %v1422_v27, %v8234_v28  ;;  %v538_v3 = vadd.f32 %v474_v18, %v394_v32  ;;  %v1502_v60 = vadd.f32 %v1438_v53, %v8239_v19  ;;  %v1083_v38 = vmul.f32 %v11781_v17, %v7762_v9  ;;  %6795 = vmatmul.mubr.msk.bf16.gmra.mxu0 %vm1619_vm0, %v11755_v24 }
  0xfb   : > { %1850 = vmatprep.subr.bf16.mxu0 %v1596_v57  ;;  %v1355_v55 = vmul.f32 %v11782_v45, %v11706_v10  ;;  %v1371_v12 = vmul.f32 %v11782_v45, %v11714_v15  ;;  %v8267_v27 = vadd.f32 %v7855_v11, %v522_v49  ;;  %v1131_v32 = vadd.f32 %v1067_v42, %v843_v50  ;;  %v11785_v57 = vld [vmem:[#allocation41_spill] sm:$0xff] }
  0xfc   : > { %v1550_v48 = vmax.f32 %v1486_v16, 0.0  ;;  %v8270_v7 = vadd.f32 %v7901_v58, %v538_v3  ;;  %v1566_v43 = vmax.f32 %v1502_v60, 0.0  ;;  %v1147_v18 = vadd.f32 %v1083_v38, %v859_v33  ;;  %1870 = vmatprep.mubr.bf16.mxu0 %v11747_v62  ;;  %v11786_v49 = vld [vmem:[#allocation45_spill] sm:$0xff]  ;;  %v11787_v3 = vld [vmem:[#allocation56_spill] sm:$0xff] }
  0xfd   : > { %11783 = vst [vmem:[#allocation95_spill] sm:$0xff] %v8267_v27  ;;  %v380_v53 = vmul.f32 %v11785_v57, %v11758_v51  ;;  %v396_v19 = vmul.f32 %v11785_v57, %v11760_v30  ;;  %v1419_v16 = vadd.f32 %v1355_v55, %v1131_v32  ;;  %v460_v28 = vmul.f32 %v11786_v49, %v11761_v52 }
  0xfe   : > { %11784 = vst [vmem:[#allocation13_spill] sm:$0xff] %v8270_v7  ;;  %v476_v42 = vmul.f32 %v11786_v49, %v11763_v21  ;;  %v845_v50 = vmul.f32 %v11787_v3, %v11703_v0  ;;  %v1598_v60 = vpack.c.bf16 %v1566_v43, %v1550_v48  ;;  %v1435_v33 = vadd.f32 %v1371_v12, %v1147_v18  ;;  %v11789_v43 = vld [vmem:[#allocation58_spill] sm:$0xff] }
  0xff   : > { %v861_v38 = vmul.f32 %v11787_v3, %v11765_v20  ;;  %v1069_v8 = vmul.f32 %v11788_v34, %v11766_v4  ;;  %v1483_v36 = vadd.f32 %v1419_v16, %v8267_v27  ;;  %v524_v55 = vadd.f32 %v460_v28, %v380_v53  ;;  %6797 = vmatmul.mubr.msk.bf16.gmra.mxu1 %vm1619_vm0, %v11755_v24 }
 0x100   : > { %v540_v32 = vadd.f32 %v476_v42, %v396_v19  ;;  %v1085_v52 = vmul.f32 %v11788_v34, %v7762_v9  ;;  %1903 = vmatprep.subr.bf16.mxu1 %v1598_v60  ;;  %v1499_v48 = vadd.f32 %v1435_v33, %v8270_v7  ;;  %v1357_v18 = vmul.f32 %v11789_v43, %v11706_v10 }
 0x101   : > { %v1133_v12 = vadd.f32 %v1069_v8, %v845_v50  ;;  %v1373_v4 = vmul.f32 %v11789_v43, %v11714_v15  ;;  %v1547_v20 = vmax.f32 %v1483_v36, 0.0  ;;  %v8300_v28 = vadd.f32 %v7855_v11, %v524_v55  ;;  %1923 = vmatprep.mubr.bf16.mxu1 %v11747_v62 }
 0x102   : > { %v8303_v19 = vadd.f32 %v7901_v58, %v540_v32  ;;  %v1149_v53 = vadd.f32 %v1085_v52, %v861_v38  ;;  %v1563_v16 = vmax.f32 %v1499_v48, 0.0  ;;  %v347_v8 = vmul.f32 %v11759_v5, %v11731_v61 }
 0x103   : > { %11790 = vst [vmem:[#allocation14_spill] sm:$0xff] %v8300_v28  ;;  %v1421_v42 = vadd.f32 %v1357_v18, %v1133_v12  ;;  %v363_v50 = vmul.f32 %v11759_v5, %v7776_v47  ;;  %v427_v36 = vmul.f32 %v11762_v2, %v7812_v37  ;;  %v443_v33 = vmul.f32 %v11762_v2, %v11734_v56 }
 0x104   : > { %11791 = vst [vmem:[#allocation15_spill] sm:$0xff] %v8303_v19  ;;  %v1437_v60 = vadd.f32 %v1373_v4, %v1149_v53  ;;  %v812_v52 = vmul.f32 %v11764_v14, %v11726_v63  ;;  %v1595_v38 = vpack.c.bf16 %v1563_v16, %v1547_v20  ;;  %v828_v32 = vmul.f32 %v11764_v14, %v7938_v6 }
 0x105   : > { %v1485_v55 = vadd.f32 %v1421_v42, %v8300_v28  ;;  %v1036_v48 = vmul.f32 %v11767_v26, %v7958_v41  ;;  %v491_v4 = vadd.f32 %v427_v36, %v347_v8  ;;  %v507_v12 = vadd.f32 %v443_v33, %v363_v50 }
 0x106   : > { %v1501_v5 = vadd.f32 %v1437_v60, %v8303_v19  ;;  %v1052_v18 = vmul.f32 %v11767_v26, %v11729_v39  ;;  %1851 = vmatpush1.bf16.msra.mxu0 %v1595_v38  ;;  %v1324_v20 = vmul.f32 %v11768_v59, %v7988_v46  ;;  %v1340_v16 = vmul.f32 %v11768_v59, %v8013_v13 }
 0x107   : > { %v1549_v2 = vmax.f32 %v1485_v55, 0.0  ;;  %v1100_v53 = vadd.f32 %v1036_v48, %v812_v52  ;;  %v8329_v42 = vadd.f32 %v7842_v1, %v491_v4  ;;  %v8332_v60 = vadd.f32 %v8031_v23, %v507_v12 }
 0x108   : > { %v1565_v14 = vmax.f32 %v1501_v5, 0.0  ;;  %v1116_v8 = vadd.f32 %v1052_v18, %v828_v32  ;;  %v349_v26 = vmul.f32 %v11771_v40, %v11731_v61  ;;  %v365_v36 = vmul.f32 %v11771_v40, %v7776_v47 }
 0x109   : > { %11792 = vst [vmem:[#allocation68_spill] sm:$0xff] %v8329_v42  ;;  %11793 = vst [vmem:[#allocation22_spill] sm:$0xff] %v8332_v60  ;;  %v1388_v50 = vadd.f32 %v1324_v20, %v1100_v53  ;;  %v429_v33 = vmul.f32 %v11772_v25, %v7812_v37  ;;  %v445_v38 = vmul.f32 %v11772_v25, %v11734_v56 }
 0x10a   : > { %v1597_v52 = vpack.c.bf16 %v1565_v14, %v1549_v2  ;;  %v1404_v59 = vadd.f32 %v1340_v16, %v1116_v8  ;;  %v814_v55 = vmul.f32 %v11773_v31, %v11726_v63  ;;  %v830_v5 = vmul.f32 %v11773_v31, %v7938_v6 }
 0x10b   : > { %v1452_v32 = vadd.f32 %v1388_v50, %v8329_v42  ;;  %v493_v48 = vadd.f32 %v429_v33, %v349_v26  ;;  %v1038_v40 = vmul.f32 %v11774_v35, %v7958_v41  ;;  %v509_v12 = vadd.f32 %v445_v38, %v365_v36  ;;  %v11816_v42 = vld [vmem:[#allocation2_spill] sm:$0xff] }
 0x10c   : > { %1904 = vmatpush1.bf16.msra.mxu1 %v1597_v52  ;;  %v1468_v4 = vadd.f32 %v1404_v59, %v8332_v60  ;;  %v1054_v18 = vmul.f32 %v11774_v35, %v11729_v39  ;;  %v1326_v25 = vmul.f32 %v11775_v22, %v7988_v46  ;;  %v1342_v31 = vmul.f32 %v11775_v22, %v8013_v13 }
 0x10d   : > { %v1516_v2 = vmax.f32 %v1452_v32, 0.0  ;;  %v8355_v53 = vadd.f32 %v7842_v1, %v493_v48  ;;  %v1102_v20 = vadd.f32 %v1038_v40, %v814_v55  ;;  %v8360_v14 = vadd.f32 %v8031_v23, %v509_v12 }
 0x10e   : > { %v1532_v16 = vmax.f32 %v1468_v4, 0.0  ;;  %v1118_v8 = vadd.f32 %v1054_v18, %v830_v5  ;;  %v346_v50 = vmul.f32 %v11778_v44, %v11731_v61  ;;  %v362_v26 = vmul.f32 %v11778_v44, %v7776_v47 }
 0x10f   : > { %11794 = vst [vmem:[#allocation23_spill] sm:$0xff] %v8355_v53  ;;  %11795 = vst [vmem:[#allocation80_spill] sm:$0xff] %v8360_v14  ;;  %v1390_v35 = vadd.f32 %v1326_v25, %v1102_v20  ;;  %v426_v36 = vmul.f32 %v11779_v29, %v7812_v37  ;;  %v442_v33 = vmul.f32 %v11779_v29, %v11734_v56  ;;  %v166_v19 = vadd.s32 1536, %v11816_v42 }
 0x110   : > { %v1580_v52 = vpack.c.bf16 %v1532_v16, %v1516_v2  ;;  %v1406_v22 = vadd.f32 %v1342_v31, %v1118_v8  ;;  %v811_v59 = vmul.f32 %v11780_v54, %v11726_v63  ;;  %v827_v38 = vmul.f32 %v11780_v54, %v7938_v6 }
 0x111   : > { %v1454_v55 = vadd.f32 %v1390_v35, %v8355_v53  ;;  %v490_v32 = vadd.f32 %v426_v36, %v346_v50  ;;  %v506_v48 = vadd.f32 %v442_v33, %v362_v26  ;;  %v1035_v44 = vmul.f32 %v11781_v17, %v7958_v41 }
 0x112   : > { %1852 = vmatprep.subr.bf16.mxu0 %v1580_v52  ;;  %v1470_v5 = vadd.f32 %v1406_v22, %v8360_v14  ;;  %v1051_v29 = vmul.f32 %v11781_v17, %v11729_v39  ;;  %v1323_v40 = vmul.f32 %v11782_v45, %v7988_v46  ;;  %v1339_v4 = vmul.f32 %v11782_v45, %v8013_v13 }
 0x113   : > { %v1518_v54 = vmax.f32 %v1454_v55, 0.0  ;;  %v8385_v12 = vadd.f32 %v7842_v1, %v490_v32  ;;  %v8388_v18 = vadd.f32 %v8031_v23, %v506_v48  ;;  %v1099_v25 = vadd.f32 %v1035_v44, %v811_v59  ;;  %v8413_v32 = vld [vmem:[%s7213_s22 + $0x30] sm:$0x77] }
 0x114   : > { %v1534_v2 = vmax.f32 %v1470_v5, 0.0  ;;  %v1115_v20 = vadd.f32 %v1051_v29, %v827_v38  ;;  %v348_v31 = vmul.f32 %v11785_v57, %v11731_v61  ;;  %v364_v17 = vmul.f32 %v11785_v57, %v7776_v47 }
 0x115   : > { %11796 = vst [vmem:[#allocation16_spill] sm:$0xff] %v8385_v12  ;;  %11797 = vst [vmem:[#allocation17_spill] sm:$0xff] %v8388_v18  ;;  %v1387_v16 = vadd.f32 %v1323_v40, %v1099_v25  ;;  %v428_v45 = vmul.f32 %v11786_v49, %v7812_v37  ;;  %v444_v8 = vmul.f32 %v11786_v49, %v11734_v56 }
 0x116   : > { %v813_v50 = vmul.f32 %v11787_v3, %v11726_v63  ;;  %v1582_v35 = vpack.c.bf16 %v1534_v2, %v1518_v54  ;;  %v1403_v26 = vadd.f32 %v1339_v4, %v1115_v20  ;;  %v829_v36 = vmul.f32 %v11787_v3, %v7938_v6  ;;  %v11800_v4 = vld [vmem:[#allocation48_spill] sm:$0xff]  ;;  %v11802_v20 = vld [vmem:[#allocation49_spill] sm:$0xff] }
 0x117   : > { %v1037_v33 = vmul.f32 %v11788_v34, %v7958_v41  ;;  %v1451_v57 = vadd.f32 %v1387_v16, %v8385_v12  ;;  %v492_v52 = vadd.f32 %v428_v45, %v348_v31  ;;  %v508_v22 = vadd.f32 %v444_v8, %v364_v17  ;;  %v11803_v16 = vld [vmem:[#allocation3_spill] sm:$0xff] }
 0x118   : > { %v1053_v59 = vmul.f32 %v11788_v34, %v11729_v39  ;;  %1905 = vmatprep.subr.bf16.mxu1 %v1582_v35  ;;  %v1467_v49 = vadd.f32 %v1403_v26, %v8388_v18  ;;  %v1325_v55 = vmul.f32 %v11789_v43, %v7988_v46  ;;  %v1341_v3 = vmul.f32 %v11789_v43, %v8013_v13  ;;  %v11801_v43 = vld [vmem:[#allocation54_spill] sm:$0xff]  ;;  %v11804_v35 = vld [vmem:[#allocation4_spill] sm:$0xff] }
 0x119   : > { %v1101_v38 = vadd.f32 %v1037_v33, %v813_v50  ;;  %v1515_v48 = vmax.f32 %v1451_v57, 0.0  ;;  %v8416_v44 = vadd.f32 %v7842_v1, %v492_v52  ;;  %v8419_v5 = vadd.f32 %v8031_v23, %v508_v22 }
 0x11a   : > { %v1117_v34 = vadd.f32 %v1053_v59, %v829_v36  ;;  %v1531_v29 = vmax.f32 %v1467_v49, 0.0  ;;  %v383_v54 = vmul.f32 %v11800_v4, %v11758_v51  ;;  %v399_v25 = vmul.f32 %v11800_v4, %v11760_v30  ;;  %v11805_v36 = vld [vmem:[#allocation5_spill] sm:$0xff]  ;;  %v11806_v59 = vld [vmem:[#allocation6_spill] sm:$0xff] }
 0x11b   : > { %11798 = vst [vmem:[#allocation18_spill] sm:$0xff] %v8416_v44  ;;  %11799 = vst [vmem:[#allocation24_spill] sm:$0xff] %v8419_v5  ;;  %v1389_v40 = vadd.f32 %v1325_v55, %v1101_v38  ;;  %v463_v31 = vmul.f32 %v11802_v20, %v11801_v43  ;;  %v479_v17 = vmul.f32 %v11802_v20, %v11763_v21  ;;  %v11807_v55 = vld [vmem:[#allocation7_spill] sm:$0xff] }
 0x11c   : > { %v1405_v2 = vadd.f32 %v1341_v3, %v1117_v34  ;;  %v714_v45 = vrot.slane %v8413_v32, %v11803_v16  ;;  %v1579_v8 = vpack.c.bf16 %v1531_v29, %v1515_v48  ;;  %v938_v26 = vrot.slane %v8413_v32, %v11804_v35  ;;  %v11808_v48 = vld [vmem:[#allocation8_spill] sm:$0xff]  ;;  %v11809_v29 = vld [vmem:[#allocation11_spill] sm:$0xff] }
 0x11d   : > { %v1453_v50 = vadd.f32 %v1389_v40, %v8416_v44  ;;  %v1226_v33 = vrot.slane %v8413_v32, %v11805_v36  ;;  %v527_v52 = vadd.f32 %v463_v31, %v383_v54  ;;  %v543_v22 = vadd.f32 %v479_v17, %v399_v25  ;;  %v11812_v31 = vld [vmem:[#allocation72_spill] sm:$0xff] }
 0x11e   : > { %v1469_v57 = vadd.f32 %v1405_v2, %v8419_v5  ;;  %v8438_v49 = vrot.slane %v714_v45, %v11806_v59  ;;  %1853 = vmatpush1.bf16.msra.mxu0 %v1579_v8  ;;  %v8441_v3 = vrot.slane %v938_v26, %v11807_v55  ;;  %v8447_v40 = vadd.f32 -1.0, %v11809_v29  ;;  %v8458_v2 = vld [vmem:[%s7213_s22 + $0x38] sm:$0x77]  ;;  %v11813_v45 = vld [vmem:[#allocation83_spill] sm:$0xff]  ;;  %v11815_v5 = vld [vmem:[#allocation34_spill] sm:$0xff] }
 0x11f   : > { %v1517_v38 = vmax.f32 %v1453_v50, 0.0  ;;  %v8444_v34 = vrot.slane %v1226_v33, %v11808_v48  ;;  %v8450_v18 = vadd.f32 %v7855_v11, %v527_v52  ;;  %v8453_v54 = vadd.f32 %v7901_v58, %v543_v22  ;;  %v11814_v52 = vld [vmem:[#allocation35_spill] sm:$0xff] }
 0x120   : > { %v1533_v44 = vmax.f32 %v1469_v57, 0.0  ;;  %v848_v25 = vmul.f32 %v8438_v49, %v11703_v0  ;;  %v864_v17 = vmul.f32 %v8438_v49, %v11812_v31  ;;  %v1072_v8 = vmul.f32 %v8441_v3, %v11813_v45 }
 0x121   : > { %11810 = vst [vmem:[#allocation25_spill] sm:$0xff] %v8450_v18  ;;  %11811 = vst [vmem:[#allocation21_spill] sm:$0xff] %v8453_v54  ;;  %v1088_v50 = vmul.f32 %v8441_v3, %v7762_v9  ;;  %v1360_v26 = vmul.f32 %v8444_v34, %v11706_v10  ;;  %v1376_v57 = vmul.f32 %v8444_v34, %v11714_v15  ;;  %v281_v22 = vcvt.s32.f32 %v11814_v52 }
 0x122   : > { %v1581_v33 = vpack.c.bf16 %v1533_v44, %v1517_v38  ;;  %v385_v29 = vmul.f32 %v8447_v40, %v11758_v51  ;;  %6798 = vmatmul.mubr.msk.bf16.vlgmr.msra.gmra.mxu0 %vm1619_vm0, %v11815_v5  ;;  %v1136_v12 = vadd.f32 %v1072_v8, %v848_v25  ;;  %v401_v53 = vmul.f32 %v8447_v40, %v11760_v30 }
 0x123   : > { %v1152_v14 = vadd.f32 %v1088_v50, %v864_v17  ;;  %v722_v60 = vrot.slane %v8458_v2, %v11803_v16  ;;  %1880 = vmatprep.mubr.bf16.mxu0 %v11747_v62  ;;  %v297_v44 = vmul.f32 0.06451613, %v281_v22  ;;  %v946_v38 = vrot.slane %v8458_v2, %v11804_v35 }
 0x124   : > { %1906 = vmatpush1.bf16.msra.mxu1 %v1581_v33  ;;  %v1234_v52 = vrot.slane %v8458_v2, %v11805_v36  ;;  %v1424_v25 = vadd.f32 %v1360_v26, %v1136_v12  ;;  %v710_v16 = vrot.slane %v8413_v32, %v11806_v59  ;;  %v182_v22 = vand.u32 1023, %v166_v19 }
 0x125   : > { %v1440_v17 = vadd.f32 %v1376_v57, %v1152_v14  ;;  %v8486_v8 = vrot.slane %v722_v60, %v11806_v59  ;;  %v8490_v50 = vadd.f32 -1.0, %v297_v44  ;;  %v8493_v33 = vrot.slane %v946_v38, %v11807_v55 }
 0x126   : > { %v8496_v35 = vrot.slane %v1234_v52, %v11808_v48  ;;  %v1488_v36 = vadd.f32 %v1424_v25, %v8450_v18 }
 0x127   : > { %11817 = vst [vmem:[#allocation27_spill] sm:$0xff] %v8486_v8  ;;  %11818 = vst [vmem:[#allocation28_spill] sm:$0xff] %v8493_v33  ;;  %v1504_v12 = vadd.f32 %v1440_v17, %v8453_v54  ;;  %v850_v60 = vmul.f32 %v8486_v8, %v11703_v0  ;;  %v866_v14 = vmul.f32 %v8486_v8, %v11812_v31  ;;  %6800 = vmatmul.mubr.msk.bf16.vlgmr.msra.gmra.mxu1 %vm1619_vm0, %v11815_v5 }
 0x128   : > { %v465_v26 = vmul.f32 %v8490_v50, %v11801_v43  ;;  %v481_v57 = vmul.f32 %v8490_v50, %v11763_v21  ;;  %v1074_v19 = vmul.f32 %v8493_v33, %v11813_v45  ;;  %v1090_v44 = vmul.f32 %v8493_v33, %v7762_v9  ;;  %1933 = vmatprep.mubr.bf16.mxu1 %v11747_v62 }
 0x129   : > { %v1552_v38 = vmax.f32 %v1488_v36, 0.0  ;;  %v1568_v52 = vmax.f32 %v1504_v12, 0.0  ;;  %v1362_v25 = vmul.f32 %v8496_v35, %v11706_v10  ;;  %v1378_v17 = vmul.f32 %v8496_v35, %v11714_v15 }
 0x12a   : > { %v529_v54 = vadd.f32 %v465_v26, %v385_v29  ;;  %v545_v18 = vadd.f32 %v481_v57, %v401_v53  ;;  %v1138_v28 = vadd.f32 %v1074_v19, %v850_v60  ;;  %v1154_v7 = vadd.f32 %v1090_v44, %v866_v14  ;;  %6799 = vmatmul.mubr.msk.bf16.gmra.mxu0 %vm1619_vm0, %v11755_v24 }
 0x12b   : > { %v1600_v27 = vpack.c.bf16 %v1568_v52, %v1552_v38  ;;  %v198_v5 = vshra.s32 %v182_v22, 5  ;;  %v214_v33 = vand.u32 31, %v182_v22  ;;  %v8522_v8 = vrot.slane %v710_v16, %v11806_v59  ;;  %1976 = vmatprep.mubr.bf16.mxu0 %v11747_v62 }
 0x12c   : > { %v8526_v36 = vadd.f32 %v7855_v11, %v529_v54  ;;  %v8529_v12 = vadd.f32 %v7901_v58, %v545_v18  ;;  %v1426_v53 = vadd.f32 %v1362_v25, %v1138_v28  ;;  %v1442_v29 = vadd.f32 %v1378_v17, %v1154_v7 }
 0x12d   : > { %1956 = vmatprep.subr.bf16.mxu0 %v1600_v27  ;;  %v230_v60 = vcvt.s32.f32 %v198_v5  ;;  %v278_v14 = vcvt.s32.f32 %v214_v33  ;;  %v847_v26 = vmul.f32 %v8522_v8, %v11703_v0  ;;  %v863_v16 = vmul.f32 %v8522_v8, %v11812_v31 }
 0x12e   : > { %11819 = vst [vmem:[#allocation26_spill] sm:$0xff] %v8526_v36  ;;  %11820 = vst [vmem:[#allocation29_spill] sm:$0xff] %v8529_v12  ;;  %v1490_v22 = vadd.f32 %v1426_v53, %v8526_v36  ;;  %v1506_v57 = vadd.f32 %v1442_v29, %v8529_v12  ;;  %v934_v54 = vrot.slane %v8413_v32, %v11807_v55  ;;  %v168_v18 = vadd.s32 1792, %v11816_v42 }
 0x12f   : > { %v1222_v28 = vrot.slane %v8413_v32, %v11808_v48  ;;  %v246_v7 = vmul.f32 0.06451613, %v230_v60  ;;  %v294_v27 = vmul.f32 0.06451613, %v278_v14  ;;  %v718_v5 = vrot.slane %v8458_v2, %v11806_v59  ;;  %6801 = vmatmul.mubr.msk.bf16.gmra.mxu1 %vm1619_vm0, %v11755_v24 }
 0x130   : > { %v1554_v33 = vmax.f32 %v1490_v22, 0.0  ;;  %v1570_v19 = vmax.f32 %v1506_v57, 0.0  ;;  %v8547_v44 = vrot.slane %v934_v54, %v11807_v55  ;;  %2029 = vmatprep.mubr.bf16.mxu1 %v11747_v62  ;;  %v184_v42 = vand.u32 1023, %v168_v18 }
 0x131   : > { %v8550_v38 = vrot.slane %v1222_v28, %v11808_v48  ;;  %v8553_v32 = vadd.f32 -1.0, %v246_v7  ;;  %v8555_v52 = vadd.f32 -1.0, %v294_v27  ;;  %v8558_v25 = vrot.slane %v718_v5, %v11806_v59 }
 0x132   : > { %v1602_v17 = vpack.c.bf16 %v1570_v19, %v1554_v33  ;;  %v1071_v53 = vmul.f32 %v8547_v44, %v11813_v45  ;;  %v1087_v29 = vmul.f32 %v8547_v44, %v7762_v9  ;;  %v200_v18 = vshra.s32 %v184_v42, 5 }
 0x133   : > { %v1359_v60 = vmul.f32 %v8550_v38, %v11706_v10  ;;  %v382_v14 = vmul.f32 %v8553_v32, %v11758_v51  ;;  %v398_v22 = vmul.f32 %v8553_v32, %v11760_v30  ;;  %v462_v57 = vmul.f32 %v8555_v52, %v11801_v43 }
 0x134   : > { %v478_v54 = vmul.f32 %v8555_v52, %v11763_v21  ;;  %2009 = vmatprep.subr.bf16.mxu1 %v1602_v17  ;;  %v1135_v28 = vadd.f32 %v1071_v53, %v847_v26  ;;  %v1151_v7 = vadd.f32 %v1087_v29, %v863_v16  ;;  %v1375_v27 = vmul.f32 %v8550_v38, %v11714_v15 }
 0x135   : > { %v526_v5 = vadd.f32 %v462_v57, %v382_v14  ;;  %v216_v19 = vand.u32 31, %v184_v42  ;;  %v849_v12 = vmul.f32 %v8558_v25, %v11703_v0  ;;  %v232_v24 = vcvt.s32.f32 %v200_v18 }
 0x136   : > { %v542_v33 = vadd.f32 %v478_v54, %v398_v22  ;;  %v1423_v36 = vadd.f32 %v1359_v60, %v1135_v28  ;;  %v1439_v59 = vadd.f32 %v1375_v27, %v1151_v7  ;;  %v865_v62 = vmul.f32 %v8558_v25, %v11812_v31 }
 0x137   : > { %v8581_v17 = vadd.f32 %v7855_v11, %v526_v5  ;;  %v280_v16 = vcvt.s32.f32 %v216_v19  ;;  %v942_v53 = vrot.slane %v8458_v2, %v11807_v55  ;;  %v248_v42 = vmul.f32 0.06451613, %v232_v24 }
 0x138   : > { %v8584_v26 = vadd.f32 %v7901_v58, %v542_v33  ;;  %v1230_v29 = vrot.slane %v8458_v2, %v11808_v48  ;;  %v351_v60 = vmul.f32 %v11800_v4, %v11731_v61  ;;  %v367_v14 = vmul.f32 %v11800_v4, %v7776_v47 }
 0x139   : > { %11821 = vst [vmem:[#allocation55_spill] sm:$0xff] %v8581_v17  ;;  %v1487_v22 = vadd.f32 %v1423_v36, %v8581_v17  ;;  %v296_v54 = vmul.f32 0.06451613, %v280_v16  ;;  %v8597_v28 = vrot.slane %v942_v53, %v11807_v55  ;;  %v8599_v7 = vadd.f32 -1.0, %v248_v42 }
 0x13a   : > { %11822 = vst [vmem:[#allocation31_spill] sm:$0xff] %v8584_v26  ;;  %v1503_v57 = vadd.f32 %v1439_v59, %v8584_v26  ;;  %v8602_v24 = vrot.slane %v1230_v29, %v11808_v48  ;;  %v431_v2 = vmul.f32 %v11802_v20, %v7812_v37  ;;  %v447_v27 = vmul.f32 %v11802_v20, %v11734_v56 }
 0x13b   : > { %v1551_v4 = vmax.f32 %v1487_v22, 0.0  ;;  %v8608_v36 = vadd.f32 -1.0, %v296_v54  ;;  %v1073_v59 = vmul.f32 %v8597_v28, %v11813_v45  ;;  %v384_v5 = vmul.f32 %v8599_v7, %v11758_v51 }
 0x13c   : > { %v1567_v18 = vmax.f32 %v1503_v57, 0.0  ;;  %v400_v33 = vmul.f32 %v8599_v7, %v11760_v30  ;;  %v1089_v19 = vmul.f32 %v8597_v28, %v7762_v9  ;;  %v1361_v16 = vmul.f32 %v8602_v24, %v11706_v10 }
 0x13d   : > { %v464_v53 = vmul.f32 %v8608_v36, %v11801_v43  ;;  %v480_v42 = vmul.f32 %v8608_v36, %v11763_v21  ;;  %v1137_v29 = vadd.f32 %v1073_v59, %v849_v12  ;;  %v1377_v51 = vmul.f32 %v8602_v24, %v11714_v15 }
 0x13e   : > { %v1599_v20 = vpack.c.bf16 %v1567_v18, %v1551_v4  ;;  %v1153_v22 = vadd.f32 %v1089_v19, %v865_v62  ;;  %v495_v57 = vadd.f32 %v431_v2, %v351_v60  ;;  %v511_v30 = vadd.f32 %v447_v27, %v367_v14 }
 0x13f   : > { %v528_v54 = vadd.f32 %v464_v53, %v384_v5  ;;  %v544_v26 = vadd.f32 %v480_v42, %v400_v33  ;;  %v1425_v17 = vadd.f32 %v1361_v16, %v1137_v29  ;;  %v816_v4 = vmul.f32 %v8438_v49, %v11726_v63 }
 0x140   : > { %1957 = vmatpush1.bf16.msra.mxu0 %v1599_v20  ;;  %v1441_v18 = vadd.f32 %v1377_v51, %v1153_v22  ;;  %v8629_v43 = vadd.f32 %v7842_v1, %v495_v57  ;;  %v8632_v21 = vadd.f32 %v8031_v23, %v511_v30  ;;  %v832_v62 = vmul.f32 %v8438_v49, %v7938_v6  ;;  %v11828_v51 = vld [vmem:[#allocation28_spill] sm:$0xff] }
 0x141   : > { %v8637_v12 = vadd.f32 %v7855_v11, %v528_v54  ;;  %v8640_v60 = vadd.f32 %v7901_v58, %v544_v26  ;;  %v1040_v14 = vmul.f32 %v8441_v3, %v7958_v41  ;;  %v1056_v2 = vmul.f32 %v8441_v3, %v11729_v39 }
 0x142   : > { %11823 = vst [vmem:[#allocation63_spill] sm:$0xff] %v8629_v43  ;;  %11824 = vst [vmem:[#allocation33_spill] sm:$0xff] %v8632_v21  ;;  %v1328_v27 = vmul.f32 %v8444_v34, %v7988_v46  ;;  %v1344_v59 = vmul.f32 %v8444_v34, %v8013_v13  ;;  %v353_v49 = vmul.f32 %v8447_v40, %v11731_v61  ;;  %v11827_v34 = vld [vmem:[#allocation27_spill] sm:$0xff] }
 0x143   : > { %11825 = vst [vmem:[#allocation62_spill] sm:$0xff] %v8637_v12  ;;  %11826 = vst [vmem:[#allocation40_spill] sm:$0xff] %v8640_v60  ;;  %v369_v11 = vmul.f32 %v8447_v40, %v7776_v47  ;;  %v1489_v58 = vadd.f32 %v1425_v17, %v8637_v12  ;;  %v1505_v26 = vadd.f32 %v1441_v18, %v8640_v60 }
 0x144   : > { %v1104_v5 = vadd.f32 %v1040_v14, %v816_v4  ;;  %v1120_v33 = vadd.f32 %v1056_v2, %v832_v62  ;;  %v433_v3 = vmul.f32 %v8490_v50, %v7812_v37  ;;  %v449_v19 = vmul.f32 %v8490_v50, %v11734_v56 }
 0x145   : > { %v818_v16 = vmul.f32 %v11827_v34, %v11726_v63  ;;  %v834_v20 = vmul.f32 %v11827_v34, %v7938_v6  ;;  %v1553_v53 = vmax.f32 %v1489_v58, 0.0  ;;  %v1569_v40 = vmax.f32 %v1505_v26, 0.0 }
 0x146   : > { %v1392_v42 = vadd.f32 %v1328_v27, %v1104_v5  ;;  %v1408_v17 = vadd.f32 %v1344_v59, %v1120_v33  ;;  %v497_v29 = vadd.f32 %v433_v3, %v353_v49  ;;  %v513_v22 = vadd.f32 %v449_v19, %v369_v11 }
 0x147   : > { %v1042_v57 = vmul.f32 %v11828_v51, %v7958_v41  ;;  %v1058_v30 = vmul.f32 %v11828_v51, %v11729_v39  ;;  %v1601_v54 = vpack.c.bf16 %v1569_v40, %v1553_v53  ;;  %v1330_v18 = vmul.f32 %v8496_v35, %v7988_v46 }
 0x148   : > { %v1456_v50 = vadd.f32 %v1392_v42, %v8629_v43  ;;  %v1472_v4 = vadd.f32 %v1408_v17, %v8632_v21  ;;  %v8673_v62 = vadd.f32 %v7842_v1, %v497_v29  ;;  %v8676_v14 = vadd.f32 %v8031_v23, %v513_v22 }
 0x149   : > { %v1106_v2 = vadd.f32 %v1042_v57, %v818_v16  ;;  %v1122_v27 = vadd.f32 %v1058_v30, %v834_v20  ;;  %2010 = vmatpush1.bf16.msra.mxu1 %v1601_v54  ;;  %v1346_v11 = vmul.f32 %v8496_v35, %v8013_v13  ;;  %v350_v58 = vmul.f32 %v8553_v32, %v11731_v61 }
 0x14a   : > { %11829 = vst [vmem:[#allocation42_spill] sm:$0xff] %v8673_v62  ;;  %11830 = vst [vmem:[#allocation43_spill] sm:$0xff] %v8676_v14  ;;  %v1520_v59 = vmax.f32 %v1456_v50, 0.0  ;;  %v1536_v49 = vmax.f32 %v1472_v4, 0.0  ;;  %v366_v5 = vmul.f32 %v8553_v32, %v7776_v47  ;;  %v430_v33 = vmul.f32 %v8555_v52, %v7812_v37 }
 0x14b   : > { %v1394_v26 = vadd.f32 %v1330_v18, %v1106_v2  ;;  %v446_v3 = vmul.f32 %v8555_v52, %v11734_v56  ;;  %v1410_v34 = vadd.f32 %v1346_v11, %v1122_v27  ;;  %v815_v16 = vmul.f32 %v8522_v8, %v11726_v63 }
 0x14c   : > { %v1584_v19 = vpack.c.bf16 %v1536_v49, %v1520_v59  ;;  %v831_v35 = vmul.f32 %v8522_v8, %v7938_v6  ;;  %v494_v53 = vadd.f32 %v430_v33, %v350_v58  ;;  %v1039_v32 = vmul.f32 %v8547_v44, %v7958_v41 }
 0x14d   : > { %v1458_v20 = vadd.f32 %v1394_v26, %v8673_v62  ;;  %v510_v40 = vadd.f32 %v446_v3, %v366_v5  ;;  %v1474_v42 = vadd.f32 %v1410_v34, %v8676_v14  ;;  %v1055_v52 = vmul.f32 %v8547_v44, %v11729_v39 }
 0x14e   : > { %1958 = vmatprep.subr.bf16.mxu0 %v1584_v19  ;;  %v1327_v17 = vmul.f32 %v8550_v38, %v7988_v46  ;;  %v1343_v29 = vmul.f32 %v8550_v38, %v8013_v13  ;;  %v8703_v22 = vadd.f32 %v7842_v1, %v494_v53  ;;  %v1103_v57 = vadd.f32 %v1039_v32, %v815_v16  ;;  %v7131_v32 = vld [vmem:[%s11281_s1 + $0x38] sm:$0xff] }
 0x14f   : > { %v1522_v8 = vmax.f32 %v1458_v20, 0.0  ;;  %v8706_v51 = vadd.f32 %v8031_v23, %v510_v40  ;;  %v1538_v30 = vmax.f32 %v1474_v42, 0.0  ;;  %v1119_v54 = vadd.f32 %v1055_v52, %v831_v35  ;;  %v11835_v52 = vld [vmem:[#allocation34_spill] sm:$0xff] }
 0x150   : > { %11831 = vst [vmem:[#allocation36_spill] sm:$0xff] %v8703_v22  ;;  %v352_v50 = vmul.f32 %v8599_v7, %v11731_v61  ;;  %v368_v44 = vmul.f32 %v8599_v7, %v7776_v47  ;;  %v1391_v4 = vadd.f32 %v1327_v17, %v1103_v57  ;;  %v432_v38 = vmul.f32 %v8608_v36, %v7812_v37 }
 0x151   : > { %11832 = vst [vmem:[#allocation37_spill] sm:$0xff] %v8706_v51  ;;  %v448_v18 = vmul.f32 %v8608_v36, %v11734_v56  ;;  %v817_v2 = vmul.f32 %v8558_v25, %v11726_v63  ;;  %v1586_v27 = vpack.c.bf16 %v1538_v30, %v1522_v8  ;;  %v1407_v59 = vadd.f32 %v1343_v29, %v1119_v54  ;;  %v7132_v29 = vld [vmem:[%s11281_s1 + $0x40] sm:$0xff] }
 0x152   : > { %v833_v49 = vmul.f32 %v8558_v25, %v7938_v6  ;;  %v1041_v61 = vmul.f32 %v8597_v28, %v7958_v41  ;;  %v1455_v47 = vadd.f32 %v1391_v4, %v8703_v22  ;;  %v496_v7 = vadd.f32 %v432_v38, %v352_v50  ;;  %v11837_v8 = vld [vmem:[#allocation50_spill] sm:$0xff] }
 0x153   : > { %v512_v11 = vadd.f32 %v448_v18, %v368_v44  ;;  %v1057_v37 = vmul.f32 %v8597_v28, %v11729_v39  ;;  %2011 = vmatprep.subr.bf16.mxu1 %v1586_v27  ;;  %v1471_v56 = vadd.f32 %v1407_v59, %v8706_v51  ;;  %v1329_v58 = vmul.f32 %v8602_v24, %v7988_v46 }
 0x154   : > { %v1105_v36 = vadd.f32 %v1041_v61, %v817_v2  ;;  %v1345_v25 = vmul.f32 %v8602_v24, %v8013_v13  ;;  %v1519_v26 = vmax.f32 %v1455_v47, 0.0  ;;  %v8734_v19 = vadd.f32 %v7842_v1, %v496_v7  ;;  %v7129_v24 = vld [vmem:[%s11281_s1 + $0x48] sm:$0xff] }
 0x155   : > { %v8731_v5 = vadd.f32 %v8031_v23, %v512_v11  ;;  %v1121_v33 = vadd.f32 %v1057_v37, %v833_v49  ;;  %v1535_v3 = vmax.f32 %v1471_v56, 0.0  ;;  %v7151_v16 = vmov 6   ;;  %v7130_v23 = vld [vmem:[%s11281_s1 + $0x50] sm:$0xff]  ;;  %v626_v11 = vld [vmem:[%s11281_s1 + $0x38] sm:$0x7] }
 0x156   : > { %11834 = vst [vmem:[#allocation46_spill] sm:$0xff] %v8734_v19  ;;  %v1393_v28 = vadd.f32 %v1329_v58, %v1105_v36  ;;  %6922 = vset.pattern.permute.xlu1 %v7151_v16  ;;  %6923 = vset.pattern.permute.xlu0 %v7151_v16  ;;  %v11836_v17 = vmov 0   ;;  %v7152_v37 = vmov 11  }
 0x157   : > { %11833 = vst [vmem:[#allocation44_spill] sm:$0xff] %v8731_v5  ;;  %v1409_v34 = vadd.f32 %v1345_v25, %v1121_v33  ;;  %v1583_v35 = vpack.c.bf16 %v1535_v3, %v1519_v26  ;;  %1612 = vperm.xlu1 %6922, %v7129_v24   ;;  %1616 = vperm.xlu0 %6923, %v7130_v23  }
 0x158   : > { %v1457_v20 = vadd.f32 %v1393_v28, %v8734_v19 }
 0x159   : > { %v1473_v1 = vadd.f32 %v1409_v34, %v8731_v5  ;;  %1959 = vmatpush1.bf16.msra.mxu0 %v1583_v35 }
 0x15a   : > { %v1521_v53 = vmax.f32 %v1457_v20, 0.0 }
 0x15b   : > { %v1537_v40 = vmax.f32 %v1473_v1, 0.0  ;;  %1604 = vperm.xlu1 %6922, %v7131_v32   ;;  %6924 = vset.pattern.permute.xlu0 %v7152_v37  ;;  %v633_v1 = vld [vmem:[%s11281_s1 + $0x20] sm:$0x7] }
 0x15c   : > { %6802 = vmatmul.mubr.msk.bf16.vlgmr.msra.gmra.mxu0 %vm1619_vm0, %v11835_v52  ;;  %2148 = vperm.xlu0 %6924, %v626_v11  }
 0x15d   : > { %v1585_v42 = vpack.c.bf16 %v1537_v40, %v1521_v53  ;;  %1986 = vmatprep.mubr.bf16.mxu0 %v11836_v17 }
 0x15f   : > { %2012 = vmatpush1.bf16.msra.mxu1 %v1585_v42  ;;  %1608 = vperm.xlu1 %6922, %v7132_v29  }
 0x162   : > { %6804 = vmatmul.mubr.msk.bf16.vlgmr.msra.gmra.mxu1 %vm1619_vm0, %v11835_v52 }
 0x163   : > { %2039 = vmatprep.mubr.bf16.mxu1 %v11836_v17 }
 0x164   : > { %6803 = vmatmul.mubr.msk.bf16.gmra.mxu0 %vm1619_vm0, %v11837_v8 }
 0x165   : > { %2186 = vmatprep.mubr.bf16.mxu0 %v11836_v17 }
 0x16a   : > { %6805 = vmatmul.mubr.msk.bf16.gmra.mxu1 %vm1619_vm0, %v11837_v8 }
 0x16b   : > { %2227 = vmatprep.mubr.bf16.mxu1 %v11836_v17 }
 0x19c   : > { %v1660_v57 = vpop.f32.mrf.mxu0  ;;  %v1713_v30 = vpop.f32.mrf.mxu1 }
 0x19e   : > { %v1662_v54 = vpop.f32.mrf.mxu0  ;;  %v1715_v50 = vpop.f32.mrf.mxu1 }
 0x1a0   : > { %v1664_v44 = vpop.f32.mrf.mxu0  ;;  %v1717_v4 = vpop.f32.mrf.mxu1 }
 0x1a2   : > { %v1666_v38 = vpop.f32.mrf.mxu0  ;;  %v1719_v18 = vpop.f32.mrf.mxu1 }
 0x1a5   : > { %v1670_v2 = vpop.f32.mrf.mxu0  ;;  %v1723_v27 = vpop.f32.mrf.mxu1 }
 0x1a7   : > { %v1672_v59 = vpop.f32.mrf.mxu0  ;;  %v1725_v49 = vpop.f32.mrf.mxu1 }
 0x1a9   : > { %v1674_v61 = vpop.f32.mrf.mxu0  ;;  %v1727_v47 = vpop.f32.mrf.mxu1 }
 0x1ab   : > { %v1676_v7 = vpop.f32.mrf.mxu0  ;;  %v1729_v56 = vpop.f32.mrf.mxu1 }
 0x1b2   : > { %v8765_v36 = vpop.f32.mrf.mxu0 }
 0x1b4   : > { %v1768_v25 = vpop.f32.mrf.mxu0 }
 0x1b6   : > { %v8769_v33 = vpop.f32.mrf.mxu0 }
 0x1b7   : > { %v8767_v58 = vpop.f32.mrf.mxu1 }
 0x1b8   : > { %v1772_v28 = vpop.f32.mrf.mxu0 }
 0x1b9   : > { %v1821_v26 = vpop.f32.mrf.mxu1 }
 0x1ba   : > { %v8773_v16 = vpop.f32.mrf.mxu0 }
 0x1bb   : > { %v8771_v3 = vpop.f32.mrf.mxu1 }
 0x1bc   : > { %v1778_v37 = vpop.f32.mrf.mxu0 }
 0x1bd   : > { %v1825_v34 = vpop.f32.mrf.mxu1 }
 0x1bf   : > { %v8780_v23 = vpop.f32.mrf.mxu1 }
 0x1c1   : > { %v1831_v22 = vpop.f32.mrf.mxu1 }
 0x1c3   : > { %v1833_v60 = vpop.f32.mrf.mxu1 }
 0x1d2   : > { %v8775_v35 = vpop.permute.xlu1 %1612  ;;  %v8777_v20 = vpop.permute.xlu0 %1616 }
 0x1d3   : > { %v1675_v24 = vadd.f32 %v1674_v61, %v8777_v20  ;;  %v1671_v53 = vadd.f32 %v1670_v2, %v8775_v35  ;;  %v1724_v40 = vadd.f32 %v1723_v27, %v8775_v35  ;;  %v1728_v32 = vadd.f32 %v1727_v47, %v8777_v20 }
 0x1d4   : > { %v1677_v42 = vadd.f32 %v1676_v7, %v8777_v20  ;;  %v1730_v11 = vadd.f32 %v1729_v56, %v8777_v20  ;;  %v8792_v61 = vpack.c.bf16 %v633_v1, %v633_v1  ;;  %v1673_v19 = vadd.f32 %v1672_v59, %v8775_v35 }
 0x1d5   : > { %v1726_v51 = vadd.f32 %v1725_v49, %v8775_v35  ;;  %v2098_v2 = vmax.f32 %v1675_v24, 0.0  ;;  %v2082_v27 = vmax.f32 %v1671_v53, 0.0  ;;  %v2084_v14 = vmax.f32 %v1724_v40, 0.0 }
 0x1d6   : > { %v8789_v29 = vpop.permute.xlu1 %1604  ;;  %11838 = vst [vmem:[#allocation47_spill] sm:$0xff] %v8792_v61  ;;  %v2100_v47 = vmax.f32 %v1728_v32, 0.0  ;;  %v2099_v62 = vmax.f32 %v1677_v42, 0.0  ;;  %v2101_v43 = vmax.f32 %v1730_v11, 0.0  ;;  %v2083_v32 = vmax.f32 %v1673_v19, 0.0 }
 0x1d7   : > { %v1714_v5 = vadd.f32 %v1713_v30, %v8789_v29  ;;  %v1661_v7 = vadd.f32 %v1660_v57, %v8789_v29  ;;  %v1663_v21 = vadd.f32 %v1662_v54, %v8789_v29  ;;  %v1716_v56 = vadd.f32 %v1715_v50, %v8789_v29  ;;  %v1780_v30 = vpop.f32.mrf.mxu0 }
 0x1d8   : > { %v2085_v42 = vmax.f32 %v1726_v51, 0.0  ;;  %v2130_v57 = vpack.c.bf16 %v2098_v2, %v2082_v27  ;;  %v2131_v13 = vpack.c.bf16 %v2099_v62, %v2083_v32  ;;  %v1835_v2 = vpop.f32.mrf.mxu1  ;;  %v1779_v62 = vadd.f32 %v1778_v37, %v8775_v35 }
 0x1d9   : > { %v2052_v40 = vmax.f32 %v1714_v5, 0.0  ;;  %v2050_v52 = vmax.f32 %v1661_v7, 0.0  ;;  %v2051_v11 = vmax.f32 %v1663_v21, 0.0  ;;  %v2053_v39 = vmax.f32 %v1716_v56, 0.0 }
 0x1da   : > { %v8800_v1 = vpop.permute.xlu1 %1608  ;;  %v2133_v46 = vpack.c.bf16 %v2101_v43, %v2085_v42  ;;  %2166 = vmatprep.subr.bf16.mxu0 %v2131_v13  ;;  %v1777_v21 = vadd.f32 %v8773_v16, %v8775_v35  ;;  %v1781_v13 = vadd.f32 %v1780_v30, %v8777_v20  ;;  %v2087_v16 = vmax.f32 %v1779_v62, 0.0 }
 0x1db   : > { %v1665_v59 = vadd.f32 %v1664_v44, %v8800_v1  ;;  %v1718_v49 = vadd.f32 %v1717_v4, %v8800_v1  ;;  %v1667_v24 = vadd.f32 %v1666_v38, %v8800_v1  ;;  %v1720_v53 = vadd.f32 %v1719_v18, %v8800_v1  ;;  %v1782_v44 = vpop.f32.mrf.mxu0  ;;  %2167 = vmatpush1.bf16.msra.mxu0 %v2130_v57 }
 0x1dc   : > { %v2132_v4 = vpack.c.bf16 %v2100_v47, %v2084_v14  ;;  %v1769_v38 = vadd.f32 %v1768_v25, %v8789_v29  ;;  %v1822_v18 = vadd.f32 %v1821_v26, %v8789_v29  ;;  %2207 = vmatprep.subr.bf16.mxu1 %v2133_v46  ;;  %v1773_v51 = vadd.f32 %v1772_v28, %v8800_v1 }
 0x1dd   : > { %v2066_v54 = vmax.f32 %v1665_v59, 0.0  ;;  %v2068_v12 = vmax.f32 %v1718_v49, 0.0  ;;  %v2067_v50 = vmax.f32 %v1667_v24, 0.0  ;;  %v2069_v8 = vmax.f32 %v1720_v53, 0.0 }
 0x1de   : > { %v1826_v7 = vadd.f32 %v1825_v34, %v8800_v1  ;;  %2208 = vmatpush1.bf16.msra.mxu1 %v2132_v4  ;;  %v1832_v14 = vadd.f32 %v1831_v22, %v8775_v35  ;;  %v1771_v25 = vadd.f32 %v8769_v33, %v8800_v1  ;;  %v1824_v22 = vadd.f32 %v8771_v3, %v8800_v1 }
 0x1df   : > { %v2114_v5 = vpack.c.bf16 %v2066_v54, %v2050_v52  ;;  %v2115_v19 = vpack.c.bf16 %v2067_v50, %v2051_v11  ;;  %v2116_v27 = vpack.c.bf16 %v2068_v12, %v2052_v40  ;;  %v2117_v43 = vpack.c.bf16 %v2069_v8, %v2053_v39 }
 0x1e0   : > { %v1830_v12 = vadd.f32 %v8780_v23, %v8775_v35  ;;  %v1834_v52 = vadd.f32 %v1833_v60, %v8777_v20  ;;  %v1783_v39 = vadd.f32 %v1782_v44, %v8777_v20  ;;  %v1836_v8 = vadd.f32 %v1835_v2, %v8777_v20 }
 0x1e1   : > { %2168 = vmatprep.subr.bf16.mxu0 %v2115_v19  ;;  %2209 = vmatprep.subr.bf16.mxu1 %v2117_v43  ;;  %v2071_v26 = vmax.f32 %v1773_v51, 0.0  ;;  %v2102_v28 = vmax.f32 %v1781_v13, 0.0  ;;  %v1767_v60 = vadd.f32 %v8765_v36, %v8789_v29  ;;  %v2073_v56 = vmax.f32 %v1826_v7, 0.0 }
 0x1e2   : > { %v8815_v46 = vpop.f32.mrf.mxu0  ;;  %2169 = vmatpush1.bf16.msra.mxu0 %v2114_v5  ;;  %2210 = vmatpush1.bf16.msra.mxu1 %v2116_v27  ;;  %v2104_v37 = vmax.f32 %v1834_v52, 0.0  ;;  %v2103_v23 = vmax.f32 %v1783_v39, 0.0  ;;  %v2105_v47 = vmax.f32 %v1836_v8, 0.0  ;;  %v2086_v30 = vmax.f32 %v1777_v21, 0.0 }
 0x1e3   : > { %v2089_v59 = vmax.f32 %v1832_v14, 0.0  ;;  %v1820_v33 = vadd.f32 %v8767_v58, %v8789_v29  ;;  %v2055_v3 = vmax.f32 %v1769_v38, 0.0  ;;  %v2088_v24 = vmax.f32 %v1830_v12, 0.0 }
 0x1e4   : > { %v1874_v34 = vpop.f32.mrf.mxu0  ;;  %v2135_v40 = vpack.c.bf16 %v2103_v23, %v2087_v16  ;;  %v2057_v32 = vmax.f32 %v1822_v18, 0.0  ;;  %v2070_v42 = vmax.f32 %v1771_v25, 0.0  ;;  %v2134_v57 = vpack.c.bf16 %v2102_v28, %v2086_v30 }
 0x1e5   : > { %6806 = vmatmul.mubr.msk.bf16.vlgmr.msra.gmra.mxu0 %vm1619_vm0, %v8792_v61  ;;  %6807 = vmatmul.mubr.msk.bf16.vlgmr.msra.gmra.mxu1 %vm1619_vm0, %v8792_v61  ;;  %v2137_v36 = vpack.c.bf16 %v2105_v47, %v2089_v59  ;;  %v2072_v50 = vmax.f32 %v1824_v22, 0.0  ;;  %v2136_v11 = vpack.c.bf16 %v2104_v37, %v2088_v24  ;;  %v2119_v58 = vpack.c.bf16 %v2071_v26, %v2055_v3 }
 0x1e6   : > { %v1876_v49 = vpop.f32.mrf.mxu0  ;;  %2248 = vmatprep.subr.bf16.mxu0 %v2135_v40  ;;  %2268 = vmatprep.mubr.bf16.mxu0 %v11836_v17  ;;  %v2054_v4 = vmax.f32 %v1767_v60, 0.0  ;;  %v2121_v38 = vpack.c.bf16 %v2073_v56, %v2057_v32  ;;  %v2056_v5 = vmax.f32 %v1820_v33, 0.0  ;;  %v1875_v39 = vadd.f32 %v1874_v34, %v8789_v29 }
 0x1e7   : > { %v8830_v53 = vpop.f32.mrf.mxu1  ;;  %2289 = vmatprep.subr.bf16.mxu1 %v2137_v36  ;;  %2249 = vmatpush1.bf16.msra.mxu0 %v2134_v57  ;;  %v1877_v22 = vadd.f32 %v1876_v49, %v8800_v1  ;;  %v1873_v28 = vadd.f32 %v8815_v46, %v8789_v29 }
 0x1e8   : > { %v1878_v54 = vpop.f32.mrf.mxu0  ;;  %2290 = vmatpush1.bf16.msra.mxu1 %v2136_v11  ;;  %2250 = vmatprep.subr.bf16.mxu0 %v2119_v58  ;;  %v2118_v19 = vpack.c.bf16 %v2070_v42, %v2054_v4  ;;  %v2120_v27 = vpack.c.bf16 %v2072_v50, %v2056_v5  ;;  %v2059_v59 = vmax.f32 %v1875_v39, 0.0  ;;  %v1926_v4 = vadd.f32 %v8830_v53, %v8789_v29 }
 0x1e9   : > { %v1927_v44 = vpop.f32.mrf.mxu1  ;;  %2291 = vmatprep.subr.bf16.mxu1 %v2121_v38  ;;  %2309 = vmatprep.mubr.bf16.mxu1 %v11836_v17  ;;  %v1879_v21 = vadd.f32 %v1878_v54, %v8800_v1  ;;  %v2074_v24 = vmax.f32 %v1877_v22, 0.0  ;;  %v2058_v54 = vmax.f32 %v1873_v28, 0.0 }
 0x1ea   : > { %v1882_v18 = vpop.f32.mrf.mxu0  ;;  %v1928_v46 = vadd.f32 %v1927_v44, %v8789_v29 }
 0x1eb   : > { %v1929_v51 = vpop.f32.mrf.mxu1  ;;  %2251 = vmatpush1.bf16.msra.mxu0 %v2118_v19  ;;  %v1883_v12 = vadd.f32 %v1882_v18, %v8775_v35  ;;  %v2075_v16 = vmax.f32 %v1879_v21, 0.0  ;;  %v2122_v18 = vpack.c.bf16 %v2074_v24, %v2058_v54 }
 0x1ec   : > { %v1884_v2 = vpop.f32.mrf.mxu0  ;;  %2292 = vmatpush1.bf16.msra.mxu1 %v2120_v27  ;;  %v1930_v42 = vadd.f32 %v1929_v51, %v8800_v1  ;;  %v2061_v44 = vmax.f32 %v1928_v46, 0.0  ;;  %v2060_v27 = vmax.f32 %v1926_v4, 0.0 }
 0x1ed   : > { %v1931_v7 = vpop.f32.mrf.mxu1  ;;  %v1885_v14 = vadd.f32 %v1884_v2, %v8775_v35  ;;  %v2090_v60 = vmax.f32 %v1883_v12, 0.0  ;;  %v2123_v36 = vpack.c.bf16 %v2075_v16, %v2059_v59 }
 0x1ee   : > { %v1886_v43 = vpop.f32.mrf.mxu0  ;;  %6808 = vmatmul.mubr.msk.bf16.vlgmr.msra.gmra.mxu0 %vm1619_vm0, %v8792_v61  ;;  %v1932_v47 = vadd.f32 %v1931_v7, %v8800_v1  ;;  %v2076_v19 = vmax.f32 %v1930_v42, 0.0 }
 0x1ef   : > { %v1935_v62 = vpop.f32.mrf.mxu1  ;;  %v1887_v13 = vadd.f32 %v1886_v43, %v8777_v20  ;;  %6809 = vmatmul.mubr.msk.bf16.vlgmr.msra.gmra.mxu1 %vm1619_vm0, %v8792_v61  ;;  %2350 = vmatprep.mubr.bf16.mxu0 %v11836_v17  ;;  %v2091_v37 = vmax.f32 %v1885_v14, 0.0 }
 0x1f0   : > { %v1888_v52 = vpop.f32.mrf.mxu0  ;;  %2391 = vmatprep.mubr.bf16.mxu1 %v11836_v17  ;;  %v1936_v49 = vadd.f32 %v1935_v62, %v8775_v35  ;;  %v2077_v50 = vmax.f32 %v1932_v47, 0.0  ;;  %v2124_v7 = vpack.c.bf16 %v2076_v19, %v2060_v27 }
 0x1f1   : > { %v1937_v8 = vpop.f32.mrf.mxu1  ;;  %v1889_v25 = vadd.f32 %v1888_v52, %v8777_v20  ;;  %v2106_v26 = vmax.f32 %v1887_v13, 0.0 }
 0x1f2   : > { %v1938_v56 = vadd.f32 %v1937_v8, %v8775_v35  ;;  %v2092_v38 = vmax.f32 %v1936_v49, 0.0  ;;  %v2125_v51 = vpack.c.bf16 %v2077_v50, %v2061_v44 }
 0x1f3   : > { %v1939_v34 = vpop.f32.mrf.mxu1  ;;  %v2107_v23 = vmax.f32 %v1889_v25, 0.0  ;;  %v2138_v40 = vpack.c.bf16 %v2106_v26, %v2090_v60 }
 0x1f4   : > { %v1940_v30 = vadd.f32 %v1939_v34, %v8777_v20  ;;  %v2093_v11 = vmax.f32 %v1938_v56, 0.0 }
 0x1f5   : > { %v1941_v33 = vpop.f32.mrf.mxu1  ;;  %v2139_v3 = vpack.c.bf16 %v2107_v23, %v2091_v37 }
 0x1f6   : > { %v1942_v32 = vadd.f32 %v1941_v33, %v8777_v20  ;;  %v2108_v57 = vmax.f32 %v1940_v30, 0.0 }
 0x1f7   : > { %2330 = vmatprep.subr.bf16.mxu0 %v2139_v3 }
 0x1f8   : > { %v2109_v58 = vmax.f32 %v1942_v32, 0.0  ;;  %2331 = vmatpush1.bf16.msra.mxu0 %v2138_v40  ;;  %v2140_v2 = vpack.c.bf16 %v2108_v57, %v2092_v38 }
 0x1f9   : > { %2332 = vmatprep.subr.bf16.mxu0 %v2123_v36 }
 0x1fa   : > { %v2141_v5 = vpack.c.bf16 %v2109_v58, %v2093_v11 }
 0x1fc   : > { %2371 = vmatprep.subr.bf16.mxu1 %v2141_v5  ;;  %2333 = vmatpush1.bf16.msra.mxu0 %v2122_v18 }
 0x1fd   : > { %2372 = vmatpush1.bf16.msra.mxu1 %v2140_v2 }
 0x1fe   : > { %2373 = vmatprep.subr.bf16.mxu1 %v2125_v51 }
 0x1ff   : > { %6810 = vmatmul.mubr.msk.bf16.vlgmr.msra.gmra.mxu0 %vm1619_vm0, %v8792_v61 }
 0x200   : > { %2432 = vmatprep.mubr.bf16.mxu0 %v11836_v17 }
 0x201   : > { %2374 = vmatpush1.bf16.msra.mxu1 %v2124_v7 }
 0x204   : > { %6811 = vmatmul.mubr.msk.bf16.vlgmr.msra.gmra.mxu1 %vm1619_vm0, %v8792_v61 }
 0x205   : > { %2473 = vmatprep.mubr.bf16.mxu1 %v11836_v17 }
 0x21c   : > { %v1978_v53 = vpop.f32.mrf.mxu0 }
 0x21d   : > { %v1979_v59 = vadd.f32 %v1978_v53, %v8789_v29 }
 0x21e   : > { %v1980_v43 = vpop.f32.mrf.mxu0 }
 0x21f   : > { %v1981_v23 = vadd.f32 %v1980_v43, %v8789_v29  ;;  %v2062_v19 = vmax.f32 %v1979_v59, 0.0 }
 0x220   : > { %v1982_v21 = vpop.f32.mrf.mxu0 }
 0x221   : > { %v1983_v56 = vadd.f32 %v1982_v21, %v8800_v1  ;;  %v2063_v57 = vmax.f32 %v1981_v23, 0.0 }
 0x222   : > { %v2031_v62 = vpop.f32.mrf.mxu1  ;;  %v1984_v14 = vpop.f32.mrf.mxu0 }
 0x223   : > { %v1985_v22 = vadd.f32 %v1984_v14, %v8800_v1  ;;  %v2078_v58 = vmax.f32 %v1983_v56, 0.0  ;;  %v2032_v7 = vadd.f32 %v2031_v62, %v8789_v29  ;;  %v8890_v62 = vpop.permute.xlu0 %2148 }
 0x224   : > { %v2033_v13 = vpop.f32.mrf.mxu1  ;;  %v1988_v12 = vpop.f32.mrf.mxu0 }
 0x225   : > { %v1989_v37 = vadd.f32 %v1988_v12, %v8775_v35  ;;  %v2079_v49 = vmax.f32 %v1985_v22, 0.0  ;;  %v2034_v11 = vadd.f32 %v2033_v13, %v8789_v29  ;;  %v2126_v21 = vpack.c.bf16 %v2078_v58, %v2062_v19 }
 0x226   : > { %v2035_v52 = vpop.f32.mrf.mxu1  ;;  %v1990_v39 = vpop.f32.mrf.mxu0 }
 0x227   : > { %v1991_v28 = vadd.f32 %v1990_v39, %v8775_v35  ;;  %v2094_v40 = vmax.f32 %v1989_v37, 0.0  ;;  %v2036_v44 = vadd.f32 %v2035_v52, %v8800_v1  ;;  %v2127_v5 = vpack.c.bf16 %v2079_v49, %v2063_v57 }
 0x228   : > { %v2037_v8 = vpop.f32.mrf.mxu1  ;;  %v1992_v25 = vpop.f32.mrf.mxu0  ;;  %v2065_v43 = vmax.f32 %v2034_v11, 0.0  ;;  %v2064_v52 = vmax.f32 %v2032_v7, 0.0 }
 0x229   : > { %v1993_v16 = vadd.f32 %v1992_v25, %v8777_v20  ;;  %v2095_v33 = vmax.f32 %v1991_v28, 0.0  ;;  %v2038_v24 = vadd.f32 %v2037_v8, %v8800_v1  ;;  %v2080_v13 = vmax.f32 %v2036_v44, 0.0 }
 0x22a   : > { %v2041_v26 = vpop.f32.mrf.mxu1  ;;  %v1994_v34 = vpop.f32.mrf.mxu0 }
 0x22b   : > { %v1995_v60 = vadd.f32 %v1994_v34, %v8777_v20  ;;  %v2110_v30 = vmax.f32 %v1993_v16, 0.0  ;;  %v2042_v36 = vadd.f32 %v2041_v26, %v8775_v35  ;;  %v2081_v2 = vmax.f32 %v2038_v24, 0.0 }
 0x22c   : > { %v2043_v47 = vpop.f32.mrf.mxu1  ;;  %v2128_v8 = vpack.c.bf16 %v2080_v13, %v2064_v52 }
 0x22d   : > { %v2111_v46 = vmax.f32 %v1995_v60, 0.0  ;;  %v2044_v32 = vadd.f32 %v2043_v47, %v8775_v35  ;;  %v2142_v4 = vpack.c.bf16 %v2110_v30, %v2094_v40  ;;  %v2096_v53 = vmax.f32 %v2042_v36, 0.0 }
 0x22e   : > { %v2045_v3 = vpop.f32.mrf.mxu1  ;;  %v2129_v39 = vpack.c.bf16 %v2081_v2, %v2065_v43 }
 0x22f   : > { %v2046_v42 = vadd.f32 %v2045_v3, %v8777_v20  ;;  %v2143_v50 = vpack.c.bf16 %v2111_v46, %v2095_v33  ;;  %v2097_v51 = vmax.f32 %v2044_v32, 0.0 }
 0x230   : > { %v2047_v54 = vpop.f32.mrf.mxu1 }
 0x231   : > { %v2048_v38 = vadd.f32 %v2047_v54, %v8777_v20  ;;  %v2112_v18 = vmax.f32 %v2046_v42, 0.0  ;;  %2412 = vmatprep.subr.bf16.mxu0 %v2143_v50 }
 0x232   : > { %2413 = vmatpush1.bf16.msra.mxu0 %v2142_v4 }
 0x233   : > { %v2113_v27 = vmax.f32 %v2048_v38, 0.0  ;;  %2414 = vmatprep.subr.bf16.mxu0 %v2127_v5  ;;  %v2144_v12 = vpack.c.bf16 %v2112_v18, %v2096_v53 }
 0x235   : > { %v2145_v14 = vpack.c.bf16 %v2113_v27, %v2097_v51 }
 0x236   : > { %2415 = vmatpush1.bf16.msra.mxu0 %v2126_v21 }
 0x237   : > { %2453 = vmatprep.subr.bf16.mxu1 %v2145_v14 }
 0x238   : > { %2454 = vmatpush1.bf16.msra.mxu1 %v2144_v12 }
 0x239   : > { %2455 = vmatprep.subr.bf16.mxu1 %v2129_v39  ;;  %6812 = vmatmul.mubr.msk.bf16.vlgmr.msra.gmra.mxu0 %vm1619_vm0, %v8792_v61 }
 0x23a   : > { %3282 = vmatprep.mubr.bf16.mxu0 %v11836_v17 }
 0x23c   : > { %2456 = vmatpush1.bf16.msra.mxu1 %v2128_v8 }
 0x23f   : > { %6813 = vmatmul.mubr.msk.bf16.vlgmr.msra.gmra.mxu1 %vm1619_vm0, %v8792_v61 }
 0x240   : > { %3335 = vmatprep.mubr.bf16.mxu1 %v11836_v17 }
 0x2a5   : > { %v2188_v25 = vpop.f32.mrf.mxu0  ;;  %v2229_v22 = vpop.f32.mrf.mxu1 }
 0x2a6   : > { %v2189_v26 = vadd.f32 %v2188_v25, %v8890_v62  ;;  %v2230_v28 = vadd.f32 %v2229_v22, %v8890_v62 }
 0x2a7   : > { %v2190_v16 = vpop.f32.mrf.mxu0  ;;  %v2231_v37 = vpop.f32.mrf.mxu1 }
 0x2a8   : > { %v2482_v34 = vsub.f32 0.0, %v2189_v26  ;;  %v2484_v23 = vsub.f32 0.0, %v2230_v28  ;;  %v2191_v47 = vadd.f32 %v2190_v16, %v8890_v62  ;;  %v2232_v60 = vadd.f32 %v2231_v37, %v8890_v62 }
 0x2a9   : > { %v2192_v56 = vpop.f32.mrf.mxu0  ;;  %v2233_v30 = vpop.f32.mrf.mxu1 }
 0x2aa   : > { %v2498_v59 = vmul.f32 1.442695, %v2482_v34  ;;  %v2502_v49 = vmul.f32 1.442695, %v2484_v23  ;;  %v2483_v33 = vsub.f32 0.0, %v2191_v47  ;;  %v2485_v3 = vsub.f32 0.0, %v2232_v60 }
 0x2ab   : > { %v2193_v46 = vpop.f32.mrf.mxu0  ;;  %v2234_v24 = vpop.f32.mrf.mxu1 }
 0x2ac   : > { %6937 = vpow2.f32 %v2498_v59  ;;  %v2500_v40 = vmul.f32 1.442695, %v2483_v33  ;;  %v2504_v32 = vmul.f32 1.442695, %v2485_v3 }
 0x2ad   : > { %6939 = vpow2.f32 %v2502_v49 }
 0x2ae   : > { %6941 = vpow2.f32 %v2500_v40  ;;  %v2270_v42 = vpop.f32.mrf.mxu0 }
 0x2af   : > { %6943 = vpow2.f32 %v2504_v32  ;;  %v2271_v57 = vadd.f32 %v2270_v42, %v8890_v62  ;;  %v2311_v36 = vpop.f32.mrf.mxu1 }
 0x2b0   : > { %v2312_v54 = vadd.f32 %v2311_v36, %v8890_v62  ;;  %v2272_v50 = vpop.f32.mrf.mxu0 }
 0x2b1   : > { %v2486_v11 = vsub.f32 0.0, %v2271_v57  ;;  %v2273_v58 = vadd.f32 %v2272_v50, %v8890_v62  ;;  %v2313_v4 = vpop.f32.mrf.mxu1 }
 0x2b2   : > { %v2488_v38 = vsub.f32 0.0, %v2312_v54  ;;  %v2314_v44 = vadd.f32 %v2313_v4, %v8890_v62  ;;  %v2274_v18 = vpop.f32.mrf.mxu0 }
 0x2b3   : > { %v2506_v5 = vmul.f32 1.442695, %v2486_v11  ;;  %v2487_v19 = vsub.f32 0.0, %v2273_v58  ;;  %v2315_v2 = vpop.f32.mrf.mxu1 }
 0x2b4   : > { %v2510_v51 = vmul.f32 1.442695, %v2488_v38  ;;  %v2489_v27 = vsub.f32 0.0, %v2314_v44  ;;  %v2275_v7 = vpop.f32.mrf.mxu0 }
 0x2b5   : > { %6945 = vpow2.f32 %v2506_v5  ;;  %v2508_v53 = vmul.f32 1.442695, %v2487_v19  ;;  %v2316_v43 = vpop.f32.mrf.mxu1  ;;  %v11839_v19 = vld [vmem:[#allocation6_spill] sm:$0xff] }
 0x2b6   : > { %6947 = vpow2.f32 %v2510_v51  ;;  %v2512_v21 = vmul.f32 1.442695, %v2489_v27 }
 0x2b7   : > { %6949 = vpow2.f32 %v2508_v53 }
 0x2b8   : > { %6951 = vpow2.f32 %v2512_v21 }
 0x2b9   : > { %v6938_v14 = vpop.eup %6937 }
 0x2ba   : > { %v6940_v13 = vpop.eup %6939  ;;  %v2530_v12 = vadd.f32 1.0, %v6938_v14 }
 0x2bb   : > { %v6942_v39 = vpop.eup %6941  ;;  %v2532_v52 = vadd.f32 1.0, %v6940_v13 }
 0x2bc   : > { %v6944_v8 = vpop.eup %6943  ;;  %6953 = vrcp.f32 %v2530_v12  ;;  %v2531_v25 = vadd.f32 1.0, %v6942_v39 }
 0x2bd   : > { %6955 = vrcp.f32 %v2532_v52  ;;  %v2533_v26 = vadd.f32 1.0, %v6944_v8 }
 0x2be   : > { %6957 = vrcp.f32 %v2531_v25 }
 0x2bf   : > { %v2352_v22 = vpop.f32.mrf.mxu0  ;;  %6959 = vrcp.f32 %v2533_v26 }
 0x2c0   : > { %v2353_v28 = vadd.f32 %v2352_v22, %v8890_v62 }
 0x2c1   : > { %v2354_v16 = vpop.f32.mrf.mxu0 }
 0x2c2   : > { %v2490_v37 = vsub.f32 0.0, %v2353_v28  ;;  %v2355_v34 = vadd.f32 %v2354_v16, %v8890_v62  ;;  %v6946_v30 = vpop.eup %6945 }
 0x2c3   : > { %v2356_v23 = vpop.f32.mrf.mxu0  ;;  %v6948_v33 = vpop.eup %6947  ;;  %v2534_v3 = vadd.f32 1.0, %v6946_v30 }
 0x2c4   : > { %v2514_v47 = vmul.f32 1.442695, %v2490_v37  ;;  %v2393_v60 = vpop.f32.mrf.mxu1  ;;  %v2491_v56 = vsub.f32 0.0, %v2355_v34  ;;  %v6950_v24 = vpop.eup %6949  ;;  %v2536_v40 = vadd.f32 1.0, %v6948_v33 }
 0x2c5   : > { %v2394_v59 = vadd.f32 %v2393_v60, %v8890_v62  ;;  %v2357_v49 = vpop.f32.mrf.mxu0  ;;  %v6952_v57 = vpop.eup %6951  ;;  %v2535_v36 = vadd.f32 1.0, %v6950_v24 }
 0x2c6   : > { %6961 = vpow2.f32 %v2514_v47  ;;  %v2395_v46 = vpop.f32.mrf.mxu1  ;;  %v2516_v54 = vmul.f32 1.442695, %v2491_v56  ;;  %v2537_v11 = vadd.f32 1.0, %v6952_v57 }
 0x2c7   : > { %v2492_v32 = vsub.f32 0.0, %v2394_v59  ;;  %v2396_v42 = vadd.f32 %v2395_v46, %v8890_v62  ;;  %6963 = vrcp.f32 %v2534_v3 }
 0x2c8   : > { %v2397_v50 = vpop.f32.mrf.mxu1  ;;  %6965 = vrcp.f32 %v2536_v40 }
 0x2c9   : > { %v2518_v58 = vmul.f32 1.442695, %v2492_v32  ;;  %v2493_v4 = vsub.f32 0.0, %v2396_v42  ;;  %6967 = vrcp.f32 %v2535_v36  ;;  %v6954_v18 = vpop.eup %6953 }
 0x2ca   : > { %v2398_v38 = vpop.f32.mrf.mxu1  ;;  %6969 = vrcp.f32 %v2537_v11  ;;  %v6956_v5 = vpop.eup %6955  ;;  %v8905_v2 = vrot.slane %v6954_v18, %v11839_v19  ;;  %v8908_v51 = vrot.slane %v6954_v18, %v11807_v55  ;;  %v8911_v27 = vrot.slane %v6954_v18, %v11808_v48  ;;  %v11840_v18 = vld [vmem:[#allocation79_spill] sm:$0xff] }
 0x2cb   : > { %v2520_v44 = vmul.f32 1.442695, %v2493_v4  ;;  %6971 = vpow2.f32 %v2518_v58  ;;  %v6958_v7 = vpop.eup %6957  ;;  %v8914_v53 = vrot.slane %v6956_v5, %v11839_v19  ;;  %v8917_v43 = vrot.slane %v6956_v5, %v11807_v55 }
 0x2cc   : > { %6973 = vpow2.f32 %v2516_v54  ;;  %v8920_v21 = vrot.slane %v6956_v5, %v11808_v48  ;;  %v6960_v14 = vpop.eup %6959  ;;  %v8923_v13 = vrot.slane %v6958_v7, %v11839_v19  ;;  %v8926_v12 = vrot.slane %v6958_v7, %v11807_v55 }
 0x2cd   : > { %6975 = vpow2.f32 %v2520_v44  ;;  %v8929_v39 = vrot.slane %v6958_v7, %v11808_v48  ;;  %v2674_v52 = vmul.f32 %v8905_v2, %v11703_v0  ;;  %v8934_v8 = vrot.slane %v6960_v14, %v11839_v19  ;;  %v11841_v7 = vld [vmem:[#allocation78_spill] sm:$0xff] }
 0x2ce   : > { %v8937_v25 = vrot.slane %v6960_v14, %v11807_v55  ;;  %v8940_v22 = vrot.slane %v6960_v14, %v11808_v48  ;;  %v2690_v26 = vmul.f32 %v8905_v2, %v11812_v31  ;;  %v2675_v28 = vmul.f32 %v8923_v13, %v11703_v0 }
 0x2cf   : > { %v2691_v16 = vmul.f32 %v8923_v13, %v11812_v31  ;;  %v2803_v37 = vmul.f32 %v8926_v12, %v11813_v45  ;;  %v2819_v34 = vmul.f32 %v8926_v12, %v7762_v9  ;;  %v2995_v23 = vmul.f32 %v8929_v39, %v11706_v10 }
 0x2d0   : > { %v3011_v47 = vmul.f32 %v8929_v39, %v11714_v15  ;;  %v2677_v60 = vmul.f32 %v8934_v8, %v11703_v0  ;;  %v2693_v56 = vmul.f32 %v8934_v8, %v11812_v31  ;;  %v2805_v33 = vmul.f32 %v8937_v25, %v11813_v45 }
 0x2d1   : > { %v2867_v59 = vadd.f32 %v2803_v37, %v2675_v28  ;;  %v2883_v49 = vadd.f32 %v2819_v34, %v2691_v16  ;;  %v2821_v3 = vmul.f32 %v8937_v25, %v7762_v9  ;;  %v2997_v24 = vmul.f32 %v8940_v22, %v11706_v10 }
 0x2d2   : > { %v3013_v40 = vmul.f32 %v8940_v22, %v11714_v15  ;;  %v2802_v32 = vmul.f32 %v8908_v51, %v11813_v45  ;;  %v2869_v54 = vadd.f32 %v2805_v33, %v2677_v60  ;;  %v2818_v58 = vmul.f32 %v8908_v51, %v7762_v9  ;;  %v11843_v33 = vld [vmem:[#allocation84_spill] sm:$0xff] }
 0x2d3   : > { %v6962_v30 = vpop.eup %6961  ;;  %v3059_v57 = vadd.f32 %v2995_v23, %v2867_v59  ;;  %v3075_v36 = vadd.f32 %v3011_v47, %v2883_v49  ;;  %v2885_v50 = vadd.f32 %v2821_v3, %v2693_v56  ;;  %v2994_v38 = vmul.f32 %v8911_v27, %v11706_v10  ;;  %v11842_v59 = vld [vmem:[#allocation86_spill] sm:$0xff] }
 0x2d4   : > { %v2538_v46 = vadd.f32 1.0, %v6962_v30  ;;  %v8970_v42 = vpop.eup %6963  ;;  %v2866_v4 = vadd.f32 %v2802_v32, %v2674_v52  ;;  %v3061_v28 = vadd.f32 %v2997_v24, %v2869_v54  ;;  %v2882_v34 = vadd.f32 %v2818_v58, %v2690_v26  ;;  %v11844_v32 = vld [vmem:[#allocation60_spill] sm:$0xff] }
 0x2d5   : > { %v8972_v11 = vpop.eup %6965  ;;  %v3123_v5 = vadd.f32 %v3059_v57, %v11840_v18  ;;  %v3139_v14 = vadd.f32 %v3075_v36, %v11841_v7  ;;  %v3077_v16 = vadd.f32 %v3013_v40, %v2885_v50  ;;  %v3010_v23 = vmul.f32 %v8911_v27, %v11714_v15 }
 0x2d6   : > { %6977 = vrcp.f32 %v2538_v46  ;;  %v8978_v44 = vpop.eup %6967  ;;  %v3058_v47 = vadd.f32 %v2994_v38, %v2866_v4  ;;  %v2676_v52 = vmul.f32 %v8914_v53, %v11703_v0  ;;  %v3125_v49 = vadd.f32 %v3061_v28, %v11842_v59 }
 0x2d7   : > { %v8982_v37 = vpop.eup %6969  ;;  %v3187_v56 = vmax.f32 %v3123_v5, 0.0  ;;  %v3203_v30 = vmax.f32 %v3139_v14, 0.0  ;;  %v3141_v3 = vadd.f32 %v3077_v16, %v11843_v33  ;;  %v3074_v40 = vadd.f32 %v3010_v23, %v2882_v34  ;;  %v11845_v5 = vld [vmem:[#allocation82_spill] sm:$0xff] }
 0x2d8   : > { %v6972_v60 = vpop.eup %6971  ;;  %v3122_v57 = vadd.f32 %v3058_v47, %v11844_v32  ;;  %v2692_v26 = vmul.f32 %v8914_v53, %v11812_v31  ;;  %v3189_v58 = vmax.f32 %v3125_v49, 0.0  ;;  %v2804_v34 = vmul.f32 %v8917_v43, %v11813_v45 }
 0x2d9   : > { %v6974_v46 = vpop.eup %6973  ;;  %v2540_v24 = vadd.f32 1.0, %v6972_v60  ;;  %v3235_v50 = vpack.c.bf16 %v3203_v30, %v3187_v56  ;;  %v3205_v4 = vmax.f32 %v3141_v3, 0.0  ;;  %v3138_v14 = vadd.f32 %v3074_v40, %v11845_v5 }
 0x2da   : > { %v6976_v36 = vpop.eup %6975  ;;  %v2539_v54 = vadd.f32 1.0, %v6974_v46  ;;  %v3186_v28 = vmax.f32 %v3122_v57, 0.0  ;;  %v2820_v23 = vmul.f32 %v8917_v43, %v7762_v9  ;;  %v2996_v60 = vmul.f32 %v8920_v21, %v11706_v10  ;;  %v11846_v57 = vld [vmem:[#allocation97_spill] sm:$0xff] }
 0x2db   : > { %6979 = vrcp.f32 %v2540_v24  ;;  %v2541_v38 = vadd.f32 1.0, %v6976_v36  ;;  %3262 = vmatprep.subr.bf16.mxu0 %v3235_v50  ;;  %v3237_v16 = vpack.c.bf16 %v3205_v4, %v3189_v58  ;;  %v3202_v47 = vmax.f32 %v3138_v14, 0.0 }
 0x2dc   : > { %6981 = vrcp.f32 %v2539_v54  ;;  %v3012_v56 = vmul.f32 %v8920_v21, %v11714_v15  ;;  %v2868_v30 = vadd.f32 %v2804_v34, %v2676_v52  ;;  %v2884_v49 = vadd.f32 %v2820_v23, %v2692_v26  ;;  %v11847_v54 = vld [vmem:[#allocation81_spill] sm:$0xff]  ;;  %v11848_v52 = vld [vmem:[#allocation87_spill] sm:$0xff] }
 0x2dd   : > { %6983 = vrcp.f32 %v2541_v38  ;;  %3315 = vmatprep.subr.bf16.mxu1 %v3237_v16  ;;  %v2643_v3 = vmul.f32 %v8923_v13, %v11726_v63  ;;  %v2659_v46 = vmul.f32 %v8923_v13, %v7938_v6  ;;  %v3234_v24 = vpack.c.bf16 %v3202_v47, %v3186_v28  ;;  %v11849_v34 = vld [vmem:[#allocation61_spill] sm:$0xff]  ;;  %v11850_v47 = vld [vmem:[#allocation66_spill] sm:$0xff] }
 0x2de   : > { %v2771_v40 = vmul.f32 %v8926_v12, %v7958_v41  ;;  %v2787_v36 = vmul.f32 %v8926_v12, %v11846_v57  ;;  %v2963_v50 = vmul.f32 %v8929_v39, %v11847_v54  ;;  %v3060_v58 = vadd.f32 %v2996_v60, %v2868_v30 }
 0x2df   : > { %v3076_v4 = vadd.f32 %v3012_v56, %v2884_v49  ;;  %v2979_v26 = vmul.f32 %v8929_v39, %v11848_v52  ;;  %v2645_v38 = vmul.f32 %v8934_v8, %v11726_v63  ;;  %3263 = vmatpush1.bf16.msra.mxu0 %v3234_v24  ;;  %v2661_v28 = vmul.f32 %v8934_v8, %v7938_v6 }
 0x2e0   : > { %v2835_v13 = vadd.f32 %v2771_v40, %v2643_v3  ;;  %v2851_v14 = vadd.f32 %v2787_v36, %v2659_v46  ;;  %v2773_v12 = vmul.f32 %v8937_v25, %v7958_v41  ;;  %v3124_v23 = vadd.f32 %v3060_v58, %v11849_v34  ;;  %v11851_v58 = vld [vmem:[#allocation73_spill] sm:$0xff] }
 0x2e1   : > { %v3140_v60 = vadd.f32 %v3076_v4, %v11850_v47  ;;  %v2789_v39 = vmul.f32 %v8937_v25, %v11846_v57  ;;  %v2965_v56 = vmul.f32 %v8940_v22, %v11847_v54  ;;  %v2981_v8 = vmul.f32 %v8940_v22, %v11848_v52  ;;  %v11852_v47 = vld [vmem:[#allocation88_spill] sm:$0xff] }
 0x2e2   : > { %v3027_v30 = vadd.f32 %v2963_v50, %v2835_v13  ;;  %v3043_v49 = vadd.f32 %v2979_v26, %v2851_v14  ;;  %v2837_v3 = vadd.f32 %v2773_v12, %v2645_v38  ;;  %v3188_v46 = vmax.f32 %v3124_v23, 0.0 }
 0x2e3   : > { %v9020_v16 = vpop.eup %6977  ;;  %v3204_v24 = vmax.f32 %v3140_v60, 0.0  ;;  %v2853_v40 = vadd.f32 %v2789_v39, %v2661_v28  ;;  %v2642_v36 = vmul.f32 %v8905_v2, %v11726_v63  ;;  %v2658_v5 = vmul.f32 %v8905_v2, %v7938_v6  ;;  %v11853_v28 = vld [vmem:[#allocation74_spill] sm:$0xff]  ;;  %v11854_v39 = vld [vmem:[#allocation59_spill] sm:$0xff] }
 0x2e4   : > { %v3091_v4 = vadd.f32 %v3027_v30, %v11851_v58  ;;  %v3107_v34 = vadd.f32 %v3043_v49, %v11852_v47  ;;  %v3029_v25 = vadd.f32 %v2965_v56, %v2837_v3  ;;  %v2770_v38 = vmul.f32 %v8908_v51, %v7958_v41 }
 0x2e5   : > { %v3236_v50 = vpack.c.bf16 %v3204_v24, %v3188_v46  ;;  %v3045_v26 = vadd.f32 %v2981_v8, %v2853_v40  ;;  %v2786_v22 = vmul.f32 %v8908_v51, %v11846_v57  ;;  %v2962_v23 = vmul.f32 %v8911_v27, %v11847_v54 }
 0x2e6   : > { %v3155_v13 = vmax.f32 %v3091_v4, 0.0  ;;  %v3171_v14 = vmax.f32 %v3107_v34, 0.0  ;;  %v3093_v12 = vadd.f32 %v3029_v25, %v11853_v28  ;;  %v2834_v56 = vadd.f32 %v2770_v38, %v2642_v36  ;;  %v11855_v38 = vld [vmem:[#allocation75_spill] sm:$0xff] }
 0x2e7   : > { %3316 = vmatpush1.bf16.msra.mxu1 %v3236_v50  ;;  %v3109_v2 = vadd.f32 %v3045_v26, %v11854_v39  ;;  %v2850_v30 = vadd.f32 %v2786_v22, %v2658_v5  ;;  %v2978_v49 = vmul.f32 %v8911_v27, %v11848_v52  ;;  %v2644_v34 = vmul.f32 %v8914_v53, %v11726_v63 }
 0x2e8   : > { %v9043_v60 = vpop.eup %6979  ;;  %v3219_v51 = vpack.c.bf16 %v3171_v14, %v3155_v13  ;;  %v3157_v8 = vmax.f32 %v3093_v12, 0.0  ;;  %v2660_v46 = vmul.f32 %v8914_v53, %v7938_v6  ;;  %v3026_v4 = vadd.f32 %v2962_v23, %v2834_v56  ;;  %v11856_v13 = vld [vmem:[#allocation89_spill] sm:$0xff] }
 0x2e9   : > { %v9048_v3 = vpop.eup %6981  ;;  %v3173_v40 = vmax.f32 %v3109_v2, 0.0  ;;  %v3042_v25 = vadd.f32 %v2978_v49, %v2850_v30  ;;  %v2772_v5 = vmul.f32 %v8917_v43, %v7958_v41  ;;  %v2788_v27 = vmul.f32 %v8917_v43, %v11846_v57 }
 0x2ea   : > { %v9054_v24 = vpop.eup %6983  ;;  %3264 = vmatprep.subr.bf16.mxu0 %v3219_v51  ;;  %v2964_v36 = vmul.f32 %v8920_v21, %v11847_v54  ;;  %v2980_v50 = vmul.f32 %v8920_v21, %v11848_v52  ;;  %v9066_v53 = vrot.slane %v8978_v44, %v11839_v19  ;;  %v3090_v22 = vadd.f32 %v3026_v4, %v11855_v38 }
 0x2eb   : > { %v3221_v26 = vpack.c.bf16 %v3173_v40, %v3157_v8  ;;  %v3106_v14 = vadd.f32 %v3042_v25, %v11856_v13  ;;  %v2836_v12 = vadd.f32 %v2772_v5, %v2644_v34  ;;  %v2852_v23 = vadd.f32 %v2788_v27, %v2660_v46  ;;  %v11857_v25 = vld [vmem:[#allocation77_spill] sm:$0xff] }
 0x2ec   : > { %v2679_v43 = vmul.f32 %v9066_v53, %v11703_v0  ;;  %v2695_v2 = vmul.f32 %v9066_v53, %v11812_v31  ;;  %v9076_v21 = vrot.slane %v8978_v44, %v11807_v55  ;;  %v3154_v56 = vmax.f32 %v3090_v22, 0.0 }
 0x2ed   : > { %3317 = vmatprep.subr.bf16.mxu1 %v3221_v26  ;;  %v3170_v30 = vmax.f32 %v3106_v14, 0.0  ;;  %v3028_v49 = vadd.f32 %v2964_v36, %v2836_v12  ;;  %v9080_v51 = vrot.slane %v8978_v44, %v11808_v48  ;;  %v3044_v8 = vadd.f32 %v2980_v50, %v2852_v23  ;;  %v11858_v36 = vld [vmem:[#allocation30_spill] sm:$0xff] }
 0x2ee   : > { %v2807_v34 = vmul.f32 %v9076_v21, %v11813_v45  ;;  %v2823_v46 = vmul.f32 %v9076_v21, %v7762_v9  ;;  %v9088_v40 = vrot.slane %v8982_v37, %v11839_v19 }
 0x2ef   : > { %v3218_v4 = vpack.c.bf16 %v3170_v30, %v3154_v56  ;;  %v3092_v5 = vadd.f32 %v3028_v49, %v11857_v25  ;;  %v2999_v27 = vmul.f32 %v9080_v51, %v11706_v10  ;;  %v3015_v44 = vmul.f32 %v9080_v51, %v11714_v15 }
 0x2f0   : > { %v3108_v50 = vadd.f32 %v3044_v8, %v11858_v36  ;;  %v2871_v26 = vadd.f32 %v2807_v34, %v2679_v43  ;;  %v2887_v22 = vadd.f32 %v2823_v46, %v2695_v2  ;;  %v2681_v14 = vmul.f32 %v9088_v40, %v11703_v0 }
 0x2f1   : > { %3265 = vmatpush1.bf16.msra.mxu0 %v3218_v4  ;;  %v3156_v12 = vmax.f32 %v3092_v5, 0.0  ;;  %v2697_v23 = vmul.f32 %v9088_v40, %v11812_v31  ;;  %v9102_v56 = vrot.slane %v8982_v37, %v11807_v55  ;;  %v9106_v30 = vrot.slane %v8982_v37, %v11808_v48 }
 0x2f2   : > { %v3172_v49 = vmax.f32 %v3108_v50, 0.0  ;;  %v3063_v8 = vadd.f32 %v2999_v27, %v2871_v26  ;;  %v3079_v43 = vadd.f32 %v3015_v44, %v2887_v22  ;;  %v9110_v2 = vrot.slane %v8970_v42, %v11839_v19  ;;  %v11859_v50 = vld [vmem:[#allocation34_spill] sm:$0xff]  ;;  %v11860_v27 = vld [vmem:[#allocation64_spill] sm:$0xff]  ;;  %v11861_v26 = vld [vmem:[#allocation67_spill] sm:$0xff] }
 0x2f3   : > { %v2809_v34 = vmul.f32 %v9102_v56, %v11813_v45  ;;  %v2825_v46 = vmul.f32 %v9102_v56, %v7762_v9  ;;  %v3001_v4 = vmul.f32 %v9106_v30, %v11706_v10  ;;  %v3017_v37 = vmul.f32 %v9106_v30, %v11714_v15 }
 0x2f4   : > { %v3220_v5 = vpack.c.bf16 %v3172_v49, %v3156_v12  ;;  %6814 = vmatmul.mubr.msk.bf16.vlgmr.msra.gmra.mxu0 %vm1619_vm0, %v11859_v50  ;;  %v3127_v44 = vadd.f32 %v3063_v8, %v11860_v27  ;;  %v3143_v22 = vadd.f32 %v3079_v43, %v11861_v26  ;;  %v2678_v36 = vmul.f32 %v9110_v2, %v11703_v0 }
 0x2f5   : > { %3292 = vmatprep.mubr.bf16.mxu0 %v11836_v17  ;;  %v2873_v25 = vadd.f32 %v2809_v34, %v2681_v14  ;;  %v2889_v13 = vadd.f32 %v2825_v46, %v2697_v23  ;;  %v2694_v38 = vmul.f32 %v9110_v2, %v11812_v31  ;;  %v9131_v12 = vrot.slane %v8970_v42, %v11807_v55 }
 0x2f6   : > { %3318 = vmatpush1.bf16.msra.mxu1 %v3220_v5  ;;  %v3191_v49 = vmax.f32 %v3127_v44, 0.0  ;;  %v3207_v39 = vmax.f32 %v3143_v22, 0.0  ;;  %v9135_v8 = vrot.slane %v8970_v42, %v11808_v48  ;;  %v9139_v43 = vrot.slane %v8972_v11, %v11839_v19 }
 0x2f7   : > { %v3065_v23 = vadd.f32 %v3001_v4, %v2873_v25  ;;  %v3081_v34 = vadd.f32 %v3017_v37, %v2889_v13  ;;  %v2806_v46 = vmul.f32 %v9131_v12, %v11813_v45  ;;  %v2822_v26 = vmul.f32 %v9131_v12, %v7762_v9  ;;  %v11862_v13 = vld [vmem:[#allocation65_spill] sm:$0xff] }
 0x2f8   : > { %v3239_v44 = vpack.c.bf16 %v3207_v39, %v3191_v49  ;;  %v2998_v42 = vmul.f32 %v9135_v8, %v11706_v10  ;;  %v3014_v22 = vmul.f32 %v9135_v8, %v11714_v15  ;;  %v11863_v4 = vld [vmem:[#allocation69_spill] sm:$0xff]  ;;  %v2680_v39 = vmul.f32 %v9139_v43, %v11703_v0 }
 0x2f9   : > { %v2434_v14 = vpop.f32.mrf.mxu0  ;;  %6816 = vmatmul.mubr.msk.bf16.vlgmr.msra.gmra.mxu1 %vm1619_vm0, %v11859_v50  ;;  %v3129_v25 = vadd.f32 %v3065_v23, %v11862_v13  ;;  %v3145_v37 = vadd.f32 %v3081_v34, %v11863_v4  ;;  %v2870_v28 = vadd.f32 %v2806_v46, %v2678_v36  ;;  %v2886_v47 = vadd.f32 %v2822_v26, %v2694_v38  ;;  %v11864_v26 = vld [vmem:[#allocation50_spill] sm:$0xff] }
 0x2fa   : > { %v2435_v5 = vadd.f32 %v2434_v14, %v8890_v62  ;;  %3345 = vmatprep.mubr.bf16.mxu1 %v11836_v17  ;;  %3368 = vmatprep.subr.bf16.mxu0 %v3239_v44  ;;  %v2696_v49 = vmul.f32 %v9139_v43, %v11812_v31  ;;  %v9168_v46 = vrot.slane %v8972_v11, %v11808_v48 }
 0x2fb   : > { %v2436_v27 = vpop.f32.mrf.mxu0  ;;  %v3193_v33 = vmax.f32 %v3129_v25, 0.0  ;;  %v3209_v59 = vmax.f32 %v3145_v37, 0.0  ;;  %v3062_v23 = vadd.f32 %v2998_v42, %v2870_v28  ;;  %v3078_v13 = vadd.f32 %v3014_v22, %v2886_v47  ;;  %v11865_v28 = vld [vmem:[#allocation71_spill] sm:$0xff] }
 0x2fc   : > { %v2494_v58 = vsub.f32 0.0, %v2435_v5  ;;  %v2437_v14 = vadd.f32 %v2436_v27, %v8890_v62  ;;  %6815 = vmatmul.mubr.msk.bf16.gmra.mxu0 %vm1619_vm0, %v11864_v26  ;;  %v9164_v27 = vrot.slane %v8972_v11, %v11807_v55 }
 0x2fd   : > { %v2438_v32 = vpop.f32.mrf.mxu0  ;;  %v3241_v44 = vpack.c.bf16 %v3209_v59, %v3193_v33  ;;  %v3126_v47 = vadd.f32 %v3062_v23, %v11865_v28  ;;  %3388 = vmatprep.mubr.bf16.mxu0 %v11836_v17 }
 0x2fe   : > { %v2522_v34 = vmul.f32 1.442695, %v2494_v58  ;;  %v2495_v38 = vsub.f32 0.0, %v2437_v14  ;;  %v11866_v58 = vld [vmem:[#allocation70_spill] sm:$0xff]  ;;  %v2808_v37 = vmul.f32 %v9164_v27, %v11813_v45  ;;  %v2824_v11 = vmul.f32 %v9164_v27, %v7762_v9 }
 0x2ff   : > { %v2475_v36 = vpop.f32.mrf.mxu1  ;;  %v2439_v5 = vpop.f32.mrf.mxu0  ;;  %v3142_v42 = vadd.f32 %v3078_v13, %v11866_v58  ;;  %3421 = vmatprep.subr.bf16.mxu1 %v3241_v44  ;;  %v3190_v59 = vmax.f32 %v3126_v47, 0.0  ;;  %v2647_v47 = vmul.f32 %v9066_v53, %v11726_v63 }
 0x300   : > { %v2476_v32 = vadd.f32 %v2475_v36, %v8890_v62  ;;  %6985 = vpow2.f32 %v2522_v34  ;;  %v2524_v22 = vmul.f32 1.442695, %v2495_v38  ;;  %v2872_v13 = vadd.f32 %v2808_v37, %v2680_v39 }
 0x301   : > { %v2477_v25 = vpop.f32.mrf.mxu1  ;;  %v3206_v33 = vmax.f32 %v3142_v42, 0.0  ;;  %v2888_v5 = vadd.f32 %v2824_v11, %v2696_v49  ;;  %v3000_v34 = vmul.f32 %v9168_v46, %v11706_v10  ;;  %6817 = vmatmul.mubr.msk.bf16.gmra.mxu1 %vm1619_vm0, %v11864_v26  ;;  %v2663_v39 = vmul.f32 %v9066_v53, %v7938_v6  ;;  %v11867_v11 = vld [vmem:[#allocation76_spill] sm:$0xff] }
 0x302   : > { %v2496_v14 = vsub.f32 0.0, %v2476_v32  ;;  %v2478_v36 = vadd.f32 %v2477_v25, %v8890_v62  ;;  %6987 = vpow2.f32 %v2524_v22  ;;  %v3016_v32 = vmul.f32 %v9168_v46, %v11714_v15  ;;  %3441 = vmatprep.mubr.bf16.mxu1 %v11836_v17 }
 0x303   : > { %v2479_v23 = vpop.f32.mrf.mxu1  ;;  %v3238_v28 = vpack.c.bf16 %v3206_v33, %v3190_v59  ;;  %v3064_v44 = vadd.f32 %v3000_v34, %v2872_v13  ;;  %v2775_v49 = vmul.f32 %v9076_v21, %v7958_v41  ;;  %v2791_v37 = vmul.f32 %v9076_v21, %v11846_v57  ;;  %v11868_v33 = vld [vmem:[#allocation85_spill] sm:$0xff] }
 0x304   : > { %v2526_v38 = vmul.f32 1.442695, %v2496_v14  ;;  %v2497_v58 = vsub.f32 0.0, %v2478_v36  ;;  %v3080_v22 = vadd.f32 %v3016_v32, %v2888_v5  ;;  %v2967_v59 = vmul.f32 %v9080_v51, %v11847_v54 }
 0x305   : > { %v2480_v25 = vpop.f32.mrf.mxu1  ;;  %3369 = vmatpush1.bf16.msra.mxu0 %v3238_v28  ;;  %v3128_v14 = vadd.f32 %v3064_v44, %v11867_v11  ;;  %v2839_v36 = vadd.f32 %v2775_v49, %v2647_v47  ;;  %v2983_v53 = vmul.f32 %v9080_v51, %v11848_v52  ;;  %v2855_v13 = vadd.f32 %v2791_v37, %v2663_v39  ;;  %v11869_v44 = vld [vmem:[#allocation32_spill] sm:$0xff] }
 0x306   : > { %6989 = vpow2.f32 %v2526_v38  ;;  %v2528_v42 = vmul.f32 1.442695, %v2497_v58  ;;  %v3144_v23 = vadd.f32 %v3080_v22, %v11868_v33  ;;  %v2649_v28 = vmul.f32 %v9088_v40, %v11726_v63  ;;  %v11870_v22 = vld [vmem:[#allocation94_spill] sm:$0xff] }
 0x307   : > { %v3192_v58 = vmax.f32 %v3128_v14, 0.0  ;;  %v3031_v5 = vadd.f32 %v2967_v59, %v2839_v36  ;;  %v2665_v21 = vmul.f32 %v9088_v40, %v7938_v6  ;;  %v2777_v34 = vmul.f32 %v9102_v56, %v7958_v41 }
 0x308   : > { %6991 = vpow2.f32 %v2528_v42  ;;  %v3208_v38 = vmax.f32 %v3144_v23, 0.0  ;;  %v3047_v32 = vadd.f32 %v2983_v53, %v2855_v13  ;;  %v2793_v51 = vmul.f32 %v9102_v56, %v11846_v57 }
 0x309   : > { %v2969_v25 = vmul.f32 %v9106_v30, %v11847_v54  ;;  %v3095_v47 = vadd.f32 %v3031_v5, %v11869_v44  ;;  %v2841_v39 = vadd.f32 %v2777_v34, %v2649_v28  ;;  %v2985_v49 = vmul.f32 %v9106_v30, %v11848_v52 }
 0x30a   : > { %v2646_v40 = vmul.f32 %v9110_v2, %v11726_v63  ;;  %v3240_v42 = vpack.c.bf16 %v3208_v38, %v3192_v58  ;;  %v3111_v37 = vadd.f32 %v3047_v32, %v11870_v22  ;;  %v2857_v14 = vadd.f32 %v2793_v51, %v2665_v21 }
 0x30b   : > { %v2662_v36 = vmul.f32 %v9110_v2, %v7938_v6  ;;  %v3159_v56 = vmax.f32 %v3095_v47, 0.0  ;;  %v3033_v59 = vadd.f32 %v2969_v25, %v2841_v39  ;;  %v2774_v53 = vmul.f32 %v9131_v12, %v7958_v41  ;;  %v11871_v2 = vld [vmem:[#allocation9_spill] sm:$0xff]  ;;  %v11872_v47 = vld [vmem:[#allocation10_spill] sm:$0xff] }
 0x30c   : > { %v2790_v23 = vmul.f32 %v9131_v12, %v11846_v57  ;;  %3422 = vmatpush1.bf16.msra.mxu1 %v3240_v42  ;;  %v3175_v30 = vmax.f32 %v3111_v37, 0.0  ;;  %v3049_v28 = vadd.f32 %v2985_v49, %v2857_v14  ;;  %v2966_v58 = vmul.f32 %v9135_v8, %v11847_v54 }
 0x30d   : > { %v6986_v13 = vpop.eup %6985  ;;  %v2982_v5 = vmul.f32 %v9135_v8, %v11848_v52  ;;  %v3097_v34 = vadd.f32 %v3033_v59, %v11871_v2  ;;  %v2838_v38 = vadd.f32 %v2774_v53, %v2646_v40  ;;  %v2648_v12 = vmul.f32 %v9139_v43, %v11726_v63  ;;  %v11873_v59 = vld [vmem:[#allocation12_spill] sm:$0xff] }
 0x30e   : > { %v2542_v21 = vadd.f32 1.0, %v6986_v13  ;;  %v2854_v32 = vadd.f32 %v2790_v23, %v2662_v36  ;;  %v3223_v25 = vpack.c.bf16 %v3175_v30, %v3159_v56  ;;  %v3113_v39 = vadd.f32 %v3049_v28, %v11872_v47 }
 0x30f   : > { %v6988_v51 = vpop.eup %6987  ;;  %v2664_v49 = vmul.f32 %v9139_v43, %v7938_v6  ;;  %v3161_v37 = vmax.f32 %v3097_v34, 0.0  ;;  %v3030_v14 = vadd.f32 %v2966_v58, %v2838_v38  ;;  %v2776_v40 = vmul.f32 %v9164_v27, %v7958_v41  ;;  %v11874_v58 = vld [vmem:[#allocation91_spill] sm:$0xff] }
 0x310   : > { %6993 = vrcp.f32 %v2542_v21  ;;  %v2543_v42 = vadd.f32 1.0, %v6988_v51  ;;  %3370 = vmatprep.subr.bf16.mxu0 %v3223_v25  ;;  %v3177_v8 = vmax.f32 %v3113_v39, 0.0  ;;  %v3046_v13 = vadd.f32 %v2982_v5, %v2854_v32 }
 0x311   : > { %v2792_v36 = vmul.f32 %v9164_v27, %v11846_v57  ;;  %v3094_v53 = vadd.f32 %v3030_v14, %v11873_v59  ;;  %v2968_v43 = vmul.f32 %v9168_v46, %v11847_v54  ;;  %v2984_v23 = vmul.f32 %v9168_v46, %v11848_v52 }
 0x312   : > { %6995 = vrcp.f32 %v2543_v42  ;;  %v3225_v28 = vpack.c.bf16 %v3177_v8, %v3161_v37  ;;  %v3110_v5 = vadd.f32 %v3046_v13, %v11874_v58  ;;  %v2840_v21 = vadd.f32 %v2776_v40, %v2648_v12  ;;  %v11875_v8 = vld [vmem:[#allocation90_spill] sm:$0xff] }
 0x313   : > { %v6990_v56 = vpop.eup %6989  ;;  %v3158_v38 = vmax.f32 %v3094_v53, 0.0  ;;  %v2856_v32 = vadd.f32 %v2792_v36, %v2664_v49  ;;  %v9244_v27 = vrot.slane %v9048_v3, %v11839_v19  ;;  %v9248_v51 = vrot.slane %v9048_v3, %v11807_v55  ;;  %v11876_v36 = vld [vmem:[#allocation96_spill] sm:$0xff] }
 0x314   : > { %v2544_v30 = vadd.f32 1.0, %v6990_v56  ;;  %3423 = vmatprep.subr.bf16.mxu1 %v3225_v28  ;;  %v3174_v25 = vmax.f32 %v3110_v5, 0.0  ;;  %v3032_v46 = vadd.f32 %v2968_v43, %v2840_v21  ;;  %v9262_v43 = vrot.slane %v9048_v3, %v11808_v48 }
 0x315   : > { %v6992_v34 = vpop.eup %6991  ;;  %v3048_v39 = vadd.f32 %v2984_v23, %v2856_v32  ;;  %v2683_v42 = vmul.f32 %v9244_v27, %v11703_v0  ;;  %v2699_v12 = vmul.f32 %v9244_v27, %v11812_v31  ;;  %v2811_v49 = vmul.f32 %v9248_v51, %v11813_v45 }
 0x316   : > { %6997 = vrcp.f32 %v2544_v30  ;;  %v2545_v37 = vadd.f32 1.0, %v6992_v34  ;;  %v3222_v14 = vpack.c.bf16 %v3174_v25, %v3158_v38  ;;  %v3096_v13 = vadd.f32 %v3032_v46, %v11875_v8 }
 0x317   : > { %v2827_v40 = vmul.f32 %v9248_v51, %v7762_v9  ;;  %v3112_v56 = vadd.f32 %v3048_v39, %v11876_v36  ;;  %v2875_v53 = vadd.f32 %v2811_v49, %v2683_v42  ;;  %v9266_v23 = vrot.slane %v9054_v24, %v11839_v19 }
 0x318   : > { %3371 = vmatpush1.bf16.msra.mxu0 %v3222_v14  ;;  %v3160_v30 = vmax.f32 %v3096_v13, 0.0  ;;  %v9270_v5 = vrot.slane %v9054_v24, %v11807_v55  ;;  %v9274_v21 = vrot.slane %v9054_v24, %v11808_v48  ;;  %v3003_v3 = vmul.f32 %v9262_v43, %v11706_v10 }
 0x319   : > { %v2891_v28 = vadd.f32 %v2827_v40, %v2699_v12  ;;  %v3176_v34 = vmax.f32 %v3112_v56, 0.0  ;;  %v3019_v38 = vmul.f32 %v9262_v43, %v11714_v15  ;;  %v2685_v32 = vmul.f32 %v9266_v23, %v11703_v0 }
 0x31a   : > { %v2701_v25 = vmul.f32 %v9266_v23, %v11812_v31  ;;  %v2813_v46 = vmul.f32 %v9270_v5, %v11813_v45  ;;  %v2829_v24 = vmul.f32 %v9270_v5, %v7762_v9  ;;  %v3005_v39 = vmul.f32 %v9274_v21, %v11706_v10 }
 0x31b   : > { %v3224_v42 = vpack.c.bf16 %v3176_v34, %v3160_v30  ;;  %6818 = vmatmul.mubr.msk.bf16.vlgmr.msra.gmra.mxu0 %vm1619_vm0, %v11859_v50  ;;  %v3067_v12 = vadd.f32 %v3003_v3, %v2875_v53  ;;  %v3083_v49 = vadd.f32 %v3019_v38, %v2891_v28  ;;  %v3021_v14 = vmul.f32 %v9274_v21, %v11714_v15  ;;  %v11877_v53 = vld [vmem:[#allocation19_spill] sm:$0xff]  ;;  %v11878_v34 = vld [vmem:[#allocation20_spill] sm:$0xff] }
 0x31c   : > { %3398 = vmatprep.mubr.bf16.mxu0 %v11836_v17  ;;  %v2877_v40 = vadd.f32 %v2813_v46, %v2685_v32  ;;  %v2893_v56 = vadd.f32 %v2829_v24, %v2701_v25  ;;  %v9299_v36 = vrot.slane %v9020_v16, %v11839_v19  ;;  %v9303_v30 = vrot.slane %v9020_v16, %v11807_v55 }
 0x31d   : > { %v9294_v13 = vpop.eup %6993  ;;  %3424 = vmatpush1.bf16.msra.mxu1 %v3224_v42  ;;  %v3131_v28 = vadd.f32 %v3067_v12, %v11877_v53  ;;  %v3147_v3 = vadd.f32 %v3083_v49, %v11878_v34  ;;  %v9309_v38 = vrot.slane %v9020_v16, %v11808_v48  ;;  %v9313_v32 = vrot.slane %v9043_v60, %v11839_v19  ;;  %v11879_v53 = vld [vmem:[#allocation92_spill] sm:$0xff] }
 0x31e   : > { %v3069_v46 = vadd.f32 %v3005_v39, %v2877_v40  ;;  %v3085_v24 = vadd.f32 %v3021_v14, %v2893_v56  ;;  %v2682_v8 = vmul.f32 %v9299_v36, %v11703_v0  ;;  %v2698_v42 = vmul.f32 %v9299_v36, %v11812_v31  ;;  %v11880_v14 = vld [vmem:[#allocation93_spill] sm:$0xff] }
 0x31f   : > { %v9315_v25 = vpop.eup %6995  ;;  %v3195_v12 = vmax.f32 %v3131_v28, 0.0  ;;  %v3211_v49 = vmax.f32 %v3147_v3, 0.0  ;;  %v2810_v16 = vmul.f32 %v9303_v30, %v11813_v45  ;;  %v2826_v34 = vmul.f32 %v9303_v30, %v7762_v9 }
 0x320   : > { %6820 = vmatmul.mubr.msk.bf16.vlgmr.msra.gmra.mxu1 %vm1619_vm0, %v11859_v50  ;;  %v3133_v39 = vadd.f32 %v3069_v46, %v11879_v53  ;;  %v3149_v40 = vadd.f32 %v3085_v24, %v11880_v14  ;;  %v3002_v56 = vmul.f32 %v9309_v38, %v11706_v10  ;;  %v3018_v28 = vmul.f32 %v9309_v38, %v11714_v15 }
 0x321   : > { %3451 = vmatprep.mubr.bf16.mxu1 %v11836_v17  ;;  %v3243_v58 = vpack.c.bf16 %v3211_v49, %v3195_v12  ;;  %v2874_v59 = vadd.f32 %v2810_v16, %v2682_v8  ;;  %v2890_v47 = vadd.f32 %v2826_v34, %v2698_v42  ;;  %v2684_v2 = vmul.f32 %v9313_v32, %v11703_v0 }
 0x322   : > { %v3197_v22 = vmax.f32 %v3133_v39, 0.0  ;;  %v3213_v46 = vmax.f32 %v3149_v40, 0.0  ;;  %v2700_v24 = vmul.f32 %v9313_v32, %v11812_v31  ;;  %v9342_v14 = vrot.slane %v9043_v60, %v11807_v55  ;;  %v11881_v39 = vld [vmem:[#allocation95_spill] sm:$0xff] }
 0x323   : > { %v9333_v3 = vpop.eup %6997  ;;  %6999 = vrcp.f32 %v2545_v37  ;;  %6819 = vmatmul.mubr.msk.bf16.gmra.mxu0 %vm1619_vm0, %v11864_v26  ;;  %3474 = vmatprep.subr.bf16.mxu0 %v3243_v58  ;;  %v3066_v12 = vadd.f32 %v3002_v56, %v2874_v59  ;;  %v3082_v8 = vadd.f32 %v3018_v28, %v2890_v47  ;;  %v9348_v34 = vrot.slane %v9043_v60, %v11808_v48  ;;  %v11882_v59 = vld [vmem:[#allocation13_spill] sm:$0xff] }
 0x324   : > { %v3245_v42 = vpack.c.bf16 %v3213_v46, %v3197_v22  ;;  %v2812_v49 = vmul.f32 %v9342_v14, %v11813_v45  ;;  %v2828_v16 = vmul.f32 %v9342_v14, %v7762_v9  ;;  %v2651_v37 = vmul.f32 %v9244_v27, %v11726_v63  ;;  %3494 = vmatprep.mubr.bf16.mxu0 %v11836_v17 }
 0x325   : > { %v3130_v58 = vadd.f32 %v3066_v12, %v11881_v39  ;;  %v3146_v47 = vadd.f32 %v3082_v8, %v11882_v59  ;;  %v3004_v60 = vmul.f32 %v9348_v34, %v11706_v10  ;;  %v3020_v22 = vmul.f32 %v9348_v34, %v11714_v15  ;;  %v11884_v39 = vld [vmem:[#allocation15_spill] sm:$0xff] }
 0x326   : > { %3527 = vmatprep.subr.bf16.mxu1 %v3245_v42  ;;  %v2876_v40 = vadd.f32 %v2812_v49, %v2684_v2  ;;  %v2892_v56 = vadd.f32 %v2828_v16, %v2700_v24  ;;  %v2667_v28 = vmul.f32 %v9244_v27, %v7938_v6  ;;  %v2779_v46 = vmul.f32 %v9248_v51, %v7958_v41 }
 0x327   : > { %v3194_v53 = vmax.f32 %v3130_v58, 0.0  ;;  %v3210_v44 = vmax.f32 %v3146_v47, 0.0  ;;  %v2795_v12 = vmul.f32 %v9248_v51, %v11846_v57  ;;  %v2971_v8 = vmul.f32 %v9262_v43, %v11847_v54  ;;  %v11883_v47 = vld [vmem:[#allocation14_spill] sm:$0xff] }
 0x328   : > { %6821 = vmatmul.mubr.msk.bf16.gmra.mxu1 %vm1619_vm0, %v11864_v26  ;;  %v3068_v42 = vadd.f32 %v3004_v60, %v2876_v40  ;;  %v3084_v2 = vadd.f32 %v3020_v22, %v2892_v56  ;;  %v2843_v24 = vadd.f32 %v2779_v46, %v2651_v37  ;;  %v2987_v27 = vmul.f32 %v9262_v43, %v11848_v52  ;;  %v11885_v56 = vld [vmem:[#allocation68_spill] sm:$0xff] }
 0x329   : > { %v3242_v49 = vpack.c.bf16 %v3210_v44, %v3194_v53  ;;  %v2859_v16 = vadd.f32 %v2795_v12, %v2667_v28  ;;  %v2653_v58 = vmul.f32 %v9266_v23, %v11726_v63  ;;  %v2669_v51 = vmul.f32 %v9266_v23, %v7938_v6  ;;  %3547 = vmatprep.mubr.bf16.mxu1 %v11836_v17  ;;  %v11886_v12 = vld [vmem:[#allocation22_spill] sm:$0xff] }
 0x32a   : > { %v3132_v59 = vadd.f32 %v3068_v42, %v11883_v47  ;;  %v3148_v33 = vadd.f32 %v3084_v2, %v11884_v39  ;;  %v3035_v60 = vadd.f32 %v2971_v8, %v2843_v24  ;;  %v2781_v37 = vmul.f32 %v9270_v5, %v7958_v41 }
 0x32b   : > { %3475 = vmatpush1.bf16.msra.mxu0 %v3242_v49  ;;  %v3051_v43 = vadd.f32 %v2987_v27, %v2859_v16  ;;  %v2797_v44 = vmul.f32 %v9270_v5, %v11846_v57  ;;  %v2973_v53 = vmul.f32 %v9274_v21, %v11847_v54  ;;  %v2989_v23 = vmul.f32 %v9274_v21, %v11848_v52 }
 0x32c   : > { %v3196_v22 = vmax.f32 %v3132_v59, 0.0  ;;  %v3212_v40 = vmax.f32 %v3148_v33, 0.0  ;;  %v3099_v28 = vadd.f32 %v3035_v60, %v11885_v56  ;;  %v2845_v46 = vadd.f32 %v2781_v37, %v2653_v58  ;;  %v11887_v60 = vld [vmem:[#allocation23_spill] sm:$0xff] }
 0x32d   : > { %v3115_v8 = vadd.f32 %v3051_v43, %v11886_v12  ;;  %v2861_v42 = vadd.f32 %v2797_v44, %v2669_v51  ;;  %v2650_v2 = vmul.f32 %v9299_v36, %v11726_v63  ;;  %v2666_v5 = vmul.f32 %v9299_v36, %v7938_v6  ;;  %v11900_v12 = vld [vmem:[#allocation40_spill] sm:$0xff] }
 0x32e   : > { %v3244_v24 = vpack.c.bf16 %v3212_v40, %v3196_v22  ;;  %v3163_v27 = vmax.f32 %v3099_v28, 0.0  ;;  %v3037_v49 = vadd.f32 %v2973_v53, %v2845_v46  ;;  %v2778_v21 = vmul.f32 %v9303_v30, %v7958_v41  ;;  %v11888_v22 = vld [vmem:[#allocation80_spill] sm:$0xff] }
 0x32f   : > { %v3179_v59 = vmax.f32 %v3115_v8, 0.0  ;;  %v3053_v33 = vadd.f32 %v2989_v23, %v2861_v42  ;;  %v2794_v16 = vmul.f32 %v9303_v30, %v11846_v57  ;;  %v2970_v58 = vmul.f32 %v9309_v38, %v11847_v54 }
 0x330   : > { %v7000_v51 = vpop.eup %6999  ;;  %3528 = vmatpush1.bf16.msra.mxu1 %v3244_v24  ;;  %v3101_v37 = vadd.f32 %v3037_v49, %v11887_v60  ;;  %v2842_v43 = vadd.f32 %v2778_v21, %v2650_v2  ;;  %v2986_v36 = vmul.f32 %v9309_v38, %v11848_v52  ;;  %v2652_v44 = vmul.f32 %v9313_v32, %v11726_v63 }
 0x331   : > { %v3227_v53 = vpack.c.bf16 %v3179_v59, %v3163_v27  ;;  %v3117_v23 = vadd.f32 %v3053_v33, %v11888_v22  ;;  %v2858_v40 = vadd.f32 %v2794_v16, %v2666_v5  ;;  %v2668_v30 = vmul.f32 %v9313_v32, %v7938_v6  ;;  %v11889_v27 = vld [vmem:[#allocation16_spill] sm:$0xff]  ;;  %v11890_v16 = vld [vmem:[#allocation17_spill] sm:$0xff] }
 0x332   : > { %v3165_v28 = vmax.f32 %v3101_v37, 0.0  ;;  %v3034_v46 = vadd.f32 %v2970_v58, %v2842_v43  ;;  %v2780_v8 = vmul.f32 %v9342_v14, %v7958_v41  ;;  %v2796_v42 = vmul.f32 %v9342_v14, %v11846_v57 }
 0x333   : > { %3476 = vmatprep.subr.bf16.mxu0 %v3227_v53  ;;  %v3181_v38 = vmax.f32 %v3117_v23, 0.0  ;;  %v3050_v2 = vadd.f32 %v2986_v36, %v2858_v40  ;;  %v2972_v24 = vmul.f32 %v9348_v34, %v11847_v54  ;;  %v2988_v5 = vmul.f32 %v9348_v34, %v11848_v52 }
 0x334   : > { %v3098_v49 = vadd.f32 %v3034_v46, %v11889_v27  ;;  %v2844_v32 = vadd.f32 %v2780_v8, %v2652_v44  ;;  %v2860_v21 = vadd.f32 %v2796_v42, %v2668_v30  ;;  %v9421_v59 = vrot.slane %v9315_v25, %v11839_v19  ;;  %v11892_v46 = vld [vmem:[#allocation24_spill] sm:$0xff] }
 0x335   : > { %v3229_v33 = vpack.c.bf16 %v3181_v38, %v3165_v28  ;;  %v3114_v14 = vadd.f32 %v3050_v2, %v11890_v16  ;;  %v9426_v58 = vrot.slane %v9315_v25, %v11807_v55  ;;  %v9430_v37 = vrot.slane %v9315_v25, %v11808_v48  ;;  %v11891_v28 = vld [vmem:[#allocation18_spill] sm:$0xff] }
 0x336   : > { %v3162_v34 = vmax.f32 %v3098_v49, 0.0  ;;  %v3036_v43 = vadd.f32 %v2972_v24, %v2844_v32  ;;  %v3052_v36 = vadd.f32 %v2988_v5, %v2860_v21  ;;  %v2687_v44 = vmul.f32 %v9421_v59, %v11703_v0 }
 0x337   : > { %3529 = vmatprep.subr.bf16.mxu1 %v3229_v33  ;;  %v3178_v53 = vmax.f32 %v3114_v14, 0.0  ;;  %v2703_v23 = vmul.f32 %v9421_v59, %v11812_v31  ;;  %v2815_v40 = vmul.f32 %v9426_v58, %v11813_v45  ;;  %v2831_v30 = vmul.f32 %v9426_v58, %v7762_v9 }
 0x338   : > { %v3100_v25 = vadd.f32 %v3036_v43, %v11891_v28  ;;  %v3116_v8 = vadd.f32 %v3052_v36, %v11892_v46  ;;  %v3007_v42 = vmul.f32 %v9430_v37, %v11706_v10  ;;  %v3023_v38 = vmul.f32 %v9430_v37, %v11714_v15 }
 0x339   : > { %v3226_v2 = vpack.c.bf16 %v3178_v53, %v3162_v34  ;;  %v2879_v24 = vadd.f32 %v2815_v40, %v2687_v44  ;;  %v2895_v5 = vadd.f32 %v2831_v30, %v2703_v23  ;;  %v9447_v49 = vrot.slane %v7000_v51, %v11839_v19  ;;  %v11893_v40 = vld [vmem:[#allocation25_spill] sm:$0xff] }
 0x33a   : > { %v3164_v32 = vmax.f32 %v3100_v25, 0.0  ;;  %v3180_v21 = vmax.f32 %v3116_v8, 0.0  ;;  %v9450_v33 = vrot.slane %v7000_v51, %v11807_v55  ;;  %v9453_v14 = vrot.slane %v7000_v51, %v11808_v48  ;;  %v11894_v25 = vld [vmem:[#allocation21_spill] sm:$0xff] }
 0x33b   : > { %3477 = vmatpush1.bf16.msra.mxu0 %v3226_v2  ;;  %v3071_v43 = vadd.f32 %v3007_v42, %v2879_v24  ;;  %v3087_v36 = vadd.f32 %v3023_v38, %v2895_v5  ;;  %v2689_v46 = vmul.f32 %v9447_v49, %v11703_v0  ;;  %v2705_v34 = vmul.f32 %v9447_v49, %v11812_v31 }
 0x33c   : > { %v3228_v44 = vpack.c.bf16 %v3180_v21, %v3164_v32  ;;  %v2817_v53 = vmul.f32 %v9450_v33, %v11813_v45  ;;  %v2833_v23 = vmul.f32 %v9450_v33, %v7762_v9  ;;  %v3009_v51 = vmul.f32 %v9453_v14, %v11706_v10 }
 0x33d   : > { %v3135_v30 = vadd.f32 %v3071_v43, %v11893_v40  ;;  %v3151_v8 = vadd.f32 %v3087_v36, %v11894_v25  ;;  %v3025_v42 = vmul.f32 %v9453_v14, %v11714_v15  ;;  %v9471_v38 = vrot.slane %v9294_v13, %v11839_v19 }
 0x33e   : > { %3530 = vmatpush1.bf16.msra.mxu1 %v3228_v44  ;;  %6822 = vmatmul.mubr.msk.bf16.vlgmr.msra.gmra.mxu0 %vm1619_vm0, %v11859_v50  ;;  %v2881_v2 = vadd.f32 %v2817_v53, %v2689_v46  ;;  %v2897_v24 = vadd.f32 %v2833_v23, %v2705_v34  ;;  %v9477_v5 = vrot.slane %v9294_v13, %v11807_v55 }
 0x33f   : > { %3504 = vmatprep.mubr.bf16.mxu0 %v11836_v17  ;;  %v3199_v32 = vmax.f32 %v3135_v30, 0.0  ;;  %v3215_v21 = vmax.f32 %v3151_v8, 0.0  ;;  %v2686_v43 = vmul.f32 %v9471_v38, %v11703_v0  ;;  %v2702_v36 = vmul.f32 %v9471_v38, %v11812_v31  ;;  %v11895_v8 = vld [vmem:[#allocation26_spill] sm:$0xff] }
 0x340   : > { %v3073_v44 = vadd.f32 %v3009_v51, %v2881_v2  ;;  %v3089_v25 = vadd.f32 %v3025_v42, %v2897_v24  ;;  %v2814_v46 = vmul.f32 %v9477_v5, %v11813_v45  ;;  %v2830_v34 = vmul.f32 %v9477_v5, %v7762_v9  ;;  %v11896_v2 = vld [vmem:[#allocation29_spill] sm:$0xff] }
 0x341   : > { %6824 = vmatmul.mubr.msk.bf16.vlgmr.msra.gmra.mxu1 %vm1619_vm0, %v11859_v50  ;;  %v3247_v53 = vpack.c.bf16 %v3215_v21, %v3199_v32  ;;  %v9492_v23 = vrot.slane %v9294_v13, %v11808_v48  ;;  %v9496_v30 = vrot.slane %v9333_v3, %v11839_v19  ;;  %v9500_v51 = vrot.slane %v9333_v3, %v11807_v55 }
 0x342   : > { %3557 = vmatprep.mubr.bf16.mxu1 %v11836_v17  ;;  %v3137_v42 = vadd.f32 %v3073_v44, %v11895_v8  ;;  %v3153_v24 = vadd.f32 %v3089_v25, %v11896_v2  ;;  %v2878_v40 = vadd.f32 %v2814_v46, %v2686_v43  ;;  %v2894_v32 = vadd.f32 %v2830_v34, %v2702_v36  ;;  %v11897_v8 = vld [vmem:[#allocation55_spill] sm:$0xff] }
 0x343   : > { %3580 = vmatprep.subr.bf16.mxu0 %v3247_v53  ;;  %v3006_v13 = vmul.f32 %v9492_v23, %v11706_v10  ;;  %v3022_v21 = vmul.f32 %v9492_v23, %v11714_v15  ;;  %v2688_v28 = vmul.f32 %v9496_v30, %v11703_v0  ;;  %v2704_v16 = vmul.f32 %v9496_v30, %v11812_v31 }
 0x344   : > { %v3201_v27 = vmax.f32 %v3137_v42, 0.0  ;;  %v3217_v22 = vmax.f32 %v3153_v24, 0.0  ;;  %v2816_v25 = vmul.f32 %v9500_v51, %v11813_v45  ;;  %v2832_v43 = vmul.f32 %v9500_v51, %v7762_v9 }
 0x345   : > { %v3070_v36 = vadd.f32 %v3006_v13, %v2878_v40  ;;  %v3086_v44 = vadd.f32 %v3022_v21, %v2894_v32  ;;  %v9519_v46 = vrot.slane %v9333_v3, %v11808_v48  ;;  %v2655_v34 = vmul.f32 %v9421_v59, %v11726_v63  ;;  %v11898_v40 = vld [vmem:[#allocation31_spill] sm:$0xff] }
 0x346   : > { %6823 = vmatmul.mubr.msk.bf16.gmra.mxu0 %vm1619_vm0, %v11864_v26  ;;  %v3249_v53 = vpack.c.bf16 %v3217_v22, %v3201_v27  ;;  %v2880_v42 = vadd.f32 %v2816_v25, %v2688_v28  ;;  %v2896_v24 = vadd.f32 %v2832_v43, %v2704_v16  ;;  %v2671_v2 = vmul.f32 %v9421_v59, %v7938_v6 }
 0x347   : > { %v3134_v60 = vadd.f32 %v3070_v36, %v11897_v8  ;;  %v3150_v32 = vadd.f32 %v3086_v44, %v11898_v40  ;;  %v3008_v3 = vmul.f32 %v9519_v46, %v11706_v10  ;;  %v3024_v13 = vmul.f32 %v9519_v46, %v11714_v15  ;;  %3600 = vmatprep.mubr.bf16.mxu0 %v11836_v17  ;;  %v11899_v8 = vld [vmem:[#allocation62_spill] sm:$0xff] }
 0x348   : > { %3633 = vmatprep.subr.bf16.mxu1 %v3249_v53  ;;  %v2783_v22 = vmul.f32 %v9426_v58, %v7958_v41  ;;  %v2799_v27 = vmul.f32 %v9426_v58, %v11846_v57  ;;  %v2975_v59 = vmul.f32 %v9430_v37, %v11847_v54  ;;  %v2991_v16 = vmul.f32 %v9430_v37, %v11848_v52 }
 0x349   : > { %6825 = vmatmul.mubr.msk.bf16.gmra.mxu1 %vm1619_vm0, %v11864_v26  ;;  %v3198_v28 = vmax.f32 %v3134_v60, 0.0  ;;  %v3214_v21 = vmax.f32 %v3150_v32, 0.0  ;;  %v3072_v25 = vadd.f32 %v3008_v3, %v2880_v42  ;;  %v3088_v43 = vadd.f32 %v3024_v13, %v2896_v24 }
 0x34a   : > { %v2847_v36 = vadd.f32 %v2783_v22, %v2655_v34  ;;  %v2863_v44 = vadd.f32 %v2799_v27, %v2671_v2  ;;  %v2657_v53 = vmul.f32 %v9447_v49, %v11726_v63  ;;  %v2673_v58 = vmul.f32 %v9447_v49, %v7938_v6  ;;  %3653 = vmatprep.mubr.bf16.mxu1 %v11836_v17  ;;  %v11901_v22 = vld [vmem:[#allocation63_spill] sm:$0xff] }
 0x34b   : > { %v3246_v40 = vpack.c.bf16 %v3214_v21, %v3198_v28  ;;  %v3136_v37 = vadd.f32 %v3072_v25, %v11899_v8  ;;  %v3152_v56 = vadd.f32 %v3088_v43, %v11900_v12  ;;  %v2785_v60 = vmul.f32 %v9450_v33, %v7958_v41  ;;  %v11902_v28 = vld [vmem:[#allocation33_spill] sm:$0xff] }
 0x34c   : > { %v3039_v42 = vadd.f32 %v2975_v59, %v2847_v36  ;;  %v3055_v24 = vadd.f32 %v2991_v16, %v2863_v44  ;;  %v2801_v2 = vmul.f32 %v9450_v33, %v11846_v57  ;;  %v2977_v34 = vmul.f32 %v9453_v14, %v11847_v54 }
 0x34d   : > { %3581 = vmatpush1.bf16.msra.mxu0 %v3246_v40  ;;  %v3200_v49 = vmax.f32 %v3136_v37, 0.0  ;;  %v3216_v32 = vmax.f32 %v3152_v56, 0.0  ;;  %v2849_v3 = vadd.f32 %v2785_v60, %v2657_v53  ;;  %v2993_v13 = vmul.f32 %v9453_v14, %v11848_v52  ;;  %v11903_v53 = vld [vmem:[#allocation42_spill] sm:$0xff] }
 0x34e   : > { %v3103_v27 = vadd.f32 %v3039_v42, %v11901_v22  ;;  %v3119_v21 = vadd.f32 %v3055_v24, %v11902_v28  ;;  %v2865_v25 = vadd.f32 %v2801_v2, %v2673_v58  ;;  %v2654_v59 = vmul.f32 %v9471_v38, %v11726_v63  ;;  %v11904_v24 = vld [vmem:[#allocation43_spill] sm:$0xff] }
 0x34f   : > { %v3248_v16 = vpack.c.bf16 %v3216_v32, %v3200_v49  ;;  %v3041_v33 = vadd.f32 %v2977_v34, %v2849_v3  ;;  %v2670_v43 = vmul.f32 %v9471_v38, %v7938_v6  ;;  %v2782_v56 = vmul.f32 %v9477_v5, %v7958_v41 }
 0x350   : > { %v3167_v40 = vmax.f32 %v3103_v27, 0.0  ;;  %v3183_v36 = vmax.f32 %v3119_v21, 0.0  ;;  %v3057_v44 = vadd.f32 %v2993_v13, %v2865_v25  ;;  %v2798_v14 = vmul.f32 %v9477_v5, %v11846_v57  ;;  %v11905_v25 = vld [vmem:[#allocation36_spill] sm:$0xff] }
 0x351   : > { %3634 = vmatpush1.bf16.msra.mxu1 %v3248_v16  ;;  %v3105_v58 = vadd.f32 %v3041_v33, %v11903_v53  ;;  %v2846_v37 = vadd.f32 %v2782_v56, %v2654_v59  ;;  %v2974_v60 = vmul.f32 %v9492_v23, %v11847_v54  ;;  %v2990_v42 = vmul.f32 %v9492_v23, %v11848_v52  ;;  %v11906_v56 = vld [vmem:[#allocation37_spill] sm:$0xff] }
 0x352   : > { %v3231_v38 = vpack.c.bf16 %v3183_v36, %v3167_v40  ;;  %v3121_v2 = vadd.f32 %v3057_v44, %v11904_v24  ;;  %v2862_v34 = vadd.f32 %v2798_v14, %v2670_v43  ;;  %v2656_v49 = vmul.f32 %v9496_v30, %v11726_v63 }
 0x353   : > { %v3169_v32 = vmax.f32 %v3105_v58, 0.0  ;;  %v3038_v3 = vadd.f32 %v2974_v60, %v2846_v37  ;;  %v2672_v5 = vmul.f32 %v9496_v30, %v7938_v6  ;;  %v2784_v13 = vmul.f32 %v9500_v51, %v7958_v41  ;;  %v11907_v60 = vld [vmem:[#allocation46_spill] sm:$0xff] }
 0x354   : > { %3582 = vmatprep.subr.bf16.mxu0 %v3231_v38  ;;  %v3185_v27 = vmax.f32 %v3121_v2, 0.0  ;;  %v3054_v21 = vadd.f32 %v2990_v42, %v2862_v34  ;;  %v2800_v23 = vmul.f32 %v9500_v51, %v11846_v57  ;;  %v2976_v33 = vmul.f32 %v9519_v46, %v11847_v54  ;;  %v11908_v38 = vld [vmem:[#allocation44_spill] sm:$0xff] }
 0x355   : > { %v3102_v59 = vadd.f32 %v3038_v3, %v11905_v25  ;;  %v2848_v16 = vadd.f32 %v2784_v13, %v2656_v49  ;;  %v2992_v30 = vmul.f32 %v9519_v46, %v11848_v52 }
 0x356   : > { %v3233_v43 = vpack.c.bf16 %v3185_v27, %v3169_v32  ;;  %v3118_v40 = vadd.f32 %v3054_v21, %v11906_v56  ;;  %v2864_v36 = vadd.f32 %v2800_v23, %v2672_v5 }
 0x357   : > { %v3166_v44 = vmax.f32 %v3102_v59, 0.0  ;;  %v3040_v14 = vadd.f32 %v2976_v33, %v2848_v16 }
 0x358   : > { %3635 = vmatprep.subr.bf16.mxu1 %v3233_v43  ;;  %v3182_v58 = vmax.f32 %v3118_v40, 0.0  ;;  %v3056_v37 = vadd.f32 %v2992_v30, %v2864_v36 }
 0x359   : > { %v3104_v51 = vadd.f32 %v3040_v14, %v11907_v60 }
 0x35a   : > { %v3230_v42 = vpack.c.bf16 %v3182_v58, %v3166_v44  ;;  %v3120_v2 = vadd.f32 %v3056_v37, %v11908_v38 }
 0x35b   : > { %v3168_v34 = vmax.f32 %v3104_v51, 0.0 }
 0x35c   : > { %3583 = vmatpush1.bf16.msra.mxu0 %v3230_v42  ;;  %v3184_v49 = vmax.f32 %v3120_v2, 0.0 }
 0x35e   : > { %v3232_v32 = vpack.c.bf16 %v3184_v49, %v3168_v34 }
 0x35f   : > { %6826 = vmatmul.mubr.msk.bf16.vlgmr.msra.gmra.mxu0 %vm1619_vm0, %v11859_v50 }
 0x360   : > { %3636 = vmatpush1.bf16.msra.mxu1 %v3232_v32  ;;  %3610 = vmatprep.mubr.bf16.mxu0 %v11836_v17 }
 0x363   : > { %6828 = vmatmul.mubr.msk.bf16.vlgmr.msra.gmra.mxu1 %vm1619_vm0, %v11859_v50 }
 0x364   : > { %3663 = vmatprep.mubr.bf16.mxu1 %v11836_v17 }
 0x367   : > { %6827 = vmatmul.mubr.msk.bf16.gmra.mxu0 %vm1619_vm0, %v11864_v26 }
 0x368   : > { %3802 = vmatprep.mubr.bf16.mxu0 %v11836_v17 }
 0x36b   : > { %6829 = vmatmul.mubr.msk.bf16.gmra.mxu1 %vm1619_vm0, %v11864_v26 }
 0x36c   : > { %3843 = vmatprep.mubr.bf16.mxu1 %v11836_v17 }
 0x3b4   : > { %v3284_v46 = vpop.f32.mrf.mxu0 }
 0x3b5   : > { %v3285_v49 = vadd.f32 %v3284_v46, %v8789_v29 }
 0x3b6   : > { %v3286_v3 = vpop.f32.mrf.mxu0 }
 0x3b7   : > { %v3287_v37 = vadd.f32 %v3286_v3, %v8789_v29 }
 0x3b8   : > { %v3288_v5 = vpop.f32.mrf.mxu0 }
 0x3b9   : > { %v3337_v13 = vpop.f32.mrf.mxu1  ;;  %v3289_v2 = vadd.f32 %v3288_v5, %v8800_v1  ;;  %v3675_v3 = vmax.f32 %v3287_v37, 0.0 }
 0x3ba   : > { %v3290_v27 = vpop.f32.mrf.mxu0 }
 0x3bb   : > { %v3339_v21 = vpop.f32.mrf.mxu1  ;;  %v3291_v40 = vadd.f32 %v3290_v27, %v8800_v1 }
 0x3bc   : > { %v3294_v23 = vpop.f32.mrf.mxu0  ;;  %v3340_v5 = vadd.f32 %v3339_v21, %v8789_v29 }
 0x3bd   : > { %v3341_v59 = vpop.f32.mrf.mxu1  ;;  %v3295_v14 = vadd.f32 %v3294_v23, %v8775_v35  ;;  %v3691_v32 = vmax.f32 %v3291_v40, 0.0 }
 0x3be   : > { %v3296_v16 = vpop.f32.mrf.mxu0  ;;  %v3677_v37 = vmax.f32 %v3340_v5, 0.0 }
 0x3bf   : > { %v3343_v33 = vpop.f32.mrf.mxu1  ;;  %v3297_v30 = vadd.f32 %v3296_v16, %v8775_v35 }
 0x3c0   : > { %v3298_v43 = vpop.f32.mrf.mxu0  ;;  %v3344_v16 = vadd.f32 %v3343_v33, %v8800_v1 }
 0x3c1   : > { %v3347_v36 = vpop.f32.mrf.mxu1  ;;  %v3299_v44 = vadd.f32 %v3298_v43, %v8777_v20  ;;  %v3707_v27 = vmax.f32 %v3297_v30, 0.0  ;;  %v3706_v43 = vmax.f32 %v3295_v14, 0.0  ;;  %v3342_v30 = vadd.f32 %v3341_v59, %v8800_v1 }
 0x3c2   : > { %v3300_v58 = vpop.f32.mrf.mxu0  ;;  %v3348_v25 = vadd.f32 %v3347_v36, %v8775_v35  ;;  %v3674_v14 = vmax.f32 %v3285_v49, 0.0  ;;  %v3338_v36 = vadd.f32 %v3337_v13, %v8789_v29 }
 0x3c3   : > { %v3349_v51 = vpop.f32.mrf.mxu1  ;;  %v3301_v42 = vadd.f32 %v3300_v58, %v8777_v20  ;;  %v3722_v34 = vmax.f32 %v3299_v44, 0.0  ;;  %v3690_v44 = vmax.f32 %v3289_v2, 0.0 }
 0x3c4   : > { %v3350_v23 = vadd.f32 %v3349_v51, %v8775_v35  ;;  %v3693_v51 = vmax.f32 %v3344_v16, 0.0  ;;  %v3676_v59 = vmax.f32 %v3338_v36, 0.0 }
 0x3c5   : > { %v3351_v38 = vpop.f32.mrf.mxu1  ;;  %v3723_v60 = vmax.f32 %v3301_v42, 0.0  ;;  %v3754_v46 = vpack.c.bf16 %v3722_v34, %v3706_v43  ;;  %v3739_v42 = vpack.c.bf16 %v3691_v32, %v3675_v3  ;;  %v3738_v21 = vpack.c.bf16 %v3690_v44, %v3674_v14 }
 0x3c6   : > { %v3352_v56 = vadd.f32 %v3351_v38, %v8777_v20  ;;  %v3709_v53 = vmax.f32 %v3350_v23, 0.0  ;;  %v3692_v34 = vmax.f32 %v3342_v30, 0.0 }
 0x3c7   : > { %v3755_v58 = vpack.c.bf16 %v3723_v60, %v3707_v27  ;;  %v3353_v24 = vpop.f32.mrf.mxu1  ;;  %v3708_v60 = vmax.f32 %v3348_v25, 0.0 }
 0x3c8   : > { %v3354_v40 = vadd.f32 %v3353_v24, %v8777_v20  ;;  %v3724_v33 = vmax.f32 %v3352_v56, 0.0  ;;  %v3741_v24 = vpack.c.bf16 %v3693_v51, %v3677_v37  ;;  %v3740_v56 = vpack.c.bf16 %v3692_v34, %v3676_v59 }
 0x3c9   : > { %3782 = vmatprep.subr.bf16.mxu0 %v3755_v58 }
 0x3ca   : > { %v3725_v38 = vmax.f32 %v3354_v40, 0.0  ;;  %3783 = vmatpush1.bf16.msra.mxu0 %v3754_v46  ;;  %v3756_v27 = vpack.c.bf16 %v3724_v33, %v3708_v60 }
 0x3cb   : > { %3784 = vmatprep.subr.bf16.mxu0 %v3739_v42 }
 0x3cc   : > { %v3757_v2 = vpack.c.bf16 %v3725_v38, %v3709_v53 }
 0x3ce   : > { %3823 = vmatprep.subr.bf16.mxu1 %v3757_v2  ;;  %3785 = vmatpush1.bf16.msra.mxu0 %v3738_v21 }
 0x3cf   : > { %3824 = vmatpush1.bf16.msra.mxu1 %v3756_v27 }
 0x3d0   : > { %3825 = vmatprep.subr.bf16.mxu1 %v3741_v24 }
 0x3d1   : > { %6830 = vmatmul.mubr.msk.bf16.vlgmr.msra.gmra.mxu0 %vm1619_vm0, %v8792_v61 }
 0x3d2   : > { %3884 = vmatprep.mubr.bf16.mxu0 %v11836_v17 }
 0x3d3   : > { %3826 = vmatpush1.bf16.msra.mxu1 %v3740_v56 }
 0x3d6   : > { %6831 = vmatmul.mubr.msk.bf16.vlgmr.msra.gmra.mxu1 %vm1619_vm0, %v8792_v61 }
 0x3d7   : > { %3925 = vmatprep.mubr.bf16.mxu1 %v11836_v17 }
 0x3db   : > { %v3390_v53 = vpop.f32.mrf.mxu0 }
 0x3dc   : > { %v3391_v37 = vadd.f32 %v3390_v53, %v8789_v29 }
 0x3dd   : > { %v3392_v25 = vpop.f32.mrf.mxu0 }
 0x3de   : > { %v3393_v14 = vadd.f32 %v3392_v25, %v8789_v29 }
 0x3df   : > { %v3394_v13 = vpop.f32.mrf.mxu0 }
 0x3e0   : > { %v3443_v49 = vpop.f32.mrf.mxu1  ;;  %v3395_v36 = vadd.f32 %v3394_v13, %v8800_v1  ;;  %v3679_v25 = vmax.f32 %v3393_v14, 0.0 }
 0x3e1   : > { %v3396_v32 = vpop.f32.mrf.mxu0 }
 0x3e2   : > { %v3445_v16 = vpop.f32.mrf.mxu1  ;;  %v3397_v44 = vadd.f32 %v3396_v32, %v8800_v1 }
 0x3e3   : > { %v3400_v43 = vpop.f32.mrf.mxu0  ;;  %v3446_v13 = vadd.f32 %v3445_v16, %v8789_v29 }
 0x3e4   : > { %v3447_v23 = vpop.f32.mrf.mxu1  ;;  %v3401_v42 = vadd.f32 %v3400_v43, %v8775_v35  ;;  %v3695_v21 = vmax.f32 %v3397_v44, 0.0 }
 0x3e5   : > { %v3402_v3 = vpop.f32.mrf.mxu0 }
 0x3e6   : > { %v3449_v58 = vpop.f32.mrf.mxu1  ;;  %v3403_v40 = vadd.f32 %v3402_v3, %v8775_v35  ;;  %v3710_v59 = vmax.f32 %v3401_v42, 0.0  ;;  %v3678_v42 = vmax.f32 %v3391_v37, 0.0 }
 0x3e7   : > { %v3404_v5 = vpop.f32.mrf.mxu0  ;;  %v3450_v24 = vadd.f32 %v3449_v58, %v8800_v1 }
 0x3e8   : > { %v3453_v46 = vpop.f32.mrf.mxu1  ;;  %v3405_v30 = vadd.f32 %v3404_v5, %v8777_v20  ;;  %v3711_v2 = vmax.f32 %v3403_v40, 0.0  ;;  %v3448_v40 = vadd.f32 %v3447_v23, %v8800_v1 }
 0x3e9   : > { %v3406_v33 = vpop.f32.mrf.mxu0  ;;  %v3454_v43 = vadd.f32 %v3453_v46, %v8775_v35  ;;  %v3444_v46 = vadd.f32 %v3443_v49, %v8789_v29 }
 0x3ea   : > { %v3455_v51 = vpop.f32.mrf.mxu1  ;;  %v3407_v38 = vadd.f32 %v3406_v33, %v8777_v20  ;;  %v3726_v60 = vmax.f32 %v3405_v30, 0.0  ;;  %v3694_v30 = vmax.f32 %v3395_v36, 0.0  ;;  %v3743_v33 = vpack.c.bf16 %v3695_v21, %v3679_v25 }
 0x3eb   : > { %v3456_v56 = vadd.f32 %v3455_v51, %v8775_v35  ;;  %v3697_v51 = vmax.f32 %v3450_v24, 0.0  ;;  %v3712_v14 = vmax.f32 %v3454_v43, 0.0  ;;  %v3680_v23 = vmax.f32 %v3444_v46, 0.0 }
 0x3ec   : > { %v3457_v34 = vpop.f32.mrf.mxu1  ;;  %v3727_v27 = vmax.f32 %v3407_v38, 0.0  ;;  %v3758_v53 = vpack.c.bf16 %v3726_v60, %v3710_v59  ;;  %v3742_v16 = vpack.c.bf16 %v3694_v30, %v3678_v42  ;;  %v3696_v60 = vmax.f32 %v3448_v40, 0.0 }
 0x3ed   : > { %v3458_v32 = vadd.f32 %v3457_v34, %v8777_v20  ;;  %v3713_v38 = vmax.f32 %v3456_v56, 0.0 }
 0x3ee   : > { %v3759_v3 = vpack.c.bf16 %v3727_v27, %v3711_v2  ;;  %v3459_v5 = vpop.f32.mrf.mxu1  ;;  %v3681_v2 = vmax.f32 %v3446_v13, 0.0  ;;  %v3744_v37 = vpack.c.bf16 %v3696_v60, %v3680_v23 }
 0x3ef   : > { %v3460_v44 = vadd.f32 %v3459_v5, %v8777_v20  ;;  %v3728_v58 = vmax.f32 %v3458_v32, 0.0 }
 0x3f0   : > { %3864 = vmatprep.subr.bf16.mxu0 %v3759_v3  ;;  %v3745_v59 = vpack.c.bf16 %v3697_v51, %v3681_v2 }
 0x3f1   : > { %v3729_v34 = vmax.f32 %v3460_v44, 0.0  ;;  %3865 = vmatpush1.bf16.msra.mxu0 %v3758_v53  ;;  %v3760_v27 = vpack.c.bf16 %v3728_v58, %v3712_v14 }
 0x3f2   : > { %3866 = vmatprep.subr.bf16.mxu0 %v3743_v33 }
 0x3f3   : > { %v3761_v36 = vpack.c.bf16 %v3729_v34, %v3713_v38 }
 0x3f5   : > { %3905 = vmatprep.subr.bf16.mxu1 %v3761_v36  ;;  %3867 = vmatpush1.bf16.msra.mxu0 %v3742_v16 }
 0x3f6   : > { %3906 = vmatpush1.bf16.msra.mxu1 %v3760_v27 }
 0x3f7   : > { %3907 = vmatprep.subr.bf16.mxu1 %v3745_v59 }
 0x3f8   : > { %6832 = vmatmul.mubr.msk.bf16.vlgmr.msra.gmra.mxu0 %vm1619_vm0, %v8792_v61 }
 0x3f9   : > { %3966 = vmatprep.mubr.bf16.mxu0 %v11836_v17 }
 0x3fa   : > { %3908 = vmatpush1.bf16.msra.mxu1 %v3744_v37 }
 0x3fd   : > { %6833 = vmatmul.mubr.msk.bf16.vlgmr.msra.gmra.mxu1 %vm1619_vm0, %v8792_v61 }
 0x3fe   : > { %v3496_v49 = vpop.f32.mrf.mxu0  ;;  %4007 = vmatprep.mubr.bf16.mxu1 %v11836_v17 }
 0x3ff   : > { %v3497_v34 = vadd.f32 %v3496_v49, %v8789_v29 }
 0x400   : > { %v3498_v21 = vpop.f32.mrf.mxu0 }
 0x401   : > { %v3549_v24 = vpop.f32.mrf.mxu1  ;;  %v3499_v42 = vadd.f32 %v3498_v21, %v8789_v29 }
 0x402   : > { %v3500_v56 = vpop.f32.mrf.mxu0 }
 0x403   : > { %v3551_v32 = vpop.f32.mrf.mxu1  ;;  %v3501_v46 = vadd.f32 %v3500_v56, %v8800_v1 }
 0x404   : > { %v3502_v25 = vpop.f32.mrf.mxu0  ;;  %v3552_v49 = vadd.f32 %v3551_v32, %v8789_v29 }
 0x405   : > { %v3553_v43 = vpop.f32.mrf.mxu1  ;;  %v3503_v44 = vadd.f32 %v3502_v25, %v8800_v1 }
 0x406   : > { %v3506_v3 = vpop.f32.mrf.mxu0  ;;  %v3685_v22 = vmax.f32 %v3552_v49, 0.0 }
 0x407   : > { %v3555_v5 = vpop.f32.mrf.mxu1  ;;  %v3507_v51 = vadd.f32 %v3506_v3, %v8775_v35  ;;  %v3699_v59 = vmax.f32 %v3503_v44, 0.0  ;;  %v3683_v3 = vmax.f32 %v3499_v42, 0.0  ;;  %v3682_v42 = vmax.f32 %v3497_v34, 0.0 }
 0x408   : > { %v3508_v13 = vpop.f32.mrf.mxu0  ;;  %v3556_v16 = vadd.f32 %v3555_v5, %v8800_v1  ;;  %v3554_v5 = vadd.f32 %v3553_v43, %v8800_v1 }
 0x409   : > { %v3559_v30 = vpop.f32.mrf.mxu1  ;;  %v3509_v40 = vadd.f32 %v3508_v13, %v8775_v35  ;;  %v3714_v56 = vmax.f32 %v3507_v51, 0.0 }
 0x40a   : > { %v3510_v53 = vpop.f32.mrf.mxu0  ;;  %v3560_v23 = vadd.f32 %v3559_v30, %v8775_v35  ;;  %v3550_v30 = vadd.f32 %v3549_v24, %v8789_v29  ;;  %v3700_v51 = vmax.f32 %v3554_v5, 0.0 }
 0x40b   : > { %v3561_v33 = vpop.f32.mrf.mxu1  ;;  %v3511_v58 = vadd.f32 %v3510_v53, %v8777_v20  ;;  %v3715_v37 = vmax.f32 %v3509_v40, 0.0  ;;  %v3698_v53 = vmax.f32 %v3501_v46, 0.0  ;;  %v3747_v40 = vpack.c.bf16 %v3699_v59, %v3683_v3 }
 0x40c   : > { %v3512_v38 = vpop.f32.mrf.mxu0  ;;  %v3562_v36 = vadd.f32 %v3561_v33, %v8775_v35 }
 0x40d   : > { %v3563_v14 = vpop.f32.mrf.mxu1  ;;  %v3513_v2 = vadd.f32 %v3512_v38, %v8777_v20  ;;  %v3730_v60 = vmax.f32 %v3511_v58, 0.0  ;;  %v3701_v58 = vmax.f32 %v3556_v16, 0.0  ;;  %v3746_v46 = vpack.c.bf16 %v3698_v53, %v3682_v42 }
 0x40e   : > { %v3564_v27 = vadd.f32 %v3563_v14, %v8777_v20  ;;  %v3717_v28 = vmax.f32 %v3562_v36, 0.0 }
 0x40f   : > { %v3731_v21 = vmax.f32 %v3513_v2, 0.0  ;;  %v3565_v25 = vpop.f32.mrf.mxu1  ;;  %v3762_v14 = vpack.c.bf16 %v3730_v60, %v3714_v56  ;;  %v3716_v2 = vmax.f32 %v3560_v23, 0.0  ;;  %v3749_v43 = vpack.c.bf16 %v3701_v58, %v3685_v22 }
 0x410   : > { %v3566_v13 = vadd.f32 %v3565_v25, %v8777_v20  ;;  %v3732_v38 = vmax.f32 %v3564_v27, 0.0  ;;  %v3684_v27 = vmax.f32 %v3550_v30, 0.0 }
 0x411   : > { %v3763_v33 = vpack.c.bf16 %v3731_v21, %v3715_v37 }
 0x412   : > { %v3733_v44 = vmax.f32 %v3566_v13, 0.0  ;;  %v3764_v25 = vpack.c.bf16 %v3732_v38, %v3716_v2  ;;  %v3748_v16 = vpack.c.bf16 %v3700_v51, %v3684_v27 }
 0x413   : > { %3946 = vmatprep.subr.bf16.mxu0 %v3763_v33 }
 0x414   : > { %v3765_v32 = vpack.c.bf16 %v3733_v44, %v3717_v28  ;;  %3947 = vmatpush1.bf16.msra.mxu0 %v3762_v14 }
 0x415   : > { %3948 = vmatprep.subr.bf16.mxu0 %v3747_v40 }
 0x416   : > { %3987 = vmatprep.subr.bf16.mxu1 %v3765_v32 }
 0x417   : > { %3988 = vmatpush1.bf16.msra.mxu1 %v3764_v25 }
 0x418   : > { %3989 = vmatprep.subr.bf16.mxu1 %v3749_v43  ;;  %3949 = vmatpush1.bf16.msra.mxu0 %v3746_v46 }
 0x41b   : > { %3990 = vmatpush1.bf16.msra.mxu1 %v3748_v16  ;;  %6834 = vmatmul.mubr.msk.bf16.vlgmr.msra.gmra.mxu0 %vm1619_vm0, %v8792_v61 }
 0x41c   : > { %4048 = vmatprep.mubr.bf16.mxu0 %v11836_v17 }
 0x41e   : > { %6835 = vmatmul.mubr.msk.bf16.vlgmr.msra.gmra.mxu1 %vm1619_vm0, %v8792_v61 }
 0x41f   : > { %v3602_v28 = vpop.f32.mrf.mxu0  ;;  %4089 = vmatprep.mubr.bf16.mxu1 %v11836_v17 }
 0x420   : > { %v3603_v43 = vadd.f32 %v3602_v28, %v8789_v29 }
 0x421   : > { %v3604_v24 = vpop.f32.mrf.mxu0 }
 0x422   : > { %v3605_v58 = vadd.f32 %v3604_v24, %v8789_v29  ;;  %v3686_v28 = vmax.f32 %v3603_v43, 0.0 }
 0x423   : > { %v3655_v22 = vpop.f32.mrf.mxu1  ;;  %v3606_v34 = vpop.f32.mrf.mxu0 }
 0x424   : > { %v3607_v44 = vadd.f32 %v3606_v34, %v8800_v1 }
 0x425   : > { %v3657_v36 = vpop.f32.mrf.mxu1  ;;  %v3608_v60 = vpop.f32.mrf.mxu0 }
 0x426   : > { %v3609_v3 = vadd.f32 %v3608_v60, %v8800_v1  ;;  %v3687_v60 = vmax.f32 %v3605_v58, 0.0  ;;  %v3658_v34 = vadd.f32 %v3657_v36, %v8789_v29 }
 0x427   : > { %v3659_v59 = vpop.f32.mrf.mxu1  ;;  %v3612_v23 = vpop.f32.mrf.mxu0 }
 0x428   : > { %v3613_v53 = vadd.f32 %v3612_v23, %v8775_v35  ;;  %v3703_v30 = vmax.f32 %v3609_v3, 0.0  ;;  %v3660_v3 = vadd.f32 %v3659_v59, %v8800_v1  ;;  %v3689_v58 = vmax.f32 %v3658_v34, 0.0 }
 0x429   : > { %v3661_v37 = vpop.f32.mrf.mxu1  ;;  %v3614_v21 = vpop.f32.mrf.mxu0 }
 0x42a   : > { %v3615_v13 = vadd.f32 %v3614_v21, %v8775_v35  ;;  %v3662_v40 = vadd.f32 %v3661_v37, %v8800_v1  ;;  %v3718_v27 = vmax.f32 %v3613_v53, 0.0  ;;  %v3702_v21 = vmax.f32 %v3607_v44, 0.0 }
 0x42b   : > { %v3665_v49 = vpop.f32.mrf.mxu1  ;;  %v3616_v56 = vpop.f32.mrf.mxu0 }
 0x42c   : > { %v3617_v38 = vadd.f32 %v3616_v56, %v8777_v20  ;;  %v3719_v32 = vmax.f32 %v3615_v13, 0.0  ;;  %v3666_v16 = vadd.f32 %v3665_v49, %v8775_v35  ;;  %v3656_v49 = vadd.f32 %v3655_v22, %v8789_v29 }
 0x42d   : > { %v3667_v5 = vpop.f32.mrf.mxu1  ;;  %v3618_v33 = vpop.f32.mrf.mxu0 }
 0x42e   : > { %v3619_v14 = vadd.f32 %v3618_v33, %v8777_v20  ;;  %v3734_v2 = vmax.f32 %v3617_v38, 0.0  ;;  %v3668_v51 = vadd.f32 %v3667_v5, %v8775_v35  ;;  %v3751_v5 = vpack.c.bf16 %v3703_v30, %v3687_v60 }
 0x42f   : > { %v3669_v42 = vpop.f32.mrf.mxu1  ;;  %v3705_v38 = vmax.f32 %v3662_v40, 0.0  ;;  %v3720_v53 = vmax.f32 %v3666_v16, 0.0  ;;  %v3688_v59 = vmax.f32 %v3656_v49, 0.0 }
 0x430   : > { %v3670_v25 = vadd.f32 %v3669_v42, %v8777_v20  ;;  %v3735_v46 = vmax.f32 %v3619_v14, 0.0  ;;  %v3766_v56 = vpack.c.bf16 %v3734_v2, %v3718_v27  ;;  %v3721_v33 = vmax.f32 %v3668_v51, 0.0 }
 0x431   : > { %v3671_v24 = vpop.f32.mrf.mxu1  ;;  %v3750_v42 = vpack.c.bf16 %v3702_v21, %v3686_v28 }
 0x432   : > { %v3767_v23 = vpack.c.bf16 %v3735_v46, %v3719_v32  ;;  %v3672_v37 = vadd.f32 %v3671_v24, %v8777_v20  ;;  %v3736_v13 = vmax.f32 %v3670_v25, 0.0  ;;  %v3704_v32 = vmax.f32 %v3660_v3, 0.0 }
 0x433   : > { %v3753_v46 = vpack.c.bf16 %v3705_v38, %v3689_v58 }
 0x434   : > { %v3737_v14 = vmax.f32 %v3672_v37, 0.0  ;;  %4028 = vmatprep.subr.bf16.mxu0 %v3767_v23  ;;  %v3768_v44 = vpack.c.bf16 %v3736_v13, %v3720_v53  ;;  %v3752_v30 = vpack.c.bf16 %v3704_v32, %v3688_v59 }
 0x435   : > { %4029 = vmatpush1.bf16.msra.mxu0 %v3766_v56 }
 0x436   : > { %v3769_v36 = vpack.c.bf16 %v3737_v14, %v3721_v33  ;;  %4030 = vmatprep.subr.bf16.mxu0 %v3751_v5 }
 0x438   : > { %4069 = vmatprep.subr.bf16.mxu1 %v3769_v36 }
 0x439   : > { %4070 = vmatpush1.bf16.msra.mxu1 %v3768_v44  ;;  %4031 = vmatpush1.bf16.msra.mxu0 %v3750_v42 }
 0x43a   : > { %4071 = vmatprep.subr.bf16.mxu1 %v3753_v46 }
 0x43c   : > { %6836 = vmatmul.mubr.msk.bf16.vlgmr.msra.gmra.mxu0 %vm1619_vm0, %v8792_v61 }
 0x43d   : > { %4072 = vmatpush1.bf16.msra.mxu1 %v3752_v30  ;;  %4898 = vmatprep.mubr.bf16.mxu0 %v11836_v17 }
 0x440   : > { %6837 = vmatmul.mubr.msk.bf16.vlgmr.msra.gmra.mxu1 %vm1619_vm0, %v8792_v61 }
 0x441   : > { %4951 = vmatprep.mubr.bf16.mxu1 %v11836_v17 }
 0x491   : > { %v3804_v22 = vpop.f32.mrf.mxu0 }
 0x492   : > { %v3805_v40 = vadd.f32 %v3804_v22, %v8890_v62 }
 0x493   : > { %v3806_v2 = vpop.f32.mrf.mxu0 }
 0x494   : > { %v4098_v51 = vsub.f32 0.0, %v3805_v40  ;;  %v3807_v25 = vadd.f32 %v3806_v2, %v8890_v62 }
 0x495   : > { %v3808_v43 = vpop.f32.mrf.mxu0 }
 0x496   : > { %v4114_v27 = vmul.f32 1.442695, %v4098_v51  ;;  %v3845_v16 = vpop.f32.mrf.mxu1  ;;  %v4099_v24 = vsub.f32 0.0, %v3807_v25 }
 0x497   : > { %v3846_v60 = vadd.f32 %v3845_v16, %v8890_v62  ;;  %v3809_v34 = vpop.f32.mrf.mxu0 }
 0x498   : > { %7001 = vpow2.f32 %v4114_v27  ;;  %v4116_v23 = vmul.f32 1.442695, %v4099_v24  ;;  %v3847_v37 = vpop.f32.mrf.mxu1 }
 0x499   : > { %v4100_v21 = vsub.f32 0.0, %v3846_v60  ;;  %v3848_v3 = vadd.f32 %v3847_v37, %v8890_v62 }
 0x49a   : > { %7003 = vpow2.f32 %v4116_v23  ;;  %v3849_v56 = vpop.f32.mrf.mxu1 }
 0x49b   : > { %v4101_v13 = vsub.f32 0.0, %v3848_v3  ;;  %v4118_v38 = vmul.f32 1.442695, %v4100_v21 }
 0x49c   : > { %v3850_v5 = vpop.f32.mrf.mxu1 }
 0x49d   : > { %v4120_v33 = vmul.f32 1.442695, %v4101_v13 }
 0x49f   : > { %7005 = vpow2.f32 %v4120_v33 }
 0x4a0   : > { %7007 = vpow2.f32 %v4118_v38 }
 0x4a5   : > { %v7002_v14 = vpop.eup %7001 }
 0x4a6   : > { %v4146_v28 = vadd.f32 1.0, %v7002_v14 }
 0x4a7   : > { %v7004_v49 = vpop.eup %7003 }
 0x4a8   : > { %7009 = vrcp.f32 %v4146_v28  ;;  %v4147_v53 = vadd.f32 1.0, %v7004_v49 }
 0x4aa   : > { %7011 = vrcp.f32 %v4147_v53 }
 0x4ac   : > { %v7006_v58 = vpop.eup %7005 }
 0x4ad   : > { %v4149_v36 = vadd.f32 1.0, %v7006_v58  ;;  %v7008_v42 = vpop.eup %7007 }
 0x4ae   : > { %v4148_v32 = vadd.f32 1.0, %v7008_v42 }
 0x4af   : > { %7013 = vrcp.f32 %v4149_v36 }
 0x4b0   : > { %7015 = vrcp.f32 %v4148_v32 }
 0x4b5   : > { %v7010_v44 = vpop.eup %7009 }
 0x4b6   : > { %v9696_v46 = vrot.slane %v7010_v44, %v11839_v19  ;;  %v9699_v59 = vrot.slane %v7010_v44, %v11807_v55  ;;  %v9702_v40 = vrot.slane %v7010_v44, %v11808_v48 }
 0x4b7   : > { %v7012_v30 = vpop.eup %7011 }
 0x4b8   : > { %v3886_v22 = vpop.f32.mrf.mxu0  ;;  %v9706_v51 = vrot.slane %v7012_v30, %v11839_v19  ;;  %v9709_v25 = vrot.slane %v7012_v30, %v11807_v55  ;;  %v9712_v43 = vrot.slane %v7012_v30, %v11808_v48  ;;  %v4290_v16 = vmul.f32 %v9696_v46, %v11703_v0 }
 0x4b9   : > { %v3887_v2 = vadd.f32 %v3886_v22, %v8890_v62  ;;  %v4306_v24 = vmul.f32 %v9696_v46, %v11812_v31  ;;  %v4418_v60 = vmul.f32 %v9699_v59, %v11813_v45  ;;  %v4434_v34 = vmul.f32 %v9699_v59, %v7762_v9 }
 0x4ba   : > { %v3888_v27 = vpop.f32.mrf.mxu0  ;;  %v4291_v21 = vmul.f32 %v9706_v51, %v11703_v0  ;;  %v4307_v3 = vmul.f32 %v9706_v51, %v11812_v31  ;;  %v4419_v13 = vmul.f32 %v9709_v25, %v11813_v45  ;;  %v4435_v5 = vmul.f32 %v9709_v25, %v7762_v9 }
 0x4bb   : > { %v4102_v23 = vsub.f32 0.0, %v3887_v2  ;;  %v3889_v37 = vadd.f32 %v3888_v27, %v8890_v62  ;;  %v4611_v38 = vmul.f32 %v9712_v43, %v11706_v10  ;;  %v4627_v33 = vmul.f32 %v9712_v43, %v11714_v15 }
 0x4bc   : > { %v3890_v56 = vpop.f32.mrf.mxu0  ;;  %v7014_v14 = vpop.eup %7013  ;;  %v4482_v58 = vadd.f32 %v4418_v60, %v4290_v16  ;;  %v4498_v36 = vadd.f32 %v4434_v34, %v4306_v24  ;;  %v4483_v44 = vadd.f32 %v4419_v13, %v4291_v21  ;;  %v4499_v30 = vadd.f32 %v4435_v5, %v4307_v3 }
 0x4bd   : > { %v4122_v28 = vmul.f32 1.442695, %v4102_v23  ;;  %v3927_v49 = vpop.f32.mrf.mxu1  ;;  %v4103_v53 = vsub.f32 0.0, %v3889_v37  ;;  %v9737_v22 = vrot.slane %v7014_v14, %v11839_v19  ;;  %v9740_v56 = vrot.slane %v7014_v14, %v11807_v55 }
 0x4be   : > { %v3928_v42 = vadd.f32 %v3927_v49, %v8890_v62  ;;  %v3891_v32 = vpop.f32.mrf.mxu0  ;;  %v9743_v23 = vrot.slane %v7014_v14, %v11808_v48  ;;  %v4675_v24 = vadd.f32 %v4611_v38, %v4483_v44  ;;  %v4691_v60 = vadd.f32 %v4627_v33, %v4499_v30 }
 0x4bf   : > { %7017 = vpow2.f32 %v4122_v28  ;;  %v4124_v2 = vmul.f32 1.442695, %v4103_v53  ;;  %v3929_v27 = vpop.f32.mrf.mxu1  ;;  %v4293_v21 = vmul.f32 %v9737_v22, %v11703_v0  ;;  %v4309_v3 = vmul.f32 %v9737_v22, %v11812_v31  ;;  %v7016_v53 = vpop.eup %7015 }
 0x4c0   : > { %v4104_v37 = vsub.f32 0.0, %v3928_v42  ;;  %v3930_v16 = vadd.f32 %v3929_v27, %v8890_v62  ;;  %v4421_v13 = vmul.f32 %v9740_v56, %v11813_v45  ;;  %v4739_v14 = vadd.f32 %v4675_v24, %v11840_v18 }
 0x4c1   : > { %7019 = vpow2.f32 %v4124_v2  ;;  %v3931_v34 = vpop.f32.mrf.mxu1  ;;  %v4755_v49 = vadd.f32 %v4691_v60, %v11841_v7  ;;  %v4437_v33 = vmul.f32 %v9740_v56, %v7762_v9  ;;  %v4613_v32 = vmul.f32 %v9743_v23, %v11706_v10 }
 0x4c2   : > { %v4126_v5 = vmul.f32 1.442695, %v4104_v37  ;;  %v4105_v28 = vsub.f32 0.0, %v3930_v16  ;;  %v4485_v42 = vadd.f32 %v4421_v13, %v4293_v21  ;;  %v4629_v44 = vmul.f32 %v9743_v23, %v11714_v15  ;;  %v11909_v13 = vld [vmem:[#allocation86_spill] sm:$0xff] }
 0x4c3   : > { %v3932_v38 = vpop.f32.mrf.mxu1  ;;  %v4803_v2 = vmax.f32 %v4739_v14, 0.0  ;;  %v4819_v27 = vmax.f32 %v4755_v49, 0.0  ;;  %v4501_v37 = vadd.f32 %v4437_v33, %v4309_v3  ;;  %v4610_v7 = vmul.f32 %v9702_v40, %v11706_v10 }
 0x4c4   : > { %7021 = vpow2.f32 %v4126_v5  ;;  %v4128_v30 = vmul.f32 1.442695, %v4105_v28  ;;  %v4677_v18 = vadd.f32 %v4613_v32, %v4485_v42  ;;  %v4626_v16 = vmul.f32 %v9702_v40, %v11714_v15  ;;  %v11910_v42 = vld [vmem:[#allocation84_spill] sm:$0xff] }
 0x4c5   : > { %v4851_v24 = vpack.c.bf16 %v4819_v27, %v4803_v2  ;;  %v9765_v60 = vrot.slane %v7016_v53, %v11839_v19  ;;  %v9768_v34 = vrot.slane %v7016_v53, %v11807_v55  ;;  %v4693_v21 = vadd.f32 %v4629_v44, %v4501_v37 }
 0x4c6   : > { %7023 = vpow2.f32 %v4128_v30  ;;  %v4741_v5 = vadd.f32 %v4677_v18, %v11909_v13  ;;  %v4674_v28 = vadd.f32 %v4610_v7, %v4482_v58  ;;  %v4690_v3 = vadd.f32 %v4626_v16, %v4498_v36  ;;  %v11911_v30 = vld [vmem:[#allocation60_spill] sm:$0xff]  ;;  %v11912_v58 = vld [vmem:[#allocation82_spill] sm:$0xff] }
 0x4c7   : > { %4878 = vmatprep.subr.bf16.mxu0 %v4851_v24  ;;  %v4292_v14 = vmul.f32 %v9765_v60, %v11703_v0  ;;  %v4308_v49 = vmul.f32 %v9765_v60, %v11812_v31  ;;  %v4420_v38 = vmul.f32 %v9768_v34, %v11813_v45  ;;  %v4436_v33 = vmul.f32 %v9768_v34, %v7762_v9 }
 0x4c8   : > { %v4757_v32 = vadd.f32 %v4693_v21, %v11910_v42  ;;  %v4805_v44 = vmax.f32 %v4741_v5, 0.0  ;;  %v4738_v2 = vadd.f32 %v4674_v28, %v11911_v30  ;;  %v4754_v36 = vadd.f32 %v4690_v3, %v11912_v58 }
 0x4c9   : > { %v4484_v27 = vadd.f32 %v4420_v38, %v4292_v14  ;;  %v4500_v37 = vadd.f32 %v4436_v33, %v4308_v49  ;;  %v9783_v18 = vrot.slane %v7016_v53, %v11808_v48  ;;  %v4259_v7 = vmul.f32 %v9706_v51, %v11726_v63 }
 0x4ca   : > { %v4821_v16 = vmax.f32 %v4757_v32, 0.0  ;;  %v4802_v24 = vmax.f32 %v4738_v2, 0.0  ;;  %v4818_v13 = vmax.f32 %v4754_v36, 0.0  ;;  %v4275_v61 = vmul.f32 %v9706_v51, %v7938_v6 }
 0x4cb   : > { %v4612_v5 = vmul.f32 %v9783_v18, %v11706_v10  ;;  %v4628_v28 = vmul.f32 %v9783_v18, %v11714_v15  ;;  %v4387_v53 = vmul.f32 %v9709_v25, %v7958_v41  ;;  %v4403_v3 = vmul.f32 %v9709_v25, %v11846_v57 }
 0x4cc   : > { %v7018_v21 = vpop.eup %7017  ;;  %v4853_v49 = vpack.c.bf16 %v4821_v16, %v4805_v44  ;;  %v4850_v38 = vpack.c.bf16 %v4818_v13, %v4802_v24  ;;  %v4579_v33 = vmul.f32 %v9712_v43, %v11847_v54  ;;  %v4595_v36 = vmul.f32 %v9712_v43, %v11848_v52  ;;  %v11913_v44 = vld [vmem:[#allocation61_spill] sm:$0xff]  ;;  %v11914_v24 = vld [vmem:[#allocation66_spill] sm:$0xff] }
 0x4cd   : > { %v4150_v14 = vadd.f32 1.0, %v7018_v21  ;;  %v4676_v42 = vadd.f32 %v4612_v5, %v4484_v27  ;;  %v4692_v32 = vadd.f32 %v4628_v28, %v4500_v37  ;;  %v4451_v30 = vadd.f32 %v4387_v53, %v4259_v7  ;;  %v11915_v53 = vld [vmem:[#allocation73_spill] sm:$0xff] }
 0x4ce   : > { %v7020_v51 = vpop.eup %7019  ;;  %v4467_v2 = vadd.f32 %v4403_v3, %v4275_v61  ;;  %4931 = vmatprep.subr.bf16.mxu1 %v4853_v49  ;;  %4879 = vmatpush1.bf16.msra.mxu0 %v4850_v38  ;;  %v4261_v25 = vmul.f32 %v9737_v22, %v11726_v63  ;;  %v4277_v27 = vmul.f32 %v9737_v22, %v7938_v6  ;;  %v11916_v49 = vld [vmem:[#allocation88_spill] sm:$0xff] }
 0x4cf   : > { %7025 = vrcp.f32 %v4150_v14  ;;  %v4151_v58 = vadd.f32 1.0, %v7020_v51  ;;  %v4740_v16 = vadd.f32 %v4676_v42, %v11913_v44  ;;  %v4756_v13 = vadd.f32 %v4692_v32, %v11914_v24 }
 0x4d0   : > { %v4643_v21 = vadd.f32 %v4579_v33, %v4451_v30  ;;  %v4659_v61 = vadd.f32 %v4595_v36, %v4467_v2  ;;  %v4389_v7 = vmul.f32 %v9740_v56, %v7958_v41  ;;  %v4405_v43 = vmul.f32 %v9740_v56, %v11846_v57 }
 0x4d1   : > { %v7022_v37 = vpop.eup %7021  ;;  %7027 = vrcp.f32 %v4151_v58  ;;  %v4804_v5 = vmax.f32 %v4740_v16, 0.0  ;;  %v4820_v28 = vmax.f32 %v4756_v13, 0.0  ;;  %v4581_v22 = vmul.f32 %v9743_v23, %v11847_v54 }
 0x4d2   : > { %v4707_v3 = vadd.f32 %v4643_v21, %v11915_v53  ;;  %v4723_v38 = vadd.f32 %v4659_v61, %v11916_v49  ;;  %v4453_v33 = vadd.f32 %v4389_v7, %v4261_v25  ;;  %v4469_v51 = vadd.f32 %v4405_v43, %v4277_v27  ;;  %v11917_v27 = vld [vmem:[#allocation74_spill] sm:$0xff] }
 0x4d3   : > { %v7024_v14 = vpop.eup %7023  ;;  %v4152_v42 = vadd.f32 1.0, %v7022_v37  ;;  %v4852_v30 = vpack.c.bf16 %v4820_v28, %v4804_v5  ;;  %v4597_v56 = vmul.f32 %v9743_v23, %v11848_v52  ;;  %v4258_v44 = vmul.f32 %v9696_v46, %v11726_v63  ;;  %v11918_v5 = vld [vmem:[#allocation59_spill] sm:$0xff] }
 0x4d4   : > { %v4153_v32 = vadd.f32 1.0, %v7024_v14  ;;  %v4771_v2 = vmax.f32 %v4707_v3, 0.0  ;;  %v4787_v58 = vmax.f32 %v4723_v38, 0.0  ;;  %v4645_v36 = vadd.f32 %v4581_v22, %v4453_v33 }
 0x4d5   : > { %4932 = vmatpush1.bf16.msra.mxu1 %v4852_v30  ;;  %v4274_v25 = vmul.f32 %v9696_v46, %v7938_v6  ;;  %v4386_v16 = vmul.f32 %v9699_v59, %v7958_v41  ;;  %v4402_v24 = vmul.f32 %v9699_v59, %v11846_v57  ;;  %v4661_v21 = vadd.f32 %v4597_v56, %v4469_v51 }
 0x4d6   : > { %7029 = vrcp.f32 %v4153_v32  ;;  %v4835_v13 = vpack.c.bf16 %v4787_v58, %v4771_v2  ;;  %v4709_v37 = vadd.f32 %v4645_v36, %v11917_v27  ;;  %v4578_v23 = vmul.f32 %v9702_v40, %v11847_v54  ;;  %v11919_v2 = vld [vmem:[#allocation75_spill] sm:$0xff]  ;;  %v11920_v58 = vld [vmem:[#allocation89_spill] sm:$0xff] }
 0x4d7   : > { %v4450_v61 = vadd.f32 %v4386_v16, %v4258_v44  ;;  %v4466_v7 = vadd.f32 %v4402_v24, %v4274_v25  ;;  %v4594_v43 = vmul.f32 %v9702_v40, %v11848_v52  ;;  %v4260_v46 = vmul.f32 %v9765_v60, %v11726_v63 }
 0x4d8   : > { %4880 = vmatprep.subr.bf16.mxu0 %v4835_v13  ;;  %v4725_v28 = vadd.f32 %v4661_v21, %v11918_v5  ;;  %v4773_v53 = vmax.f32 %v4709_v37, 0.0  ;;  %v4276_v59 = vmul.f32 %v9765_v60, %v7938_v6  ;;  %v4388_v3 = vmul.f32 %v9768_v34, %v7958_v41 }
 0x4d9   : > { %7031 = vrcp.f32 %v4152_v42  ;;  %v4642_v14 = vadd.f32 %v4578_v23, %v4450_v61  ;;  %v4658_v49 = vadd.f32 %v4594_v43, %v4466_v7  ;;  %v4404_v38 = vmul.f32 %v9768_v34, %v11846_v57 }
 0x4da   : > { %v4789_v33 = vmax.f32 %v4725_v28, 0.0  ;;  %v4452_v51 = vadd.f32 %v4388_v3, %v4260_v46  ;;  %v4580_v22 = vmul.f32 %v9783_v18, %v11847_v54  ;;  %v4596_v32 = vmul.f32 %v9783_v18, %v11848_v52  ;;  %v11921_v46 = vld [vmem:[#allocation77_spill] sm:$0xff] }
 0x4db   : > { %v3968_v40 = vpop.f32.mrf.mxu0  ;;  %v4706_v42 = vadd.f32 %v4642_v14, %v11919_v2  ;;  %v4722_v56 = vadd.f32 %v4658_v49, %v11920_v58  ;;  %v4468_v36 = vadd.f32 %v4404_v38, %v4276_v59 }
 0x4dc   : > { %v9843_v30 = vpop.eup %7025  ;;  %v3969_v60 = vadd.f32 %v3968_v40, %v8890_v62  ;;  %v4837_v34 = vpack.c.bf16 %v4789_v33, %v4773_v53  ;;  %v4644_v25 = vadd.f32 %v4580_v22, %v4452_v51  ;;  %v11922_v51 = vld [vmem:[#allocation30_spill] sm:$0xff] }
 0x4dd   : > { %v3970_v44 = vpop.f32.mrf.mxu0  ;;  %v9850_v16 = vrot.slane %v9843_v30, %v11839_v19  ;;  %v9854_v24 = vrot.slane %v9843_v30, %v11807_v55  ;;  %v4770_v37 = vmax.f32 %v4706_v42, 0.0  ;;  %v4786_v23 = vmax.f32 %v4722_v56, 0.0 }
 0x4de   : > { %v7028_v18 = vpop.eup %7027  ;;  %v4106_v13 = vsub.f32 0.0, %v3969_v60  ;;  %v4009_v21 = vpop.f32.mrf.mxu1  ;;  %v3971_v27 = vadd.f32 %v3970_v44, %v8890_v62  ;;  %4933 = vmatprep.subr.bf16.mxu1 %v4837_v34  ;;  %v4660_v43 = vadd.f32 %v4596_v32, %v4468_v36  ;;  %v4708_v5 = vadd.f32 %v4644_v25, %v11921_v46 }
 0x4df   : > { %v4010_v61 = vadd.f32 %v4009_v21, %v8890_v62  ;;  %v3972_v7 = vpop.f32.mrf.mxu0  ;;  %v9860_v28 = vrot.slane %v7028_v18, %v11839_v19  ;;  %v4834_v14 = vpack.c.bf16 %v4786_v23, %v4770_v37  ;;  %v9863_v49 = vrot.slane %v7028_v18, %v11807_v55 }
 0x4e0   : > { %v4130_v53 = vmul.f32 1.442695, %v4106_v13  ;;  %v4107_v59 = vsub.f32 0.0, %v3971_v27  ;;  %v4011_v3 = vpop.f32.mrf.mxu1  ;;  %v4724_v22 = vadd.f32 %v4660_v43, %v11922_v51  ;;  %v4772_v60 = vmax.f32 %v4708_v5, 0.0 }
 0x4e1   : > { %v4108_v38 = vsub.f32 0.0, %v4010_v61  ;;  %v4012_v40 = vadd.f32 %v4011_v3, %v8890_v62  ;;  %v3973_v33 = vpop.f32.mrf.mxu0  ;;  %4881 = vmatpush1.bf16.msra.mxu0 %v4834_v14  ;;  %v4295_v42 = vmul.f32 %v9860_v28, %v11703_v0  ;;  %v4311_v58 = vmul.f32 %v9860_v28, %v11812_v31 }
 0x4e2   : > { %7033 = vpow2.f32 %v4130_v53  ;;  %v4132_v32 = vmul.f32 1.442695, %v4107_v59  ;;  %v4013_v2 = vpop.f32.mrf.mxu1  ;;  %v4788_v34 = vmax.f32 %v4724_v22, 0.0  ;;  %v4423_v25 = vmul.f32 %v9863_v49, %v11813_v45 }
 0x4e3   : > { %v7030_v56 = vpop.eup %7029  ;;  %v4134_v36 = vmul.f32 1.442695, %v4108_v38  ;;  %v4109_v44 = vsub.f32 0.0, %v4012_v40  ;;  %v4439_v21 = vmul.f32 %v9863_v49, %v7762_v9  ;;  %v9876_v27 = vrot.slane %v7028_v18, %v11808_v48 }
 0x4e4   : > { %7035 = vpow2.f32 %v4132_v32  ;;  %v4014_v13 = vpop.f32.mrf.mxu1  ;;  %v9879_v37 = vrot.slane %v7030_v56, %v11839_v19  ;;  %v4836_v61 = vpack.c.bf16 %v4788_v34, %v4772_v60  ;;  %6838 = vmatmul.mubr.msk.bf16.vlgmr.msra.gmra.mxu0 %vm1619_vm0, %v11859_v50  ;;  %v4487_v7 = vadd.f32 %v4423_v25, %v4295_v42  ;;  %v11923_v42 = vld [vmem:[#allocation64_spill] sm:$0xff] }
 0x4e5   : > { %7037 = vpow2.f32 %v4134_v36  ;;  %v4136_v23 = vmul.f32 1.442695, %v4109_v44  ;;  %4908 = vmatprep.mubr.bf16.mxu0 %v11836_v17  ;;  %v4503_v43 = vadd.f32 %v4439_v21, %v4311_v58  ;;  %v4615_v46 = vmul.f32 %v9876_v27, %v11706_v10 }
 0x4e6   : > { %v4631_v18 = vmul.f32 %v9876_v27, %v11714_v15  ;;  %v4297_v5 = vmul.f32 %v9879_v37, %v11703_v0  ;;  %v7032_v53 = vpop.eup %7031  ;;  %4934 = vmatpush1.bf16.msra.mxu1 %v4836_v61  ;;  %v4313_v59 = vmul.f32 %v9879_v37, %v11812_v31  ;;  %v9893_v3 = vrot.slane %v7030_v56, %v11807_v55 }
 0x4e7   : > { %7039 = vpow2.f32 %v4136_v23  ;;  %v9896_v14 = vrot.slane %v7030_v56, %v11808_v48  ;;  %v4679_v38 = vadd.f32 %v4615_v46, %v4487_v7  ;;  %v4294_v33 = vmul.f32 %v9850_v16, %v11703_v0  ;;  %v11924_v56 = vld [vmem:[#allocation67_spill] sm:$0xff] }
 0x4e8   : > { %v4695_v40 = vadd.f32 %v4631_v18, %v4503_v43  ;;  %v4310_v51 = vmul.f32 %v9850_v16, %v11812_v31  ;;  %v4425_v22 = vmul.f32 %v9893_v3, %v11813_v45  ;;  %v4441_v60 = vmul.f32 %v9893_v3, %v7762_v9 }
 0x4e9   : > { %v4617_v32 = vmul.f32 %v9896_v14, %v11706_v10  ;;  %v4633_v2 = vmul.f32 %v9896_v14, %v11714_v15  ;;  %6840 = vmatmul.mubr.msk.bf16.vlgmr.msra.gmra.mxu1 %vm1619_vm0, %v11859_v50  ;;  %v4743_v58 = vadd.f32 %v4679_v38, %v11923_v42  ;;  %v4422_v44 = vmul.f32 %v9854_v24, %v11813_v45 }
 0x4ea   : > { %v4759_v36 = vadd.f32 %v4695_v40, %v11924_v56  ;;  %v4438_v34 = vmul.f32 %v9854_v24, %v7762_v9  ;;  %4961 = vmatprep.mubr.bf16.mxu1 %v11836_v17  ;;  %v4489_v25 = vadd.f32 %v4425_v22, %v4297_v5  ;;  %v4505_v13 = vadd.f32 %v4441_v60, %v4313_v59  ;;  %v11925_v60 = vld [vmem:[#allocation65_spill] sm:$0xff] }
 0x4eb   : > { %v9921_v21 = vrot.slane %v9843_v30, %v11808_v48  ;;  %v9924_v23 = vrot.slane %v7032_v53, %v11839_v19  ;;  %v4807_v61 = vmax.f32 %v4743_v58, 0.0  ;;  %v4486_v43 = vadd.f32 %v4422_v44, %v4294_v33 }
 0x4ec   : > { %v4823_v7 = vmax.f32 %v4759_v36, 0.0  ;;  %v4502_v46 = vadd.f32 %v4438_v34, %v4310_v51  ;;  %6839 = vmatmul.mubr.msk.bf16.gmra.mxu0 %vm1619_vm0, %v11864_v26  ;;  %v4681_v18 = vadd.f32 %v4617_v32, %v4489_v25  ;;  %v4697_v38 = vadd.f32 %v4633_v2, %v4505_v13 }
 0x4ed   : > { %v4614_v5 = vmul.f32 %v9921_v21, %v11706_v10  ;;  %v4630_v59 = vmul.f32 %v9921_v21, %v11714_v15  ;;  %v4296_v40 = vmul.f32 %v9924_v23, %v11703_v0  ;;  %v4312_v22 = vmul.f32 %v9924_v23, %v11812_v31  ;;  %5004 = vmatprep.mubr.bf16.mxu0 %v11836_v17 }
 0x4ee   : > { %v4855_v30 = vpack.c.bf16 %v4823_v7, %v4807_v61  ;;  %v9937_v33 = vrot.slane %v7032_v53, %v11807_v55  ;;  %v4745_v32 = vadd.f32 %v4681_v18, %v11925_v60  ;;  %v4761_v2 = vadd.f32 %v4697_v38, %v11863_v4  ;;  %v11926_v7 = vld [vmem:[#allocation71_spill] sm:$0xff]  ;;  %v11927_v60 = vld [vmem:[#allocation70_spill] sm:$0xff] }
 0x4ef   : > { %v7034_v51 = vpop.eup %7033  ;;  %v4678_v42 = vadd.f32 %v4614_v5, %v4486_v43  ;;  %v4694_v58 = vadd.f32 %v4630_v59, %v4502_v46  ;;  %v9947_v34 = vrot.slane %v7032_v53, %v11808_v48 }
 0x4f0   : > { %v4154_v56 = vadd.f32 1.0, %v7034_v51  ;;  %4984 = vmatprep.subr.bf16.mxu0 %v4855_v30  ;;  %v4424_v36 = vmul.f32 %v9937_v33, %v11813_v45  ;;  %v4440_v44 = vmul.f32 %v9937_v33, %v7762_v9  ;;  %v4809_v13 = vmax.f32 %v4745_v32, 0.0 }
 0x4f1   : > { %v7036_v25 = vpop.eup %7035  ;;  %v4825_v61 = vmax.f32 %v4761_v2, 0.0  ;;  %v4742_v18 = vadd.f32 %v4678_v42, %v11926_v7  ;;  %v4758_v4 = vadd.f32 %v4694_v58, %v11927_v60  ;;  %6841 = vmatmul.mubr.msk.bf16.gmra.mxu1 %vm1619_vm0, %v11864_v26  ;;  %v4616_v2 = vmul.f32 %v9947_v34, %v11706_v10  ;;  %v11928_v60 = vld [vmem:[#allocation85_spill] sm:$0xff] }
 0x4f2   : > { %v7038_v43 = vpop.eup %7037  ;;  %7041 = vrcp.f32 %v4154_v56  ;;  %v4155_v46 = vadd.f32 1.0, %v7036_v25  ;;  %v4488_v38 = vadd.f32 %v4424_v36, %v4296_v40  ;;  %v4504_v5 = vadd.f32 %v4440_v44, %v4312_v22  ;;  %5057 = vmatprep.mubr.bf16.mxu1 %v11836_v17 }
 0x4f3   : > { %v4156_v59 = vadd.f32 1.0, %v7038_v43  ;;  %v4857_v30 = vpack.c.bf16 %v4825_v61, %v4809_v13  ;;  %v4806_v51 = vmax.f32 %v4742_v18, 0.0  ;;  %v4822_v53 = vmax.f32 %v4758_v4, 0.0 }
 0x4f4   : > { %v7040_v32 = vpop.eup %7039  ;;  %7043 = vrcp.f32 %v4155_v46  ;;  %v4632_v42 = vmul.f32 %v9947_v34, %v11714_v15  ;;  %v4263_v58 = vmul.f32 %v9860_v28, %v11726_v63  ;;  %v4279_v56 = vmul.f32 %v9860_v28, %v7938_v6 }
 0x4f5   : > { %7045 = vrcp.f32 %v4156_v59  ;;  %v4157_v40 = vadd.f32 1.0, %v7040_v32  ;;  %5037 = vmatprep.subr.bf16.mxu1 %v4857_v30  ;;  %v4854_v22 = vpack.c.bf16 %v4822_v53, %v4806_v51  ;;  %v4680_v36 = vadd.f32 %v4616_v2, %v4488_v38 }
 0x4f6   : > { %v4696_v44 = vadd.f32 %v4632_v42, %v4504_v5  ;;  %v4391_v25 = vmul.f32 %v9863_v49, %v7958_v41  ;;  %v4407_v13 = vmul.f32 %v9863_v49, %v11846_v57  ;;  %v4583_v61 = vmul.f32 %v9876_v27, %v11847_v54 }
 0x4f7   : > { %7047 = vrcp.f32 %v4157_v40  ;;  %4985 = vmatpush1.bf16.msra.mxu0 %v4854_v22  ;;  %v4599_v7 = vmul.f32 %v9876_v27, %v11848_v52  ;;  %v4265_v18 = vmul.f32 %v9879_v37, %v11726_v63  ;;  %v4744_v28 = vadd.f32 %v4680_v36, %v11867_v11  ;;  %v11929_v40 = vld [vmem:[#allocation32_spill] sm:$0xff] }
 0x4f8   : > { %v4760_v4 = vadd.f32 %v4696_v44, %v11928_v60  ;;  %v4455_v43 = vadd.f32 %v4391_v25, %v4263_v58  ;;  %v4471_v46 = vadd.f32 %v4407_v13, %v4279_v56  ;;  %v4281_v49 = vmul.f32 %v9879_v37, %v7938_v6 }
 0x4f9   : > { %v4393_v38 = vmul.f32 %v9893_v3, %v7958_v41  ;;  %v4409_v5 = vmul.f32 %v9893_v3, %v11846_v57  ;;  %v4585_v27 = vmul.f32 %v9896_v14, %v11847_v54  ;;  %v4808_v59 = vmax.f32 %v4744_v28, 0.0  ;;  %v11930_v3 = vld [vmem:[#allocation94_spill] sm:$0xff] }
 0x4fa   : > { %v4824_v30 = vmax.f32 %v4760_v4, 0.0  ;;  %v4647_v51 = vadd.f32 %v4583_v61, %v4455_v43  ;;  %v4663_v11 = vadd.f32 %v4599_v7, %v4471_v46  ;;  %v4601_v2 = vmul.f32 %v9896_v14, %v11848_v52  ;;  %v11931_v46 = vld [vmem:[#allocation9_spill] sm:$0xff] }
 0x4fb   : > { %v4457_v53 = vadd.f32 %v4393_v38, %v4265_v18  ;;  %v4473_v32 = vadd.f32 %v4409_v5, %v4281_v49  ;;  %v4262_v37 = vmul.f32 %v9850_v16, %v11726_v63  ;;  %v4278_v36 = vmul.f32 %v9850_v16, %v7938_v6  ;;  %v11932_v38 = vld [vmem:[#allocation10_spill] sm:$0xff] }
 0x4fc   : > { %v4050_v42 = vpop.f32.mrf.mxu0  ;;  %v4856_v58 = vpack.c.bf16 %v4824_v30, %v4808_v59  ;;  %v4711_v22 = vadd.f32 %v4647_v51, %v11929_v40  ;;  %v4727_v56 = vadd.f32 %v4663_v11, %v11930_v3  ;;  %v4390_v61 = vmul.f32 %v9854_v24, %v7958_v41 }
 0x4fd   : > { %v4051_v44 = vadd.f32 %v4050_v42, %v8890_v62  ;;  %v4649_v25 = vadd.f32 %v4585_v27, %v4457_v53  ;;  %v4665_v13 = vadd.f32 %v4601_v2, %v4473_v32  ;;  %v4406_v28 = vmul.f32 %v9854_v24, %v11846_v57 }
 0x4fe   : > { %v4052_v14 = vpop.f32.mrf.mxu0  ;;  %5038 = vmatpush1.bf16.msra.mxu1 %v4856_v58  ;;  %v4775_v7 = vmax.f32 %v4711_v22, 0.0  ;;  %v4791_v18 = vmax.f32 %v4727_v56, 0.0  ;;  %v4582_v60 = vmul.f32 %v9921_v21, %v11847_v54  ;;  %v4454_v51 = vadd.f32 %v4390_v61, %v4262_v37 }
 0x4ff   : > { %v9997_v4 = vpop.eup %7041  ;;  %v4110_v16 = vsub.f32 0.0, %v4051_v44  ;;  %v4053_v43 = vadd.f32 %v4052_v14, %v8890_v62  ;;  %v4713_v49 = vadd.f32 %v4649_v25, %v11931_v46  ;;  %v4729_v5 = vadd.f32 %v4665_v13, %v11932_v38 }
 0x500   : > { %v4091_v27 = vpop.f32.mrf.mxu1  ;;  %v4054_v59 = vpop.f32.mrf.mxu0  ;;  %v4839_v30 = vpack.c.bf16 %v4791_v18, %v4775_v7  ;;  %v4470_v11 = vadd.f32 %v4406_v28, %v4278_v36  ;;  %v4598_v24 = vmul.f32 %v9921_v21, %v11848_v52  ;;  %v4646_v44 = vadd.f32 %v4582_v60, %v4454_v51  ;;  %v11933_v18 = vld [vmem:[#allocation12_spill] sm:$0xff] }
 0x501   : > { %v7044_v53 = vpop.eup %7043  ;;  %v4138_v32 = vmul.f32 1.442695, %v4110_v16  ;;  %v4092_v2 = vadd.f32 %v4091_v27, %v8890_v62  ;;  %v4111_v42 = vsub.f32 0.0, %v4053_v43  ;;  %v4777_v58 = vmax.f32 %v4713_v49, 0.0  ;;  %v11934_v16 = vld [vmem:[#allocation91_spill] sm:$0xff] }
 0x502   : > { %v10005_v40 = vpop.eup %7045  ;;  %v4093_v22 = vpop.f32.mrf.mxu1  ;;  %4986 = vmatprep.subr.bf16.mxu0 %v4839_v30  ;;  %v4793_v56 = vmax.f32 %v4729_v5, 0.0  ;;  %v4662_v25 = vadd.f32 %v4598_v24, %v4470_v11  ;;  %v4264_v37 = vmul.f32 %v9924_v23, %v11726_v63  ;;  %v4710_v28 = vadd.f32 %v4646_v44, %v11933_v18 }
 0x503   : > { %v4055_v3 = vpop.f32.mrf.mxu0  ;;  %7049 = vpow2.f32 %v4138_v32  ;;  %v4112_v36 = vsub.f32 0.0, %v4092_v2  ;;  %v4140_v21 = vmul.f32 1.442695, %v4111_v42  ;;  %v4094_v13 = vadd.f32 %v4093_v22, %v8890_v62 }
 0x504   : > { %v7048_v61 = vpop.eup %7047  ;;  %v4095_v14 = vpop.f32.mrf.mxu1  ;;  %v4841_v7 = vpack.c.bf16 %v4793_v56, %v4777_v58  ;;  %v4726_v43 = vadd.f32 %v4662_v25, %v11934_v16  ;;  %v4280_v46 = vmul.f32 %v9924_v23, %v7938_v6  ;;  %v4392_v38 = vmul.f32 %v9937_v33, %v7958_v41 }
 0x505   : > { %v4142_v60 = vmul.f32 1.442695, %v4112_v36  ;;  %7051 = vpow2.f32 %v4140_v21  ;;  %v4113_v49 = vsub.f32 0.0, %v4094_v13  ;;  %v4774_v27 = vmax.f32 %v4710_v28, 0.0  ;;  %v11936_v14 = vld [vmem:[#allocation96_spill] sm:$0xff] }
 0x506   : > { %v4096_v5 = vpop.f32.mrf.mxu1  ;;  %5039 = vmatprep.subr.bf16.mxu1 %v4841_v7  ;;  %v4790_v59 = vmax.f32 %v4726_v43, 0.0  ;;  %v4408_v30 = vmul.f32 %v9937_v33, %v11846_v57  ;;  %v4584_v51 = vmul.f32 %v9947_v34, %v11847_v54  ;;  %v4456_v24 = vadd.f32 %v4392_v38, %v4264_v37  ;;  %v11935_v37 = vld [vmem:[#allocation90_spill] sm:$0xff] }
 0x507   : > { %7053 = vpow2.f32 %v4142_v60  ;;  %v4144_v11 = vmul.f32 1.442695, %v4113_v49  ;;  %v4600_v23 = vmul.f32 %v9947_v34, %v11848_v52  ;;  %v10023_v42 = vrot.slane %v7044_v53, %v11839_v19 }
 0x508   : > { %v4838_v32 = vpack.c.bf16 %v4790_v59, %v4774_v27  ;;  %v4472_v2 = vadd.f32 %v4408_v30, %v4280_v46  ;;  %v10026_v58 = vrot.slane %v7044_v53, %v11807_v55  ;;  %v4648_v22 = vadd.f32 %v4584_v51, %v4456_v24 }
 0x509   : > { %7055 = vpow2.f32 %v4144_v11  ;;  %v10029_v33 = vrot.slane %v7044_v53, %v11808_v48  ;;  %v10032_v3 = vrot.slane %v7048_v61, %v11839_v19  ;;  %v4299_v34 = vmul.f32 %v10023_v42, %v11703_v0 }
 0x50a   : > { %4987 = vmatpush1.bf16.msra.mxu0 %v4838_v32  ;;  %v4664_v56 = vadd.f32 %v4600_v23, %v4472_v2  ;;  %v4315_v44 = vmul.f32 %v10023_v42, %v11812_v31  ;;  %v4427_v25 = vmul.f32 %v10026_v58, %v11813_v45  ;;  %v4712_v36 = vadd.f32 %v4648_v22, %v11935_v37  ;;  %v11937_v32 = vld [vmem:[#allocation19_spill] sm:$0xff] }
 0x50b   : > { %v4443_v53 = vmul.f32 %v10026_v58, %v7762_v9  ;;  %v4619_v21 = vmul.f32 %v10029_v33, %v11706_v10  ;;  %v4635_v13 = vmul.f32 %v10029_v33, %v11714_v15  ;;  %v4301_v28 = vmul.f32 %v10032_v3, %v11703_v0 }
 0x50c   : > { %v4728_v7 = vadd.f32 %v4664_v56, %v11936_v14  ;;  %v4491_v18 = vadd.f32 %v4427_v25, %v4299_v34  ;;  %v4317_v16 = vmul.f32 %v10032_v3, %v11812_v31  ;;  %v4776_v43 = vmax.f32 %v4712_v36, 0.0 }
 0x50d   : > { %6842 = vmatmul.mubr.msk.bf16.vlgmr.msra.gmra.mxu0 %vm1619_vm0, %v11859_v50  ;;  %v4507_v46 = vadd.f32 %v4443_v53, %v4315_v44  ;;  %v10055_v60 = vrot.slane %v7048_v61, %v11807_v55  ;;  %v10058_v49 = vrot.slane %v7048_v61, %v11808_v48  ;;  %v10063_v27 = vrot.slane %v9997_v4, %v11839_v19  ;;  %v11938_v44 = vld [vmem:[#allocation20_spill] sm:$0xff] }
 0x50e   : > { %v4792_v38 = vmax.f32 %v4728_v7, 0.0  ;;  %5014 = vmatprep.mubr.bf16.mxu0 %v11836_v17  ;;  %v4683_v5 = vadd.f32 %v4619_v21, %v4491_v18  ;;  %v10067_v59 = vrot.slane %v9997_v4, %v11807_v55 }
 0x50f   : > { %v4699_v30 = vadd.f32 %v4635_v13, %v4507_v46  ;;  %v4429_v51 = vmul.f32 %v10055_v60, %v11813_v45  ;;  %v4445_v61 = vmul.f32 %v10055_v60, %v7762_v9  ;;  %v4621_v11 = vmul.f32 %v10058_v49, %v11706_v10 }
 0x510   : > { %v7050_v24 = vpop.eup %7049  ;;  %v4840_v23 = vpack.c.bf16 %v4792_v38, %v4776_v43  ;;  %v4747_v2 = vadd.f32 %v4683_v5, %v11937_v32  ;;  %v4637_v22 = vmul.f32 %v10058_v49, %v11714_v15  ;;  %v4298_v56 = vmul.f32 %v10063_v27, %v11703_v0  ;;  %v11940_v32 = vld [vmem:[#allocation93_spill] sm:$0xff] }
 0x511   : > { %v4158_v34 = vadd.f32 1.0, %v7050_v24  ;;  %v4763_v25 = vadd.f32 %v4699_v30, %v11938_v44  ;;  %v4493_v37 = vadd.f32 %v4429_v51, %v4301_v28  ;;  %v4509_v36 = vadd.f32 %v4445_v61, %v4317_v16  ;;  %v11939_v24 = vld [vmem:[#allocation92_spill] sm:$0xff] }
 0x512   : > { %v7052_v53 = vpop.eup %7051  ;;  %5040 = vmatpush1.bf16.msra.mxu1 %v4840_v23  ;;  %v4811_v21 = vmax.f32 %v4747_v2, 0.0  ;;  %v4314_v13 = vmul.f32 %v10063_v27, %v11812_v31  ;;  %v4426_v14 = vmul.f32 %v10067_v59, %v11813_v45  ;;  %v4442_v7 = vmul.f32 %v10067_v59, %v7762_v9 }
 0x513   : > { %7057 = vrcp.f32 %v4158_v34  ;;  %v4159_v18 = vadd.f32 1.0, %v7052_v53  ;;  %v4827_v43 = vmax.f32 %v4763_v25, 0.0  ;;  %v4685_v46 = vadd.f32 %v4621_v11, %v4493_v37 }
 0x514   : > { %v7054_v38 = vpop.eup %7053  ;;  %v4701_v5 = vadd.f32 %v4637_v22, %v4509_v36  ;;  %v4490_v28 = vadd.f32 %v4426_v14, %v4298_v56  ;;  %v4506_v16 = vadd.f32 %v4442_v7, %v4314_v13  ;;  %v10089_v30 = vrot.slane %v9997_v4, %v11808_v48 }
 0x515   : > { %v4160_v51 = vadd.f32 1.0, %v7054_v38  ;;  %7059 = vrcp.f32 %v4159_v18  ;;  %6844 = vmatmul.mubr.msk.bf16.vlgmr.msra.gmra.mxu1 %vm1619_vm0, %v11859_v50  ;;  %6843 = vmatmul.mubr.msk.bf16.gmra.mxu0 %vm1619_vm0, %v11864_v26  ;;  %v4859_v61 = vpack.c.bf16 %v4827_v43, %v4811_v21  ;;  %v4749_v23 = vadd.f32 %v4685_v46, %v11939_v24  ;;  %v11941_v43 = vld [vmem:[#allocation95_spill] sm:$0xff]  ;;  %v11942_v38 = vld [vmem:[#allocation13_spill] sm:$0xff] }
 0x516   : > { %v7056_v11 = vpop.eup %7055  ;;  %5067 = vmatprep.mubr.bf16.mxu1 %v11836_v17  ;;  %v4765_v2 = vadd.f32 %v4701_v5, %v11940_v32  ;;  %v4618_v4 = vmul.f32 %v10089_v30, %v11706_v10  ;;  %v4634_v22 = vmul.f32 %v10089_v30, %v11714_v15  ;;  %v10104_v56 = vrot.slane %v10005_v40, %v11839_v19 }
 0x517   : > { %7061 = vrcp.f32 %v4160_v51  ;;  %v4161_v34 = vadd.f32 1.0, %v7056_v11  ;;  %5090 = vmatprep.subr.bf16.mxu0 %v4859_v61  ;;  %v4813_v44 = vmax.f32 %v4749_v23, 0.0  ;;  %v10108_v25 = vrot.slane %v10005_v40, %v11807_v55  ;;  %5110 = vmatprep.mubr.bf16.mxu0 %v11836_v17 }
 0x518   : > { %v4829_v37 = vmax.f32 %v4765_v2, 0.0  ;;  %v4682_v36 = vadd.f32 %v4618_v4, %v4490_v28  ;;  %v4698_v53 = vadd.f32 %v4634_v22, %v4506_v16  ;;  %v4300_v21 = vmul.f32 %v10104_v56, %v11703_v0 }
 0x519   : > { %7063 = vrcp.f32 %v4161_v34  ;;  %v4316_v13 = vmul.f32 %v10104_v56, %v11812_v31  ;;  %v4428_v14 = vmul.f32 %v10108_v25, %v11813_v45  ;;  %v4444_v7 = vmul.f32 %v10108_v25, %v7762_v9 }
 0x51a   : > { %v4861_v18 = vpack.c.bf16 %v4829_v37, %v4813_v44  ;;  %v4746_v46 = vadd.f32 %v4682_v36, %v11941_v43  ;;  %v4762_v5 = vadd.f32 %v4698_v53, %v11942_v38  ;;  %v10123_v28 = vrot.slane %v10005_v40, %v11808_v48 }
 0x51b   : > { %v4492_v16 = vadd.f32 %v4428_v14, %v4300_v21  ;;  %v4508_v51 = vadd.f32 %v4444_v7, %v4316_v13  ;;  %v4267_v61 = vmul.f32 %v10023_v42, %v11726_v63  ;;  %v4283_v24 = vmul.f32 %v10023_v42, %v7938_v6 }
 0x51c   : > { %5143 = vmatprep.subr.bf16.mxu1 %v4861_v18  ;;  %v4810_v23 = vmax.f32 %v4746_v46, 0.0  ;;  %v4826_v11 = vmax.f32 %v4762_v5, 0.0  ;;  %v4620_v32 = vmul.f32 %v10123_v28, %v11706_v10  ;;  %v4636_v2 = vmul.f32 %v10123_v28, %v11714_v15 }
 0x51d   : > { %6845 = vmatmul.mubr.msk.bf16.gmra.mxu1 %vm1619_vm0, %v11864_v26  ;;  %v4395_v40 = vmul.f32 %v10026_v58, %v7958_v41  ;;  %v4411_v4 = vmul.f32 %v10026_v58, %v11846_v57  ;;  %v4587_v42 = vmul.f32 %v10029_v33, %v11847_v54  ;;  %v4603_v22 = vmul.f32 %v10029_v33, %v11848_v52 }
 0x51e   : > { %v4858_v34 = vpack.c.bf16 %v4826_v11, %v4810_v23  ;;  %v4684_v44 = vadd.f32 %v4620_v32, %v4492_v16  ;;  %v4700_v37 = vadd.f32 %v4636_v2, %v4508_v51  ;;  %v4269_v36 = vmul.f32 %v10032_v3, %v11726_v63  ;;  %5163 = vmatprep.mubr.bf16.mxu1 %v11836_v17  ;;  %v11944_v11 = vld [vmem:[#allocation22_spill] sm:$0xff] }
 0x51f   : > { %v4459_v53 = vadd.f32 %v4395_v40, %v4267_v61  ;;  %v4475_v21 = vadd.f32 %v4411_v4, %v4283_v24  ;;  %v4285_v13 = vmul.f32 %v10032_v3, %v7938_v6  ;;  %v4397_v58 = vmul.f32 %v10055_v60, %v7958_v41 }
 0x520   : > { %v10150_v14 = vpop.eup %7057  ;;  %5091 = vmatpush1.bf16.msra.mxu0 %v4858_v34  ;;  %v4748_v33 = vadd.f32 %v4684_v44, %v11883_v47  ;;  %v4764_v7 = vadd.f32 %v4700_v37, %v11884_v39  ;;  %v4413_v18 = vmul.f32 %v10055_v60, %v11846_v57  ;;  %v4589_v43 = vmul.f32 %v10058_v49, %v11847_v54  ;;  %v11943_v39 = vld [vmem:[#allocation68_spill] sm:$0xff]  ;;  %v11945_v37 = vld [vmem:[#allocation23_spill] sm:$0xff] }
 0x521   : > { %v4651_v46 = vadd.f32 %v4587_v42, %v4459_v53  ;;  %v4667_v38 = vadd.f32 %v4603_v22, %v4475_v21  ;;  %v4461_v5 = vadd.f32 %v4397_v58, %v4269_v36  ;;  %v4605_v3 = vmul.f32 %v10058_v49, %v11848_v52 }
 0x522   : > { %v7060_v16 = vpop.eup %7059  ;;  %v4812_v51 = vmax.f32 %v4748_v33, 0.0  ;;  %v4828_v61 = vmax.f32 %v4764_v7, 0.0  ;;  %v4477_v24 = vadd.f32 %v4413_v18, %v4285_v13  ;;  %v4266_v47 = vmul.f32 %v10063_v27, %v11726_v63 }
 0x523   : > { %v4715_v23 = vadd.f32 %v4651_v46, %v11943_v39  ;;  %v4731_v60 = vadd.f32 %v4667_v38, %v11944_v11  ;;  %v4653_v32 = vadd.f32 %v4589_v43, %v4461_v5  ;;  %v4282_v2 = vmul.f32 %v10063_v27, %v7938_v6  ;;  %v11946_v27 = vld [vmem:[#allocation80_spill] sm:$0xff]  ;;  %v11948_v11 = vld [vmem:[#allocation17_spill] sm:$0xff] }
 0x524   : > { %v10166_v40 = vpop.eup %7061  ;;  %v4860_v4 = vpack.c.bf16 %v4828_v61, %v4812_v51  ;;  %v4669_v42 = vadd.f32 %v4605_v3, %v4477_v24  ;;  %v4394_v49 = vmul.f32 %v10067_v59, %v7958_v41  ;;  %v4410_v22 = vmul.f32 %v10067_v59, %v11846_v57  ;;  %v11947_v39 = vld [vmem:[#allocation16_spill] sm:$0xff] }
 0x525   : > { %v4779_v34 = vmax.f32 %v4715_v23, 0.0  ;;  %v4795_v44 = vmax.f32 %v4731_v60, 0.0  ;;  %v4717_v36 = vadd.f32 %v4653_v32, %v11945_v37  ;;  %v4586_v53 = vmul.f32 %v10089_v30, %v11847_v54 }
 0x526   : > { %v7064_v21 = vpop.eup %7063  ;;  %5144 = vmatpush1.bf16.msra.mxu1 %v4860_v4  ;;  %v4733_v13 = vadd.f32 %v4669_v42, %v11946_v27  ;;  %v4458_v58 = vadd.f32 %v4394_v49, %v4266_v47  ;;  %v4474_v33 = vadd.f32 %v4410_v22, %v4282_v2  ;;  %v4602_v7 = vmul.f32 %v10089_v30, %v11848_v52 }
 0x527   : > { %v4843_v18 = vpack.c.bf16 %v4795_v44, %v4779_v34  ;;  %v4781_v43 = vmax.f32 %v4717_v36, 0.0  ;;  %v4268_v59 = vmul.f32 %v10104_v56, %v11726_v63  ;;  %v4284_v46 = vmul.f32 %v10104_v56, %v7938_v6 }
 0x528   : > { %v4797_v38 = vmax.f32 %v4733_v13, 0.0  ;;  %v4650_v5 = vadd.f32 %v4586_v53, %v4458_v58  ;;  %v4666_v3 = vadd.f32 %v4602_v7, %v4474_v33  ;;  %v4396_v51 = vmul.f32 %v10108_v25, %v7958_v41  ;;  %v11949_v13 = vld [vmem:[#allocation18_spill] sm:$0xff]  ;;  %v11950_v7 = vld [vmem:[#allocation24_spill] sm:$0xff] }
 0x529   : > { %5092 = vmatprep.subr.bf16.mxu0 %v4843_v18  ;;  %v4412_v61 = vmul.f32 %v10108_v25, %v11846_v57  ;;  %v4588_v30 = vmul.f32 %v10123_v28, %v11847_v54  ;;  %v4604_v24 = vmul.f32 %v10123_v28, %v11848_v52  ;;  %v10191_v47 = vrot.slane %v7060_v16, %v11839_v19 }
 0x52a   : > { %v4845_v56 = vpack.c.bf16 %v4797_v38, %v4781_v43  ;;  %v4714_v23 = vadd.f32 %v4650_v5, %v11947_v39  ;;  %v4730_v60 = vadd.f32 %v4666_v3, %v11948_v11  ;;  %v4460_v32 = vadd.f32 %v4396_v51, %v4268_v59 }
 0x52b   : > { %v4476_v2 = vadd.f32 %v4412_v61, %v4284_v46  ;;  %v4303_v4 = vmul.f32 %v10191_v47, %v11703_v0  ;;  %v4319_v25 = vmul.f32 %v10191_v47, %v11812_v31  ;;  %v10200_v42 = vrot.slane %v7060_v16, %v11807_v55 }
 0x52c   : > { %5145 = vmatprep.subr.bf16.mxu1 %v4845_v56  ;;  %v4778_v28 = vmax.f32 %v4714_v23, 0.0  ;;  %v4794_v49 = vmax.f32 %v4730_v60, 0.0  ;;  %v4652_v22 = vadd.f32 %v4588_v30, %v4460_v32  ;;  %v10203_v34 = vrot.slane %v7060_v16, %v11808_v48  ;;  %v11951_v32 = vld [vmem:[#allocation25_spill] sm:$0xff] }
 0x52d   : > { %v4668_v44 = vadd.f32 %v4604_v24, %v4476_v2  ;;  %v4431_v37 = vmul.f32 %v10200_v42, %v11813_v45  ;;  %v4447_v36 = vmul.f32 %v10200_v42, %v7762_v9  ;;  %v10210_v53 = vrot.slane %v7064_v21, %v11839_v19 }
 0x52e   : > { %v4842_v27 = vpack.c.bf16 %v4794_v49, %v4778_v28  ;;  %v4716_v58 = vadd.f32 %v4652_v22, %v11949_v13  ;;  %v4623_v33 = vmul.f32 %v10203_v34, %v11706_v10  ;;  %v4639_v16 = vmul.f32 %v10203_v34, %v11714_v15 }
 0x52f   : > { %v4732_v18 = vadd.f32 %v4668_v44, %v11950_v7  ;;  %v4495_v43 = vadd.f32 %v4431_v37, %v4303_v4  ;;  %v4511_v59 = vadd.f32 %v4447_v36, %v4319_v25  ;;  %v4305_v46 = vmul.f32 %v10210_v53, %v11703_v0  ;;  %v11952_v4 = vld [vmem:[#allocation21_spill] sm:$0xff] }
 0x530   : > { %5093 = vmatpush1.bf16.msra.mxu0 %v4842_v27  ;;  %v4780_v38 = vmax.f32 %v4716_v58, 0.0  ;;  %v4321_v5 = vmul.f32 %v10210_v53, %v11812_v31  ;;  %v10223_v3 = vrot.slane %v7064_v21, %v11807_v55  ;;  %v10226_v51 = vrot.slane %v7064_v21, %v11808_v48 }
 0x531   : > { %v4796_v61 = vmax.f32 %v4732_v18, 0.0  ;;  %v4687_v30 = vadd.f32 %v4623_v33, %v4495_v43  ;;  %v4703_v24 = vadd.f32 %v4639_v16, %v4511_v59  ;;  %v10230_v56 = vrot.slane %v10150_v14, %v11839_v19 }
 0x532   : > { %v4433_v39 = vmul.f32 %v10223_v3, %v11813_v45  ;;  %v4449_v23 = vmul.f32 %v10223_v3, %v7762_v9  ;;  %v4625_v11 = vmul.f32 %v10226_v51, %v11706_v10  ;;  %v4641_v21 = vmul.f32 %v10226_v51, %v11714_v15 }
 0x533   : > { %v4844_v60 = vpack.c.bf16 %v4796_v61, %v4780_v38  ;;  %6846 = vmatmul.mubr.msk.bf16.vlgmr.msra.gmra.mxu0 %vm1619_vm0, %v11859_v50  ;;  %v4751_v2 = vadd.f32 %v4687_v30, %v11951_v32  ;;  %v4767_v25 = vadd.f32 %v4703_v24, %v11952_v4  ;;  %v4302_v28 = vmul.f32 %v10230_v56, %v11703_v0  ;;  %v11953_v38 = vld [vmem:[#allocation26_spill] sm:$0xff]  ;;  %v11954_v61 = vld [vmem:[#allocation29_spill] sm:$0xff] }
 0x534   : > { %5120 = vmatprep.mubr.bf16.mxu0 %v11836_v17  ;;  %v4497_v49 = vadd.f32 %v4433_v39, %v4305_v46  ;;  %v4513_v22 = vadd.f32 %v4449_v23, %v4321_v5  ;;  %v4318_v44 = vmul.f32 %v10230_v56, %v11812_v31  ;;  %v10251_v37 = vrot.slane %v10150_v14, %v11807_v55 }
 0x535   : > { %5146 = vmatpush1.bf16.msra.mxu1 %v4844_v60  ;;  %v4815_v36 = vmax.f32 %v4751_v2, 0.0  ;;  %v4831_v27 = vmax.f32 %v4767_v25, 0.0  ;;  %v10255_v13 = vrot.slane %v10150_v14, %v11808_v48  ;;  %v10259_v58 = vrot.slane %v10166_v40, %v11839_v19 }
 0x536   : > { %v4689_v33 = vadd.f32 %v4625_v11, %v4497_v49  ;;  %v4705_v16 = vadd.f32 %v4641_v21, %v4513_v22  ;;  %v4430_v7 = vmul.f32 %v10251_v37, %v11813_v45  ;;  %v4446_v18 = vmul.f32 %v10251_v37, %v7762_v9  ;;  %v11955_v49 = vld [vmem:[#allocation55_spill] sm:$0xff] }
 0x537   : > { %v4863_v43 = vpack.c.bf16 %v4831_v27, %v4815_v36  ;;  %v4622_v59 = vmul.f32 %v10255_v13, %v11706_v10  ;;  %v4638_v14 = vmul.f32 %v10255_v13, %v11714_v15  ;;  %v4304_v46 = vmul.f32 %v10259_v58, %v11703_v0 }
 0x538   : > { %6848 = vmatmul.mubr.msk.bf16.vlgmr.msra.gmra.mxu1 %vm1619_vm0, %v11859_v50  ;;  %v4753_v5 = vadd.f32 %v4689_v33, %v11953_v38  ;;  %v4769_v30 = vadd.f32 %v4705_v16, %v11954_v61  ;;  %v4494_v24 = vadd.f32 %v4430_v7, %v4302_v28  ;;  %v4510_v39 = vadd.f32 %v4446_v18, %v4318_v44  ;;  %v11956_v44 = vld [vmem:[#allocation31_spill] sm:$0xff] }
 0x539   : > { %5173 = vmatprep.mubr.bf16.mxu1 %v11836_v17  ;;  %5196 = vmatprep.subr.bf16.mxu0 %v4863_v43  ;;  %v4320_v23 = vmul.f32 %v10259_v58, %v11812_v31  ;;  %v10280_v11 = vrot.slane %v10166_v40, %v11807_v55  ;;  %v10284_v0 = vrot.slane %v10166_v40, %v11808_v48 }
 0x53a   : > { %v4817_v21 = vmax.f32 %v4753_v5, 0.0  ;;  %v4833_v60 = vmax.f32 %v4769_v30, 0.0  ;;  %v4686_v32 = vadd.f32 %v4622_v59, %v4494_v24  ;;  %v4702_v2 = vadd.f32 %v4638_v14, %v4510_v39 }
 0x53b   : > { %6847 = vmatmul.mubr.msk.bf16.gmra.mxu0 %vm1619_vm0, %v11864_v26  ;;  %v4432_v4 = vmul.f32 %v10280_v11, %v11813_v45  ;;  %v4448_v31 = vmul.f32 %v10280_v11, %v7762_v9  ;;  %v4624_v25 = vmul.f32 %v10284_v0, %v11706_v10  ;;  %v4640_v40 = vmul.f32 %v10284_v0, %v11714_v15 }
 0x53c   : > { %v4865_v28 = vpack.c.bf16 %v4833_v60, %v4817_v21  ;;  %v4750_v22 = vadd.f32 %v4686_v32, %v11955_v49  ;;  %v4766_v36 = vadd.f32 %v4702_v2, %v11956_v44  ;;  %v4271_v27 = vmul.f32 %v10191_v47, %v11726_v63  ;;  %5216 = vmatprep.mubr.bf16.mxu0 %v11836_v17 }
 0x53d   : > { %v4496_v45 = vadd.f32 %v4432_v4, %v4304_v46  ;;  %v4512_v33 = vadd.f32 %v4448_v31, %v4320_v23  ;;  %v4287_v9 = vmul.f32 %v10191_v47, %v7938_v6  ;;  %v4399_v10 = vmul.f32 %v10200_v42, %v7958_v41  ;;  %v11958_v4 = vld [vmem:[#allocation33_spill] sm:$0xff] }
 0x53e   : > { %5249 = vmatprep.subr.bf16.mxu1 %v4865_v28  ;;  %v4814_v15 = vmax.f32 %v4750_v22, 0.0  ;;  %v4830_v16 = vmax.f32 %v4766_v36, 0.0  ;;  %v4415_v7 = vmul.f32 %v10200_v42, %v11846_v57  ;;  %v4591_v18 = vmul.f32 %v10203_v34, %v11847_v54 }
 0x53f   : > { %v4688_v43 = vadd.f32 %v4624_v25, %v4496_v45  ;;  %v4704_v59 = vadd.f32 %v4640_v40, %v4512_v33  ;;  %v4463_v14 = vadd.f32 %v4399_v10, %v4271_v27  ;;  %v4607_v46 = vmul.f32 %v10203_v34, %v11848_v52  ;;  %v11959_v33 = vld [vmem:[#allocation42_spill] sm:$0xff] }
 0x540   : > { %6849 = vmatmul.mubr.msk.bf16.gmra.mxu1 %vm1619_vm0, %v11864_v26  ;;  %v4862_v47 = vpack.c.bf16 %v4830_v16, %v4814_v15  ;;  %v4479_v38 = vadd.f32 %v4415_v7, %v4287_v9  ;;  %v4273_v5 = vmul.f32 %v10210_v53, %v11726_v63  ;;  %v4289_v42 = vmul.f32 %v10210_v53, %v7938_v6  ;;  %v11960_v7 = vld [vmem:[#allocation43_spill] sm:$0xff] }
 0x541   : > { %v4752_v61 = vadd.f32 %v4688_v43, %v11899_v8  ;;  %v4768_v30 = vadd.f32 %v4704_v59, %v11900_v12  ;;  %v4655_v24 = vadd.f32 %v4591_v18, %v4463_v14  ;;  %v4401_v39 = vmul.f32 %v10223_v3, %v7958_v41  ;;  %5269 = vmatprep.mubr.bf16.mxu1 %v11836_v17  ;;  %v11957_v12 = vld [vmem:[#allocation63_spill] sm:$0xff] }
 0x542   : > { %5197 = vmatpush1.bf16.msra.mxu0 %v4862_v47  ;;  %v4671_v34 = vadd.f32 %v4607_v46, %v4479_v38  ;;  %v4417_v23 = vmul.f32 %v10223_v3, %v11846_v57  ;;  %v4593_v21 = vmul.f32 %v10226_v51, %v11847_v54  ;;  %v4609_v53 = vmul.f32 %v10226_v51, %v11848_v52 }
 0x543   : > { %v4816_v8 = vmax.f32 %v4752_v61, 0.0  ;;  %v4832_v60 = vmax.f32 %v4768_v30, 0.0  ;;  %v4719_v32 = vadd.f32 %v4655_v24, %v11957_v12  ;;  %v4465_v2 = vadd.f32 %v4401_v39, %v4273_v5  ;;  %v11961_v5 = vld [vmem:[#allocation36_spill] sm:$0xff]  ;;  %v11962_v24 = vld [vmem:[#allocation37_spill] sm:$0xff] }
 0x544   : > { %v4735_v31 = vadd.f32 %v4671_v34, %v11958_v4  ;;  %v4481_v25 = vadd.f32 %v4417_v23, %v4289_v42  ;;  %v4270_v40 = vmul.f32 %v10230_v56, %v11726_v63  ;;  %v4286_v3 = vmul.f32 %v10230_v56, %v7938_v6 }
 0x545   : > { %v4864_v28 = vpack.c.bf16 %v4832_v60, %v4816_v8  ;;  %v4783_v49 = vmax.f32 %v4719_v32, 0.0  ;;  %v4657_v22 = vadd.f32 %v4593_v21, %v4465_v2  ;;  %v4398_v51 = vmul.f32 %v10251_v37, %v7958_v41 }
 0x546   : > { %v4799_v44 = vmax.f32 %v4735_v31, 0.0  ;;  %v4673_v36 = vadd.f32 %v4609_v53, %v4481_v25  ;;  %v4414_v27 = vmul.f32 %v10251_v37, %v11846_v57  ;;  %v4590_v45 = vmul.f32 %v10255_v13, %v11847_v54  ;;  %v11964_v53 = vld [vmem:[#allocation44_spill] sm:$0xff] }
 0x547   : > { %5250 = vmatpush1.bf16.msra.mxu1 %v4864_v28  ;;  %v4721_v9 = vadd.f32 %v4657_v22, %v11959_v33  ;;  %v4462_v10 = vadd.f32 %v4398_v51, %v4270_v40  ;;  %v4606_v56 = vmul.f32 %v10255_v13, %v11848_v52  ;;  %v4272_v15 = vmul.f32 %v10259_v58, %v11726_v63 }
 0x548   : > { %v4847_v16 = vpack.c.bf16 %v4799_v44, %v4783_v49  ;;  %v4737_v18 = vadd.f32 %v4673_v36, %v11960_v7  ;;  %v4478_v43 = vadd.f32 %v4414_v27, %v4286_v3  ;;  %v4288_v37 = vmul.f32 %v10259_v58, %v7938_v6 }
 0x549   : > { %v4785_v59 = vmax.f32 %v4721_v9, 0.0  ;;  %v4654_v14 = vadd.f32 %v4590_v45, %v4462_v10  ;;  %v4400_v46 = vmul.f32 %v10280_v11, %v7958_v41  ;;  %v4416_v47 = vmul.f32 %v10280_v11, %v11846_v57  ;;  %v11963_v11 = vld [vmem:[#allocation46_spill] sm:$0xff] }
 0x54a   : > { %5198 = vmatprep.subr.bf16.mxu0 %v4847_v16  ;;  %v4801_v13 = vmax.f32 %v4737_v18, 0.0  ;;  %v4670_v38 = vadd.f32 %v4606_v56, %v4478_v43  ;;  %v4592_v63 = vmul.f32 %v10284_v0, %v11847_v54  ;;  %v4608_v6 = vmul.f32 %v10284_v0, %v11848_v52 }
 0x54b   : > { %v4718_v42 = vadd.f32 %v4654_v14, %v11961_v5  ;;  %v4464_v61 = vadd.f32 %v4400_v46, %v4272_v15  ;;  %v4480_v30 = vadd.f32 %v4416_v47, %v4288_v37  ;;  %v7153_v37 = vmov 7  }
 0x54c   : > { %v4849_v58 = vpack.c.bf16 %v4801_v13, %v4785_v59  ;;  %v4734_v39 = vadd.f32 %v4670_v38, %v11962_v24  ;;  %6925 = vset.pattern.permute.xlu1 %v7153_v37  ;;  %6927 = vset.pattern.permute.xlu0 %v7153_v37  ;;  %v10388_v13 = vld [vmem:[%s11281_s1 + $0x50] sm:$0xff]  ;;  %v10394_v38 = vld [vmem:[%s11281_s1 + $0x48] sm:$0xff] }
 0x54d   : > { %v4782_v41 = vmax.f32 %v4718_v42, 0.0  ;;  %v4656_v34 = vadd.f32 %v4592_v63, %v4464_v61  ;;  %v4672_v23 = vadd.f32 %v4608_v6, %v4480_v30  ;;  %5823 = vperm.xlu1 %6925, %v10388_v13   ;;  %5819 = vperm.xlu0 %6927, %v10394_v38  }
 0x54e   : > { %5251 = vmatprep.subr.bf16.mxu1 %v4849_v58  ;;  %v4798_v57 = vmax.f32 %v4734_v39, 0.0 }
 0x54f   : > { %v4720_v21 = vadd.f32 %v4656_v34, %v11963_v11  ;;  %v4736_v8 = vadd.f32 %v4672_v23, %v11964_v53  ;;  %v7154_v53 = vmov 8  }
 0x550   : > { %v4846_v54 = vpack.c.bf16 %v4798_v57, %v4782_v41 }
 0x551   : > { %v4784_v60 = vmax.f32 %v4720_v21, 0.0  ;;  %v4800_v12 = vmax.f32 %v4736_v8, 0.0  ;;  %6926 = vset.pattern.permute.xlu1 %v7154_v53 }
 0x552   : > { %5199 = vmatpush1.bf16.msra.mxu0 %v4846_v54  ;;  %5967 = vperm.xlu1 %6926, %v10388_v13  }
 0x553   : > { %v4848_v32 = vpack.c.bf16 %v4800_v12, %v4784_v60 }
 0x555   : > { %5252 = vmatpush1.bf16.msra.mxu1 %v4848_v32  ;;  %6850 = vmatmul.mubr.msk.bf16.vlgmr.msra.gmra.mxu0 %vm1619_vm0, %v11859_v50 }
 0x556   : > { %5226 = vmatprep.mubr.bf16.mxu0 %v11836_v17  ;;  %5963 = vperm.xlu1 %6926, %v10394_v38  }
 0x558   : > { %6852 = vmatmul.mubr.msk.bf16.vlgmr.msra.gmra.mxu1 %vm1619_vm0, %v11859_v50 }
 0x559   : > { %5279 = vmatprep.mubr.bf16.mxu1 %v11836_v17 }
 0x55d   : > { %6851 = vmatmul.mubr.msk.bf16.gmra.mxu0 %vm1619_vm0, %v11864_v26 }
 0x55e   : > { %5418 = vmatprep.mubr.bf16.mxu0 %v11836_v17 }
 0x560   : > { %6853 = vmatmul.mubr.msk.bf16.gmra.mxu1 %vm1619_vm0, %v11864_v26 }
 0x561   : > { %5459 = vmatprep.mubr.bf16.mxu1 %v11836_v17 }
 0x5a4   : > { %v4900_v52 = vpop.f32.mrf.mxu0 }
 0x5a5   : > { %v4901_v15 = vadd.f32 %v4900_v52, %v8789_v29  ;;  %v7135_v52 = vld [vmem:[%s11281_s1 + $0x40] sm:$0xff] }
 0x5a6   : > { %v4902_v0 = vpop.f32.mrf.mxu0  ;;  %5815 = vperm.xlu0 %6927, %v7135_v52  }
 0x5a7   : > { %v4903_v45 = vadd.f32 %v4902_v0, %v8789_v29  ;;  %v5290_v23 = vmax.f32 %v4901_v15, 0.0 }
 0x5a8   : > { %v4904_v2 = vpop.f32.mrf.mxu0 }
 0x5a9   : > { %v4953_v4 = vpop.f32.mrf.mxu1  ;;  %v4905_v10 = vadd.f32 %v4904_v2, %v8800_v1  ;;  %v5291_v63 = vmax.f32 %v4903_v45, 0.0 }
 0x5aa   : > { %v4906_v31 = vpop.f32.mrf.mxu0  ;;  %v4954_v8 = vadd.f32 %v4953_v4, %v8789_v29  ;;  %v7155_v4 = vmov 9  }
 0x5ab   : > { %v4955_v25 = vpop.f32.mrf.mxu1  ;;  %v4907_v22 = vadd.f32 %v4906_v31, %v8800_v1  ;;  %v5306_v6 = vmax.f32 %v4905_v10, 0.0  ;;  %6930 = vset.pattern.permute.xlu0 %v7155_v4  ;;  %6928 = vset.pattern.permute.xlu1 %v7155_v4 }
 0x5ac   : > { %v4910_v40 = vpop.f32.mrf.mxu0  ;;  %v4956_v30 = vadd.f32 %v4955_v25, %v8789_v29  ;;  %v5292_v25 = vmax.f32 %v4954_v8, 0.0  ;;  %6171 = vperm.xlu0 %6930, %v10394_v38   ;;  %6175 = vperm.xlu1 %6928, %v10388_v13  }
 0x5ad   : > { %v4957_v50 = vpop.f32.mrf.mxu1  ;;  %v4911_v36 = vadd.f32 %v4910_v40, %v8775_v35  ;;  %v5307_v16 = vmax.f32 %v4907_v22, 0.0  ;;  %v5354_v12 = vpack.c.bf16 %v5306_v6, %v5290_v23 }
 0x5ae   : > { %v4912_v3 = vpop.f32.mrf.mxu0  ;;  %v4958_v39 = vadd.f32 %v4957_v50, %v8800_v1  ;;  %v5293_v60 = vmax.f32 %v4956_v30, 0.0  ;;  %v11965_v50 = vld [vmem:[#allocation47_spill] sm:$0xff] }
 0x5af   : > { %v4959_v28 = vpop.f32.mrf.mxu1  ;;  %v4913_v44 = vadd.f32 %v4912_v3, %v8775_v35  ;;  %v5322_v14 = vmax.f32 %v4911_v36, 0.0  ;;  %v5355_v41 = vpack.c.bf16 %v5307_v16, %v5291_v63  ;;  %v7136_v3 = vld [vmem:[%s11281_s1 + $0x38] sm:$0xff] }
 0x5b0   : > { %v4914_v49 = vpop.f32.mrf.mxu0  ;;  %v4960_v59 = vadd.f32 %v4959_v28, %v8800_v1  ;;  %v5308_v0 = vmax.f32 %v4958_v39, 0.0  ;;  %6167 = vperm.xlu0 %6930, %v7135_v52   ;;  %6929 = vset.pattern.permute.xlu1 %v7154_v53 }
 0x5b1   : > { %v4963_v51 = vpop.f32.mrf.mxu1  ;;  %v4915_v26 = vadd.f32 %v4914_v49, %v8777_v20  ;;  %v5323_v7 = vmax.f32 %v4913_v44, 0.0  ;;  %5959 = vperm.xlu1 %6929, %v7135_v52   ;;  %v7156_v49 = vmov 10  }
 0x5b2   : > { %v4916_v27 = vpop.f32.mrf.mxu0  ;;  %v4964_v5 = vadd.f32 %v4963_v51, %v8775_v35  ;;  %v5309_v57 = vmax.f32 %v4960_v59, 0.0  ;;  %v5356_v40 = vpack.c.bf16 %v5308_v0, %v5292_v25 }
 0x5b3   : > { %v4965_v33 = vpop.f32.mrf.mxu1  ;;  %v4917_v9 = vadd.f32 %v4916_v27, %v8777_v20  ;;  %v5338_v56 = vmax.f32 %v4915_v26, 0.0 }
 0x5b4   : > { %v4966_v46 = vadd.f32 %v4965_v33, %v8775_v35  ;;  %v5324_v54 = vmax.f32 %v4964_v5, 0.0  ;;  %v5357_v31 = vpack.c.bf16 %v5309_v57, %v5293_v60  ;;  %6163 = vperm.xlu0 %6930, %v7136_v3  }
 0x5b5   : > { %v4967_v18 = vpop.f32.mrf.mxu1  ;;  %v5339_v43 = vmax.f32 %v4917_v9, 0.0  ;;  %v5370_v58 = vpack.c.bf16 %v5338_v56, %v5322_v14  ;;  %6931 = vset.pattern.permute.xlu1 %v7153_v37 }
 0x5b6   : > { %v4968_v47 = vadd.f32 %v4967_v18, %v8777_v20  ;;  %v5325_v11 = vmax.f32 %v4966_v46, 0.0  ;;  %5811 = vperm.xlu1 %6931, %v7136_v3  }
 0x5b7   : > { %v5371_v42 = vpack.c.bf16 %v5339_v43, %v5323_v7  ;;  %v4969_v61 = vpop.f32.mrf.mxu1 }
 0x5b8   : > { %v4970_v24 = vadd.f32 %v4969_v61, %v8777_v20  ;;  %v5340_v34 = vmax.f32 %v4968_v47, 0.0  ;;  %6934 = vset.pattern.permute.xlu0 %v7156_v49 }
 0x5b9   : > { %5398 = vmatprep.subr.bf16.mxu0 %v5371_v42  ;;  %6375 = vperm.xlu0 %6934, %v7135_v52  }
 0x5ba   : > { %v5341_v21 = vmax.f32 %v4970_v24, 0.0  ;;  %5399 = vmatpush1.bf16.msra.mxu0 %v5370_v58  ;;  %v5372_v2 = vpack.c.bf16 %v5340_v34, %v5324_v54  ;;  %6932 = vset.pattern.permute.xlu1 %v7154_v53 }
 0x5bb   : > { %5400 = vmatprep.subr.bf16.mxu0 %v5355_v41  ;;  %5955 = vperm.xlu1 %6932, %v7136_v3  }
 0x5bc   : > { %v5373_v32 = vpack.c.bf16 %v5341_v21, %v5325_v11 }
 0x5be   : > { %5439 = vmatprep.subr.bf16.mxu1 %v5373_v32  ;;  %5401 = vmatpush1.bf16.msra.mxu0 %v5354_v12 }
 0x5bf   : > { %5440 = vmatpush1.bf16.msra.mxu1 %v5372_v2  ;;  %6933 = vset.pattern.permute.xlu1 %v7156_v49 }
 0x5c0   : > { %5441 = vmatprep.subr.bf16.mxu1 %v5357_v31  ;;  %6383 = vperm.xlu1 %6933, %v10388_v13  }
 0x5c1   : > { %6854 = vmatmul.mubr.msk.bf16.vlgmr.msra.gmra.mxu0 %vm1619_vm0, %v11965_v50 }
 0x5c2   : > { %5500 = vmatprep.mubr.bf16.mxu0 %v11836_v17 }
 0x5c3   : > { %5442 = vmatpush1.bf16.msra.mxu1 %v5356_v40 }
 0x5c4   : > { %6379 = vperm.xlu1 %6933, %v10394_v38  }
 0x5c6   : > { %6855 = vmatmul.mubr.msk.bf16.vlgmr.msra.gmra.mxu1 %vm1619_vm0, %v11965_v50 }
 0x5c7   : > { %5541 = vmatprep.mubr.bf16.mxu1 %v11836_v17 }
 0x5c8   : > { %6371 = vperm.xlu1 %6933, %v7136_v3  }
 0x5cd   : > { %v5006_v28 = vpop.f32.mrf.mxu0 }
 0x5ce   : > { %v5007_v42 = vadd.f32 %v5006_v28, %v8789_v29 }
 0x5cf   : > { %v5008_v22 = vpop.f32.mrf.mxu0 }
 0x5d0   : > { %v5009_v37 = vadd.f32 %v5008_v22, %v8789_v29  ;;  %v5294_v21 = vmax.f32 %v5007_v42, 0.0 }
 0x5d1   : > { %v5010_v51 = vpop.f32.mrf.mxu0 }
 0x5d2   : > { %v5011_v59 = vadd.f32 %v5010_v51, %v8800_v1  ;;  %v5295_v30 = vmax.f32 %v5009_v37, 0.0 }
 0x5d3   : > { %v5012_v44 = vpop.f32.mrf.mxu0 }
 0x5d4   : > { %v5013_v56 = vadd.f32 %v5012_v44, %v8800_v1  ;;  %v5310_v6 = vmax.f32 %v5011_v59, 0.0 }
 0x5d5   : > { %v5059_v26 = vpop.f32.mrf.mxu1  ;;  %v5016_v36 = vpop.f32.mrf.mxu0 }
 0x5d6   : > { %v5017_v18 = vadd.f32 %v5016_v36, %v8775_v35  ;;  %v5311_v47 = vmax.f32 %v5013_v56, 0.0  ;;  %v5358_v12 = vpack.c.bf16 %v5310_v6, %v5294_v21  ;;  %v5060_v2 = vadd.f32 %v5059_v26, %v8789_v29 }
 0x5d7   : > { %v5061_v27 = vpop.f32.mrf.mxu1  ;;  %v5018_v45 = vpop.f32.mrf.mxu0 }
 0x5d8   : > { %v5019_v16 = vadd.f32 %v5018_v45, %v8775_v35  ;;  %v5326_v61 = vmax.f32 %v5017_v18, 0.0  ;;  %v5359_v23 = vpack.c.bf16 %v5311_v47, %v5295_v30  ;;  %v5062_v53 = vadd.f32 %v5061_v27, %v8789_v29 }
 0x5d9   : > { %v5063_v33 = vpop.f32.mrf.mxu1  ;;  %v5020_v9 = vpop.f32.mrf.mxu0  ;;  %v5296_v49 = vmax.f32 %v5060_v2, 0.0 }
 0x5da   : > { %v5021_v10 = vadd.f32 %v5020_v9, %v8777_v20  ;;  %v5327_v13 = vmax.f32 %v5019_v16, 0.0  ;;  %v5064_v54 = vadd.f32 %v5063_v33, %v8800_v1  ;;  %v5297_v25 = vmax.f32 %v5062_v53, 0.0 }
 0x5db   : > { %v5065_v15 = vpop.f32.mrf.mxu1  ;;  %v5022_v7 = vpop.f32.mrf.mxu0 }
 0x5dc   : > { %v5023_v43 = vadd.f32 %v5022_v7, %v8777_v20  ;;  %v5342_v46 = vmax.f32 %v5021_v10, 0.0  ;;  %v5066_v39 = vadd.f32 %v5065_v15, %v8800_v1  ;;  %v5312_v40 = vmax.f32 %v5064_v54, 0.0 }
 0x5dd   : > { %v5069_v14 = vpop.f32.mrf.mxu1 }
 0x5de   : > { %v5343_v5 = vmax.f32 %v5023_v43, 0.0  ;;  %v5374_v34 = vpack.c.bf16 %v5342_v46, %v5326_v61  ;;  %v5070_v57 = vadd.f32 %v5069_v14, %v8775_v35  ;;  %v5313_v32 = vmax.f32 %v5066_v39, 0.0 }
 0x5df   : > { %v5071_v63 = vpop.f32.mrf.mxu1  ;;  %v5360_v22 = vpack.c.bf16 %v5312_v40, %v5296_v49 }
 0x5e0   : > { %v5375_v24 = vpack.c.bf16 %v5343_v5, %v5327_v13  ;;  %v5072_v41 = vadd.f32 %v5071_v63, %v8775_v35  ;;  %v5328_v31 = vmax.f32 %v5070_v57, 0.0  ;;  %v5361_v28 = vpack.c.bf16 %v5313_v32, %v5297_v25 }
 0x5e1   : > { %v5073_v58 = vpop.f32.mrf.mxu1 }
 0x5e2   : > { %v5074_v38 = vadd.f32 %v5073_v58, %v8777_v20  ;;  %5480 = vmatprep.subr.bf16.mxu0 %v5375_v24  ;;  %v5329_v52 = vmax.f32 %v5072_v41, 0.0 }
 0x5e3   : > { %v5075_v11 = vpop.f32.mrf.mxu1  ;;  %5481 = vmatpush1.bf16.msra.mxu0 %v5374_v34 }
 0x5e4   : > { %v5076_v8 = vadd.f32 %v5075_v11, %v8777_v20  ;;  %v5344_v60 = vmax.f32 %v5074_v38, 0.0  ;;  %5482 = vmatprep.subr.bf16.mxu0 %v5359_v23 }
 0x5e6   : > { %v5345_v0 = vmax.f32 %v5076_v8, 0.0  ;;  %v5376_v3 = vpack.c.bf16 %v5344_v60, %v5328_v31 }
 0x5e7   : > { %5483 = vmatpush1.bf16.msra.mxu0 %v5358_v12 }
 0x5e8   : > { %v5377_v4 = vpack.c.bf16 %v5345_v0, %v5329_v52 }
 0x5ea   : > { %5521 = vmatprep.subr.bf16.mxu1 %v5377_v4  ;;  %6856 = vmatmul.mubr.msk.bf16.vlgmr.msra.gmra.mxu0 %vm1619_vm0, %v11965_v50 }
 0x5eb   : > { %5522 = vmatpush1.bf16.msra.mxu1 %v5376_v3  ;;  %5582 = vmatprep.mubr.bf16.mxu0 %v11836_v17 }
 0x5ec   : > { %5523 = vmatprep.subr.bf16.mxu1 %v5361_v28 }
 0x5ef   : > { %5524 = vmatpush1.bf16.msra.mxu1 %v5360_v22 }
 0x5f2   : > { %6857 = vmatmul.mubr.msk.bf16.vlgmr.msra.gmra.mxu1 %vm1619_vm0, %v11965_v50 }
 0x5f3   : > { %v5112_v51 = vpop.f32.mrf.mxu0  ;;  %5623 = vmatprep.mubr.bf16.mxu1 %v11836_v17 }
 0x5f4   : > { %v5113_v5 = vadd.f32 %v5112_v51, %v8789_v29 }
 0x5f5   : > { %v5114_v44 = vpop.f32.mrf.mxu0 }
 0x5f6   : > { %v5115_v14 = vadd.f32 %v5114_v44, %v8789_v29  ;;  %v5298_v32 = vmax.f32 %v5113_v5, 0.0 }
 0x5f7   : > { %v5116_v26 = vpop.f32.mrf.mxu0 }
 0x5f8   : > { %v5165_v36 = vpop.f32.mrf.mxu1  ;;  %v5117_v13 = vadd.f32 %v5116_v26, %v8800_v1  ;;  %v5299_v34 = vmax.f32 %v5115_v14, 0.0 }
 0x5f9   : > { %v5118_v27 = vpop.f32.mrf.mxu0  ;;  %v5166_v31 = vadd.f32 %v5165_v36, %v8789_v29 }
 0x5fa   : > { %v5167_v45 = vpop.f32.mrf.mxu1  ;;  %v5119_v16 = vadd.f32 %v5118_v27, %v8800_v1  ;;  %v5314_v21 = vmax.f32 %v5117_v13, 0.0 }
 0x5fb   : > { %v5122_v33 = vpop.f32.mrf.mxu0  ;;  %v5168_v11 = vadd.f32 %v5167_v45, %v8789_v29  ;;  %v5300_v51 = vmax.f32 %v5166_v31, 0.0 }
 0x5fc   : > { %v5169_v9 = vpop.f32.mrf.mxu1  ;;  %v5123_v37 = vadd.f32 %v5122_v33, %v8775_v35  ;;  %v5315_v42 = vmax.f32 %v5119_v16, 0.0  ;;  %v5362_v40 = vpack.c.bf16 %v5314_v21, %v5298_v32 }
 0x5fd   : > { %v5124_v10 = vpop.f32.mrf.mxu0  ;;  %v5170_v54 = vadd.f32 %v5169_v9, %v8800_v1  ;;  %v5301_v4 = vmax.f32 %v5168_v11, 0.0 }
 0x5fe   : > { %v5171_v56 = vpop.f32.mrf.mxu1  ;;  %v5125_v18 = vadd.f32 %v5124_v10, %v8775_v35  ;;  %v5330_v24 = vmax.f32 %v5123_v37, 0.0  ;;  %v5363_v60 = vpack.c.bf16 %v5315_v42, %v5299_v34 }
 0x5ff   : > { %v5126_v15 = vpop.f32.mrf.mxu0  ;;  %v5172_v58 = vadd.f32 %v5171_v56, %v8800_v1  ;;  %v5316_v28 = vmax.f32 %v5170_v54, 0.0 }
 0x600   : > { %v5175_v7 = vpop.f32.mrf.mxu1  ;;  %v5127_v43 = vadd.f32 %v5126_v15, %v8777_v20  ;;  %v5331_v61 = vmax.f32 %v5125_v18, 0.0 }
 0x601   : > { %v5128_v59 = vpop.f32.mrf.mxu0  ;;  %v5176_v38 = vadd.f32 %v5175_v7, %v8775_v35  ;;  %v5317_v52 = vmax.f32 %v5172_v58, 0.0  ;;  %v5364_v44 = vpack.c.bf16 %v5316_v28, %v5300_v51 }
 0x602   : > { %v5177_v46 = vpop.f32.mrf.mxu1  ;;  %v5129_v47 = vadd.f32 %v5128_v59, %v8777_v20  ;;  %v5346_v63 = vmax.f32 %v5127_v43, 0.0 }
 0x603   : > { %v5178_v39 = vadd.f32 %v5177_v46, %v8775_v35  ;;  %v5332_v25 = vmax.f32 %v5176_v38, 0.0  ;;  %v5365_v22 = vpack.c.bf16 %v5317_v52, %v5301_v4 }
 0x604   : > { %v5179_v30 = vpop.f32.mrf.mxu1  ;;  %v5347_v6 = vmax.f32 %v5129_v47, 0.0  ;;  %v5378_v53 = vpack.c.bf16 %v5346_v63, %v5330_v24 }
 0x605   : > { %v5180_v41 = vadd.f32 %v5179_v30, %v8777_v20  ;;  %v5333_v0 = vmax.f32 %v5178_v39, 0.0 }
 0x606   : > { %v5379_v23 = vpack.c.bf16 %v5347_v6, %v5331_v61  ;;  %v5181_v57 = vpop.f32.mrf.mxu1 }
 0x607   : > { %v5182_v8 = vadd.f32 %v5181_v57, %v8777_v20  ;;  %v5348_v12 = vmax.f32 %v5180_v41, 0.0 }
 0x608   : > { %5562 = vmatprep.subr.bf16.mxu0 %v5379_v23 }
 0x609   : > { %v5349_v2 = vmax.f32 %v5182_v8, 0.0  ;;  %5563 = vmatpush1.bf16.msra.mxu0 %v5378_v53  ;;  %v5380_v49 = vpack.c.bf16 %v5348_v12, %v5332_v25 }
 0x60a   : > { %5564 = vmatprep.subr.bf16.mxu0 %v5363_v60 }
 0x60b   : > { %v5381_v3 = vpack.c.bf16 %v5349_v2, %v5333_v0 }
 0x60d   : > { %5603 = vmatprep.subr.bf16.mxu1 %v5381_v3  ;;  %5565 = vmatpush1.bf16.msra.mxu0 %v5362_v40 }
 0x60e   : > { %5604 = vmatpush1.bf16.msra.mxu1 %v5380_v49 }
 0x60f   : > { %5605 = vmatprep.subr.bf16.mxu1 %v5365_v22 }
 0x610   : > { %6858 = vmatmul.mubr.msk.bf16.vlgmr.msra.gmra.mxu0 %vm1619_vm0, %v11965_v50 }
 0x611   : > { %5664 = vmatprep.mubr.bf16.mxu0 %v11836_v17 }
 0x612   : > { %5606 = vmatpush1.bf16.msra.mxu1 %v5364_v44 }
 0x615   : > { %v5218_v26 = vpop.f32.mrf.mxu0  ;;  %6859 = vmatmul.mubr.msk.bf16.vlgmr.msra.gmra.mxu1 %vm1619_vm0, %v11965_v50 }
 0x616   : > { %5705 = vmatprep.mubr.bf16.mxu1 %v11836_v17  ;;  %v5219_v13 = vadd.f32 %v5218_v26, %v8789_v29 }
 0x617   : > { %v5220_v36 = vpop.f32.mrf.mxu0 }
 0x618   : > { %v5271_v27 = vpop.f32.mrf.mxu1  ;;  %v5221_v17 = vadd.f32 %v5220_v36, %v8789_v29  ;;  %v5302_v25 = vmax.f32 %v5219_v13, 0.0 }
 0x619   : > { %v5222_v45 = vpop.f32.mrf.mxu0 }
 0x61a   : > { %v5273_v33 = vpop.f32.mrf.mxu1  ;;  %v5223_v63 = vadd.f32 %v5222_v45, %v8800_v1  ;;  %v5303_v23 = vmax.f32 %v5221_v17, 0.0 }
 0x61b   : > { %v5224_v9 = vpop.f32.mrf.mxu0  ;;  %v5274_v57 = vadd.f32 %v5273_v33, %v8789_v29 }
 0x61c   : > { %v5275_v10 = vpop.f32.mrf.mxu1  ;;  %v5225_v43 = vadd.f32 %v5224_v9, %v8800_v1  ;;  %v5318_v53 = vmax.f32 %v5223_v63, 0.0 }
 0x61d   : > { %v5228_v56 = vpop.f32.mrf.mxu0  ;;  %v5276_v8 = vadd.f32 %v5275_v10, %v8800_v1  ;;  %v5305_v4 = vmax.f32 %v5274_v57, 0.0 }
 0x61e   : > { %v5277_v15 = vpop.f32.mrf.mxu1  ;;  %v5229_v46 = vadd.f32 %v5228_v56, %v8775_v35  ;;  %v5319_v24 = vmax.f32 %v5225_v43, 0.0  ;;  %v5366_v28 = vpack.c.bf16 %v5318_v53, %v5302_v25  ;;  %v10488_v56 = vpop.permute.xlu1 %5823 }
 0x61f   : > { %v5230_v16 = vpop.f32.mrf.mxu0  ;;  %v5278_v61 = vadd.f32 %v5277_v15, %v8800_v1  ;;  %v5320_v3 = vmax.f32 %v5276_v8, 0.0 }
 0x620   : > { %v5281_v7 = vpop.f32.mrf.mxu1  ;;  %v5231_v37 = vadd.f32 %v5230_v16, %v8775_v35  ;;  %v5334_v11 = vmax.f32 %v5229_v46, 0.0  ;;  %v5367_v2 = vpack.c.bf16 %v5319_v24, %v5303_v23 }
 0x621   : > { %v5232_v18 = vpop.f32.mrf.mxu0  ;;  %v5282_v39 = vadd.f32 %v5281_v7, %v8775_v35  ;;  %v5321_v12 = vmax.f32 %v5278_v61, 0.0 }
 0x622   : > { %v5283_v59 = vpop.f32.mrf.mxu1  ;;  %v5233_v14 = vadd.f32 %v5232_v18, %v8777_v20  ;;  %v5335_v41 = vmax.f32 %v5231_v37, 0.0  ;;  %v10491_v46 = vpop.permute.xlu1 %5967 }
 0x623   : > { %v5234_v47 = vpop.f32.mrf.mxu0  ;;  %v5284_v30 = vadd.f32 %v5283_v59, %v8775_v35  ;;  %v5272_v35 = vadd.f32 %v5271_v27, %v8789_v29  ;;  %v5336_v31 = vmax.f32 %v5282_v39, 0.0  ;;  %v5369_v1 = vpack.c.bf16 %v5321_v12, %v5305_v4 }
 0x624   : > { %v5285_v5 = vpop.f32.mrf.mxu1  ;;  %v5235_v42 = vadd.f32 %v5234_v47, %v8777_v20  ;;  %v5350_v6 = vmax.f32 %v5233_v14, 0.0 }
 0x625   : > { %v5286_v58 = vadd.f32 %v5285_v5, %v8777_v20  ;;  %v5337_v32 = vmax.f32 %v5284_v30, 0.0  ;;  %v5304_v49 = vmax.f32 %v5272_v35, 0.0 }
 0x626   : > { %v5351_v34 = vmax.f32 %v5235_v42, 0.0  ;;  %v5287_v38 = vpop.f32.mrf.mxu1  ;;  %v5382_v52 = vpack.c.bf16 %v5350_v6, %v5334_v11  ;;  %v10493_v47 = vpop.permute.xlu1 %5963 }
 0x627   : > { %v5288_v21 = vadd.f32 %v5287_v38, %v8777_v20  ;;  %v5352_v54 = vmax.f32 %v5286_v58, 0.0  ;;  %v5368_v22 = vpack.c.bf16 %v5320_v3, %v5304_v49 }
 0x628   : > { %v5383_v60 = vpack.c.bf16 %v5351_v34, %v5335_v41  ;;  %v10499_v41 = vpop.permute.xlu0 %5819 }
 0x629   : > { %v5353_v0 = vmax.f32 %v5288_v21, 0.0  ;;  %v5384_v20 = vpack.c.bf16 %v5352_v54, %v5336_v31 }
 0x62a   : > { %5644 = vmatprep.subr.bf16.mxu0 %v5383_v60  ;;  %v10495_v61 = vpop.permute.xlu1 %6175 }
 0x62b   : > { %v5385_v40 = vpack.c.bf16 %v5353_v0, %v5337_v32  ;;  %5645 = vmatpush1.bf16.msra.mxu0 %v5382_v52 }
 0x62c   : > { %5646 = vmatprep.subr.bf16.mxu0 %v5367_v2  ;;  %v10525_v0 = vpop.permute.xlu0 %5815 }
 0x62d   : > { %5685 = vmatprep.subr.bf16.mxu1 %v5385_v40 }
 0x62e   : > { %5686 = vmatpush1.bf16.msra.mxu1 %v5384_v20  ;;  %v10497_v39 = vpop.permute.xlu1 %5959 }
 0x62f   : > { %5687 = vmatprep.subr.bf16.mxu1 %v5369_v1  ;;  %5647 = vmatpush1.bf16.msra.mxu0 %v5366_v28 }
 0x632   : > { %5688 = vmatpush1.bf16.msra.mxu1 %v5368_v22  ;;  %6860 = vmatmul.mubr.msk.bf16.vlgmr.msra.gmra.mxu0 %vm1619_vm0, %v11965_v50  ;;  %v10501_v38 = vpop.permute.xlu1 %5811 }
 0x635   : > { %6861 = vmatmul.mubr.msk.bf16.vlgmr.msra.gmra.mxu1 %vm1619_vm0, %v11965_v50 }
 0x636   : > { %v10532_v25 = vpop.permute.xlu1 %5955 }
 0x681   : > { %v5420_v29 = vpop.f32.mrf.mxu0 }
 0x682   : > { %v5421_v51 = vadd.f32 %v5420_v29, %v8890_v62 }
 0x683   : > { %v5422_v44 = vpop.f32.mrf.mxu0 }
 0x684   : > { %v5714_v26 = vsub.f32 0.0, %v5421_v51  ;;  %v5423_v36 = vadd.f32 %v5422_v44, %v8890_v62 }
 0x685   : > { %v5424_v27 = vpop.f32.mrf.mxu0 }
 0x686   : > { %v5730_v45 = vmul.f32 1.442695, %v5714_v26  ;;  %v5461_v33 = vpop.f32.mrf.mxu1  ;;  %v5715_v9 = vsub.f32 0.0, %v5423_v36 }
 0x687   : > { %v5462_v10 = vadd.f32 %v5461_v33, %v8890_v62  ;;  %v5425_v15 = vpop.f32.mrf.mxu0 }
 0x688   : > { %7065 = vpow2.f32 %v5730_v45  ;;  %v5732_v16 = vmul.f32 1.442695, %v5715_v9  ;;  %v5463_v7 = vpop.f32.mrf.mxu1 }
 0x689   : > { %v5716_v50 = vsub.f32 0.0, %v5462_v10  ;;  %v5464_v18 = vadd.f32 %v5463_v7, %v8890_v62 }
 0x68a   : > { %7067 = vpow2.f32 %v5732_v16  ;;  %v5465_v43 = vpop.f32.mrf.mxu1 }
 0x68b   : > { %v5734_v37 = vmul.f32 1.442695, %v5716_v50  ;;  %v5717_v59 = vsub.f32 0.0, %v5464_v18  ;;  %v10564_v18 = vpop.permute.xlu0 %6171 }
 0x68c   : > { %v5466_v14 = vpop.f32.mrf.mxu1 }
 0x68d   : > { %7069 = vpow2.f32 %v5734_v37  ;;  %v5736_v17 = vmul.f32 1.442695, %v5717_v59 }
 0x68f   : > { %7071 = vpow2.f32 %v5736_v17 }
 0x695   : > { %v7066_v13 = vpop.eup %7065 }
 0x696   : > { %v5762_v63 = vadd.f32 1.0, %v7066_v13 }
 0x697   : > { %v7068_v5 = vpop.eup %7067 }
 0x698   : > { %7073 = vrcp.f32 %v5762_v63  ;;  %v5763_v42 = vadd.f32 1.0, %v7068_v5  ;;  %v10573_v5 = vpop.permute.xlu1 %6383 }
 0x69a   : > { %v7070_v30 = vpop.eup %7069  ;;  %7075 = vrcp.f32 %v5763_v42 }
 0x69b   : > { %v5764_v6 = vadd.f32 1.0, %v7070_v30 }
 0x69c   : > { %v7072_v58 = vpop.eup %7071 }
 0x69d   : > { %7077 = vrcp.f32 %v5764_v6  ;;  %v5765_v24 = vadd.f32 1.0, %v7072_v58 }
 0x69f   : > { %7079 = vrcp.f32 %v5765_v24 }
 0x6a5   : > { %v7074_v34 = vpop.eup %7073 }
 0x6a6   : > { %v10504_v23 = vrot.slane %v7074_v34, %v11839_v19  ;;  %v10507_v57 = vrot.slane %v7074_v34, %v11807_v55  ;;  %v10510_v21 = vrot.slane %v7074_v34, %v11808_v48 }
 0x6a7   : > { %v7076_v11 = vpop.eup %7075 }
 0x6a8   : > { %v10513_v53 = vrot.slane %v7076_v11, %v11839_v19  ;;  %v5938_v8 = vmul.f32 %v10504_v23, %v10488_v56  ;;  %v10518_v54 = vrot.slane %v7076_v11, %v11807_v55  ;;  %v6082_v60 = vmul.f32 %v10507_v57, %v10491_v46 }
 0x6a9   : > { %v10523_v12 = vrot.slane %v7076_v11, %v11808_v48  ;;  %v6290_v3 = vmul.f32 %v10510_v21, %v10495_v61  ;;  %v5922_v29 = vmul.f32 %v10504_v23, %v10499_v41  ;;  %v6066_v10 = vmul.f32 %v10507_v57, %v10493_v47 }
 0x6aa   : > { %v7078_v32 = vpop.eup %7077  ;;  %v5502_v52 = vpop.f32.mrf.mxu0  ;;  %v5939_v35 = vmul.f32 %v10513_v53, %v10488_v56  ;;  %v6083_v2 = vmul.f32 %v10518_v54, %v10491_v46  ;;  %v6146_v1 = vadd.f32 %v6082_v60, %v5938_v8  ;;  %v5923_v9 = vmul.f32 %v10513_v53, %v10499_v41 }
 0x6ab   : > { %v5503_v31 = vadd.f32 %v5502_v52, %v8890_v62  ;;  %v10535_v4 = vrot.slane %v7078_v32, %v11839_v19  ;;  %v10538_v40 = vrot.slane %v7078_v32, %v11807_v55  ;;  %v6291_v22 = vmul.f32 %v10523_v12, %v10495_v61 }
 0x6ac   : > { %v7080_v20 = vpop.eup %7079  ;;  %v5504_v28 = vpop.f32.mrf.mxu0  ;;  %v6147_v49 = vadd.f32 %v6083_v2, %v5939_v35  ;;  %v10562_v7 = vrot.slane %v7078_v32, %v11808_v48  ;;  %v6354_v14 = vadd.f32 %v6290_v3, %v6146_v1  ;;  %v6067_v17 = vmul.f32 %v10518_v54, %v10493_v47 }
 0x6ad   : > { %v5718_v51 = vsub.f32 0.0, %v5503_v31  ;;  %v5505_v44 = vadd.f32 %v5504_v28, %v8890_v62  ;;  %v10548_v26 = vrot.slane %v7080_v20, %v11839_v19  ;;  %v5940_v36 = vmul.f32 %v10535_v4, %v10488_v56 }
 0x6ae   : > { %v5506_v27 = vpop.f32.mrf.mxu0  ;;  %v10553_v45 = vrot.slane %v7080_v20, %v11807_v55  ;;  %v6084_v33 = vmul.f32 %v10538_v40, %v10491_v46  ;;  %v6355_v50 = vadd.f32 %v6291_v22, %v6147_v49  ;;  %v10569_v59 = vrot.slane %v7080_v20, %v11808_v48 }
 0x6af   : > { %v5738_v15 = vmul.f32 1.442695, %v5718_v51  ;;  %v5719_v16 = vsub.f32 0.0, %v5505_v44  ;;  %v5941_v37 = vmul.f32 %v10548_v26, %v10488_v56  ;;  %v6292_v34 = vmul.f32 %v10562_v7, %v10495_v61 }
 0x6b0   : > { %v5507_v43 = vpop.f32.mrf.mxu0  ;;  %v6085_v42 = vmul.f32 %v10553_v45, %v10491_v46  ;;  %v6148_v30 = vadd.f32 %v6084_v33, %v5940_v36  ;;  %v6435_v58 = vadd.f32 %v10573_v5, %v6355_v50  ;;  %v5924_v11 = vmul.f32 %v10535_v4, %v10499_v41  ;;  %v10591_v36 = vpop.permute.xlu0 %6167 }
 0x6b1   : > { %7081 = vpow2.f32 %v5738_v15  ;;  %v5740_v63 = vmul.f32 1.442695, %v5719_v16  ;;  %v6068_v8 = vmul.f32 %v10538_v40, %v10493_v47  ;;  %v6293_v52 = vmul.f32 %v10569_v59, %v10495_v61 }
 0x6b2   : > { %v5543_v13 = vpop.f32.mrf.mxu1  ;;  %v6434_v35 = vadd.f32 %v10573_v5, %v6354_v14  ;;  %v6149_v31 = vadd.f32 %v6085_v42, %v5941_v37  ;;  %v6356_v3 = vadd.f32 %v6292_v34, %v6148_v30  ;;  %v6130_v20 = vadd.f32 %v6066_v10, %v5922_v29 }
 0x6b3   : > { %v5544_v6 = vadd.f32 %v5543_v13, %v8890_v62  ;;  %7083 = vpow2.f32 %v5740_v63  ;;  %v6131_v28 = vadd.f32 %v6067_v17, %v5923_v9  ;;  %v6499_v22 = vmax.f32 %v6435_v58, 0.0 }
 0x6b4   : > { %v5545_v24 = vpop.f32.mrf.mxu1  ;;  %v5925_v51 = vmul.f32 %v10548_v26, %v10499_v41  ;;  %v6069_v27 = vmul.f32 %v10553_v45, %v10493_v47  ;;  %v6132_v33 = vadd.f32 %v6068_v8, %v5924_v11  ;;  %v6274_v15 = vmul.f32 %v10510_v21, %v10564_v18  ;;  %v10620_v8 = vpop.permute.xlu0 %6163 }
 0x6b5   : > { %v5720_v60 = vsub.f32 0.0, %v5544_v6  ;;  %v5546_v32 = vadd.f32 %v5545_v24, %v8890_v62  ;;  %v6275_v29 = vmul.f32 %v10523_v12, %v10564_v18  ;;  %v6498_v10 = vmax.f32 %v6434_v35, 0.0  ;;  %v10610_v6 = vpop.permute.xlu1 %6379 }
 0x6b6   : > { %v5547_v2 = vpop.f32.mrf.mxu1  ;;  %v6357_v16 = vadd.f32 %v6293_v52, %v6149_v31  ;;  %v6276_v50 = vmul.f32 %v10562_v7, %v10564_v18  ;;  %v6338_v43 = vadd.f32 %v6274_v15, %v6130_v20  ;;  %v5906_v14 = vmul.f32 %v10504_v23, %v10525_v0 }
 0x6b7   : > { %v5742_v1 = vmul.f32 1.442695, %v5720_v60  ;;  %v5721_v49 = vsub.f32 0.0, %v5546_v32  ;;  %v6339_v37 = vadd.f32 %v6275_v29, %v6131_v28  ;;  %v5907_v17 = vmul.f32 %v10513_v53, %v10525_v0 }
 0x6b8   : > { %v5548_v44 = vpop.f32.mrf.mxu1  ;;  %v10606_v13 = vadd.f32 %v10573_v5, %v6356_v3  ;;  %v10608_v63 = vadd.f32 %v6499_v22, %v6498_v10  ;;  %v6133_v42 = vadd.f32 %v6069_v27, %v5925_v51  ;;  %v6340_v30 = vadd.f32 %v6276_v50, %v6132_v33  ;;  %v10645_v10 = vpop.permute.xlu0 %6375 }
 0x6b9   : > { %7085 = vpow2.f32 %v5742_v1  ;;  %v5744_v9 = vmul.f32 1.442695, %v5721_v49  ;;  %v5908_v58 = vmul.f32 %v10535_v4, %v10525_v0  ;;  %v5909_v24 = vmul.f32 %v10548_v26, %v10525_v0 }
 0x6ba   : > { %v6050_v34 = vmul.f32 %v10507_v57, %v10497_v39  ;;  %v6051_v11 = vmul.f32 %v10518_v54, %v10497_v39  ;;  %v10623_v60 = vadd.f32 %v10573_v5, %v6357_v16  ;;  %v6277_v32 = vmul.f32 %v10569_v59, %v10564_v18 }
 0x6bb   : > { %7087 = vpow2.f32 %v5744_v9  ;;  %v10628_v52 = vadd.f32 %v10610_v6, %v6338_v43  ;;  %v10631_v35 = vadd.f32 %v10610_v6, %v6339_v37  ;;  %v6052_v31 = vmul.f32 %v10538_v40, %v10497_v39 }
 0x6bc   : > { %v6053_v3 = vmul.f32 %v10553_v45, %v10497_v39  ;;  %v6114_v20 = vadd.f32 %v6050_v34, %v5906_v14  ;;  %v6115_v28 = vadd.f32 %v6051_v11, %v5907_v17  ;;  %v6500_v49 = vmax.f32 %v10606_v13, 0.0 }
 0x6bd   : > { %v6341_v22 = vadd.f32 %v6277_v32, %v6133_v42  ;;  %v10639_v51 = vadd.f32 %v10610_v6, %v6340_v30  ;;  %v6116_v27 = vadd.f32 %v6052_v31, %v5908_v58  ;;  %v6258_v15 = vmul.f32 %v10510_v21, %v10591_v36 }
 0x6be   : > { %v7082_v2 = vpop.eup %7081  ;;  %v6117_v33 = vadd.f32 %v6053_v3, %v5909_v24  ;;  %v6259_v29 = vmul.f32 %v10523_v12, %v10591_v36  ;;  %v6482_v16 = vmax.f32 %v10628_v52, 0.0  ;;  %v6260_v50 = vmul.f32 %v10562_v7, %v10591_v36 }
 0x6bf   : > { %v5766_v1 = vadd.f32 1.0, %v7082_v2  ;;  %v6483_v43 = vmax.f32 %v10631_v35, 0.0  ;;  %v6261_v37 = vmul.f32 %v10569_v59, %v10591_v36  ;;  %v6322_v14 = vadd.f32 %v6258_v15, %v6114_v20 }
 0x6c0   : > { %v7084_v44 = vpop.eup %7083  ;;  %v6323_v17 = vadd.f32 %v6259_v29, %v6115_v28  ;;  %v6324_v13 = vadd.f32 %v6260_v50, %v6116_v27  ;;  %v5890_v42 = vmul.f32 %v10504_v23, %v10501_v38  ;;  %v5891_v30 = vmul.f32 %v10513_v53, %v10501_v38 }
 0x6c1   : > { %7089 = vrcp.f32 %v5766_v1  ;;  %v5767_v9 = vadd.f32 1.0, %v7084_v44  ;;  %v6325_v58 = vadd.f32 %v6261_v37, %v6117_v33  ;;  %v6402_v24 = vadd.f32 %v10645_v10, %v6322_v14 }
 0x6c2   : > { %v6403_v34 = vadd.f32 %v10645_v10, %v6323_v17  ;;  %v5892_v11 = vmul.f32 %v10535_v4, %v10501_v38  ;;  %v6404_v52 = vadd.f32 %v10645_v10, %v6324_v13  ;;  %v5893_v35 = vmul.f32 %v10548_v26, %v10501_v38 }
 0x6c3   : > { %7091 = vrcp.f32 %v5767_v9  ;;  %v6034_v23 = vmul.f32 %v10507_v57, %v10532_v25  ;;  %v6035_v53 = vmul.f32 %v10518_v54, %v10532_v25  ;;  %v6405_v31 = vadd.f32 %v10645_v10, %v6325_v58 }
 0x6c4   : > { %v6466_v3 = vmax.f32 %v6402_v24, 0.0  ;;  %v6467_v20 = vmax.f32 %v6403_v34, 0.0  ;;  %v6468_v1 = vmax.f32 %v6404_v52, 0.0  ;;  %v6036_v4 = vmul.f32 %v10538_v40, %v10532_v25 }
 0x6c5   : > { %v6037_v44 = vmul.f32 %v10553_v45, %v10532_v25  ;;  %v6098_v26 = vadd.f32 %v6034_v23, %v5890_v42  ;;  %v6469_v57 = vmax.f32 %v6405_v31, 0.0  ;;  %v6099_v15 = vadd.f32 %v6035_v53, %v5891_v30 }
 0x6c6   : > { %v7086_v32 = vpop.eup %7085  ;;  %v6523_v33 = vadd.f32 %v6467_v20, %v6466_v3  ;;  %v6100_v54 = vadd.f32 %v6036_v4, %v5892_v11  ;;  %v6242_v9 = vmul.f32 %v10510_v21, %v10620_v8  ;;  %v6243_v37 = vmul.f32 %v10523_v12, %v10620_v8 }
 0x6c7   : > { %v5768_v2 = vadd.f32 1.0, %v7086_v32  ;;  %v6101_v29 = vadd.f32 %v6037_v44, %v5893_v35  ;;  %v6244_v40 = vmul.f32 %v10562_v7, %v10620_v8  ;;  %v6542_v45 = vadd.f32 %v10608_v63, %v6500_v49 }
 0x6c8   : > { %v7088_v28 = vpop.eup %7087  ;;  %v6524_v50 = vadd.f32 %v6523_v33, %v6468_v1  ;;  %v10681_v14 = vadd.f32 %v10610_v6, %v6341_v22  ;;  %v6245_v17 = vmul.f32 %v10569_v59, %v10620_v8  ;;  %v10685_v13 = vadd.f32 %v6242_v9, %v6098_v26 }
 0x6c9   : > { %7093 = vrcp.f32 %v5768_v2  ;;  %v5769_v27 = vadd.f32 1.0, %v7088_v28  ;;  %v6532_v42 = vadd.f32 %v6483_v43, %v6482_v16  ;;  %v10689_v30 = vadd.f32 %v6243_v37, %v6099_v15 }
 0x6ca   : > { %v10687_v21 = vadd.f32 %v6524_v50, %v6469_v57  ;;  %v10691_v58 = vadd.f32 %v6244_v40, %v6100_v54  ;;  %v10693_v12 = vadd.f32 %v6245_v17, %v6101_v29  ;;  %v6501_v63 = vmax.f32 %v10623_v60, 0.0 }
 0x6cb   : > { %7095 = vrcp.f32 %v5769_v27  ;;  %v6484_v49 = vmax.f32 %v10639_v51, 0.0  ;;  %v6485_v32 = vmax.f32 %v10681_v14, 0.0 }
 0x6cc   : > { %v10707_v11 = vadd.f32 %v6542_v45, %v6501_v63 }
 0x6cd   : > { %v10710_v60 = vadd.f32 %v6532_v42, %v6484_v49 }
 0x6ce   : > { %v7090_v7 = vpop.eup %7089 }
 0x6cf   : > { %v10698_v24 = vrot.slane %v7090_v7, %v11839_v19  ;;  %v10701_v59 = vrot.slane %v7090_v7, %v11807_v55  ;;  %v10704_v16 = vrot.slane %v7090_v7, %v11808_v48 }
 0x6d0   : > { %v5584_v22 = vpop.f32.mrf.mxu0  ;;  %v7092_v43 = vpop.eup %7091 }
 0x6d1   : > { %11966 = vst [vmem:[#allocation38_spill] sm:$0xff] %v10704_v16  ;;  %v5585_v34 = vadd.f32 %v5584_v22, %v8890_v62  ;;  %v10713_v52 = vrot.slane %v7092_v43, %v11839_v19  ;;  %v5942_v35 = vmul.f32 %v10698_v24, %v10488_v56  ;;  %v10718_v23 = vrot.slane %v7092_v43, %v11807_v55 }
 0x6d2   : > { %v5586_v51 = vpop.f32.mrf.mxu0  ;;  %v6086_v53 = vmul.f32 %v10701_v59, %v10491_v46  ;;  %v10724_v3 = vrot.slane %v7092_v43, %v11808_v48  ;;  %v6294_v20 = vmul.f32 %v10704_v16, %v10495_v61  ;;  %v5926_v26 = vmul.f32 %v10698_v24, %v10499_v41 }
 0x6d3   : > { %v5722_v2 = vsub.f32 0.0, %v5585_v34  ;;  %v5587_v31 = vadd.f32 %v5586_v51, %v8890_v62  ;;  %v5943_v1 = vmul.f32 %v10713_v52, %v10488_v56  ;;  %v6087_v4 = vmul.f32 %v10718_v23, %v10491_v46 }
 0x6d4   : > { %11967 = vst [vmem:[#allocation39_spill] sm:$0xff] %v10724_v3  ;;  %v5588_v28 = vpop.f32.mrf.mxu0  ;;  %v6150_v44 = vadd.f32 %v6086_v53, %v5942_v35  ;;  %v6295_v15 = vmul.f32 %v10724_v3, %v10495_v61  ;;  %v5927_v54 = vmul.f32 %v10713_v52, %v10499_v41  ;;  %v6070_v45 = vmul.f32 %v10701_v59, %v10493_v47 }
 0x6d5   : > { %v5746_v27 = vmul.f32 1.442695, %v5722_v2  ;;  %v5625_v57 = vpop.f32.mrf.mxu1  ;;  %v5723_v33 = vsub.f32 0.0, %v5587_v31  ;;  %v6151_v37 = vadd.f32 %v6087_v4, %v5943_v1 }
 0x6d6   : > { %v7094_v29 = vpop.eup %7093  ;;  %v5626_v9 = vadd.f32 %v5625_v57, %v8890_v62  ;;  %v5589_v50 = vpop.f32.mrf.mxu0  ;;  %v6358_v40 = vadd.f32 %v6294_v20, %v6150_v44 }
 0x6d7   : > { %7097 = vpow2.f32 %v5746_v27  ;;  %v5748_v17 = vmul.f32 1.442695, %v5723_v33  ;;  %v5627_v42 = vpop.f32.mrf.mxu1  ;;  %v10742_v7 = vrot.slane %v7094_v29, %v11839_v19  ;;  %v10745_v63 = vrot.slane %v7094_v29, %v11807_v55 }
 0x6d8   : > { %v7096_v49 = vpop.eup %7095  ;;  %v5724_v22 = vsub.f32 0.0, %v5626_v9  ;;  %v5628_v43 = vadd.f32 %v5627_v42, %v8890_v62  ;;  %v10749_v34 = vrot.slane %v7094_v29, %v11808_v48  ;;  %v6359_v51 = vadd.f32 %v6295_v15, %v6151_v37 }
 0x6d9   : > { %7099 = vpow2.f32 %v5748_v17  ;;  %v5629_v35 = vpop.f32.mrf.mxu1  ;;  %v10752_v53 = vrot.slane %v7096_v49, %v11839_v19  ;;  %v5944_v2 = vmul.f32 %v10742_v7, %v10488_v56  ;;  %v10757_v31 = vrot.slane %v7096_v49, %v11807_v55 }
 0x6da   : > { %11968 = vst [vmem:[#allocation51_spill] sm:$0xff] %v10749_v34  ;;  %v5750_v20 = vmul.f32 1.442695, %v5724_v22  ;;  %v5725_v28 = vsub.f32 0.0, %v5628_v43  ;;  %v6088_v1 = vmul.f32 %v10745_v63, %v10491_v46  ;;  %v10762_v4 = vrot.slane %v7096_v49, %v11808_v48 }
 0x6db   : > { %v5630_v44 = vpop.f32.mrf.mxu1  ;;  %v5945_v27 = vmul.f32 %v10752_v53, %v10488_v56  ;;  %v6089_v57 = vmul.f32 %v10757_v31, %v10491_v46  ;;  %v6296_v33 = vmul.f32 %v10749_v34, %v10495_v61  ;;  %v6438_v15 = vadd.f32 %v10573_v5, %v6358_v40 }
 0x6dc   : > { %11969 = vst [vmem:[#allocation52_spill] sm:$0xff] %v10762_v4  ;;  %7101 = vpow2.f32 %v5750_v20  ;;  %v5752_v29 = vmul.f32 1.442695, %v5725_v28  ;;  %v6152_v9 = vadd.f32 %v6088_v1, %v5944_v2  ;;  %v6297_v50 = vmul.f32 %v10762_v4, %v10495_v61 }
 0x6dd   : > { %v6153_v37 = vadd.f32 %v6089_v57, %v5945_v27  ;;  %v6439_v17 = vadd.f32 %v10573_v5, %v6359_v51  ;;  %v6502_v42 = vmax.f32 %v6438_v15, 0.0  ;;  %v5928_v49 = vmul.f32 %v10742_v7, %v10499_v41 }
 0x6de   : > { %7103 = vpow2.f32 %v5752_v29  ;;  %v6360_v22 = vadd.f32 %v6296_v33, %v6152_v9  ;;  %v5929_v43 = vmul.f32 %v10752_v53, %v10499_v41  ;;  %v6071_v40 = vmul.f32 %v10718_v23, %v10493_v47 }
 0x6df   : > { %v6361_v35 = vadd.f32 %v6297_v50, %v6153_v37  ;;  %v6503_v2 = vmax.f32 %v6439_v17, 0.0  ;;  %v6544_v20 = vadd.f32 %v10707_v11, %v6502_v42  ;;  %v6072_v28 = vmul.f32 %v10745_v63, %v10493_v47 }
 0x6e0   : > { %v6440_v51 = vadd.f32 %v10573_v5, %v6360_v22  ;;  %v6073_v1 = vmul.f32 %v10757_v31, %v10493_v47  ;;  %v6134_v44 = vadd.f32 %v6070_v45, %v5926_v26  ;;  %v6135_v27 = vadd.f32 %v6071_v40, %v5927_v54 }
 0x6e1   : > { %v6441_v57 = vadd.f32 %v10573_v5, %v6361_v35  ;;  %v6545_v33 = vadd.f32 %v6544_v20, %v6503_v2  ;;  %v6136_v15 = vadd.f32 %v6072_v28, %v5928_v49  ;;  %v6278_v29 = vmul.f32 %v10704_v16, %v10564_v18 }
 0x6e2   : > { %v6504_v9 = vmax.f32 %v6440_v51, 0.0  ;;  %v6137_v50 = vadd.f32 %v6073_v1, %v5929_v43  ;;  %v6279_v11 = vmul.f32 %v10724_v3, %v10564_v18  ;;  %v6280_v37 = vmul.f32 %v10749_v34, %v10564_v18 }
 0x6e3   : > { %v6505_v17 = vmax.f32 %v6441_v57, 0.0  ;;  %v6281_v26 = vmul.f32 %v10762_v4, %v10564_v18  ;;  %v6342_v54 = vadd.f32 %v6278_v29, %v6134_v44  ;;  %v6534_v45 = vadd.f32 %v10710_v60, %v6485_v32 }
 0x6e4   : > { %v7098_v42 = vpop.eup %7097  ;;  %v6546_v49 = vadd.f32 %v6545_v33, %v6504_v9  ;;  %v6343_v22 = vadd.f32 %v6279_v11, %v6135_v27  ;;  %v6344_v40 = vadd.f32 %v6280_v37, %v6136_v15  ;;  %v5910_v43 = vmul.f32 %v10698_v24, %v10525_v0 }
 0x6e5   : > { %v5770_v35 = vadd.f32 1.0, %v7098_v42  ;;  %v6345_v2 = vadd.f32 %v6281_v26, %v6137_v50  ;;  %v6422_v20 = vadd.f32 %v10610_v6, %v6342_v54  ;;  %v5911_v28 = vmul.f32 %v10713_v52, %v10525_v0 }
 0x6e6   : > { %v7100_v51 = vpop.eup %7099  ;;  %v6547_v1 = vadd.f32 %v6546_v49, %v6505_v17  ;;  %v6423_v14 = vadd.f32 %v10610_v6, %v6343_v22  ;;  %v6424_v32 = vadd.f32 %v10610_v6, %v6344_v40  ;;  %v5912_v60 = vmul.f32 %v10742_v7, %v10525_v0 }
 0x6e7   : > { %7105 = vrcp.f32 %v5770_v35  ;;  %v5771_v44 = vadd.f32 1.0, %v7100_v51  ;;  %v6486_v27 = vmax.f32 %v6422_v20, 0.0  ;;  %v5913_v57 = vmul.f32 %v10752_v53, %v10525_v0 }
 0x6e8   : > { %6548 = vadd.xlane.f32.xlu1 %v6547_v1  ;;  %v6425_v33 = vadd.f32 %v10610_v6, %v6345_v2  ;;  %v6487_v15 = vmax.f32 %v6423_v14, 0.0  ;;  %v6054_v29 = vmul.f32 %v10701_v59, %v10497_v39  ;;  %v6055_v9 = vmul.f32 %v10718_v23, %v10497_v39  ;;  %v10824_v14 = vpop.permute.xlu1 %6371 }
 0x6e9   : > { %v7102_v50 = vpop.eup %7101  ;;  %7107 = vrcp.f32 %v5771_v44  ;;  %v6488_v11 = vmax.f32 %v6424_v32, 0.0  ;;  %v6535_v37 = vadd.f32 %v6534_v45, %v6486_v27  ;;  %v6056_v17 = vmul.f32 %v10745_v63, %v10497_v39  ;;  %11970 = vst [vmem:[#allocation53_spill] sm:$0xff] %v10824_v14 }
 0x6ea   : > { %v5772_v26 = vadd.f32 1.0, %v7102_v50  ;;  %v6057_v54 = vmul.f32 %v10757_v31, %v10497_v39  ;;  %v6118_v42 = vadd.f32 %v6054_v29, %v5910_v43  ;;  %v6119_v49 = vadd.f32 %v6055_v9, %v5911_v28 }
 0x6eb   : > { %v7104_v22 = vpop.eup %7103  ;;  %v6536_v40 = vadd.f32 %v6535_v37, %v6487_v15  ;;  %v6120_v35 = vadd.f32 %v6056_v17, %v5912_v60  ;;  %v6262_v2 = vmul.f32 %v10704_v16, %v10591_v36  ;;  %v6263_v20 = vmul.f32 %v10724_v3, %v10591_v36 }
 0x6ec   : > { %7109 = vrcp.f32 %v5772_v26  ;;  %v5773_v45 = vadd.f32 1.0, %v7104_v22  ;;  %v6121_v51 = vadd.f32 %v6057_v54, %v5913_v57  ;;  %v6264_v1 = vmul.f32 %v10749_v34, %v10591_v36 }
 0x6ed   : > { %v6489_v32 = vmax.f32 %v6425_v33, 0.0  ;;  %v6537_v43 = vadd.f32 %v6536_v40, %v6488_v11  ;;  %v6326_v28 = vadd.f32 %v6262_v2, %v6118_v42  ;;  %v6327_v44 = vadd.f32 %v6263_v20, %v6119_v49 }
 0x6ee   : > { %7111 = vrcp.f32 %v5773_v45  ;;  %v6265_v60 = vmul.f32 %v10762_v4, %v10591_v36  ;;  %v6328_v27 = vadd.f32 %v6264_v1, %v6120_v35  ;;  %v5894_v15 = vmul.f32 %v10698_v24, %v10501_v38 }
 0x6ef   : > { %v6538_v29 = vadd.f32 %v6537_v43, %v6489_v32  ;;  %v6406_v57 = vadd.f32 %v10645_v10, %v6326_v28  ;;  %v6407_v9 = vadd.f32 %v10645_v10, %v6327_v44  ;;  %v5895_v50 = vmul.f32 %v10713_v52, %v10501_v38 }
 0x6f0   : > { %v5896_v33 = vmul.f32 %v10742_v7, %v10501_v38  ;;  %v5897_v11 = vmul.f32 %v10752_v53, %v10501_v38  ;;  %v6038_v37 = vmul.f32 %v10701_v59, %v10532_v25  ;;  %v10842_v24 = vadd.f32 %v10824_v14, %v10685_v13 }
 0x6f1   : > { %6539 = vadd.xlane.f32.xlu0 %v6538_v29  ;;  %v6329_v17 = vadd.f32 %v6265_v60, %v6121_v51  ;;  %v6470_v26 = vmax.f32 %v6406_v57, 0.0  ;;  %v6039_v54 = vmul.f32 %v10718_v23, %v10532_v25  ;;  %v10848_v52 = vadd.f32 %v10824_v14, %v10689_v30 }
 0x6f2   : > { %11971 = vst [vmem:[#allocation41_spill] sm:$0xff] %v10842_v24  ;;  %v5666_v7 = vpop.f32.mrf.mxu0  ;;  %v6471_v42 = vmax.f32 %v6407_v9, 0.0  ;;  %v6040_v53 = vmul.f32 %v10745_v63, %v10532_v25  ;;  %v6041_v59 = vmul.f32 %v10757_v31, %v10532_v25  ;;  %v10854_v13 = vadd.f32 %v6038_v37, %v5894_v15 }
 0x6f3   : > { %11972 = vst [vmem:[#allocation45_spill] sm:$0xff] %v10848_v52  ;;  %v5667_v49 = vadd.f32 %v5666_v7, %v8890_v62  ;;  %v6526_v22 = vadd.f32 %v10687_v21, %v6470_v26  ;;  %v10858_v40 = vadd.f32 %v6039_v54, %v5895_v50  ;;  %v10862_v30 = vadd.f32 %v10824_v14, %v10691_v58 }
 0x6f4   : > { %11973 = vst [vmem:[#allocation56_spill] sm:$0xff] %v10854_v13  ;;  %v7106_v23 = vpop.eup %7105  ;;  %v5668_v35 = vpop.f32.mrf.mxu0  ;;  %v10865_v2 = vadd.f32 %v10645_v10, %v6328_v27  ;;  %v10867_v63 = vadd.f32 %v6040_v53, %v5896_v33  ;;  %v10869_v31 = vadd.f32 %v6041_v59, %v5897_v11  ;;  %v10873_v20 = vadd.f32 %v10824_v14, %v10693_v12 }
 0x6f5   : > { %11974 = vst [vmem:[#allocation57_spill] sm:$0xff] %v10858_v40  ;;  %11975 = vst [vmem:[#allocation58_spill] sm:$0xff] %v10862_v30  ;;  %v5726_v21 = vsub.f32 0.0, %v5667_v49  ;;  %v5707_v45 = vpop.f32.mrf.mxu1  ;;  %v5669_v51 = vadd.f32 %v5668_v35, %v8890_v62  ;;  %v10877_v58 = vrot.slane %v7106_v23, %v11839_v19  ;;  %v10880_v1 = vrot.slane %v7106_v23, %v11807_v55 }
 0x6f6   : > { %11976 = vst [vmem:[#allocation48_spill] sm:$0xff] %v10867_v63  ;;  %11977 = vst [vmem:[#allocation54_spill] sm:$0xff] %v10869_v31  ;;  %v7108_v32 = vpop.eup %7107  ;;  %v5708_v43 = vadd.f32 %v5707_v45, %v8890_v62  ;;  %v5670_v28 = vpop.f32.mrf.mxu0  ;;  %v10884_v44 = vrot.slane %v7106_v23, %v11808_v48  ;;  %v10887_v12 = vadd.f32 %v10645_v10, %v6329_v17  ;;  %v6472_v4 = vmax.f32 %v10865_v2, 0.0 }
 0x6f7   : > { %11978 = vst [vmem:[#allocation49_spill] sm:$0xff] %v10873_v20  ;;  %v10889_v60 = vadd.f32 %v6526_v22, %v6471_v42  ;;  %v5754_v27 = vmul.f32 1.442695, %v5726_v21  ;;  %v5727_v15 = vsub.f32 0.0, %v5669_v51  ;;  %v5709_v29 = vpop.f32.mrf.mxu1  ;;  %v10892_v57 = vrot.slane %v7108_v32, %v11839_v19 }
 0x6f8   : > { %v5930_v9 = vmul.f32 %v10877_v58, %v10499_v41  ;;  %v5728_v50 = vsub.f32 0.0, %v5708_v43  ;;  %v5710_v33 = vadd.f32 %v5709_v29, %v8890_v62  ;;  %v5671_v11 = vpop.f32.mrf.mxu0  ;;  %v10898_v37 = vrot.slane %v7108_v32, %v11807_v55 }
 0x6f9   : > { %v6074_v17 = vmul.f32 %v10880_v1, %v10493_v47  ;;  %v7110_v26 = vpop.eup %7109  ;;  %7113 = vpow2.f32 %v5754_v27  ;;  %v5756_v54 = vmul.f32 1.442695, %v5727_v15  ;;  %v5711_v7 = vpop.f32.mrf.mxu1  ;;  %v5931_v42 = vmul.f32 %v10892_v57, %v10499_v41 }
 0x6fa   : > { %v10905_v53 = vrot.slane %v7108_v32, %v11808_v48  ;;  %v5758_v59 = vmul.f32 1.442695, %v5728_v50  ;;  %v5729_v49 = vsub.f32 0.0, %v5710_v33  ;;  %v10908_v62 = vrot.slane %v7110_v26, %v11839_v19 }
 0x6fb   : > { %v10911_v22 = vrot.slane %v7110_v26, %v11807_v55  ;;  %v7112_v23 = vpop.eup %7111  ;;  %7115 = vpow2.f32 %v5756_v54  ;;  %v5712_v35 = vpop.f32.mrf.mxu1  ;;  %v6075_v21 = vmul.f32 %v10898_v37, %v10493_v47  ;;  %v6138_v45 = vadd.f32 %v6074_v17, %v5930_v9 }
 0x6fc   : > { %v10916_v51 = vrot.slane %v7110_v26, %v11808_v48  ;;  %7117 = vpow2.f32 %v5758_v59  ;;  %v5760_v32 = vmul.f32 1.442695, %v5729_v49  ;;  %v10919_v43 = vrot.slane %v7112_v23, %v11839_v19 }
 0x6fd   : > { %v5932_v28 = vmul.f32 %v10908_v62, %v10499_v41  ;;  %v10924_v27 = vrot.slane %v7112_v23, %v11807_v55  ;;  %v6076_v15 = vmul.f32 %v10911_v22, %v10493_v47  ;;  %v6139_v29 = vadd.f32 %v6075_v21, %v5931_v42 }
 0x6fe   : > { %v10929_v9 = vrot.slane %v7112_v23, %v11808_v48  ;;  %7119 = vpow2.f32 %v5760_v32  ;;  %v5933_v50 = vmul.f32 %v10919_v43, %v10499_v41  ;;  %v6282_v33 = vmul.f32 %v10884_v44, %v10564_v18 }
 0x6ff   : > { %v6283_v11 = vmul.f32 %v10905_v53, %v10564_v18  ;;  %v6077_v17 = vmul.f32 %v10924_v27, %v10493_v47  ;;  %v6140_v26 = vadd.f32 %v6076_v15, %v5932_v28  ;;  %v6284_v54 = vmul.f32 %v10916_v51, %v10564_v18 }
 0x700   : > { %11979 = vst [vmem:[#allocation3_spill] sm:$0xff] %v10929_v9  ;;  %v6285_v7 = vmul.f32 %v10929_v9, %v10564_v18  ;;  %v6346_v42 = vadd.f32 %v6282_v33, %v6138_v45  ;;  %v5946_v49 = vmul.f32 %v10877_v58, %v10488_v56  ;;  %v5947_v23 = vmul.f32 %v10892_v57, %v10488_v56 }
 0x701   : > { %v6347_v59 = vadd.f32 %v6283_v11, %v6139_v29  ;;  %v6141_v35 = vadd.f32 %v6077_v17, %v5933_v50  ;;  %v6348_v21 = vadd.f32 %v6284_v54, %v6140_v26  ;;  %v5948_v32 = vmul.f32 %v10908_v62, %v10488_v56 }
 0x702   : > { %v5949_v28 = vmul.f32 %v10919_v43, %v10488_v56  ;;  %v6426_v15 = vadd.f32 %v10610_v6, %v6346_v42  ;;  %v6090_v45 = vmul.f32 %v10880_v1, %v10491_v46  ;;  %v6091_v29 = vmul.f32 %v10898_v37, %v10491_v46 }
 0x703   : > { %v6427_v20 = vadd.f32 %v10610_v6, %v6347_v59  ;;  %v6349_v33 = vadd.f32 %v6285_v7, %v6141_v35  ;;  %v6428_v50 = vadd.f32 %v10610_v6, %v6348_v21  ;;  %v6092_v11 = vmul.f32 %v10911_v22, %v10491_v46 }
 0x704   : > { %v6093_v17 = vmul.f32 %v10924_v27, %v10491_v46  ;;  %v6490_v26 = vmax.f32 %v6426_v15, 0.0  ;;  %v6154_v42 = vadd.f32 %v6090_v45, %v5946_v49  ;;  %v6155_v31 = vadd.f32 %v6091_v29, %v5947_v23 }
 0x705   : > { %v6491_v54 = vmax.f32 %v6427_v20, 0.0  ;;  %v6156_v59 = vadd.f32 %v6092_v11, %v5948_v32  ;;  %v6298_v35 = vmul.f32 %v10884_v44, %v10495_v61  ;;  %v6299_v21 = vmul.f32 %v10905_v53, %v10495_v61 }
 0x706   : > { %v6157_v63 = vadd.f32 %v6093_v17, %v5949_v28  ;;  %v7114_v13 = vpop.eup %7113  ;;  %v6300_v15 = vmul.f32 %v10916_v51, %v10495_v61  ;;  %v6429_v49 = vadd.f32 %v10610_v6, %v6349_v33  ;;  %v6301_v23 = vmul.f32 %v10929_v9, %v10495_v61 }
 0x707   : > { %v6568_v7 = vadd.f32 %v6491_v54, %v6490_v26  ;;  %v5774_v20 = vadd.f32 1.0, %v7114_v13  ;;  %v6473_v2 = vmax.f32 %v10887_v12, 0.0  ;;  %v6492_v28 = vmax.f32 %v6428_v50, 0.0 }
 0x708   : > { %v7116_v32 = vpop.eup %7115  ;;  %v6362_v45 = vadd.f32 %v6298_v35, %v6154_v42  ;;  %v6363_v29 = vadd.f32 %v6299_v21, %v6155_v31  ;;  %v6364_v11 = vadd.f32 %v6300_v15, %v6156_v59  ;;  %v6365_v54 = vadd.f32 %v6301_v23, %v6157_v63 }
 0x709   : > { %v7118_v17 = vpop.eup %7117  ;;  %7121 = vrcp.f32 %v5774_v20  ;;  %v5775_v26 = vadd.f32 1.0, %v7116_v32  ;;  %v5914_v40 = vmul.f32 %v10877_v58, %v10525_v0  ;;  %v6569_v24 = vadd.f32 %v6568_v7, %v6492_v28 }
 0x70a   : > { %v5776_v13 = vadd.f32 1.0, %v7118_v17  ;;  %v6442_v33 = vadd.f32 %v10573_v5, %v6362_v45  ;;  %v6443_v34 = vadd.f32 %v10573_v5, %v6363_v29  ;;  %v6444_v12 = vadd.f32 %v10573_v5, %v6364_v11 }
 0x70b   : > { %v7120_v3 = vpop.eup %7119  ;;  %7123 = vrcp.f32 %v5775_v26  ;;  %v5915_v31 = vmul.f32 %v10892_v57, %v10525_v0  ;;  %v5916_v50 = vmul.f32 %v10908_v62, %v10525_v0  ;;  %v6445_v7 = vadd.f32 %v10573_v5, %v6365_v54 }
 0x70c   : > { %7125 = vrcp.f32 %v5776_v13  ;;  %v5777_v63 = vadd.f32 1.0, %v7120_v3  ;;  %v6506_v42 = vmax.f32 %v6442_v33, 0.0  ;;  %v6507_v59 = vmax.f32 %v6443_v34, 0.0 }
 0x70d   : > { %v6508_v35 = vmax.f32 %v6444_v12, 0.0  ;;  %v5917_v21 = vmul.f32 %v10919_v43, %v10525_v0  ;;  %v6058_v15 = vmul.f32 %v10880_v1, %v10497_v39  ;;  %v6059_v23 = vmul.f32 %v10898_v37, %v10497_v39 }
 0x70e   : > { %7127 = vrcp.f32 %v5777_v63  ;;  %v6577_v20 = vadd.f32 %v6507_v59, %v6506_v42  ;;  %v6060_v32 = vmul.f32 %v10911_v22, %v10497_v39  ;;  %v6061_v3 = vmul.f32 %v10924_v27, %v10497_v39 }
 0x70f   : > { %v6122_v34 = vadd.f32 %v6058_v15, %v5914_v40  ;;  %v6266_v28 = vmul.f32 %v10884_v44, %v10591_v36  ;;  %v6267_v45 = vmul.f32 %v10905_v53, %v10591_v36  ;;  %v6123_v11 = vadd.f32 %v6059_v23, %v5915_v31 }
 0x710   : > { %v6578_v29 = vadd.f32 %v6577_v20, %v6508_v35  ;;  %v6124_v17 = vadd.f32 %v6060_v32, %v5916_v50  ;;  %v6268_v26 = vmul.f32 %v10916_v51, %v10591_v36  ;;  %v6125_v54 = vadd.f32 %v6061_v3, %v5917_v21 }
 0x711   : > { %v6269_v13 = vmul.f32 %v10929_v9, %v10591_v36  ;;  %v6330_v33 = vadd.f32 %v6266_v28, %v6122_v34  ;;  %v6528_v12 = vadd.f32 %v10889_v60, %v6472_v4  ;;  %v6493_v40 = vmax.f32 %v6429_v49, 0.0 }
 0x712   : > { %v6509_v63 = vmax.f32 %v6445_v7, 0.0  ;;  %v6331_v42 = vadd.f32 %v6267_v45, %v6123_v11  ;;  %v6332_v59 = vadd.f32 %v6268_v26, %v6124_v17  ;;  %v11024_v49 = vmul.f32 %v10877_v58, %v10501_v38 }
 0x713   : > { %v6333_v15 = vadd.f32 %v6269_v13, %v6125_v54  ;;  %v11004_v16 = vadd.f32 %v10645_v10, %v6330_v33  ;;  %v11006_v31 = vadd.f32 %v6528_v12, %v6473_v2  ;;  %v11009_v35 = vadd.f32 %v6569_v24, %v6493_v40 }
 0x714   : > { %v11011_v21 = vadd.f32 %v6578_v29, %v6509_v63  ;;  %v11014_v20 = vadd.f32 %v10645_v10, %v6331_v42  ;;  %v11017_v4 = vadd.f32 %v10645_v10, %v6332_v59  ;;  %v11028_v2 = vmul.f32 %v10892_v57, %v10501_v38 }
 0x715   : > { %11980 = vst [vmem:[#allocation4_spill] sm:$0xff] %v11006_v31  ;;  %v11020_v60 = vadd.f32 %v10645_v10, %v6333_v15  ;;  %v11032_v24 = vmul.f32 %v10908_v62, %v10501_v38  ;;  %v6474_v23 = vmax.f32 %v11004_v16, 0.0  ;;  %v11037_v32 = vmul.f32 %v10919_v43, %v10501_v38 }
 0x716   : > { %v7122_v7 = vpop.eup %7121  ;;  %v11041_v3 = vmul.f32 %v10880_v1, %v10532_v25  ;;  %v11045_v58 = vmul.f32 %v10898_v37, %v10532_v25  ;;  %v6475_v43 = vmax.f32 %v11014_v20, 0.0  ;;  %v11061_v37 = vmul.f32 %v10911_v22, %v10532_v25 }
 0x717   : > { %v11048_v57 = vrot.slane %v7122_v7, %v11839_v19  ;;  %v11051_v62 = vrot.slane %v7122_v7, %v11807_v55  ;;  %v11054_v16 = vrot.slane %v7122_v7, %v11808_v48  ;;  %v11065_v45 = vmul.f32 %v10924_v27, %v10532_v25 }
 0x718   : > { %v7124_v34 = vpop.eup %7123  ;;  %v6559_v31 = vadd.f32 %v6475_v43, %v6474_v23 }
 0x719   : > { %v7126_v29 = vpop.eup %7125  ;;  %v11068_v11 = vrot.slane %v7124_v34, %v11839_v19  ;;  %v5934_v17 = vmul.f32 %v11048_v57, %v10499_v41  ;;  %v11073_v26 = vrot.slane %v7124_v34, %v11807_v55  ;;  %v6078_v54 = vmul.f32 %v11051_v62, %v10493_v47 }
 0x71a   : > { %v11078_v22 = vrot.slane %v7126_v29, %v11839_v19  ;;  %v11081_v13 = vrot.slane %v7126_v29, %v11807_v55  ;;  %v11084_v27 = vrot.slane %v7124_v34, %v11808_v48  ;;  %v11087_v33 = vrot.slane %v7126_v29, %v11808_v48 }
 0x71b   : > { %v7128_v12 = vpop.eup %7127  ;;  %v5935_v40 = vmul.f32 %v11068_v11, %v10499_v41  ;;  %v6079_v63 = vmul.f32 %v11073_v26, %v10493_v47  ;;  %v6142_v42 = vadd.f32 %v6078_v54, %v5934_v17  ;;  %v6286_v59 = vmul.f32 %v11054_v16, %v10564_v18 }
 0x71c   : > { %v11096_v15 = vrot.slane %v7128_v12, %v11839_v19  ;;  %v5936_v20 = vmul.f32 %v11078_v22, %v10499_v41  ;;  %v11101_v7 = vrot.slane %v7128_v12, %v11807_v55  ;;  %v6080_v34 = vmul.f32 %v11081_v13, %v10493_v47 }
 0x71d   : > { %v6143_v29 = vadd.f32 %v6079_v63, %v5935_v40  ;;  %v11106_v50 = vrot.slane %v7128_v12, %v11808_v48  ;;  %v6287_v17 = vmul.f32 %v11084_v27, %v10564_v18  ;;  %v6288_v19 = vmul.f32 %v11087_v33, %v10564_v18 }
 0x71e   : > { %v5937_v54 = vmul.f32 %v11096_v15, %v10499_v41  ;;  %v6081_v55 = vmul.f32 %v11101_v7, %v10493_v47  ;;  %v6144_v1 = vadd.f32 %v6080_v34, %v5936_v20  ;;  %v6350_v28 = vadd.f32 %v6286_v59, %v6142_v42 }
 0x71f   : > { %v6289_v40 = vmul.f32 %v11106_v50, %v10564_v18  ;;  %v6351_v63 = vadd.f32 %v6287_v17, %v6143_v29  ;;  %v5950_v48 = vmul.f32 %v11048_v57, %v10488_v56  ;;  %v5951_v12 = vmul.f32 %v11068_v11, %v10488_v56 }
 0x720   : > { %v6145_v52 = vadd.f32 %v6081_v55, %v5937_v54  ;;  %v6352_v30 = vadd.f32 %v6288_v19, %v6144_v1  ;;  %v6430_v14 = vadd.f32 %v10610_v6, %v6350_v28  ;;  %v5952_v41 = vmul.f32 %v11078_v22, %v10488_v56 }
 0x721   : > { %v6431_v47 = vadd.f32 %v10610_v6, %v6351_v63  ;;  %v5953_v42 = vmul.f32 %v11096_v15, %v10488_v56  ;;  %v6094_v18 = vmul.f32 %v11051_v62, %v10491_v46  ;;  %v6095_v59 = vmul.f32 %v11073_v26, %v10491_v46 }
 0x722   : > { %v6353_v20 = vadd.f32 %v6289_v40, %v6145_v52  ;;  %v6432_v34 = vadd.f32 %v10610_v6, %v6352_v30  ;;  %v6494_v1 = vmax.f32 %v6430_v14, 0.0  ;;  %v6096_v28 = vmul.f32 %v11081_v13, %v10491_v46 }
 0x723   : > { %v6495_v29 = vmax.f32 %v6431_v47, 0.0  ;;  %v6097_v17 = vmul.f32 %v11101_v7, %v10491_v46  ;;  %v6158_v19 = vadd.f32 %v6094_v18, %v5950_v48  ;;  %v6159_v54 = vadd.f32 %v6095_v59, %v5951_v12 }
 0x724   : > { %v6433_v56 = vadd.f32 %v10610_v6, %v6353_v20  ;;  %v6571_v55 = vadd.f32 %v11009_v35, %v6494_v1  ;;  %v6160_v63 = vadd.f32 %v6096_v28, %v5952_v41  ;;  %v6302_v52 = vmul.f32 %v11054_v16, %v10495_v61 }
 0x725   : > { %v6161_v9 = vadd.f32 %v6097_v17, %v5953_v42  ;;  %v6303_v14 = vmul.f32 %v11084_v27, %v10495_v61  ;;  %v6304_v30 = vmul.f32 %v11087_v33, %v10495_v61  ;;  %v6496_v40 = vmax.f32 %v6432_v34, 0.0 }
 0x726   : > { %v6497_v46 = vmax.f32 %v6433_v56, 0.0  ;;  %v6572_v48 = vadd.f32 %v6571_v55, %v6495_v29  ;;  %v6305_v6 = vmul.f32 %v11106_v50, %v10495_v61  ;;  %v6366_v12 = vadd.f32 %v6302_v52, %v6158_v19 }
 0x727   : > { %v6367_v35 = vadd.f32 %v6303_v14, %v6159_v54  ;;  %v6368_v41 = vadd.f32 %v6304_v30, %v6160_v63  ;;  %v5918_v23 = vmul.f32 %v11048_v57, %v10525_v0  ;;  %v5919_v42 = vmul.f32 %v11068_v11, %v10525_v0 }
 0x728   : > { %v6573_v43 = vadd.f32 %v6572_v48, %v6496_v40  ;;  %v6369_v47 = vadd.f32 %v6305_v6, %v6161_v9  ;;  %v5920_v18 = vmul.f32 %v11078_v22, %v10525_v0  ;;  %v6446_v59 = vadd.f32 %v10573_v5, %v6366_v12 }
 0x729   : > { %v6447_v20 = vadd.f32 %v10573_v5, %v6367_v35  ;;  %v5921_v61 = vmul.f32 %v11096_v15, %v10525_v0  ;;  %v6062_v34 = vmul.f32 %v11051_v62, %v10497_v39  ;;  %v6448_v28 = vadd.f32 %v10573_v5, %v6368_v41 }
 0x72a   : > { %v6574_v1 = vadd.f32 %v6573_v43, %v6497_v46  ;;  %v6063_v9 = vmul.f32 %v11073_v26, %v10497_v39  ;;  %v6064_v29 = vmul.f32 %v11081_v13, %v10497_v39  ;;  %v6510_v17 = vmax.f32 %v6446_v59, 0.0 }
 0x72b   : > { %v6511_v19 = vmax.f32 %v6447_v20, 0.0  ;;  %v6065_v54 = vmul.f32 %v11101_v7, %v10497_v39  ;;  %v6106_v0 = vadd.f32 %v11041_v3, %v11024_v49  ;;  %v6449_v56 = vadd.f32 %v10573_v5, %v6369_v47 }
 0x72c   : > { %6575 = vadd.xlane.f32.xlu1 %v6574_v1  ;;  %v6126_v55 = vadd.f32 %v6062_v34, %v5918_v23  ;;  %v6127_v63 = vadd.f32 %v6063_v9, %v5919_v42  ;;  %v6128_v52 = vadd.f32 %v6064_v29, %v5920_v18  ;;  %v6580_v14 = vadd.f32 %v11011_v21, %v6510_v17  ;;  %v11983_v17 = vld [vmem:[#allocation3_spill] sm:$0xff] }
 0x72d   : > { %v6129_v30 = vadd.f32 %v6065_v54, %v5921_v61  ;;  %v6270_v40 = vmul.f32 %v11054_v16, %v10591_v36  ;;  %v6271_v46 = vmul.f32 %v11084_v27, %v10591_v36  ;;  %v6512_v48 = vmax.f32 %v6448_v28, 0.0 }
 0x72e   : > { %v6272_v39 = vmul.f32 %v11087_v33, %v10591_v36  ;;  %v6273_v49 = vmul.f32 %v11106_v50, %v10591_v36  ;;  %v6107_v5 = vadd.f32 %v11045_v58, %v11028_v2  ;;  %v6581_v3 = vadd.f32 %v6580_v14, %v6511_v19 }
 0x72f   : > { %v6334_v6 = vadd.f32 %v6270_v40, %v6126_v55  ;;  %v6335_v21 = vadd.f32 %v6271_v46, %v6127_v63  ;;  %v11981_v12 = vmax.f32 %v11017_v4, 0.0  ;;  %v6513_v41 = vmax.f32 %v6449_v56, 0.0  ;;  %v11984_v56 = vld [vmem:[#allocation4_spill] sm:$0xff] }
 0x730   : > { %v6336_v23 = vadd.f32 %v6272_v39, %v6128_v52  ;;  %v6337_v43 = vadd.f32 %v6273_v49, %v6129_v30  ;;  %v6108_v47 = vadd.f32 %v11061_v37, %v11032_v24  ;;  %v6582_v42 = vadd.f32 %v6581_v3, %v6512_v48  ;;  %v11985_v30 = vld [vmem:[#allocation53_spill] sm:$0xff]  ;;  %v11986_v39 = vld [vmem:[#allocation58_spill] sm:$0xff] }
 0x731   : > { %v6560_v35 = vadd.f32 %v6559_v31, %v11981_v12  ;;  %v6414_v18 = vadd.f32 %v10645_v10, %v6334_v6  ;;  %v6415_v36 = vadd.f32 %v10645_v10, %v6335_v21  ;;  %v5902_v2 = vmul.f32 %v11048_v57, %v10501_v38  ;;  %v11987_v3 = vld [vmem:[#allocation38_spill] sm:$0xff] }
 0x732   : > { %v6416_v58 = vadd.f32 %v10645_v10, %v6336_v23  ;;  %v5903_v4 = vmul.f32 %v11068_v11, %v10501_v38  ;;  %v6046_v31 = vmul.f32 %v11051_v62, %v10532_v25  ;;  %v6047_v59 = vmul.f32 %v11073_v26, %v10532_v25 }
 0x733   : > { %v6583_v24 = vadd.f32 %v6582_v42, %v6513_v41  ;;  %v6478_v37 = vmax.f32 %v6414_v18, 0.0  ;;  %v6479_v20 = vmax.f32 %v6415_v36, 0.0  ;;  %v11982_v61 = vmax.f32 %v11020_v60, 0.0  ;;  %v11988_v41 = vld [vmem:[#allocation39_spill] sm:$0xff] }
 0x734   : > { %v6417_v1 = vadd.f32 %v10645_v10, %v6337_v43  ;;  %v5904_v57 = vmul.f32 %v11078_v22, %v10501_v38  ;;  %v5905_v11 = vmul.f32 %v11096_v15, %v10501_v38  ;;  %v6048_v62 = vmul.f32 %v11081_v13, %v10532_v25  ;;  %v11989_v42 = vld [vmem:[#allocation51_spill] sm:$0xff] }
 0x735   : > { %v6561_v34 = vadd.f32 %v6560_v35, %v11982_v61  ;;  %6584 = vadd.xlane.f32.xlu0 %v6583_v24  ;;  %v6480_v28 = vmax.f32 %v6416_v58, 0.0  ;;  %v6109_v9 = vadd.f32 %v11065_v45, %v11037_v32  ;;  %v6110_v29 = vadd.f32 %v6046_v31, %v5902_v2  ;;  %v11990_v2 = vld [vmem:[#allocation56_spill] sm:$0xff] }
 0x736   : > { %v6049_v60 = vmul.f32 %v11101_v7, %v10532_v25  ;;  %v6111_v10 = vadd.f32 %v6047_v59, %v5903_v4  ;;  %v6250_v22 = vmul.f32 %v10884_v44, %v10620_v8  ;;  %v6251_v38 = vmul.f32 %v10905_v53, %v10620_v8  ;;  %v11991_v4 = vld [vmem:[#allocation57_spill] sm:$0xff]  ;;  %v11992_v24 = vld [vmem:[#allocation52_spill] sm:$0xff] }
 0x737   : > { %v6562_v26 = vadd.f32 %v6561_v34, %v6478_v37  ;;  %v6252_v13 = vmul.f32 %v10916_v51, %v10620_v8  ;;  %v6253_v19 = vmul.f32 %v11983_v17, %v10620_v8  ;;  %v6254_v32 = vmul.f32 %v11054_v16, %v10620_v8  ;;  %v11994_v34 = vld [vmem:[#allocation41_spill] sm:$0xff] }
 0x738   : > { %v6481_v45 = vmax.f32 %v6417_v1, 0.0  ;;  %v6255_v25 = vmul.f32 %v11084_v27, %v10620_v8  ;;  %v6314_v7 = vadd.f32 %v6250_v22, %v6106_v0  ;;  %v6315_v54 = vadd.f32 %v6251_v38, %v6107_v5  ;;  %v11999_v22 = vld [vmem:[#allocation49_spill] sm:$0xff] }
 0x739   : > { %v6563_v15 = vadd.f32 %v6562_v26, %v6479_v20  ;;  %6530 = vadd.xlane.f32.xlu0 %v11984_v56  ;;  %v6316_v53 = vadd.f32 %v6252_v13, %v6108_v47  ;;  %v6317_v55 = vadd.f32 %v6253_v19, %v6109_v9  ;;  %v6318_v63 = vadd.f32 %v6254_v32, %v6110_v29  ;;  %v11993_v20 = vld [vmem:[#allocation48_spill] sm:$0xff] }
 0x73a   : > { %v6112_v52 = vadd.f32 %v6048_v62, %v5904_v57  ;;  %v6113_v51 = vadd.f32 %v6049_v60, %v5905_v11  ;;  %v6319_v14 = vadd.f32 %v6255_v25, %v6111_v10  ;;  %v6394_v40 = vadd.f32 %v11985_v30, %v6314_v7  ;;  %v11996_v57 = vld [vmem:[#allocation45_spill] sm:$0xff]  ;;  %v11998_v60 = vld [vmem:[#allocation54_spill] sm:$0xff] }
 0x73b   : > { %v6564_v44 = vadd.f32 %v6563_v15, %v6480_v28  ;;  %v6395_v16 = vadd.f32 %v11985_v30, %v6315_v54  ;;  %v6396_v48 = vadd.f32 %v11985_v30, %v6316_v53  ;;  %v6452_v27 = vmax.f32 %v11986_v39, 0.0  ;;  %v6595_v39 = vld [vmem:[%s11281_s1 + $0x28] sm:$0xff] }
 0x73c   : > { %v6256_v0 = vmul.f32 %v11087_v33, %v10620_v8  ;;  %v6257_v49 = vmul.f32 %v11106_v50, %v10620_v8  ;;  %v6397_v5 = vadd.f32 %v11985_v30, %v6317_v55  ;;  %v6246_v6 = vmul.f32 %v11987_v3, %v10620_v8  ;;  %6882 = vmatprep.mubr.msk.f32.mxu0 %vm1619_vm0, %v6595_v39 }
 0x73d   : > { %v6565_v46 = vadd.f32 %v6564_v44, %v6481_v45  ;;  %v6398_v21 = vadd.f32 %v11985_v30, %v6318_v63  ;;  %v6458_v12 = vmax.f32 %v6394_v40, 0.0  ;;  %v6459_v35 = vmax.f32 %v6395_v16, 0.0 }
 0x73e   : > { %v6247_v23 = vmul.f32 %v11988_v41, %v10620_v8  ;;  %v6320_v43 = vadd.f32 %v6256_v0, %v6112_v52  ;;  %v6321_v47 = vadd.f32 %v6257_v49, %v6113_v51  ;;  %v6399_v33 = vadd.f32 %v11985_v30, %v6319_v14  ;;  %v6597_v0 = vld [vmem:[%s11281_s1 + $0x38] sm:$0xff] }
 0x73f   : > { %6566 = vadd.xlane.f32.xlu1 %v6565_v46  ;;  %v6248_v50 = vmul.f32 %v11989_v42, %v10620_v8  ;;  %v6460_v18 = vmax.f32 %v6396_v48, 0.0  ;;  %v6550_v36 = vadd.f32 %v6459_v35, %v6458_v12  ;;  %v6310_v58 = vadd.f32 %v6246_v6, %v11990_v2  ;;  %v6596_v2 = vld [vmem:[%s11281_s1 + $0x30] sm:$0x3] }
 0x740   : > { %v6311_v31 = vadd.f32 %v6247_v23, %v11991_v4  ;;  %v6461_v59 = vmax.f32 %v6397_v5, 0.0  ;;  %v6249_v37 = vmul.f32 %v11992_v24, %v10620_v8  ;;  %v11995_v1 = vmax.f32 %v11994_v34, 0.0 }
 0x741   : > { %v6312_v61 = vadd.f32 %v6248_v50, %v11993_v20  ;;  %v11997_v11 = vmax.f32 %v11996_v57, 0.0  ;;  %v6462_v28 = vmax.f32 %v6398_v21, 0.0  ;;  %v6551_v26 = vadd.f32 %v6550_v36, %v6460_v18 }
 0x742   : > { %v6390_v9 = vadd.f32 %v11985_v30, %v6310_v58  ;;  %v6391_v29 = vadd.f32 %v11985_v30, %v6311_v31  ;;  %v6313_v10 = vadd.f32 %v6249_v37, %v11998_v60  ;;  %v6453_v38 = vmax.f32 %v11999_v22, 0.0 }
 0x743   : > { %v6514_v62 = vadd.f32 %v11997_v11, %v11995_v1  ;;  %v6400_v8 = vadd.f32 %v11985_v30, %v6320_v43  ;;  %v6463_v13 = vmax.f32 %v6399_v33, 0.0  ;;  %v6552_v17 = vadd.f32 %v6551_v26, %v6461_v59 }
 0x744   : > { %v6454_v19 = vmax.f32 %v6390_v9, 0.0  ;;  %v6392_v32 = vadd.f32 %v11985_v30, %v6312_v61  ;;  %v6455_v45 = vmax.f32 %v6391_v29, 0.0  ;;  %v6401_v7 = vadd.f32 %v11985_v30, %v6321_v47 }
 0x745   : > { %v6515_v15 = vadd.f32 %v6514_v62, %v6452_v27  ;;  %v6553_v54 = vadd.f32 %v6552_v17, %v6462_v28  ;;  %v6393_v44 = vadd.f32 %v11985_v30, %v6313_v10  ;;  %v6464_v53 = vmax.f32 %v6400_v8, 0.0  ;;  %v6598_v30 = vld [vmem:[%s11281_s1 + $0x40] sm:$0x3] }
 0x746   : > { %v6456_v63 = vmax.f32 %v6392_v32, 0.0  ;;  %v6465_v51 = vmax.f32 %v6401_v7, 0.0  ;;  %v7157_v27 = vmov 12  }
 0x747   : > { %v6516_v25 = vadd.f32 %v6515_v15, %v6453_v38  ;;  %v6554_v55 = vadd.f32 %v6553_v54, %v6463_v13  ;;  %v6457_v40 = vmax.f32 %v6393_v44, 0.0  ;;  %6936 = vset.pattern.permute.xlu1 %v7157_v27  ;;  %6935 = vset.pattern.permute.xlu0 %v7157_v27 }
 0x749   : > { %v6517_v56 = vadd.f32 %v6516_v25, %v6454_v19  ;;  %v6555_v14 = vadd.f32 %v6554_v55, %v6464_v53 }
 0x74b   : > { %v6518_v52 = vadd.f32 %v6517_v56, %v6455_v45  ;;  %v6556_v16 = vadd.f32 %v6555_v14, %v6465_v51 }
 0x74d   : > { %v6519_v46 = vadd.f32 %v6518_v52, %v6456_v63  ;;  %6557 = vadd.xlane.f32.xlu1 %v6556_v16 }
 0x74f   : > { %v6520_v48 = vadd.f32 %v6519_v46, %v6457_v40 }
 0x751   : > { %6521 = vadd.xlane.f32.xlu0 %v6520_v48 }
 0x75e   : > { %6606 = vperm.xlu1 %6936, %v6598_v30  }
 0x767   : > { %6601 = vperm.xlu0 %6935, %v6597_v0  }
 0x771   : > { %v6549_v49 = vpop.xlane.xlu1 %6548 }
 0x77a   : > { %v6540_v5 = vpop.xlane.xlu0 %6539 }
 0x7b5   : > { %v6576_v3 = vpop.xlane.xlu1 %6575 }
 0x7b6   : > { %v6589_v21 = vsel %vm6586_vm1, %v6540_v5, %v6576_v3 }
 0x7b7   : > { %v6593_v41 = vmul.f32 0.0009765625, %v6589_v21 }
 0x7be   : > { %v6585_v6 = vpop.xlane.xlu0 %6584 }
 0x7bf   : > { %v6590_v12 = vsel %vm6586_vm1, %v6549_v49, %v6585_v6 }
 0x7c0   : > { %v6594_v35 = vmul.f32 0.0009765625, %v6590_v12 }
 0x7c2   : > { %6874 = vmatprep.subr.mxu0 %v6594_v35  ;;  %v6531_v23 = vpop.xlane.xlu0 %6530 }
 0x7c3   : > { %6875 = vmatpush3.msra.mxu0 %v6594_v35 }
 0x7c4   : > { %6876 = vmatprep.subr.mxu0 %v6593_v41 }
 0x7c5   : > { %6877 = vmatpush3.msra.mxu0 %v6593_v41 }
 0x7c8   : > { %v6567_v43 = vpop.xlane.xlu1 %6566 }
 0x7c9   : > { %v6588_v47 = vsel %vm6586_vm1, %v6531_v23, %v6567_v43 }
 0x7ca   : > { %v6592_v33 = vmul.f32 0.0009765625, %v6588_v47 }
 0x7cc   : > { %6878 = vmatprep.subr.mxu0 %v6592_v33 }
 0x7cd   : > { %6879 = vmatpush3.msra.mxu0 %v6592_v33 }
 0x7d6   : > { %v6558_v42 = vpop.xlane.xlu1 %6557 }
 0x7da   : > { %v6522_v50 = vpop.xlane.xlu0 %6521  ;;  %v6607_v58 = vpop.permute.xlu1 %6606 }
 0x7db   : > { %v6587_v18 = vsel %vm6586_vm1, %v6522_v50, %v6558_v42 }
 0x7dc   : > { %v6591_v36 = vmul.f32 0.0009765625, %v6587_v18 }
 0x7de   : > { %6880 = vmatprep.subr.mxu0 %v6591_v36 }
 0x7df   : > { %6881 = vmatpush3.msra.mxu0 %v6591_v36 }
 0x7e0   : > { %6883 = vmatmul.mubr.msk.f32.vlgmr.msra.gmra.mxu0 %vm1619_vm0, %v6596_v2 }
 0x7e2   : > { %v6602_v31 = vpop.permute.xlu0 %6601 }
 0x8a0   : > { %v6884_v4 = vpop.f32.mrf.mxu0 }
 0x8a1   : > { %v6687_v59 = vadd.f32 %v6884_v4, %v6607_v58 }
 0x8a2   : > { %v6681_v24 = vpop.f32.mrf.mxu0 }
 0x8a3   : > { %6693 = vst.msk [vmem:[%s143_s8 + $0x8] sm:$0x3] %vm6692_vm2, %v6687_v59  ;;  %v6682_v37 = vadd.f32 %v6681_v24, %v6602_v31 }
 0x8a5   : > { %6691 = vst.msk [vmem:[%s143_s8] sm:$0xff] %vm6690_vm3, %v6682_v37 }
 0x8a6 PF: > { %s12_s9 = sadd.s32 1, %s7143_s9  }
 0x8a7   : > { %p9_p4 = scmp.ge.s32.totalorder %s12_s9, 4  }
 0x8a9   :  { %11 = sbr.rel (!%p9_p4) target bundleno = 1 (0x1), region = 58 }

</bundles_post_ra>
